<compile_context>
chip_gen: v6e
topology: v6e:2x2x1
jax: 0.10.0
libtpu: 0.0.40
codegen_flags: <defaults>
</compile_context>

<pallas_src>
import functools
import math

import jax
import jax.numpy as jnp
from jax.experimental import pallas as pl
from jax.experimental.pallas import tpu as pltpu

# ----------------------------- configuration -----------------------------
B, T = 2, 8
IMG = 16                        # crops / optical-flow spatial size (112 in the real model)
D_SKEL, D_CNN, D_FLOW = 16, 32, 32
D_TOTAL = D_SKEL + D_CNN + D_FLOW            # 80
D_TEMP = 32
MODEL_DIM = 32
FFN_DIM = 2 * MODEL_DIM
NUM_HEADS = 4
NUM_LAYERS = 2
VOCAB = 16                      # includes blank (index 0)
CONV_CH = 8                     # channels of the tiny image CNN
BLANK = 0
LN_EPS = 1e-5

# NOTE(v7x): at the production resolution (IMG=112, P=3136) SPATIAL_TILE must be re-derived
# against the 64 MiB VMEM (drop to 8/4 or set an explicit vmem_limit_bytes); at toy dims the
# default scoped limit is ample on every generation.
SPATIAL_TILE = 16               # images per grid step in the fused spatial kernel


# ----------------------------- spec helpers -----------------------------
def _full_spec(a):
    """Full-array block, constant index map (weights / biases / PE)."""
    nd = a.ndim
    return pl.BlockSpec(a.shape, lambda *_: (0,) * nd)


def _parallel():
    return pltpu.CompilerParams(dimension_semantics=("parallel",))


# ----------------------------- Pallas kernels -----------------------------
def _spatial_kernel(sk_ref, cp_ref, fp_ref,
                    skw_ref, skb_ref,
                    ccw_ref, ccb_ref, cfw_ref, cfb_ref,
                    fcw_ref, fcb_ref, ffw_ref, ffb_ref,
                    o_ref, *, n_patches):
    """Fused SpatialEncoding for a tile of images.

    skeletal proj->relu  +  two (conv-as-matmul -> relu -> per-image mean pool -> fc -> relu)
    image branches.  Pooling is an in-kernel reshape + sublane sum (no pooling matrix).
    Branch outputs are stored directly into lane slices of o_ref (no lane concat)."""
    bf16, f32 = jnp.bfloat16, jnp.float32
    tile = o_ref.shape[0]
    inv_p = 1.0 / float(n_patches)

    def dense(x, w_ref, b_ref):
        return jnp.dot(x.astype(bf16), w_ref[...], preferred_element_type=f32) + b_ref[...]

    # skeletal branch: (tile, 63) -> (tile, D_SKEL)
    sk_feat = jnp.maximum(dense(sk_ref[...], skw_ref, skb_ref), 0.0)

    def image_branch(p_ref, cw_ref, cb_ref, fw_ref, fb_ref):
        c = jnp.maximum(dense(p_ref[...], cw_ref, cb_ref), 0.0)          # (tile*P, CONV_CH)
        c3 = c.reshape(tile, n_patches, c.shape[-1])                     # (tile, P, CONV_CH)
        pooled = jnp.sum(c3, axis=1) * inv_p                             # (tile, CONV_CH)
        return jnp.maximum(dense(pooled, fw_ref, fb_ref), 0.0)

    crop_feat = image_branch(cp_ref, ccw_ref, ccb_ref, cfw_ref, cfb_ref)  # (tile, D_CNN)
    flow_feat = image_branch(fp_ref, fcw_ref, fcb_ref, ffw_ref, ffb_ref)  # (tile, D_FLOW)

    o_ref[:, 0:D_SKEL] = sk_feat
    o_ref[:, D_SKEL:D_SKEL + D_CNN] = crop_feat
    o_ref[:, D_SKEL + D_CNN:D_TOTAL] = flow_feat


def _seq_kernel(sp_ref, pe_ref,
                tw_ref, tb_ref, iwt_ref, iwb_ref, ib_ref,
                wqkv_ref, bqkv_ref, wo_ref, bo_ref, ln1g_ref, ln1b_ref,
                w1_ref, b1_ref, w2_ref, b2_ref, ln2g_ref, ln2b_ref,
                cw_ref, cb_ref, o_ref, *, num_layers, num_heads, eps):
    """Whole post-spatial pipeline for ONE batch element:

    temporal 1D conv (k=3, per hand, time_unfold folded in via the padded input) ->
    input projection + positional encoding -> `num_layers` transformer encoder layers
    (per-head attention with head-major weights, residual+LN, FFN, residual+LN) ->
    gloss classifier + log-softmax.  Everything stays resident in VMEM/vregs."""
    bf16, f32 = jnp.bfloat16, jnp.float32
    Tt, D = pe_ref.shape
    dh = D // num_heads
    scale = 1.0 / math.sqrt(dh)

    def mm(x, w):
        return jnp.dot(x.astype(bf16), w, preferred_element_type=f32)

    def layer_norm(x, g, b):
        mu = jnp.mean(x, axis=-1, keepdims=True)
        var = jnp.mean((x - mu) ** 2, axis=-1, keepdims=True)
        return (x - mu) * jax.lax.rsqrt(var + eps) * g + b

    # ---- temporal encoding (1D conv over time, kernel=3, same padding) per hand ----
    def temporal(hand):
        xh = sp_ref[0, hand]                                   # (T+2, D_TOTAL), zero-padded
        acc = (mm(xh[0:Tt], tw_ref[0])
               + mm(xh[1:Tt + 1], tw_ref[1])
               + mm(xh[2:Tt + 2], tw_ref[2])
               + tb_ref[...])
        return jnp.maximum(acc, 0.0)                           # (T, D_TEMP)

    t0 = temporal(0)
    t1 = temporal(1)

    # ---- transformer input projection (concat([t0,t1]) @ W == t0@Wtop + t1@Wbot) + PE ----
    h = mm(t0, iwt_ref[...]) + mm(t1, iwb_ref[...]) + ib_ref[...] + pe_ref[...]   # (T, D)

    # ---- transformer encoder layers (dropout = identity at inference) ----
    for l in range(num_layers):
        # multi-head self-attention, head-major weights: no lane slicing / lane concat,
        # out-projection folded into the per-head accumulation.
        attn = None
        for hd in range(num_heads):
            q = mm(h, wqkv_ref[l, 0, hd]) + bqkv_ref[l, 0, hd]          # (T, dh)
            k = mm(h, wqkv_ref[l, 1, hd]) + bqkv_ref[l, 1, hd]          # (T, dh)
            v = mm(h, wqkv_ref[l, 2, hd]) + bqkv_ref[l, 2, hd]          # (T, dh)
            s = jax.lax.dot_general(q.astype(bf16), k.astype(bf16),
                                    (((1,), (1,)), ((), ())),
                                    preferred_element_type=f32) * scale  # (T, T)
            m = jnp.max(s, axis=-1, keepdims=True)
            p = jnp.exp(s - m)
            p = p * pl.reciprocal(jnp.sum(p, axis=-1, keepdims=True), approx=True)
            ctx = jnp.dot(p.astype(bf16), v.astype(bf16),
                          preferred_element_type=f32)                    # (T, dh)
            contrib = mm(ctx, wo_ref[l, hd])                             # (T, D)
            attn = contrib if attn is None else attn + contrib
        x = h + attn + bo_ref[l]
        h = layer_norm(x, ln1g_ref[l], ln1b_ref[l])

        # feed-forward
        f = jnp.maximum(mm(h, w1_ref[l]) + b1_ref[l], 0.0)
        f = mm(f, w2_ref[l]) + b2_ref[l]
        x = h + f
        h = layer_norm(x, ln2g_ref[l], ln2b_ref[l])

    # ---- gloss classifier + log-softmax ----
    logits = mm(h, cw_ref[...]) + cb_ref[...]                            # (T, VOCAB)
    m = jnp.max(logits, axis=-1, keepdims=True)
    lse = jnp.log(jnp.sum(jnp.exp(logits - m), axis=-1, keepdims=True)) + m
    o_ref[0] = logits - lse


# ----------------------------- kernel wrappers -----------------------------
def pallas_spatial(p, sk, crop_p, flow_p, n_patches):
    """sk:(M,63), crop_p:(M*P,27), flow_p:(M*P,18)  ->  spatial features (M, D_TOTAL)."""
    M, Ksk = sk.shape
    tile = min(SPATIAL_TILE, M)
    return pl.pallas_call(
        functools.partial(_spatial_kernel, n_patches=n_patches),
        grid=(pl.cdiv(M, tile),),
        in_specs=[
            pl.BlockSpec((tile, Ksk), lambda i: (i, 0)),
            pl.BlockSpec((tile * n_patches, crop_p.shape[1]), lambda i: (i, 0)),
            pl.BlockSpec((tile * n_patches, flow_p.shape[1]), lambda i: (i, 0)),
            _full_spec(p["sk_w"]), _full_spec(p["sk_b"]),
            _full_spec(p["crop_conv_w"]), _full_spec(p["crop_conv_b"]),
            _full_spec(p["crop_fc_w"]), _full_spec(p["crop_fc_b"]),
            _full_spec(p["flow_conv_w"]), _full_spec(p["flow_conv_b"]),
            _full_spec(p["flow_fc_w"]), _full_spec(p["flow_fc_b"]),
        ],
        out_specs=pl.BlockSpec((tile, D_TOTAL), lambda i: (i, 0)),
        out_shape=jax.ShapeDtypeStruct((M, D_TOTAL), jnp.float32),
        compiler_params=_parallel(),
    )(sk, crop_p, flow_p,
      p["sk_w"], p["sk_b"],
      p["crop_conv_w"], p["crop_conv_b"], p["crop_fc_w"], p["crop_fc_b"],
      p["flow_conv_w"], p["flow_conv_b"], p["flow_fc_w"], p["flow_fc_b"])


def pallas_sequence(p, sp_pad, pe):
    """sp_pad:(B, 2, T+2, D_TOTAL) time-padded spatial features -> (B, T, VOCAB) log-probs."""
    Bb = sp_pad.shape[0]
    Tt = pe.shape[0]
    kernel = functools.partial(_seq_kernel, num_layers=NUM_LAYERS,
                               num_heads=NUM_HEADS, eps=LN_EPS)
    return pl.pallas_call(
        kernel,
        grid=(Bb,),
        in_specs=[
            pl.BlockSpec((1, 2, Tt + 2, D_TOTAL), lambda b: (b, 0, 0, 0)),
            _full_spec(pe),
            _full_spec(p["temp_w"]), _full_spec(p["temp_b"]),
            _full_spec(p["in_w_top"]), _full_spec(p["in_w_bot"]), _full_spec(p["in_b"]),
            _full_spec(p["wqkv"]), _full_spec(p["bqkv"]),
            _full_spec(p["wo"]), _full_spec(p["bo"]),
            _full_spec(p["ln1_g"]), _full_spec(p["ln1_b"]),
            _full_spec(p["w1"]), _full_spec(p["b1"]),
            _full_spec(p["w2"]), _full_spec(p["b2"]),
            _full_spec(p["ln2_g"]), _full_spec(p["ln2_b"]),
            _full_spec(p["cls_w"]), _full_spec(p["cls_b"]),
        ],
        out_specs=pl.BlockSpec((1, Tt, VOCAB), lambda b: (b, 0, 0)),
        out_shape=jax.ShapeDtypeStruct((Bb, Tt, VOCAB), jnp.float32),
        compiler_params=_parallel(),
    )(sp_pad, pe,
      p["temp_w"], p["temp_b"], p["in_w_top"], p["in_w_bot"], p["in_b"],
      p["wqkv"], p["bqkv"], p["wo"], p["bo"], p["ln1_g"], p["ln1_b"],
      p["w1"], p["b1"], p["w2"], p["b2"], p["ln2_g"], p["ln2_b"],
      p["cls_w"], p["cls_b"])


# ----------------------------- glue helpers -----------------------------
def _im2col_nhwc(x, kh, kw, stride, pad):
    """x: (N,H,W,C) -> (N, oh*ow, kh*kw*C)."""
    x = jnp.pad(x, ((0, 0), (pad, pad), (pad, pad), (0, 0)))
    N, H, W, C = x.shape
    oh = (H - kh) // stride + 1
    ow = (W - kw) // stride + 1
    cols = []
    for di in range(kh):
        for dj in range(kw):
            cols.append(x[:, di:di + stride * oh:stride, dj:dj + stride * ow:stride, :])
    patches = jnp.stack(cols, axis=3)                  # (N, oh, ow, kh*kw, C)
    return patches.reshape(N, oh * ow, kh * kw * C)


def _image_patches(x):
    """x: (B,T,2,C,H,W) NCHW -> hand-major im2col patches (B*2*T*P, 3*3*C) plus patch count."""
    Bb, Tt, H2, C, H, W = x.shape
    x = x.transpose(0, 2, 1, 3, 4, 5).reshape(Bb * H2 * Tt, C, H, W)       # hand-major
    x = x.transpose(0, 2, 3, 1).astype(jnp.float32)                        # NHWC
    p = _im2col_nhwc(x, 3, 3, 2, 1)                                        # (N, P, 9*C)
    P = p.shape[1]
    # TODO(synk): at production resolution (112x112) fuse this im2col into the spatial kernel
    # (raw NHWC frame blocks + 9 shifted matmuls) to avoid ~9x HBM traffic — matters on v5e.
    return p.reshape(-1, p.shape[2]), P


def sinusoidal_pe(length, dim):
    pos = jnp.arange(length, dtype=jnp.float32)[:, None]
    i = jnp.arange(dim // 2, dtype=jnp.float32)[None, :]
    angle = pos / jnp.power(10000.0, 2.0 * i / dim)
    return jnp.concatenate([jnp.sin(angle), jnp.cos(angle)], axis=-1)


# ----------------------------- parameters -----------------------------
def _dense_init(key, fan_in, fan_out):
    kw, kb = jax.random.split(key)
    s = 1.0 / math.sqrt(fan_in)
    w = jax.random.uniform(kw, (fan_in, fan_out), jnp.float32, -s, s)
    b = jax.random.uniform(kb, (fan_out,), jnp.float32, -s, s)
    return w, b


def init_params(key):
    keys = iter(jax.random.split(key, 64))
    p = {}
    p["sk_w"], p["sk_b"] = _dense_init(next(keys), 21 * 3, D_SKEL)
    p["crop_conv_w"], p["crop_conv_b"] = _dense_init(next(keys), 3 * 3 * 3, CONV_CH)
    p["crop_fc_w"], p["crop_fc_b"] = _dense_init(next(keys), CONV_CH, D_CNN)
    p["flow_conv_w"], p["flow_conv_b"] = _dense_init(next(keys), 3 * 3 * 2, CONV_CH)
    p["flow_fc_w"], p["flow_fc_b"] = _dense_init(next(keys), CONV_CH, D_FLOW)
    p["temp_w"], p["temp_b"] = _dense_init(next(keys), 3 * D_TOTAL, D_TEMP)
    p["in_w"], p["in_b"] = _dense_init(next(keys), 2 * D_TEMP, MODEL_DIM)
    layers = []
    for _ in range(NUM_LAYERS):
        l = {}
        for nm in ("q", "k", "v", "o"):
            l[f"w{nm}"], l[f"b{nm}"] = _dense_init(next(keys), MODEL_DIM, MODEL_DIM)
        l["w1"], l["b1"] = _dense_init(next(keys), MODEL_DIM, FFN_DIM)
        l["w2"], l["b2"] = _dense_init(next(keys), FFN_DIM, MODEL_DIM)
        l["ln1_g"] = jnp.ones((MODEL_DIM,), jnp.float32)
        l["ln1_b"] = jnp.zeros((MODEL_DIM,), jnp.float32)
        l["ln2_g"] = jnp.ones((MODEL_DIM,), jnp.float32)
        l["ln2_b"] = jnp.zeros((MODEL_DIM,), jnp.float32)
        layers.append(l)
    p["layers"] = layers
    p["cls_w"], p["cls_b"] = _dense_init(next(keys), MODEL_DIM, VOCAB)
    return p


def prepare_params(p):
    """Pack parameters for the two fused Pallas kernels:
       - matmul weights -> bf16 (f32 accumulation happens inside the kernels),
       - temporal conv weight reshaped tap-major (3, D_TOTAL, D_TEMP),
       - in_w split per hand so the concat([t0,t1]) matmul becomes two matmuls,
       - attention weights in head-major layout: wqkv (L,3,H,D,dh), bqkv (L,3,H,1,dh),
         out-proj per head wo (L,H,dh,D)  -> no lane slicing / lane concat in-kernel,
       - per-layer FFN / LN params stacked with a leading layer axis,
       - biases / LN params as (.., 1, N) f32 rows."""
    bf = lambda w: w.astype(jnp.bfloat16)
    row = lambda b: b.reshape(1, -1).astype(jnp.float32)
    H, dh = NUM_HEADS, MODEL_DIM // NUM_HEADS

    q = {
        "sk_w": bf(p["sk_w"]), "sk_b": row(p["sk_b"]),
        "crop_conv_w": bf(p["crop_conv_w"]), "crop_conv_b": row(p["crop_conv_b"]),
        "crop_fc_w": bf(p["crop_fc_w"]), "crop_fc_b": row(p["crop_fc_b"]),
        "flow_conv_w": bf(p["flow_conv_w"]), "flow_conv_b": row(p["flow_conv_b"]),
        "flow_fc_w": bf(p["flow_fc_w"]), "flow_fc_b": row(p["flow_fc_b"]),
        "temp_w": bf(p["temp_w"].reshape(3, D_TOTAL, D_TEMP)), "temp_b": row(p["temp_b"]),
        "in_w_top": bf(p["in_w"][:D_TEMP]), "in_w_bot": bf(p["in_w"][D_TEMP:]),
        "in_b": row(p["in_b"]),
        "cls_w": bf(p["cls_w"]), "cls_b": row(p["cls_b"]),
    }

    def head_w(w):   # (D, D) -> (H, D, dh): head hd uses columns hd*dh:(hd+1)*dh
        return w.reshape(MODEL_DIM, H, dh).transpose(1, 0, 2)

    def head_b(b):   # (D,) -> (H, 1, dh)
        return b.reshape(H, 1, dh)

    wqkv, bqkv, wo, bo = [], [], [], []
    ln1g, ln1b, w1, b1, w2, b2, ln2g, ln2b = [], [], [], [], [], [], [], []
    for l in p["layers"]:
        wqkv.append(jnp.stack([head_w(l["wq"]), head_w(l["wk"]), head_w(l["wv"])]))
        bqkv.append(jnp.stack([head_b(l["bq"]), head_b(l["bk"]), head_b(l["bv"])]))
        wo.append(l["wo"].reshape(H, dh, MODEL_DIM))   # head hd contributes rows hd*dh:(hd+1)*dh
        bo.append(l["bo"].reshape(1, MODEL_DIM))
        ln1g.append(l["ln1_g"].reshape(1, -1)); ln1b.append(l["ln1_b"].reshape(1, -1))
        w1.append(l["w1"]); b1.append(l["b1"].reshape(1, -1))
        w2.append(l["w2"]); b2.append(l["b2"].reshape(1, -1))
        ln2g.append(l["ln2_g"].reshape(1, -1)); ln2b.append(l["ln2_b"].reshape(1, -1))

    q["wqkv"] = bf(jnp.stack(wqkv))                       # (L, 3, H, D, dh)
    q["bqkv"] = jnp.stack(bqkv).astype(jnp.float32)       # (L, 3, H, 1, dh)
    q["wo"] = bf(jnp.stack(wo))                           # (L, H, dh, D)
    q["bo"] = jnp.stack(bo).astype(jnp.float32)           # (L, 1, D)
    q["ln1_g"] = jnp.stack(ln1g).astype(jnp.float32)
    q["ln1_b"] = jnp.stack(ln1b).astype(jnp.float32)
    q["w1"] = bf(jnp.stack(w1)); q["b1"] = jnp.stack(b1).astype(jnp.float32)
    q["w2"] = bf(jnp.stack(w2)); q["b2"] = jnp.stack(b2).astype(jnp.float32)
    q["ln2_g"] = jnp.stack(ln2g).astype(jnp.float32)
    q["ln2_b"] = jnp.stack(ln2b).astype(jnp.float32)
    return q


# ----------------------------- forward pass -----------------------------
def cslr_forward(params, skeletal, crops, optical_flow):
    """Returns gloss log-probabilities of shape (B, T, VOCAB)."""
    Bb, Tt = skeletal.shape[:2]

    # ---- SpatialEncoding (kernel 1); hand-major flattening so the output lands directly
    #      in the (B, 2, T, D_TOTAL) layout the temporal stage consumes (no transposes). ----
    sk = skeletal.transpose(0, 2, 1, 3, 4).reshape(Bb * 2 * Tt, 21 * 3).astype(jnp.float32)
    crop_p, P = _image_patches(crops)
    flow_p, _ = _image_patches(optical_flow)
    spatial = pallas_spatial(params, sk, crop_p, flow_p, P)          # (B*2*T, D_TOTAL)

    # zero-pad the time axis so the k=3 temporal conv taps are plain in-kernel row slices
    sp = spatial.reshape(Bb, 2, Tt, D_TOTAL)
    sp_pad = jnp.pad(sp, ((0, 0), (0, 0), (1, 1), (0, 0)))           # (B, 2, T+2, D_TOTAL)

    # ---- fused temporal conv + input proj + PE + transformer layers + classifier (kernel 2) ----
    pe = sinusoidal_pe(Tt, MODEL_DIM)
    log_probs = pallas_sequence(params, sp_pad, pe)                  # (B, T, VOCAB)
    return log_probs


def enstim_ctc_decode(log_probs, input_lengths):
    """Greedy CTC decode: argmax, collapse repeats, drop blanks."""
    ids = jax.device_get(jnp.argmax(log_probs, axis=-1))
    decoded = []
    for b in range(ids.shape[0]):
        prev, seq = -1, []
        for t in range(int(input_lengths[b])):
            c = int(ids[b, t])
            if c != BLANK and c != prev:
                seq.append(c)
            prev = c
        decoded.append(seq)
    return decoded

# TODO(synk): EnStimCTC training loss (CTC forward-backward with entropy stimulation and
# causal-conv context) has no clean Pallas equivalent here; only the inference/decode path of
# CSLRModel.forward is implemented (dropout = identity).


# ----------------------------- main -----------------------------
if __name__ == "__main__":
    key = jax.random.PRNGKey(0)
    k_sk, k_cr, k_fl, k_par = jax.random.split(key, 4)

    skeletal = jax.random.normal(k_sk, (B, T, 2, 21, 3), jnp.float32)
    crops = jax.random.normal(k_cr, (B, T, 2, 3, IMG, IMG), jnp.float32)
    optical_flow = jax.random.normal(k_fl, (B, T, 2, 2, IMG, IMG), jnp.float32)
    input_lengths = [T] * B

    params = prepare_params(init_params(k_par))

    fwd = jax.jit(cslr_forward)
    log_probs = fwd(params, skeletal, crops, optical_flow)
    jax.block_until_ready(log_probs)

    assert log_probs.shape == (B, T, VOCAB)
    assert bool(jnp.all(jnp.isfinite(log_probs)))
    _ = enstim_ctc_decode(log_probs, input_lengths)

    print("KERNEL_OK")
</pallas_src>

<mosaic_0001>
module attributes {stable_mosaic.version = 11 : i64} {
  func.func @_spatial_kernel(%arg0: i32, %arg1: memref<16x63xf32, #tpu.memory_space<vmem>>, %arg2: memref<1024x27xf32, #tpu.memory_space<vmem>>, %arg3: memref<1024x18xf32, #tpu.memory_space<vmem>>, %arg4: memref<63x16xbf16, #tpu.memory_space<vmem>>, %arg5: memref<1x16xf32, #tpu.memory_space<vmem>>, %arg6: memref<27x8xbf16, #tpu.memory_space<vmem>>, %arg7: memref<1x8xf32, #tpu.memory_space<vmem>>, %arg8: memref<8x32xbf16, #tpu.memory_space<vmem>>, %arg9: memref<1x32xf32, #tpu.memory_space<vmem>>, %arg10: memref<18x8xbf16, #tpu.memory_space<vmem>>, %arg11: memref<1x8xf32, #tpu.memory_space<vmem>>, %arg12: memref<8x32xbf16, #tpu.memory_space<vmem>>, %arg13: memref<1x32xf32, #tpu.memory_space<vmem>>, %arg14: memref<16x80xf32, #tpu.memory_space<vmem>>) attributes {dimension_semantics = [#tpu.dimension_semantics<parallel>], iteration_bounds = array<i64: 2>, scalar_prefetch = 0 : i64, scratch_operands = 0 : i64, tpu.core_type = #tpu.core_type<tc>, window_params = [{transform_indices = @transform_0, window_bounds = array<i64: 16, 63>}, {transform_indices = @transform_1, window_bounds = array<i64: 1024, 27>}, {transform_indices = @transform_2, window_bounds = array<i64: 1024, 18>}, {pipeline_mode = #tpu.pipeline_mode<synchronous>, transform_indices = @transform_3, window_bounds = array<i64: 63, 16>}, {pipeline_mode = #tpu.pipeline_mode<synchronous>, transform_indices = @transform_4, window_bounds = array<i64: 1, 16>}, {pipeline_mode = #tpu.pipeline_mode<synchronous>, transform_indices = @transform_5, window_bounds = array<i64: 27, 8>}, {pipeline_mode = #tpu.pipeline_mode<synchronous>, transform_indices = @transform_6, window_bounds = array<i64: 1, 8>}, {pipeline_mode = #tpu.pipeline_mode<synchronous>, transform_indices = @transform_7, window_bounds = array<i64: 8, 32>}, {pipeline_mode = #tpu.pipeline_mode<synchronous>, transform_indices = @transform_8, window_bounds = array<i64: 1, 32>}, {pipeline_mode = #tpu.pipeline_mode<synchronous>, transform_indices = @transform_9, window_bounds = array<i64: 18, 8>}, {pipeline_mode = #tpu.pipeline_mode<synchronous>, transform_indices = @transform_10, window_bounds = array<i64: 1, 8>}, {pipeline_mode = #tpu.pipeline_mode<synchronous>, transform_indices = @transform_11, window_bounds = array<i64: 8, 32>}, {pipeline_mode = #tpu.pipeline_mode<synchronous>, transform_indices = @transform_12, window_bounds = array<i64: 1, 32>}, {transform_indices = @transform_13, window_bounds = array<i64: 16, 80>}]} {
    %c0 = arith.constant 0 : index
    %c0_0 = arith.constant 0 : index
    %0 = vector.load %arg1[%c0, %c0_0] : memref<16x63xf32, #tpu.memory_space<vmem>>, vector<16x63xf32>
    %1 = arith.truncf %0 : vector<16x63xf32> to vector<16x63xbf16>
    %c0_1 = arith.constant 0 : index
    %c0_2 = arith.constant 0 : index
    %2 = vector.load %arg4[%c0_1, %c0_2] : memref<63x16xbf16, #tpu.memory_space<vmem>>, vector<63x16xbf16>
    %cst = arith.constant dense<0.000000e+00> : vector<16x16xf32>
    %3 = tpu.matmul %1, %2, %cst {dimension_numbers = #tpu.dot_dimension_numbers<[1], [0], [0], [1], [0, 0, 1, 1], [], []>} : vector<16x63xbf16>, vector<63x16xbf16>, vector<16x16xf32> -> vector<16x16xf32>
    %c0_3 = arith.constant 0 : index
    %c0_4 = arith.constant 0 : index
    %4 = vector.load %arg5[%c0_3, %c0_4] : memref<1x16xf32, #tpu.memory_space<vmem>>, vector<1x16xf32>
    %5 = vector.broadcast %4 : vector<1x16xf32> to vector<16x16xf32>
    %6 = arith.addf %3, %5 : vector<16x16xf32>
    %cst_5 = arith.constant 0.000000e+00 : f32
    %7 = vector.broadcast %cst_5 : f32 to vector<16x16xf32>
    %8 = arith.maximumf %6, %7 : vector<16x16xf32>
    %c0_6 = arith.constant 0 : index
    %c0_7 = arith.constant 0 : index
    %9 = vector.load %arg2[%c0_6, %c0_7] : memref<1024x27xf32, #tpu.memory_space<vmem>>, vector<1024x27xf32>
    %10 = arith.truncf %9 : vector<1024x27xf32> to vector<1024x27xbf16>
    %c0_8 = arith.constant 0 : index
    %c0_9 = arith.constant 0 : index
    %11 = vector.load %arg6[%c0_8, %c0_9] : memref<27x8xbf16, #tpu.memory_space<vmem>>, vector<27x8xbf16>
    %cst_10 = arith.constant dense<0.000000e+00> : vector<1024x8xf32>
    %12 = tpu.matmul %10, %11, %cst_10 {dimension_numbers = #tpu.dot_dimension_numbers<[1], [0], [0], [1], [0, 0, 1, 1], [], []>} : vector<1024x27xbf16>, vector<27x8xbf16>, vector<1024x8xf32> -> vector<1024x8xf32>
    %c0_11 = arith.constant 0 : index
    %c0_12 = arith.constant 0 : index
    %13 = vector.load %arg7[%c0_11, %c0_12] : memref<1x8xf32, #tpu.memory_space<vmem>>, vector<1x8xf32>
    %14 = vector.broadcast %13 : vector<1x8xf32> to vector<1024x8xf32>
    %15 = arith.addf %12, %14 : vector<1024x8xf32>
    %cst_13 = arith.constant 0.000000e+00 : f32
    %16 = vector.broadcast %cst_13 : f32 to vector<1024x8xf32>
    %17 = arith.maximumf %15, %16 : vector<1024x8xf32>
    %18 = vector.shape_cast %17 : vector<1024x8xf32> to vector<16x64x8xf32>
    %cst_14 = arith.constant dense<0.000000e+00> : vector<16x8xf32>
    %19 = vector.multi_reduction <add>, %18, %cst_14 [1] : vector<16x64x8xf32> to vector<16x8xf32>
    %cst_15 = arith.constant 1.562500e-02 : f32
    %20 = vector.broadcast %cst_15 : f32 to vector<16x8xf32>
    %21 = arith.mulf %19, %20 : vector<16x8xf32>
    %22 = arith.truncf %21 : vector<16x8xf32> to vector<16x8xbf16>
    %c0_16 = arith.constant 0 : index
    %c0_17 = arith.constant 0 : index
    %23 = vector.load %arg8[%c0_16, %c0_17] : memref<8x32xbf16, #tpu.memory_space<vmem>>, vector<8x32xbf16>
    %cst_18 = arith.constant dense<0.000000e+00> : vector<16x32xf32>
    %24 = tpu.matmul %22, %23, %cst_18 {dimension_numbers = #tpu.dot_dimension_numbers<[1], [0], [0], [1], [0, 0, 1, 1], [], []>} : vector<16x8xbf16>, vector<8x32xbf16>, vector<16x32xf32> -> vector<16x32xf32>
    %c0_19 = arith.constant 0 : index
    %c0_20 = arith.constant 0 : index
    %25 = vector.load %arg9[%c0_19, %c0_20] : memref<1x32xf32, #tpu.memory_space<vmem>>, vector<1x32xf32>
    %26 = vector.broadcast %25 : vector<1x32xf32> to vector<16x32xf32>
    %27 = arith.addf %24, %26 : vector<16x32xf32>
    %cst_21 = arith.constant 0.000000e+00 : f32
    %28 = vector.broadcast %cst_21 : f32 to vector<16x32xf32>
    %29 = arith.maximumf %27, %28 : vector<16x32xf32>
    %c0_22 = arith.constant 0 : index
    %c0_23 = arith.constant 0 : index
    %30 = vector.load %arg3[%c0_22, %c0_23] : memref<1024x18xf32, #tpu.memory_space<vmem>>, vector<1024x18xf32>
    %31 = arith.truncf %30 : vector<1024x18xf32> to vector<1024x18xbf16>
    %c0_24 = arith.constant 0 : index
    %c0_25 = arith.constant 0 : index
    %32 = vector.load %arg10[%c0_24, %c0_25] : memref<18x8xbf16, #tpu.memory_space<vmem>>, vector<18x8xbf16>
    %cst_26 = arith.constant dense<0.000000e+00> : vector<1024x8xf32>
    %33 = tpu.matmul %31, %32, %cst_26 {dimension_numbers = #tpu.dot_dimension_numbers<[1], [0], [0], [1], [0, 0, 1, 1], [], []>} : vector<1024x18xbf16>, vector<18x8xbf16>, vector<1024x8xf32> -> vector<1024x8xf32>
    %c0_27 = arith.constant 0 : index
    %c0_28 = arith.constant 0 : index
    %34 = vector.load %arg11[%c0_27, %c0_28] : memref<1x8xf32, #tpu.memory_space<vmem>>, vector<1x8xf32>
    %35 = vector.broadcast %34 : vector<1x8xf32> to vector<1024x8xf32>
    %36 = arith.addf %33, %35 : vector<1024x8xf32>
    %cst_29 = arith.constant 0.000000e+00 : f32
    %37 = vector.broadcast %cst_29 : f32 to vector<1024x8xf32>
    %38 = arith.maximumf %36, %37 : vector<1024x8xf32>
    %39 = vector.shape_cast %38 : vector<1024x8xf32> to vector<16x64x8xf32>
    %cst_30 = arith.constant dense<0.000000e+00> : vector<16x8xf32>
    %40 = vector.multi_reduction <add>, %39, %cst_30 [1] : vector<16x64x8xf32> to vector<16x8xf32>
    %cst_31 = arith.constant 1.562500e-02 : f32
    %41 = vector.broadcast %cst_31 : f32 to vector<16x8xf32>
    %42 = arith.mulf %40, %41 : vector<16x8xf32>
    %43 = arith.truncf %42 : vector<16x8xf32> to vector<16x8xbf16>
    %c0_32 = arith.constant 0 : index
    %c0_33 = arith.constant 0 : index
    %44 = vector.load %arg12[%c0_32, %c0_33] : memref<8x32xbf16, #tpu.memory_space<vmem>>, vector<8x32xbf16>
    %cst_34 = arith.constant dense<0.000000e+00> : vector<16x32xf32>
    %45 = tpu.matmul %43, %44, %cst_34 {dimension_numbers = #tpu.dot_dimension_numbers<[1], [0], [0], [1], [0, 0, 1, 1], [], []>} : vector<16x8xbf16>, vector<8x32xbf16>, vector<16x32xf32> -> vector<16x32xf32>
    %c0_35 = arith.constant 0 : index
    %c0_36 = arith.constant 0 : index
    %46 = vector.load %arg13[%c0_35, %c0_36] : memref<1x32xf32, #tpu.memory_space<vmem>>, vector<1x32xf32>
    %47 = vector.broadcast %46 : vector<1x32xf32> to vector<16x32xf32>
    %48 = arith.addf %45, %47 : vector<16x32xf32>
    %cst_37 = arith.constant 0.000000e+00 : f32
    %49 = vector.broadcast %cst_37 : f32 to vector<16x32xf32>
    %50 = arith.maximumf %48, %49 : vector<16x32xf32>
    %c0_38 = arith.constant 0 : index
    %c0_39 = arith.constant 0 : index
    %51 = vector.load %arg14[%c0_38, %c0_39] : memref<16x80xf32, #tpu.memory_space<vmem>>, vector<16x16xf32>
    tpu.vector_store %arg14[%c0_38, %c0_39], %8 {strides = array<i32>} : memref<16x80xf32, #tpu.memory_space<vmem>>, vector<16x16xf32>,
    %c0_40 = arith.constant 0 : index
    %c16 = arith.constant 16 : index
    %52 = vector.load %arg14[%c0_40, %c16] : memref<16x80xf32, #tpu.memory_space<vmem>>, vector<16x32xf32>
    tpu.vector_store %arg14[%c0_40, %c16], %29 {strides = array<i32>} : memref<16x80xf32, #tpu.memory_space<vmem>>, vector<16x32xf32>,
    %c0_41 = arith.constant 0 : index
    %c48 = arith.constant 48 : index
    %53 = vector.load %arg14[%c0_41, %c48] : memref<16x80xf32, #tpu.memory_space<vmem>>, vector<16x32xf32>
    tpu.vector_store %arg14[%c0_41, %c48], %50 {strides = array<i32>} : memref<16x80xf32, #tpu.memory_space<vmem>>, vector<16x32xf32>,
    return
  }
  func.func @transform_0(%arg0: i32) -> (i32, i32) {
    %c0_i32 = arith.constant 0 : i32
    %c0_i32_0 = arith.constant 0 : i32
    return %arg0, %c0_i32 : i32, i32
  }
  func.func @transform_1(%arg0: i32) -> (i32, i32) {
    %c0_i32 = arith.constant 0 : i32
    %c0_i32_0 = arith.constant 0 : i32
    return %arg0, %c0_i32 : i32, i32
  }
  func.func @transform_2(%arg0: i32) -> (i32, i32) {
    %c0_i32 = arith.constant 0 : i32
    %c0_i32_0 = arith.constant 0 : i32
    return %arg0, %c0_i32 : i32, i32
  }
  func.func @transform_3(%arg0: i32) -> (i32, i32) {
    %c0_i32 = arith.constant 0 : i32
    %c0_i32_0 = arith.constant 0 : i32
    %c0_i32_1 = arith.constant 0 : i32
    return %c0_i32, %c0_i32_0 : i32, i32
  }
  func.func @transform_4(%arg0: i32) -> (i32, i32) {
    %c0_i32 = arith.constant 0 : i32
    %c0_i32_0 = arith.constant 0 : i32
    %c0_i32_1 = arith.constant 0 : i32
    return %c0_i32, %c0_i32_0 : i32, i32
  }
  func.func @transform_5(%arg0: i32) -> (i32, i32) {
    %c0_i32 = arith.constant 0 : i32
    %c0_i32_0 = arith.constant 0 : i32
    %c0_i32_1 = arith.constant 0 : i32
    return %c0_i32, %c0_i32_0 : i32, i32
  }
  func.func @transform_6(%arg0: i32) -> (i32, i32) {
    %c0_i32 = arith.constant 0 : i32
    %c0_i32_0 = arith.constant 0 : i32
    %c0_i32_1 = arith.constant 0 : i32
    return %c0_i32, %c0_i32_0 : i32, i32
  }
  func.func @transform_7(%arg0: i32) -> (i32, i32) {
    %c0_i32 = arith.constant 0 : i32
    %c0_i32_0 = arith.constant 0 : i32
    %c0_i32_1 = arith.constant 0 : i32
    return %c0_i32, %c0_i32_0 : i32, i32
  }
  func.func @transform_8(%arg0: i32) -> (i32, i32) {
    %c0_i32 = arith.constant 0 : i32
    %c0_i32_0 = arith.constant 0 : i32
    %c0_i32_1 = arith.constant 0 : i32
    return %c0_i32, %c0_i32_0 : i32, i32
  }
  func.func @transform_9(%arg0: i32) -> (i32, i32) {
    %c0_i32 = arith.constant 0 : i32
    %c0_i32_0 = arith.constant 0 : i32
    %c0_i32_1 = arith.constant 0 : i32
    return %c0_i32, %c0_i32_0 : i32, i32
  }
  func.func @transform_10(%arg0: i32) -> (i32, i32) {
    %c0_i32 = arith.constant 0 : i32
    %c0_i32_0 = arith.constant 0 : i32
    %c0_i32_1 = arith.constant 0 : i32
    return %c0_i32, %c0_i32_0 : i32, i32
  }
  func.func @transform_11(%arg0: i32) -> (i32, i32) {
    %c0_i32 = arith.constant 0 : i32
    %c0_i32_0 = arith.constant 0 : i32
    %c0_i32_1 = arith.constant 0 : i32
    return %c0_i32, %c0_i32_0 : i32, i32
  }
  func.func @transform_12(%arg0: i32) -> (i32, i32) {
    %c0_i32 = arith.constant 0 : i32
    %c0_i32_0 = arith.constant 0 : i32
    %c0_i32_1 = arith.constant 0 : i32
    return %c0_i32, %c0_i32_0 : i32, i32
  }
  func.func @transform_13(%arg0: i32) -> (i32, i32) {
    %c0_i32 = arith.constant 0 : i32
    %c0_i32_0 = arith.constant 0 : i32
    return %arg0, %c0_i32 : i32, i32
  }
}

module attributes {stable_mosaic.version = 11 : i64} {
  func.func @_seq_kernel(%arg0: i32, %arg1: memref<1x2x10x80xf32, #tpu.memory_space<vmem>>, %arg2: memref<8x32xf32, #tpu.memory_space<vmem>>, %arg3: memref<3x80x32xbf16, #tpu.memory_space<vmem>>, %arg4: memref<1x32xf32, #tpu.memory_space<vmem>>, %arg5: memref<32x32xbf16, #tpu.memory_space<vmem>>, %arg6: memref<32x32xbf16, #tpu.memory_space<vmem>>, %arg7: memref<1x32xf32, #tpu.memory_space<vmem>>, %arg8: memref<2x3x4x32x8xbf16, #tpu.memory_space<vmem>>, %arg9: memref<2x3x4x1x8xf32, #tpu.memory_space<vmem>>, %arg10: memref<2x4x8x32xbf16, #tpu.memory_space<vmem>>, %arg11: memref<2x1x32xf32, #tpu.memory_space<vmem>>, %arg12: memref<2x1x32xf32, #tpu.memory_space<vmem>>, %arg13: memref<2x1x32xf32, #tpu.memory_space<vmem>>, %arg14: memref<2x32x64xbf16, #tpu.memory_space<vmem>>, %arg15: memref<2x1x64xf32, #tpu.memory_space<vmem>>, %arg16: memref<2x64x32xbf16, #tpu.memory_space<vmem>>, %arg17: memref<2x1x32xf32, #tpu.memory_space<vmem>>, %arg18: memref<2x1x32xf32, #tpu.memory_space<vmem>>, %arg19: memref<2x1x32xf32, #tpu.memory_space<vmem>>, %arg20: memref<32x16xbf16, #tpu.memory_space<vmem>>, %arg21: memref<1x16xf32, #tpu.memory_space<vmem>>, %arg22: memref<1x8x16xf32, #tpu.memory_space<vmem>>) attributes {dimension_semantics = [#tpu.dimension_semantics<parallel>], iteration_bounds = array<i64: 2>, scalar_prefetch = 0 : i64, scratch_operands = 0 : i64, tpu.core_type = #tpu.core_type<tc>, window_params = [{transform_indices = @transform_0, window_bounds = array<i64: 1, 2, 10, 80>}, {pipeline_mode = #tpu.pipeline_mode<synchronous>, transform_indices = @transform_1, window_bounds = array<i64: 8, 32>}, {pipeline_mode = #tpu.pipeline_mode<synchronous>, transform_indices = @transform_2, window_bounds = array<i64: 3, 80, 32>}, {pipeline_mode = #tpu.pipeline_mode<synchronous>, transform_indices = @transform_3, window_bounds = array<i64: 1, 32>}, {pipeline_mode = #tpu.pipeline_mode<synchronous>, transform_indices = @transform_4, window_bounds = array<i64: 32, 32>}, {pipeline_mode = #tpu.pipeline_mode<synchronous>, transform_indices = @transform_5, window_bounds = array<i64: 32, 32>}, {pipeline_mode = #tpu.pipeline_mode<synchronous>, transform_indices = @transform_6, window_bounds = array<i64: 1, 32>}, {pipeline_mode = #tpu.pipeline_mode<synchronous>, transform_indices = @transform_7, window_bounds = array<i64: 2, 3, 4, 32, 8>}, {pipeline_mode = #tpu.pipeline_mode<synchronous>, transform_indices = @transform_8, window_bounds = array<i64: 2, 3, 4, 1, 8>}, {pipeline_mode = #tpu.pipeline_mode<synchronous>, transform_indices = @transform_9, window_bounds = array<i64: 2, 4, 8, 32>}, {pipeline_mode = #tpu.pipeline_mode<synchronous>, transform_indices = @transform_10, window_bounds = array<i64: 2, 1, 32>}, {pipeline_mode = #tpu.pipeline_mode<synchronous>, transform_indices = @transform_11, window_bounds = array<i64: 2, 1, 32>}, {pipeline_mode = #tpu.pipeline_mode<synchronous>, transform_indices = @transform_12, window_bounds = array<i64: 2, 1, 32>}, {pipeline_mode = #tpu.pipeline_mode<synchronous>, transform_indices = @transform_13, window_bounds = array<i64: 2, 32, 64>}, {pipeline_mode = #tpu.pipeline_mode<synchronous>, transform_indices = @transform_14, window_bounds = array<i64: 2, 1, 64>}, {pipeline_mode = #tpu.pipeline_mode<synchronous>, transform_indices = @transform_15, window_bounds = array<i64: 2, 64, 32>}, {pipeline_mode = #tpu.pipeline_mode<synchronous>, transform_indices = @transform_16, window_bounds = array<i64: 2, 1, 32>}, {pipeline_mode = #tpu.pipeline_mode<synchronous>, transform_indices = @transform_17, window_bounds = array<i64: 2, 1, 32>}, {pipeline_mode = #tpu.pipeline_mode<synchronous>, transform_indices = @transform_18, window_bounds = array<i64: 2, 1, 32>}, {pipeline_mode = #tpu.pipeline_mode<synchronous>, transform_indices = @transform_19, window_bounds = array<i64: 32, 16>}, {pipeline_mode = #tpu.pipeline_mode<synchronous>, transform_indices = @transform_20, window_bounds = array<i64: 1, 16>}, {transform_indices = @transform_21, window_bounds = array<i64: 1, 8, 16>}]} {
    %c0 = arith.constant 0 : index
    %c0_0 = arith.constant 0 : index
    %c0_1 = arith.constant 0 : index
    %c0_2 = arith.constant 0 : index
    %0 = vector.load %arg1[%c0, %c0_0, %c0_1, %c0_2] : memref<1x2x10x80xf32, #tpu.memory_space<vmem>>, vector<1x1x10x80xf32>
    %1 = vector.shape_cast %0 : vector<1x1x10x80xf32> to vector<10x80xf32>
    %2 = vector.extract_strided_slice %1 {offsets = [0, 0], sizes = [8, 80], strides = [1, 1]} : vector<10x80xf32> to vector<8x80xf32>
    %c0_3 = arith.constant 0 : index
    %c0_4 = arith.constant 0 : index
    %c0_5 = arith.constant 0 : index
    %3 = vector.load %arg3[%c0_3, %c0_4, %c0_5] : memref<3x80x32xbf16, #tpu.memory_space<vmem>>, vector<1x80x32xbf16>
    %4 = vector.shape_cast %3 : vector<1x80x32xbf16> to vector<80x32xbf16>
    %5 = arith.truncf %2 : vector<8x80xf32> to vector<8x80xbf16>
    %cst = arith.constant dense<0.000000e+00> : vector<8x32xf32>
    %6 = tpu.matmul %5, %4, %cst {dimension_numbers = #tpu.dot_dimension_numbers<[1], [0], [0], [1], [0, 0, 1, 1], [], []>} : vector<8x80xbf16>, vector<80x32xbf16>, vector<8x32xf32> -> vector<8x32xf32>
    %7 = vector.extract_strided_slice %1 {offsets = [1, 0], sizes = [8, 80], strides = [1, 1]} : vector<10x80xf32> to vector<8x80xf32>
    %c1 = arith.constant 1 : index
    %c0_6 = arith.constant 0 : index
    %c0_7 = arith.constant 0 : index
    %8 = vector.load %arg3[%c1, %c0_6, %c0_7] : memref<3x80x32xbf16, #tpu.memory_space<vmem>>, vector<1x80x32xbf16>
    %9 = vector.shape_cast %8 : vector<1x80x32xbf16> to vector<80x32xbf16>
    %10 = arith.truncf %7 : vector<8x80xf32> to vector<8x80xbf16>
    %cst_8 = arith.constant dense<0.000000e+00> : vector<8x32xf32>
    %11 = tpu.matmul %10, %9, %cst_8 {dimension_numbers = #tpu.dot_dimension_numbers<[1], [0], [0], [1], [0, 0, 1, 1], [], []>} : vector<8x80xbf16>, vector<80x32xbf16>, vector<8x32xf32> -> vector<8x32xf32>
    %12 = arith.addf %6, %11 : vector<8x32xf32>
    %13 = vector.extract_strided_slice %1 {offsets = [2, 0], sizes = [8, 80], strides = [1, 1]} : vector<10x80xf32> to vector<8x80xf32>
    %c2 = arith.constant 2 : index
    %c0_9 = arith.constant 0 : index
    %c0_10 = arith.constant 0 : index
    %14 = vector.load %arg3[%c2, %c0_9, %c0_10] : memref<3x80x32xbf16, #tpu.memory_space<vmem>>, vector<1x80x32xbf16>
    %15 = vector.shape_cast %14 : vector<1x80x32xbf16> to vector<80x32xbf16>
    %16 = arith.truncf %13 : vector<8x80xf32> to vector<8x80xbf16>
    %cst_11 = arith.constant dense<0.000000e+00> : vector<8x32xf32>
    %17 = tpu.matmul %16, %15, %cst_11 {dimension_numbers = #tpu.dot_dimension_numbers<[1], [0], [0], [1], [0, 0, 1, 1], [], []>} : vector<8x80xbf16>, vector<80x32xbf16>, vector<8x32xf32> -> vector<8x32xf32>
    %18 = arith.addf %12, %17 : vector<8x32xf32>
    %c0_12 = arith.constant 0 : index
    %c0_13 = arith.constant 0 : index
    %19 = vector.load %arg4[%c0_12, %c0_13] : memref<1x32xf32, #tpu.memory_space<vmem>>, vector<1x32xf32>
    %20 = vector.broadcast %19 : vector<1x32xf32> to vector<8x32xf32>
    %21 = arith.addf %18, %20 : vector<8x32xf32>
    %cst_14 = arith.constant 0.000000e+00 : f32
    %22 = vector.broadcast %cst_14 : f32 to vector<8x32xf32>
    %23 = arith.maximumf %21, %22 : vector<8x32xf32>
    %c0_15 = arith.constant 0 : index
    %c1_16 = arith.constant 1 : index
    %c0_17 = arith.constant 0 : index
    %c0_18 = arith.constant 0 : index
    %24 = vector.load %arg1[%c0_15, %c1_16, %c0_17, %c0_18] : memref<1x2x10x80xf32, #tpu.memory_space<vmem>>, vector<1x1x10x80xf32>
    %25 = vector.shape_cast %24 : vector<1x1x10x80xf32> to vector<10x80xf32>
    %26 = vector.extract_strided_slice %25 {offsets = [0, 0], sizes = [8, 80], strides = [1, 1]} : vector<10x80xf32> to vector<8x80xf32>
    %c0_19 = arith.constant 0 : index
    %c0_20 = arith.constant 0 : index
    %c0_21 = arith.constant 0 : index
    %27 = vector.load %arg3[%c0_19, %c0_20, %c0_21] : memref<3x80x32xbf16, #tpu.memory_space<vmem>>, vector<1x80x32xbf16>
    %28 = vector.shape_cast %27 : vector<1x80x32xbf16> to vector<80x32xbf16>
    %29 = arith.truncf %26 : vector<8x80xf32> to vector<8x80xbf16>
    %cst_22 = arith.constant dense<0.000000e+00> : vector<8x32xf32>
    %30 = tpu.matmul %29, %28, %cst_22 {dimension_numbers = #tpu.dot_dimension_numbers<[1], [0], [0], [1], [0, 0, 1, 1], [], []>} : vector<8x80xbf16>, vector<80x32xbf16>, vector<8x32xf32> -> vector<8x32xf32>
    %31 = vector.extract_strided_slice %25 {offsets = [1, 0], sizes = [8, 80], strides = [1, 1]} : vector<10x80xf32> to vector<8x80xf32>
    %c1_23 = arith.constant 1 : index
    %c0_24 = arith.constant 0 : index
    %c0_25 = arith.constant 0 : index
    %32 = vector.load %arg3[%c1_23, %c0_24, %c0_25] : memref<3x80x32xbf16, #tpu.memory_space<vmem>>, vector<1x80x32xbf16>
    %33 = vector.shape_cast %32 : vector<1x80x32xbf16> to vector<80x32xbf16>
    %34 = arith.truncf %31 : vector<8x80xf32> to vector<8x80xbf16>
    %cst_26 = arith.constant dense<0.000000e+00> : vector<8x32xf32>
    %35 = tpu.matmul %34, %33, %cst_26 {dimension_numbers = #tpu.dot_dimension_numbers<[1], [0], [0], [1], [0, 0, 1, 1], [], []>} : vector<8x80xbf16>, vector<80x32xbf16>, vector<8x32xf32> -> vector<8x32xf32>
    %36 = arith.addf %30, %35 : vector<8x32xf32>
    %37 = vector.extract_strided_slice %25 {offsets = [2, 0], sizes = [8, 80], strides = [1, 1]} : vector<10x80xf32> to vector<8x80xf32>
    %c2_27 = arith.constant 2 : index
    %c0_28 = arith.constant 0 : index
    %c0_29 = arith.constant 0 : index
    %38 = vector.load %arg3[%c2_27, %c0_28, %c0_29] : memref<3x80x32xbf16, #tpu.memory_space<vmem>>, vector<1x80x32xbf16>
    %39 = vector.shape_cast %38 : vector<1x80x32xbf16> to vector<80x32xbf16>
    %40 = arith.truncf %37 : vector<8x80xf32> to vector<8x80xbf16>
    %cst_30 = arith.constant dense<0.000000e+00> : vector<8x32xf32>
    %41 = tpu.matmul %40, %39, %cst_30 {dimension_numbers = #tpu.dot_dimension_numbers<[1], [0], [0], [1], [0, 0, 1, 1], [], []>} : vector<8x80xbf16>, vector<80x32xbf16>, vector<8x32xf32> -> vector<8x32xf32>
    %42 = arith.addf %36, %41 : vector<8x32xf32>
    %c0_31 = arith.constant 0 : index
    %c0_32 = arith.constant 0 : index
    %43 = vector.load %arg4[%c0_31, %c0_32] : memref<1x32xf32, #tpu.memory_space<vmem>>, vector<1x32xf32>
    %44 = vector.broadcast %43 : vector<1x32xf32> to vector<8x32xf32>
    %45 = arith.addf %42, %44 : vector<8x32xf32>
    %cst_33 = arith.constant 0.000000e+00 : f32
    %46 = vector.broadcast %cst_33 : f32 to vector<8x32xf32>
    %47 = arith.maximumf %45, %46 : vector<8x32xf32>
    %c0_34 = arith.constant 0 : index
    %c0_35 = arith.constant 0 : index
    %48 = vector.load %arg5[%c0_34, %c0_35] : memref<32x32xbf16, #tpu.memory_space<vmem>>, vector<32x32xbf16>
    %49 = arith.truncf %23 : vector<8x32xf32> to vector<8x32xbf16>
    %cst_36 = arith.constant dense<0.000000e+00> : vector<8x32xf32>
    %50 = tpu.matmul %49, %48, %cst_36 {dimension_numbers = #tpu.dot_dimension_numbers<[1], [0], [0], [1], [0, 0, 1, 1], [], []>} : vector<8x32xbf16>, vector<32x32xbf16>, vector<8x32xf32> -> vector<8x32xf32>
    %c0_37 = arith.constant 0 : index
    %c0_38 = arith.constant 0 : index
    %51 = vector.load %arg6[%c0_37, %c0_38] : memref<32x32xbf16, #tpu.memory_space<vmem>>, vector<32x32xbf16>
    %52 = arith.truncf %47 : vector<8x32xf32> to vector<8x32xbf16>
    %cst_39 = arith.constant dense<0.000000e+00> : vector<8x32xf32>
    %53 = tpu.matmul %52, %51, %cst_39 {dimension_numbers = #tpu.dot_dimension_numbers<[1], [0], [0], [1], [0, 0, 1, 1], [], []>} : vector<8x32xbf16>, vector<32x32xbf16>, vector<8x32xf32> -> vector<8x32xf32>
    %54 = arith.addf %50, %53 : vector<8x32xf32>
    %c0_40 = arith.constant 0 : index
    %c0_41 = arith.constant 0 : index
    %55 = vector.load %arg7[%c0_40, %c0_41] : memref<1x32xf32, #tpu.memory_space<vmem>>, vector<1x32xf32>
    %56 = vector.broadcast %55 : vector<1x32xf32> to vector<8x32xf32>
    %57 = arith.addf %54, %56 : vector<8x32xf32>
    %c0_42 = arith.constant 0 : index
    %c0_43 = arith.constant 0 : index
    %58 = vector.load %arg2[%c0_42, %c0_43] : memref<8x32xf32, #tpu.memory_space<vmem>>, vector<8x32xf32>
    %59 = arith.addf %57, %58 : vector<8x32xf32>
    %c0_44 = arith.constant 0 : index
    %c0_45 = arith.constant 0 : index
    %c0_46 = arith.constant 0 : index
    %c0_47 = arith.constant 0 : index
    %c0_48 = arith.constant 0 : index
    %60 = vector.load %arg8[%c0_44, %c0_45, %c0_46, %c0_47, %c0_48] : memref<2x3x4x32x8xbf16, #tpu.memory_space<vmem>>, vector<1x1x1x32x8xbf16>
    %61 = vector.shape_cast %60 : vector<1x1x1x32x8xbf16> to vector<32x8xbf16>
    %62 = arith.truncf %59 : vector<8x32xf32> to vector<8x32xbf16>
    %cst_49 = arith.constant dense<0.000000e+00> : vector<8x8xf32>
    %63 = tpu.matmul %62, %61, %cst_49 {dimension_numbers = #tpu.dot_dimension_numbers<[1], [0], [0], [1], [0, 0, 1, 1], [], []>} : vector<8x32xbf16>, vector<32x8xbf16>, vector<8x8xf32> -> vector<8x8xf32>
    %c0_50 = arith.constant 0 : index
    %c0_51 = arith.constant 0 : index
    %c0_52 = arith.constant 0 : index
    %c0_53 = arith.constant 0 : index
    %c0_54 = arith.constant 0 : index
    %64 = vector.load %arg9[%c0_50, %c0_51, %c0_52, %c0_53, %c0_54] : memref<2x3x4x1x8xf32, #tpu.memory_space<vmem>>, vector<1x1x1x1x8xf32>
    %65 = vector.shape_cast %64 : vector<1x1x1x1x8xf32> to vector<1x8xf32>
    %66 = vector.broadcast %65 : vector<1x8xf32> to vector<8x8xf32>
    %67 = arith.addf %63, %66 : vector<8x8xf32>
    %c0_55 = arith.constant 0 : index
    %c1_56 = arith.constant 1 : index
    %c0_57 = arith.constant 0 : index
    %c0_58 = arith.constant 0 : index
    %c0_59 = arith.constant 0 : index
    %68 = vector.load %arg8[%c0_55, %c1_56, %c0_57, %c0_58, %c0_59] : memref<2x3x4x32x8xbf16, #tpu.memory_space<vmem>>, vector<1x1x1x32x8xbf16>
    %69 = vector.shape_cast %68 : vector<1x1x1x32x8xbf16> to vector<32x8xbf16>
    %70 = arith.truncf %59 : vector<8x32xf32> to vector<8x32xbf16>
    %cst_60 = arith.constant dense<0.000000e+00> : vector<8x8xf32>
    %71 = tpu.matmul %70, %69, %cst_60 {dimension_numbers = #tpu.dot_dimension_numbers<[1], [0], [0], [1], [0, 0, 1, 1], [], []>} : vector<8x32xbf16>, vector<32x8xbf16>, vector<8x8xf32> -> vector<8x8xf32>
    %c0_61 = arith.constant 0 : index
    %c1_62 = arith.constant 1 : index
    %c0_63 = arith.constant 0 : index
    %c0_64 = arith.constant 0 : index
    %c0_65 = arith.constant 0 : index
    %72 = vector.load %arg9[%c0_61, %c1_62, %c0_63, %c0_64, %c0_65] : memref<2x3x4x1x8xf32, #tpu.memory_space<vmem>>, vector<1x1x1x1x8xf32>
    %73 = vector.shape_cast %72 : vector<1x1x1x1x8xf32> to vector<1x8xf32>
    %74 = vector.broadcast %73 : vector<1x8xf32> to vector<8x8xf32>
    %75 = arith.addf %71, %74 : vector<8x8xf32>
    %c0_66 = arith.constant 0 : index
    %c2_67 = arith.constant 2 : index
    %c0_68 = arith.constant 0 : index
    %c0_69 = arith.constant 0 : index
    %c0_70 = arith.constant 0 : index
    %76 = vector.load %arg8[%c0_66, %c2_67, %c0_68, %c0_69, %c0_70] : memref<2x3x4x32x8xbf16, #tpu.memory_space<vmem>>, vector<1x1x1x32x8xbf16>
    %77 = vector.shape_cast %76 : vector<1x1x1x32x8xbf16> to vector<32x8xbf16>
    %78 = arith.truncf %59 : vector<8x32xf32> to vector<8x32xbf16>
    %cst_71 = arith.constant dense<0.000000e+00> : vector<8x8xf32>
    %79 = tpu.matmul %78, %77, %cst_71 {dimension_numbers = #tpu.dot_dimension_numbers<[1], [0], [0], [1], [0, 0, 1, 1], [], []>} : vector<8x32xbf16>, vector<32x8xbf16>, vector<8x8xf32> -> vector<8x8xf32>
    %c0_72 = arith.constant 0 : index
    %c2_73 = arith.constant 2 : index
    %c0_74 = arith.constant 0 : index
    %c0_75 = arith.constant 0 : index
    %c0_76 = arith.constant 0 : index
    %80 = vector.load %arg9[%c0_72, %c2_73, %c0_74, %c0_75, %c0_76] : memref<2x3x4x1x8xf32, #tpu.memory_space<vmem>>, vector<1x1x1x1x8xf32>
    %81 = vector.shape_cast %80 : vector<1x1x1x1x8xf32> to vector<1x8xf32>
    %82 = vector.broadcast %81 : vector<1x8xf32> to vector<8x8xf32>
    %83 = arith.addf %79, %82 : vector<8x8xf32>
    %84 = arith.truncf %67 : vector<8x8xf32> to vector<8x8xbf16>
    %85 = arith.truncf %75 : vector<8x8xf32> to vector<8x8xbf16>
    %cst_77 = arith.constant dense<0.000000e+00> : vector<8x8xf32>
    %86 = tpu.matmul %84, %85, %cst_77 {dimension_numbers = #tpu.dot_dimension_numbers<[1], [1], [0], [0], [0, 0, 1, 0], [], []>} : vector<8x8xbf16>, vector<8x8xbf16>, vector<8x8xf32> -> vector<8x8xf32>
    %cst_78 = arith.constant 0.353553385 : f32
    %87 = vector.broadcast %cst_78 : f32 to vector<8x8xf32>
    %88 = arith.mulf %86, %87 : vector<8x8xf32>
    %cst_79 = arith.constant dense<0xFF800000> : vector<8xf32>
    %89 = vector.multi_reduction <maximumf>, %88, %cst_79 [1] : vector<8x8xf32> to vector<8xf32>
    %90 = vector.shape_cast %89 : vector<8xf32> to vector<8x1xf32>
    %91 = vector.broadcast %90 : vector<8x1xf32> to vector<8x8xf32>
    %92 = arith.subf %88, %91 : vector<8x8xf32>
    %93 = math.exp %92 : vector<8x8xf32>
    %cst_80 = arith.constant dense<0.000000e+00> : vector<8xf32>
    %94 = vector.multi_reduction <add>, %93, %cst_80 [1] : vector<8x8xf32> to vector<8xf32>
    %95 = vector.shape_cast %94 : vector<8xf32> to vector<8x1xf32>
    %96 = tpu.reciprocal %95 {approx = true} : vector<8x1xf32> -> vector<8x1xf32>
    %97 = vector.broadcast %96 : vector<8x1xf32> to vector<8x8xf32>
    %98 = arith.mulf %93, %97 : vector<8x8xf32>
    %99 = arith.truncf %98 : vector<8x8xf32> to vector<8x8xbf16>
    %100 = arith.truncf %83 : vector<8x8xf32> to vector<8x8xbf16>
    %cst_81 = arith.constant dense<0.000000e+00> : vector<8x8xf32>
    %101 = tpu.matmul %99, %100, %cst_81 {dimension_numbers = #tpu.dot_dimension_numbers<[1], [0], [0], [1], [0, 0, 1, 1], [], []>} : vector<8x8xbf16>, vector<8x8xbf16>, vector<8x8xf32> -> vector<8x8xf32>
    %c0_82 = arith.constant 0 : index
    %c0_83 = arith.constant 0 : index
    %c0_84 = arith.constant 0 : index
    %c0_85 = arith.constant 0 : index
    %102 = vector.load %arg10[%c0_82, %c0_83, %c0_84, %c0_85] : memref<2x4x8x32xbf16, #tpu.memory_space<vmem>>, vector<1x1x8x32xbf16>
    %103 = vector.shape_cast %102 : vector<1x1x8x32xbf16> to vector<8x32xbf16>
    %104 = arith.truncf %101 : vector<8x8xf32> to vector<8x8xbf16>
    %cst_86 = arith.constant dense<0.000000e+00> : vector<8x32xf32>
    %105 = tpu.matmul %104, %103, %cst_86 {dimension_numbers = #tpu.dot_dimension_numbers<[1], [0], [0], [1], [0, 0, 1, 1], [], []>} : vector<8x8xbf16>, vector<8x32xbf16>, vector<8x32xf32> -> vector<8x32xf32>
    %c0_87 = arith.constant 0 : index
    %c0_88 = arith.constant 0 : index
    %c1_89 = arith.constant 1 : index
    %c0_90 = arith.constant 0 : index
    %c0_91 = arith.constant 0 : index
    %106 = vector.load %arg8[%c0_87, %c0_88, %c1_89, %c0_90, %c0_91] : memref<2x3x4x32x8xbf16, #tpu.memory_space<vmem>>, vector<1x1x1x32x8xbf16>
    %107 = vector.shape_cast %106 : vector<1x1x1x32x8xbf16> to vector<32x8xbf16>
    %108 = arith.truncf %59 : vector<8x32xf32> to vector<8x32xbf16>
    %cst_92 = arith.constant dense<0.000000e+00> : vector<8x8xf32>
    %109 = tpu.matmul %108, %107, %cst_92 {dimension_numbers = #tpu.dot_dimension_numbers<[1], [0], [0], [1], [0, 0, 1, 1], [], []>} : vector<8x32xbf16>, vector<32x8xbf16>, vector<8x8xf32> -> vector<8x8xf32>
    %c0_93 = arith.constant 0 : index
    %c0_94 = arith.constant 0 : index
    %c1_95 = arith.constant 1 : index
    %c0_96 = arith.constant 0 : index
    %c0_97 = arith.constant 0 : index
    %110 = vector.load %arg9[%c0_93, %c0_94, %c1_95, %c0_96, %c0_97] : memref<2x3x4x1x8xf32, #tpu.memory_space<vmem>>, vector<1x1x1x1x8xf32>
    %111 = vector.shape_cast %110 : vector<1x1x1x1x8xf32> to vector<1x8xf32>
    %112 = vector.broadcast %111 : vector<1x8xf32> to vector<8x8xf32>
    %113 = arith.addf %109, %112 : vector<8x8xf32>
    %c0_98 = arith.constant 0 : index
    %c1_99 = arith.constant 1 : index
    %c1_100 = arith.constant 1 : index
    %c0_101 = arith.constant 0 : index
    %c0_102 = arith.constant 0 : index
    %114 = vector.load %arg8[%c0_98, %c1_99, %c1_100, %c0_101, %c0_102] : memref<2x3x4x32x8xbf16, #tpu.memory_space<vmem>>, vector<1x1x1x32x8xbf16>
    %115 = vector.shape_cast %114 : vector<1x1x1x32x8xbf16> to vector<32x8xbf16>
    %116 = arith.truncf %59 : vector<8x32xf32> to vector<8x32xbf16>
    %cst_103 = arith.constant dense<0.000000e+00> : vector<8x8xf32>
    %117 = tpu.matmul %116, %115, %cst_103 {dimension_numbers = #tpu.dot_dimension_numbers<[1], [0], [0], [1], [0, 0, 1, 1], [], []>} : vector<8x32xbf16>, vector<32x8xbf16>, vector<8x8xf32> -> vector<8x8xf32>
    %c0_104 = arith.constant 0 : index
    %c1_105 = arith.constant 1 : index
    %c1_106 = arith.constant 1 : index
    %c0_107 = arith.constant 0 : index
    %c0_108 = arith.constant 0 : index
    %118 = vector.load %arg9[%c0_104, %c1_105, %c1_106, %c0_107, %c0_108] : memref<2x3x4x1x8xf32, #tpu.memory_space<vmem>>, vector<1x1x1x1x8xf32>
    %119 = vector.shape_cast %118 : vector<1x1x1x1x8xf32> to vector<1x8xf32>
    %120 = vector.broadcast %119 : vector<1x8xf32> to vector<8x8xf32>
    %121 = arith.addf %117, %120 : vector<8x8xf32>
    %c0_109 = arith.constant 0 : index
    %c2_110 = arith.constant 2 : index
    %c1_111 = arith.constant 1 : index
    %c0_112 = arith.constant 0 : index
    %c0_113 = arith.constant 0 : index
    %122 = vector.load %arg8[%c0_109, %c2_110, %c1_111, %c0_112, %c0_113] : memref<2x3x4x32x8xbf16, #tpu.memory_space<vmem>>, vector<1x1x1x32x8xbf16>
    %123 = vector.shape_cast %122 : vector<1x1x1x32x8xbf16> to vector<32x8xbf16>
    %124 = arith.truncf %59 : vector<8x32xf32> to vector<8x32xbf16>
    %cst_114 = arith.constant dense<0.000000e+00> : vector<8x8xf32>
    %125 = tpu.matmul %124, %123, %cst_114 {dimension_numbers = #tpu.dot_dimension_numbers<[1], [0], [0], [1], [0, 0, 1, 1], [], []>} : vector<8x32xbf16>, vector<32x8xbf16>, vector<8x8xf32> -> vector<8x8xf32>
    %c0_115 = arith.constant 0 : index
    %c2_116 = arith.constant 2 : index
    %c1_117 = arith.constant 1 : index
    %c0_118 = arith.constant 0 : index
    %c0_119 = arith.constant 0 : index
    %126 = vector.load %arg9[%c0_115, %c2_116, %c1_117, %c0_118, %c0_119] : memref<2x3x4x1x8xf32, #tpu.memory_space<vmem>>, vector<1x1x1x1x8xf32>
    %127 = vector.shape_cast %126 : vector<1x1x1x1x8xf32> to vector<1x8xf32>
    %128 = vector.broadcast %127 : vector<1x8xf32> to vector<8x8xf32>
    %129 = arith.addf %125, %128 : vector<8x8xf32>
    %130 = arith.truncf %113 : vector<8x8xf32> to vector<8x8xbf16>
    %131 = arith.truncf %121 : vector<8x8xf32> to vector<8x8xbf16>
    %cst_120 = arith.constant dense<0.000000e+00> : vector<8x8xf32>
    %132 = tpu.matmul %130, %131, %cst_120 {dimension_numbers = #tpu.dot_dimension_numbers<[1], [1], [0], [0], [0, 0, 1, 0], [], []>} : vector<8x8xbf16>, vector<8x8xbf16>, vector<8x8xf32> -> vector<8x8xf32>
    %cst_121 = arith.constant 0.353553385 : f32
    %133 = vector.broadcast %cst_121 : f32 to vector<8x8xf32>
    %134 = arith.mulf %132, %133 : vector<8x8xf32>
    %cst_122 = arith.constant dense<0xFF800000> : vector<8xf32>
    %135 = vector.multi_reduction <maximumf>, %134, %cst_122 [1] : vector<8x8xf32> to vector<8xf32>
    %136 = vector.shape_cast %135 : vector<8xf32> to vector<8x1xf32>
    %137 = vector.broadcast %136 : vector<8x1xf32> to vector<8x8xf32>
    %138 = arith.subf %134, %137 : vector<8x8xf32>
    %139 = math.exp %138 : vector<8x8xf32>
    %cst_123 = arith.constant dense<0.000000e+00> : vector<8xf32>
    %140 = vector.multi_reduction <add>, %139, %cst_123 [1] : vector<8x8xf32> to vector<8xf32>
    %141 = vector.shape_cast %140 : vector<8xf32> to vector<8x1xf32>
    %142 = tpu.reciprocal %141 {approx = true} : vector<8x1xf32> -> vector<8x1xf32>
    %143 = vector.broadcast %142 : vector<8x1xf32> to vector<8x8xf32>
    %144 = arith.mulf %139, %143 : vector<8x8xf32>
    %145 = arith.truncf %144 : vector<8x8xf32> to vector<8x8xbf16>
    %146 = arith.truncf %129 : vector<8x8xf32> to vector<8x8xbf16>
    %cst_124 = arith.constant dense<0.000000e+00> : vector<8x8xf32>
    %147 = tpu.matmul %145, %146, %cst_124 {dimension_numbers = #tpu.dot_dimension_numbers<[1], [0], [0], [1], [0, 0, 1, 1], [], []>} : vector<8x8xbf16>, vector<8x8xbf16>, vector<8x8xf32> -> vector<8x8xf32>
    %c0_125 = arith.constant 0 : index
    %c1_126 = arith.constant 1 : index
    %c0_127 = arith.constant 0 : index
    %c0_128 = arith.constant 0 : index
    %148 = vector.load %arg10[%c0_125, %c1_126, %c0_127, %c0_128] : memref<2x4x8x32xbf16, #tpu.memory_space<vmem>>, vector<1x1x8x32xbf16>
    %149 = vector.shape_cast %148 : vector<1x1x8x32xbf16> to vector<8x32xbf16>
    %150 = arith.truncf %147 : vector<8x8xf32> to vector<8x8xbf16>
    %cst_129 = arith.constant dense<0.000000e+00> : vector<8x32xf32>
    %151 = tpu.matmul %150, %149, %cst_129 {dimension_numbers = #tpu.dot_dimension_numbers<[1], [0], [0], [1], [0, 0, 1, 1], [], []>} : vector<8x8xbf16>, vector<8x32xbf16>, vector<8x32xf32> -> vector<8x32xf32>
    %152 = arith.addf %105, %151 : vector<8x32xf32>
    %c0_130 = arith.constant 0 : index
    %c0_131 = arith.constant 0 : index
    %c2_132 = arith.constant 2 : index
    %c0_133 = arith.constant 0 : index
    %c0_134 = arith.constant 0 : index
    %153 = vector.load %arg8[%c0_130, %c0_131, %c2_132, %c0_133, %c0_134] : memref<2x3x4x32x8xbf16, #tpu.memory_space<vmem>>, vector<1x1x1x32x8xbf16>
    %154 = vector.shape_cast %153 : vector<1x1x1x32x8xbf16> to vector<32x8xbf16>
    %155 = arith.truncf %59 : vector<8x32xf32> to vector<8x32xbf16>
    %cst_135 = arith.constant dense<0.000000e+00> : vector<8x8xf32>
    %156 = tpu.matmul %155, %154, %cst_135 {dimension_numbers = #tpu.dot_dimension_numbers<[1], [0], [0], [1], [0, 0, 1, 1], [], []>} : vector<8x32xbf16>, vector<32x8xbf16>, vector<8x8xf32> -> vector<8x8xf32>
    %c0_136 = arith.constant 0 : index
    %c0_137 = arith.constant 0 : index
    %c2_138 = arith.constant 2 : index
    %c0_139 = arith.constant 0 : index
    %c0_140 = arith.constant 0 : index
    %157 = vector.load %arg9[%c0_136, %c0_137, %c2_138, %c0_139, %c0_140] : memref<2x3x4x1x8xf32, #tpu.memory_space<vmem>>, vector<1x1x1x1x8xf32>
    %158 = vector.shape_cast %157 : vector<1x1x1x1x8xf32> to vector<1x8xf32>
    %159 = vector.broadcast %158 : vector<1x8xf32> to vector<8x8xf32>
    %160 = arith.addf %156, %159 : vector<8x8xf32>
    %c0_141 = arith.constant 0 : index
    %c1_142 = arith.constant 1 : index
    %c2_143 = arith.constant 2 : index
    %c0_144 = arith.constant 0 : index
    %c0_145 = arith.constant 0 : index
    %161 = vector.load %arg8[%c0_141, %c1_142, %c2_143, %c0_144, %c0_145] : memref<2x3x4x32x8xbf16, #tpu.memory_space<vmem>>, vector<1x1x1x32x8xbf16>
    %162 = vector.shape_cast %161 : vector<1x1x1x32x8xbf16> to vector<32x8xbf16>
    %163 = arith.truncf %59 : vector<8x32xf32> to vector<8x32xbf16>
    %cst_146 = arith.constant dense<0.000000e+00> : vector<8x8xf32>
    %164 = tpu.matmul %163, %162, %cst_146 {dimension_numbers = #tpu.dot_dimension_numbers<[1], [0], [0], [1], [0, 0, 1, 1], [], []>} : vector<8x32xbf16>, vector<32x8xbf16>, vector<8x8xf32> -> vector<8x8xf32>
    %c0_147 = arith.constant 0 : index
    %c1_148 = arith.constant 1 : index
    %c2_149 = arith.constant 2 : index
    %c0_150 = arith.constant 0 : index
    %c0_151 = arith.constant 0 : index
    %165 = vector.load %arg9[%c0_147, %c1_148, %c2_149, %c0_150, %c0_151] : memref<2x3x4x1x8xf32, #tpu.memory_space<vmem>>, vector<1x1x1x1x8xf32>
    %166 = vector.shape_cast %165 : vector<1x1x1x1x8xf32> to vector<1x8xf32>
    %167 = vector.broadcast %166 : vector<1x8xf32> to vector<8x8xf32>
    %168 = arith.addf %164, %167 : vector<8x8xf32>
    %c0_152 = arith.constant 0 : index
    %c2_153 = arith.constant 2 : index
    %c2_154 = arith.constant 2 : index
    %c0_155 = arith.constant 0 : index
    %c0_156 = arith.constant 0 : index
    %169 = vector.load %arg8[%c0_152, %c2_153, %c2_154, %c0_155, %c0_156] : memref<2x3x4x32x8xbf16, #tpu.memory_space<vmem>>, vector<1x1x1x32x8xbf16>
    %170 = vector.shape_cast %169 : vector<1x1x1x32x8xbf16> to vector<32x8xbf16>
    %171 = arith.truncf %59 : vector<8x32xf32> to vector<8x32xbf16>
    %cst_157 = arith.constant dense<0.000000e+00> : vector<8x8xf32>
    %172 = tpu.matmul %171, %170, %cst_157 {dimension_numbers = #tpu.dot_dimension_numbers<[1], [0], [0], [1], [0, 0, 1, 1], [], []>} : vector<8x32xbf16>, vector<32x8xbf16>, vector<8x8xf32> -> vector<8x8xf32>
    %c0_158 = arith.constant 0 : index
    %c2_159 = arith.constant 2 : index
    %c2_160 = arith.constant 2 : index
    %c0_161 = arith.constant 0 : index
    %c0_162 = arith.constant 0 : index
    %173 = vector.load %arg9[%c0_158, %c2_159, %c2_160, %c0_161, %c0_162] : memref<2x3x4x1x8xf32, #tpu.memory_space<vmem>>, vector<1x1x1x1x8xf32>
    %174 = vector.shape_cast %173 : vector<1x1x1x1x8xf32> to vector<1x8xf32>
    %175 = vector.broadcast %174 : vector<1x8xf32> to vector<8x8xf32>
    %176 = arith.addf %172, %175 : vector<8x8xf32>
    %177 = arith.truncf %160 : vector<8x8xf32> to vector<8x8xbf16>
    %178 = arith.truncf %168 : vector<8x8xf32> to vector<8x8xbf16>
    %cst_163 = arith.constant dense<0.000000e+00> : vector<8x8xf32>
    %179 = tpu.matmul %177, %178, %cst_163 {dimension_numbers = #tpu.dot_dimension_numbers<[1], [1], [0], [0], [0, 0, 1, 0], [], []>} : vector<8x8xbf16>, vector<8x8xbf16>, vector<8x8xf32> -> vector<8x8xf32>
    %cst_164 = arith.constant 0.353553385 : f32
    %180 = vector.broadcast %cst_164 : f32 to vector<8x8xf32>
    %181 = arith.mulf %179, %180 : vector<8x8xf32>
    %cst_165 = arith.constant dense<0xFF800000> : vector<8xf32>
    %182 = vector.multi_reduction <maximumf>, %181, %cst_165 [1] : vector<8x8xf32> to vector<8xf32>
    %183 = vector.shape_cast %182 : vector<8xf32> to vector<8x1xf32>
    %184 = vector.broadcast %183 : vector<8x1xf32> to vector<8x8xf32>
    %185 = arith.subf %181, %184 : vector<8x8xf32>
    %186 = math.exp %185 : vector<8x8xf32>
    %cst_166 = arith.constant dense<0.000000e+00> : vector<8xf32>
    %187 = vector.multi_reduction <add>, %186, %cst_166 [1] : vector<8x8xf32> to vector<8xf32>
    %188 = vector.shape_cast %187 : vector<8xf32> to vector<8x1xf32>
    %189 = tpu.reciprocal %188 {approx = true} : vector<8x1xf32> -> vector<8x1xf32>
    %190 = vector.broadcast %189 : vector<8x1xf32> to vector<8x8xf32>
    %191 = arith.mulf %186, %190 : vector<8x8xf32>
    %192 = arith.truncf %191 : vector<8x8xf32> to vector<8x8xbf16>
    %193 = arith.truncf %176 : vector<8x8xf32> to vector<8x8xbf16>
    %cst_167 = arith.constant dense<0.000000e+00> : vector<8x8xf32>
    %194 = tpu.matmul %192, %193, %cst_167 {dimension_numbers = #tpu.dot_dimension_numbers<[1], [0], [0], [1], [0, 0, 1, 1], [], []>} : vector<8x8xbf16>, vector<8x8xbf16>, vector<8x8xf32> -> vector<8x8xf32>
    %c0_168 = arith.constant 0 : index
    %c2_169 = arith.constant 2 : index
    %c0_170 = arith.constant 0 : index
    %c0_171 = arith.constant 0 : index
    %195 = vector.load %arg10[%c0_168, %c2_169, %c0_170, %c0_171] : memref<2x4x8x32xbf16, #tpu.memory_space<vmem>>, vector<1x1x8x32xbf16>
    %196 = vector.shape_cast %195 : vector<1x1x8x32xbf16> to vector<8x32xbf16>
    %197 = arith.truncf %194 : vector<8x8xf32> to vector<8x8xbf16>
    %cst_172 = arith.constant dense<0.000000e+00> : vector<8x32xf32>
    %198 = tpu.matmul %197, %196, %cst_172 {dimension_numbers = #tpu.dot_dimension_numbers<[1], [0], [0], [1], [0, 0, 1, 1], [], []>} : vector<8x8xbf16>, vector<8x32xbf16>, vector<8x32xf32> -> vector<8x32xf32>
    %199 = arith.addf %152, %198 : vector<8x32xf32>
    %c0_173 = arith.constant 0 : index
    %c0_174 = arith.constant 0 : index
    %c3 = arith.constant 3 : index
    %c0_175 = arith.constant 0 : index
    %c0_176 = arith.constant 0 : index
    %200 = vector.load %arg8[%c0_173, %c0_174, %c3, %c0_175, %c0_176] : memref<2x3x4x32x8xbf16, #tpu.memory_space<vmem>>, vector<1x1x1x32x8xbf16>
    %201 = vector.shape_cast %200 : vector<1x1x1x32x8xbf16> to vector<32x8xbf16>
    %202 = arith.truncf %59 : vector<8x32xf32> to vector<8x32xbf16>
    %cst_177 = arith.constant dense<0.000000e+00> : vector<8x8xf32>
    %203 = tpu.matmul %202, %201, %cst_177 {dimension_numbers = #tpu.dot_dimension_numbers<[1], [0], [0], [1], [0, 0, 1, 1], [], []>} : vector<8x32xbf16>, vector<32x8xbf16>, vector<8x8xf32> -> vector<8x8xf32>
    %c0_178 = arith.constant 0 : index
    %c0_179 = arith.constant 0 : index
    %c3_180 = arith.constant 3 : index
    %c0_181 = arith.constant 0 : index
    %c0_182 = arith.constant 0 : index
    %204 = vector.load %arg9[%c0_178, %c0_179, %c3_180, %c0_181, %c0_182] : memref<2x3x4x1x8xf32, #tpu.memory_space<vmem>>, vector<1x1x1x1x8xf32>
    %205 = vector.shape_cast %204 : vector<1x1x1x1x8xf32> to vector<1x8xf32>
    %206 = vector.broadcast %205 : vector<1x8xf32> to vector<8x8xf32>
    %207 = arith.addf %203, %206 : vector<8x8xf32>
    %c0_183 = arith.constant 0 : index
    %c1_184 = arith.constant 1 : index
    %c3_185 = arith.constant 3 : index
    %c0_186 = arith.constant 0 : index
    %c0_187 = arith.constant 0 : index
    %208 = vector.load %arg8[%c0_183, %c1_184, %c3_185, %c0_186, %c0_187] : memref<2x3x4x32x8xbf16, #tpu.memory_space<vmem>>, vector<1x1x1x32x8xbf16>
    %209 = vector.shape_cast %208 : vector<1x1x1x32x8xbf16> to vector<32x8xbf16>
    %210 = arith.truncf %59 : vector<8x32xf32> to vector<8x32xbf16>
    %cst_188 = arith.constant dense<0.000000e+00> : vector<8x8xf32>
    %211 = tpu.matmul %210, %209, %cst_188 {dimension_numbers = #tpu.dot_dimension_numbers<[1], [0], [0], [1], [0, 0, 1, 1], [], []>} : vector<8x32xbf16>, vector<32x8xbf16>, vector<8x8xf32> -> vector<8x8xf32>
    %c0_189 = arith.constant 0 : index
    %c1_190 = arith.constant 1 : index
    %c3_191 = arith.constant 3 : index
    %c0_192 = arith.constant 0 : index
    %c0_193 = arith.constant 0 : index
    %212 = vector.load %arg9[%c0_189, %c1_190, %c3_191, %c0_192, %c0_193] : memref<2x3x4x1x8xf32, #tpu.memory_space<vmem>>, vector<1x1x1x1x8xf32>
    %213 = vector.shape_cast %212 : vector<1x1x1x1x8xf32> to vector<1x8xf32>
    %214 = vector.broadcast %213 : vector<1x8xf32> to vector<8x8xf32>
    %215 = arith.addf %211, %214 : vector<8x8xf32>
    %c0_194 = arith.constant 0 : index
    %c2_195 = arith.constant 2 : index
    %c3_196 = arith.constant 3 : index
    %c0_197 = arith.constant 0 : index
    %c0_198 = arith.constant 0 : index
    %216 = vector.load %arg8[%c0_194, %c2_195, %c3_196, %c0_197, %c0_198] : memref<2x3x4x32x8xbf16, #tpu.memory_space<vmem>>, vector<1x1x1x32x8xbf16>
    %217 = vector.shape_cast %216 : vector<1x1x1x32x8xbf16> to vector<32x8xbf16>
    %218 = arith.truncf %59 : vector<8x32xf32> to vector<8x32xbf16>
    %cst_199 = arith.constant dense<0.000000e+00> : vector<8x8xf32>
    %219 = tpu.matmul %218, %217, %cst_199 {dimension_numbers = #tpu.dot_dimension_numbers<[1], [0], [0], [1], [0, 0, 1, 1], [], []>} : vector<8x32xbf16>, vector<32x8xbf16>, vector<8x8xf32> -> vector<8x8xf32>
    %c0_200 = arith.constant 0 : index
    %c2_201 = arith.constant 2 : index
    %c3_202 = arith.constant 3 : index
    %c0_203 = arith.constant 0 : index
    %c0_204 = arith.constant 0 : index
    %220 = vector.load %arg9[%c0_200, %c2_201, %c3_202, %c0_203, %c0_204] : memref<2x3x4x1x8xf32, #tpu.memory_space<vmem>>, vector<1x1x1x1x8xf32>
    %221 = vector.shape_cast %220 : vector<1x1x1x1x8xf32> to vector<1x8xf32>
    %222 = vector.broadcast %221 : vector<1x8xf32> to vector<8x8xf32>
    %223 = arith.addf %219, %222 : vector<8x8xf32>
    %224 = arith.truncf %207 : vector<8x8xf32> to vector<8x8xbf16>
    %225 = arith.truncf %215 : vector<8x8xf32> to vector<8x8xbf16>
    %cst_205 = arith.constant dense<0.000000e+00> : vector<8x8xf32>
    %226 = tpu.matmul %224, %225, %cst_205 {dimension_numbers = #tpu.dot_dimension_numbers<[1], [1], [0], [0], [0, 0, 1, 0], [], []>} : vector<8x8xbf16>, vector<8x8xbf16>, vector<8x8xf32> -> vector<8x8xf32>
    %cst_206 = arith.constant 0.353553385 : f32
    %227 = vector.broadcast %cst_206 : f32 to vector<8x8xf32>
    %228 = arith.mulf %226, %227 : vector<8x8xf32>
    %cst_207 = arith.constant dense<0xFF800000> : vector<8xf32>
    %229 = vector.multi_reduction <maximumf>, %228, %cst_207 [1] : vector<8x8xf32> to vector<8xf32>
    %230 = vector.shape_cast %229 : vector<8xf32> to vector<8x1xf32>
    %231 = vector.broadcast %230 : vector<8x1xf32> to vector<8x8xf32>
    %232 = arith.subf %228, %231 : vector<8x8xf32>
    %233 = math.exp %232 : vector<8x8xf32>
    %cst_208 = arith.constant dense<0.000000e+00> : vector<8xf32>
    %234 = vector.multi_reduction <add>, %233, %cst_208 [1] : vector<8x8xf32> to vector<8xf32>
    %235 = vector.shape_cast %234 : vector<8xf32> to vector<8x1xf32>
    %236 = tpu.reciprocal %235 {approx = true} : vector<8x1xf32> -> vector<8x1xf32>
    %237 = vector.broadcast %236 : vector<8x1xf32> to vector<8x8xf32>
    %238 = arith.mulf %233, %237 : vector<8x8xf32>
    %239 = arith.truncf %238 : vector<8x8xf32> to vector<8x8xbf16>
    %240 = arith.truncf %223 : vector<8x8xf32> to vector<8x8xbf16>
    %cst_209 = arith.constant dense<0.000000e+00> : vector<8x8xf32>
    %241 = tpu.matmul %239, %240, %cst_209 {dimension_numbers = #tpu.dot_dimension_numbers<[1], [0], [0], [1], [0, 0, 1, 1], [], []>} : vector<8x8xbf16>, vector<8x8xbf16>, vector<8x8xf32> -> vector<8x8xf32>
    %c0_210 = arith.constant 0 : index
    %c3_211 = arith.constant 3 : index
    %c0_212 = arith.constant 0 : index
    %c0_213 = arith.constant 0 : index
    %242 = vector.load %arg10[%c0_210, %c3_211, %c0_212, %c0_213] : memref<2x4x8x32xbf16, #tpu.memory_space<vmem>>, vector<1x1x8x32xbf16>
    %243 = vector.shape_cast %242 : vector<1x1x8x32xbf16> to vector<8x32xbf16>
    %244 = arith.truncf %241 : vector<8x8xf32> to vector<8x8xbf16>
    %cst_214 = arith.constant dense<0.000000e+00> : vector<8x32xf32>
    %245 = tpu.matmul %244, %243, %cst_214 {dimension_numbers = #tpu.dot_dimension_numbers<[1], [0], [0], [1], [0, 0, 1, 1], [], []>} : vector<8x8xbf16>, vector<8x32xbf16>, vector<8x32xf32> -> vector<8x32xf32>
    %246 = arith.addf %199, %245 : vector<8x32xf32>
    %247 = arith.addf %59, %246 : vector<8x32xf32>
    %c0_215 = arith.constant 0 : index
    %c0_216 = arith.constant 0 : index
    %c0_217 = arith.constant 0 : index
    %248 = vector.load %arg11[%c0_215, %c0_216, %c0_217] : memref<2x1x32xf32, #tpu.memory_space<vmem>>, vector<1x1x32xf32>
    %249 = vector.shape_cast %248 : vector<1x1x32xf32> to vector<1x32xf32>
    %250 = vector.broadcast %249 : vector<1x32xf32> to vector<8x32xf32>
    %251 = arith.addf %247, %250 : vector<8x32xf32>
    %c0_218 = arith.constant 0 : index
    %c0_219 = arith.constant 0 : index
    %c0_220 = arith.constant 0 : index
    %252 = vector.load %arg12[%c0_218, %c0_219, %c0_220] : memref<2x1x32xf32, #tpu.memory_space<vmem>>, vector<1x1x32xf32>
    %253 = vector.shape_cast %252 : vector<1x1x32xf32> to vector<1x32xf32>
    %c0_221 = arith.constant 0 : index
    %c0_222 = arith.constant 0 : index
    %c0_223 = arith.constant 0 : index
    %254 = vector.load %arg13[%c0_221, %c0_222, %c0_223] : memref<2x1x32xf32, #tpu.memory_space<vmem>>, vector<1x1x32xf32>
    %255 = vector.shape_cast %254 : vector<1x1x32xf32> to vector<1x32xf32>
    %cst_224 = arith.constant dense<0.000000e+00> : vector<8xf32>
    %256 = vector.multi_reduction <add>, %251, %cst_224 [1] : vector<8x32xf32> to vector<8xf32>
    %257 = vector.shape_cast %256 : vector<8xf32> to vector<8x1xf32>
    %cst_225 = arith.constant 3.200000e+01 : f32
    %258 = vector.broadcast %cst_225 : f32 to vector<8x1xf32>
    %259 = arith.divf %257, %258 : vector<8x1xf32>
    %260 = vector.broadcast %259 : vector<8x1xf32> to vector<8x32xf32>
    %261 = arith.subf %251, %260 : vector<8x32xf32>
    %262 = arith.mulf %261, %261 : vector<8x32xf32>
    %cst_226 = arith.constant dense<0.000000e+00> : vector<8xf32>
    %263 = vector.multi_reduction <add>, %262, %cst_226 [1] : vector<8x32xf32> to vector<8xf32>
    %264 = vector.shape_cast %263 : vector<8xf32> to vector<8x1xf32>
    %cst_227 = arith.constant 3.200000e+01 : f32
    %265 = vector.broadcast %cst_227 : f32 to vector<8x1xf32>
    %266 = arith.divf %264, %265 : vector<8x1xf32>
    %267 = vector.broadcast %259 : vector<8x1xf32> to vector<8x32xf32>
    %268 = arith.subf %251, %267 : vector<8x32xf32>
    %cst_228 = arith.constant 9.99999974E-6 : f32
    %269 = vector.broadcast %cst_228 : f32 to vector<8x1xf32>
    %270 = arith.addf %266, %269 : vector<8x1xf32>
    %271 = math.rsqrt %270 : vector<8x1xf32>
    %272 = vector.broadcast %271 : vector<8x1xf32> to vector<8x32xf32>
    %273 = arith.mulf %268, %272 : vector<8x32xf32>
    %274 = vector.broadcast %253 : vector<1x32xf32> to vector<8x32xf32>
    %275 = arith.mulf %273, %274 : vector<8x32xf32>
    %276 = vector.broadcast %255 : vector<1x32xf32> to vector<8x32xf32>
    %277 = arith.addf %275, %276 : vector<8x32xf32>
    %c0_229 = arith.constant 0 : index
    %c0_230 = arith.constant 0 : index
    %c0_231 = arith.constant 0 : index
    %278 = vector.load %arg14[%c0_229, %c0_230, %c0_231] : memref<2x32x64xbf16, #tpu.memory_space<vmem>>, vector<1x32x64xbf16>
    %279 = vector.shape_cast %278 : vector<1x32x64xbf16> to vector<32x64xbf16>
    %280 = arith.truncf %277 : vector<8x32xf32> to vector<8x32xbf16>
    %cst_232 = arith.constant dense<0.000000e+00> : vector<8x64xf32>
    %281 = tpu.matmul %280, %279, %cst_232 {dimension_numbers = #tpu.dot_dimension_numbers<[1], [0], [0], [1], [0, 0, 1, 1], [], []>} : vector<8x32xbf16>, vector<32x64xbf16>, vector<8x64xf32> -> vector<8x64xf32>
    %c0_233 = arith.constant 0 : index
    %c0_234 = arith.constant 0 : index
    %c0_235 = arith.constant 0 : index
    %282 = vector.load %arg15[%c0_233, %c0_234, %c0_235] : memref<2x1x64xf32, #tpu.memory_space<vmem>>, vector<1x1x64xf32>
    %283 = vector.shape_cast %282 : vector<1x1x64xf32> to vector<1x64xf32>
    %284 = vector.broadcast %283 : vector<1x64xf32> to vector<8x64xf32>
    %285 = arith.addf %281, %284 : vector<8x64xf32>
    %cst_236 = arith.constant 0.000000e+00 : f32
    %286 = vector.broadcast %cst_236 : f32 to vector<8x64xf32>
    %287 = arith.maximumf %285, %286 : vector<8x64xf32>
    %c0_237 = arith.constant 0 : index
    %c0_238 = arith.constant 0 : index
    %c0_239 = arith.constant 0 : index
    %288 = vector.load %arg16[%c0_237, %c0_238, %c0_239] : memref<2x64x32xbf16, #tpu.memory_space<vmem>>, vector<1x64x32xbf16>
    %289 = vector.shape_cast %288 : vector<1x64x32xbf16> to vector<64x32xbf16>
    %290 = arith.truncf %287 : vector<8x64xf32> to vector<8x64xbf16>
    %cst_240 = arith.constant dense<0.000000e+00> : vector<8x32xf32>
    %291 = tpu.matmul %290, %289, %cst_240 {dimension_numbers = #tpu.dot_dimension_numbers<[1], [0], [0], [1], [0, 0, 1, 1], [], []>} : vector<8x64xbf16>, vector<64x32xbf16>, vector<8x32xf32> -> vector<8x32xf32>
    %c0_241 = arith.constant 0 : index
    %c0_242 = arith.constant 0 : index
    %c0_243 = arith.constant 0 : index
    %292 = vector.load %arg17[%c0_241, %c0_242, %c0_243] : memref<2x1x32xf32, #tpu.memory_space<vmem>>, vector<1x1x32xf32>
    %293 = vector.shape_cast %292 : vector<1x1x32xf32> to vector<1x32xf32>
    %294 = vector.broadcast %293 : vector<1x32xf32> to vector<8x32xf32>
    %295 = arith.addf %291, %294 : vector<8x32xf32>
    %296 = arith.addf %277, %295 : vector<8x32xf32>
    %c0_244 = arith.constant 0 : index
    %c0_245 = arith.constant 0 : index
    %c0_246 = arith.constant 0 : index
    %297 = vector.load %arg18[%c0_244, %c0_245, %c0_246] : memref<2x1x32xf32, #tpu.memory_space<vmem>>, vector<1x1x32xf32>
    %298 = vector.shape_cast %297 : vector<1x1x32xf32> to vector<1x32xf32>
    %c0_247 = arith.constant 0 : index
    %c0_248 = arith.constant 0 : index
    %c0_249 = arith.constant 0 : index
    %299 = vector.load %arg19[%c0_247, %c0_248, %c0_249] : memref<2x1x32xf32, #tpu.memory_space<vmem>>, vector<1x1x32xf32>
    %300 = vector.shape_cast %299 : vector<1x1x32xf32> to vector<1x32xf32>
    %cst_250 = arith.constant dense<0.000000e+00> : vector<8xf32>
    %301 = vector.multi_reduction <add>, %296, %cst_250 [1] : vector<8x32xf32> to vector<8xf32>
    %302 = vector.shape_cast %301 : vector<8xf32> to vector<8x1xf32>
    %cst_251 = arith.constant 3.200000e+01 : f32
    %303 = vector.broadcast %cst_251 : f32 to vector<8x1xf32>
    %304 = arith.divf %302, %303 : vector<8x1xf32>
    %305 = vector.broadcast %304 : vector<8x1xf32> to vector<8x32xf32>
    %306 = arith.subf %296, %305 : vector<8x32xf32>
    %307 = arith.mulf %306, %306 : vector<8x32xf32>
    %cst_252 = arith.constant dense<0.000000e+00> : vector<8xf32>
    %308 = vector.multi_reduction <add>, %307, %cst_252 [1] : vector<8x32xf32> to vector<8xf32>
    %309 = vector.shape_cast %308 : vector<8xf32> to vector<8x1xf32>
    %cst_253 = arith.constant 3.200000e+01 : f32
    %310 = vector.broadcast %cst_253 : f32 to vector<8x1xf32>
    %311 = arith.divf %309, %310 : vector<8x1xf32>
    %312 = vector.broadcast %304 : vector<8x1xf32> to vector<8x32xf32>
    %313 = arith.subf %296, %312 : vector<8x32xf32>
    %cst_254 = arith.constant 9.99999974E-6 : f32
    %314 = vector.broadcast %cst_254 : f32 to vector<8x1xf32>
    %315 = arith.addf %311, %314 : vector<8x1xf32>
    %316 = math.rsqrt %315 : vector<8x1xf32>
    %317 = vector.broadcast %316 : vector<8x1xf32> to vector<8x32xf32>
    %318 = arith.mulf %313, %317 : vector<8x32xf32>
    %319 = vector.broadcast %298 : vector<1x32xf32> to vector<8x32xf32>
    %320 = arith.mulf %318, %319 : vector<8x32xf32>
    %321 = vector.broadcast %300 : vector<1x32xf32> to vector<8x32xf32>
    %322 = arith.addf %320, %321 : vector<8x32xf32>
    %c1_255 = arith.constant 1 : index
    %c0_256 = arith.constant 0 : index
    %c0_257 = arith.constant 0 : index
    %c0_258 = arith.constant 0 : index
    %c0_259 = arith.constant 0 : index
    %323 = vector.load %arg8[%c1_255, %c0_256, %c0_257, %c0_258, %c0_259] : memref<2x3x4x32x8xbf16, #tpu.memory_space<vmem>>, vector<1x1x1x32x8xbf16>
    %324 = vector.shape_cast %323 : vector<1x1x1x32x8xbf16> to vector<32x8xbf16>
    %325 = arith.truncf %322 : vector<8x32xf32> to vector<8x32xbf16>
    %cst_260 = arith.constant dense<0.000000e+00> : vector<8x8xf32>
    %326 = tpu.matmul %325, %324, %cst_260 {dimension_numbers = #tpu.dot_dimension_numbers<[1], [0], [0], [1], [0, 0, 1, 1], [], []>} : vector<8x32xbf16>, vector<32x8xbf16>, vector<8x8xf32> -> vector<8x8xf32>
    %c1_261 = arith.constant 1 : index
    %c0_262 = arith.constant 0 : index
    %c0_263 = arith.constant 0 : index
    %c0_264 = arith.constant 0 : index
    %c0_265 = arith.constant 0 : index
    %327 = vector.load %arg9[%c1_261, %c0_262, %c0_263, %c0_264, %c0_265] : memref<2x3x4x1x8xf32, #tpu.memory_space<vmem>>, vector<1x1x1x1x8xf32>
    %328 = vector.shape_cast %327 : vector<1x1x1x1x8xf32> to vector<1x8xf32>
    %329 = vector.broadcast %328 : vector<1x8xf32> to vector<8x8xf32>
    %330 = arith.addf %326, %329 : vector<8x8xf32>
    %c1_266 = arith.constant 1 : index
    %c1_267 = arith.constant 1 : index
    %c0_268 = arith.constant 0 : index
    %c0_269 = arith.constant 0 : index
    %c0_270 = arith.constant 0 : index
    %331 = vector.load %arg8[%c1_266, %c1_267, %c0_268, %c0_269, %c0_270] : memref<2x3x4x32x8xbf16, #tpu.memory_space<vmem>>, vector<1x1x1x32x8xbf16>
    %332 = vector.shape_cast %331 : vector<1x1x1x32x8xbf16> to vector<32x8xbf16>
    %333 = arith.truncf %322 : vector<8x32xf32> to vector<8x32xbf16>
    %cst_271 = arith.constant dense<0.000000e+00> : vector<8x8xf32>
    %334 = tpu.matmul %333, %332, %cst_271 {dimension_numbers = #tpu.dot_dimension_numbers<[1], [0], [0], [1], [0, 0, 1, 1], [], []>} : vector<8x32xbf16>, vector<32x8xbf16>, vector<8x8xf32> -> vector<8x8xf32>
    %c1_272 = arith.constant 1 : index
    %c1_273 = arith.constant 1 : index
    %c0_274 = arith.constant 0 : index
    %c0_275 = arith.constant 0 : index
    %c0_276 = arith.constant 0 : index
    %335 = vector.load %arg9[%c1_272, %c1_273, %c0_274, %c0_275, %c0_276] : memref<2x3x4x1x8xf32, #tpu.memory_space<vmem>>, vector<1x1x1x1x8xf32>
    %336 = vector.shape_cast %335 : vector<1x1x1x1x8xf32> to vector<1x8xf32>
    %337 = vector.broadcast %336 : vector<1x8xf32> to vector<8x8xf32>
    %338 = arith.addf %334, %337 : vector<8x8xf32>
    %c1_277 = arith.constant 1 : index
    %c2_278 = arith.constant 2 : index
    %c0_279 = arith.constant 0 : index
    %c0_280 = arith.constant 0 : index
    %c0_281 = arith.constant 0 : index
    %339 = vector.load %arg8[%c1_277, %c2_278, %c0_279, %c0_280, %c0_281] : memref<2x3x4x32x8xbf16, #tpu.memory_space<vmem>>, vector<1x1x1x32x8xbf16>
    %340 = vector.shape_cast %339 : vector<1x1x1x32x8xbf16> to vector<32x8xbf16>
    %341 = arith.truncf %322 : vector<8x32xf32> to vector<8x32xbf16>
    %cst_282 = arith.constant dense<0.000000e+00> : vector<8x8xf32>
    %342 = tpu.matmul %341, %340, %cst_282 {dimension_numbers = #tpu.dot_dimension_numbers<[1], [0], [0], [1], [0, 0, 1, 1], [], []>} : vector<8x32xbf16>, vector<32x8xbf16>, vector<8x8xf32> -> vector<8x8xf32>
    %c1_283 = arith.constant 1 : index
    %c2_284 = arith.constant 2 : index
    %c0_285 = arith.constant 0 : index
    %c0_286 = arith.constant 0 : index
    %c0_287 = arith.constant 0 : index
    %343 = vector.load %arg9[%c1_283, %c2_284, %c0_285, %c0_286, %c0_287] : memref<2x3x4x1x8xf32, #tpu.memory_space<vmem>>, vector<1x1x1x1x8xf32>
    %344 = vector.shape_cast %343 : vector<1x1x1x1x8xf32> to vector<1x8xf32>
    %345 = vector.broadcast %344 : vector<1x8xf32> to vector<8x8xf32>
    %346 = arith.addf %342, %345 : vector<8x8xf32>
    %347 = arith.truncf %330 : vector<8x8xf32> to vector<8x8xbf16>
    %348 = arith.truncf %338 : vector<8x8xf32> to vector<8x8xbf16>
    %cst_288 = arith.constant dense<0.000000e+00> : vector<8x8xf32>
    %349 = tpu.matmul %347, %348, %cst_288 {dimension_numbers = #tpu.dot_dimension_numbers<[1], [1], [0], [0], [0, 0, 1, 0], [], []>} : vector<8x8xbf16>, vector<8x8xbf16>, vector<8x8xf32> -> vector<8x8xf32>
    %cst_289 = arith.constant 0.353553385 : f32
    %350 = vector.broadcast %cst_289 : f32 to vector<8x8xf32>
    %351 = arith.mulf %349, %350 : vector<8x8xf32>
    %cst_290 = arith.constant dense<0xFF800000> : vector<8xf32>
    %352 = vector.multi_reduction <maximumf>, %351, %cst_290 [1] : vector<8x8xf32> to vector<8xf32>
    %353 = vector.shape_cast %352 : vector<8xf32> to vector<8x1xf32>
    %354 = vector.broadcast %353 : vector<8x1xf32> to vector<8x8xf32>
    %355 = arith.subf %351, %354 : vector<8x8xf32>
    %356 = math.exp %355 : vector<8x8xf32>
    %cst_291 = arith.constant dense<0.000000e+00> : vector<8xf32>
    %357 = vector.multi_reduction <add>, %356, %cst_291 [1] : vector<8x8xf32> to vector<8xf32>
    %358 = vector.shape_cast %357 : vector<8xf32> to vector<8x1xf32>
    %359 = tpu.reciprocal %358 {approx = true} : vector<8x1xf32> -> vector<8x1xf32>
    %360 = vector.broadcast %359 : vector<8x1xf32> to vector<8x8xf32>
    %361 = arith.mulf %356, %360 : vector<8x8xf32>
    %362 = arith.truncf %361 : vector<8x8xf32> to vector<8x8xbf16>
    %363 = arith.truncf %346 : vector<8x8xf32> to vector<8x8xbf16>
    %cst_292 = arith.constant dense<0.000000e+00> : vector<8x8xf32>
    %364 = tpu.matmul %362, %363, %cst_292 {dimension_numbers = #tpu.dot_dimension_numbers<[1], [0], [0], [1], [0, 0, 1, 1], [], []>} : vector<8x8xbf16>, vector<8x8xbf16>, vector<8x8xf32> -> vector<8x8xf32>
    %c1_293 = arith.constant 1 : index
    %c0_294 = arith.constant 0 : index
    %c0_295 = arith.constant 0 : index
    %c0_296 = arith.constant 0 : index
    %365 = vector.load %arg10[%c1_293, %c0_294, %c0_295, %c0_296] : memref<2x4x8x32xbf16, #tpu.memory_space<vmem>>, vector<1x1x8x32xbf16>
    %366 = vector.shape_cast %365 : vector<1x1x8x32xbf16> to vector<8x32xbf16>
    %367 = arith.truncf %364 : vector<8x8xf32> to vector<8x8xbf16>
    %cst_297 = arith.constant dense<0.000000e+00> : vector<8x32xf32>
    %368 = tpu.matmul %367, %366, %cst_297 {dimension_numbers = #tpu.dot_dimension_numbers<[1], [0], [0], [1], [0, 0, 1, 1], [], []>} : vector<8x8xbf16>, vector<8x32xbf16>, vector<8x32xf32> -> vector<8x32xf32>
    %c1_298 = arith.constant 1 : index
    %c0_299 = arith.constant 0 : index
    %c1_300 = arith.constant 1 : index
    %c0_301 = arith.constant 0 : index
    %c0_302 = arith.constant 0 : index
    %369 = vector.load %arg8[%c1_298, %c0_299, %c1_300, %c0_301, %c0_302] : memref<2x3x4x32x8xbf16, #tpu.memory_space<vmem>>, vector<1x1x1x32x8xbf16>
    %370 = vector.shape_cast %369 : vector<1x1x1x32x8xbf16> to vector<32x8xbf16>
    %371 = arith.truncf %322 : vector<8x32xf32> to vector<8x32xbf16>
    %cst_303 = arith.constant dense<0.000000e+00> : vector<8x8xf32>
    %372 = tpu.matmul %371, %370, %cst_303 {dimension_numbers = #tpu.dot_dimension_numbers<[1], [0], [0], [1], [0, 0, 1, 1], [], []>} : vector<8x32xbf16>, vector<32x8xbf16>, vector<8x8xf32> -> vector<8x8xf32>
    %c1_304 = arith.constant 1 : index
    %c0_305 = arith.constant 0 : index
    %c1_306 = arith.constant 1 : index
    %c0_307 = arith.constant 0 : index
    %c0_308 = arith.constant 0 : index
    %373 = vector.load %arg9[%c1_304, %c0_305, %c1_306, %c0_307, %c0_308] : memref<2x3x4x1x8xf32, #tpu.memory_space<vmem>>, vector<1x1x1x1x8xf32>
    %374 = vector.shape_cast %373 : vector<1x1x1x1x8xf32> to vector<1x8xf32>
    %375 = vector.broadcast %374 : vector<1x8xf32> to vector<8x8xf32>
    %376 = arith.addf %372, %375 : vector<8x8xf32>
    %c1_309 = arith.constant 1 : index
    %c1_310 = arith.constant 1 : index
    %c1_311 = arith.constant 1 : index
    %c0_312 = arith.constant 0 : index
    %c0_313 = arith.constant 0 : index
    %377 = vector.load %arg8[%c1_309, %c1_310, %c1_311, %c0_312, %c0_313] : memref<2x3x4x32x8xbf16, #tpu.memory_space<vmem>>, vector<1x1x1x32x8xbf16>
    %378 = vector.shape_cast %377 : vector<1x1x1x32x8xbf16> to vector<32x8xbf16>
    %379 = arith.truncf %322 : vector<8x32xf32> to vector<8x32xbf16>
    %cst_314 = arith.constant dense<0.000000e+00> : vector<8x8xf32>
    %380 = tpu.matmul %379, %378, %cst_314 {dimension_numbers = #tpu.dot_dimension_numbers<[1], [0], [0], [1], [0, 0, 1, 1], [], []>} : vector<8x32xbf16>, vector<32x8xbf16>, vector<8x8xf32> -> vector<8x8xf32>
    %c1_315 = arith.constant 1 : index
    %c1_316 = arith.constant 1 : index
    %c1_317 = arith.constant 1 : index
    %c0_318 = arith.constant 0 : index
    %c0_319 = arith.constant 0 : index
    %381 = vector.load %arg9[%c1_315, %c1_316, %c1_317, %c0_318, %c0_319] : memref<2x3x4x1x8xf32, #tpu.memory_space<vmem>>, vector<1x1x1x1x8xf32>
    %382 = vector.shape_cast %381 : vector<1x1x1x1x8xf32> to vector<1x8xf32>
    %383 = vector.broadcast %382 : vector<1x8xf32> to vector<8x8xf32>
    %384 = arith.addf %380, %383 : vector<8x8xf32>
    %c1_320 = arith.constant 1 : index
    %c2_321 = arith.constant 2 : index
    %c1_322 = arith.constant 1 : index
    %c0_323 = arith.constant 0 : index
    %c0_324 = arith.constant 0 : index
    %385 = vector.load %arg8[%c1_320, %c2_321, %c1_322, %c0_323, %c0_324] : memref<2x3x4x32x8xbf16, #tpu.memory_space<vmem>>, vector<1x1x1x32x8xbf16>
    %386 = vector.shape_cast %385 : vector<1x1x1x32x8xbf16> to vector<32x8xbf16>
    %387 = arith.truncf %322 : vector<8x32xf32> to vector<8x32xbf16>
    %cst_325 = arith.constant dense<0.000000e+00> : vector<8x8xf32>
    %388 = tpu.matmul %387, %386, %cst_325 {dimension_numbers = #tpu.dot_dimension_numbers<[1], [0], [0], [1], [0, 0, 1, 1], [], []>} : vector<8x32xbf16>, vector<32x8xbf16>, vector<8x8xf32> -> vector<8x8xf32>
    %c1_326 = arith.constant 1 : index
    %c2_327 = arith.constant 2 : index
    %c1_328 = arith.constant 1 : index
    %c0_329 = arith.constant 0 : index
    %c0_330 = arith.constant 0 : index
    %389 = vector.load %arg9[%c1_326, %c2_327, %c1_328, %c0_329, %c0_330] : memref<2x3x4x1x8xf32, #tpu.memory_space<vmem>>, vector<1x1x1x1x8xf32>
    %390 = vector.shape_cast %389 : vector<1x1x1x1x8xf32> to vector<1x8xf32>
    %391 = vector.broadcast %390 : vector<1x8xf32> to vector<8x8xf32>
    %392 = arith.addf %388, %391 : vector<8x8xf32>
    %393 = arith.truncf %376 : vector<8x8xf32> to vector<8x8xbf16>
    %394 = arith.truncf %384 : vector<8x8xf32> to vector<8x8xbf16>
    %cst_331 = arith.constant dense<0.000000e+00> : vector<8x8xf32>
    %395 = tpu.matmul %393, %394, %cst_331 {dimension_numbers = #tpu.dot_dimension_numbers<[1], [1], [0], [0], [0, 0, 1, 0], [], []>} : vector<8x8xbf16>, vector<8x8xbf16>, vector<8x8xf32> -> vector<8x8xf32>
    %cst_332 = arith.constant 0.353553385 : f32
    %396 = vector.broadcast %cst_332 : f32 to vector<8x8xf32>
    %397 = arith.mulf %395, %396 : vector<8x8xf32>
    %cst_333 = arith.constant dense<0xFF800000> : vector<8xf32>
    %398 = vector.multi_reduction <maximumf>, %397, %cst_333 [1] : vector<8x8xf32> to vector<8xf32>
    %399 = vector.shape_cast %398 : vector<8xf32> to vector<8x1xf32>
    %400 = vector.broadcast %399 : vector<8x1xf32> to vector<8x8xf32>
    %401 = arith.subf %397, %400 : vector<8x8xf32>
    %402 = math.exp %401 : vector<8x8xf32>
    %cst_334 = arith.constant dense<0.000000e+00> : vector<8xf32>
    %403 = vector.multi_reduction <add>, %402, %cst_334 [1] : vector<8x8xf32> to vector<8xf32>
    %404 = vector.shape_cast %403 : vector<8xf32> to vector<8x1xf32>
    %405 = tpu.reciprocal %404 {approx = true} : vector<8x1xf32> -> vector<8x1xf32>
    %406 = vector.broadcast %405 : vector<8x1xf32> to vector<8x8xf32>
    %407 = arith.mulf %402, %406 : vector<8x8xf32>
    %408 = arith.truncf %407 : vector<8x8xf32> to vector<8x8xbf16>
    %409 = arith.truncf %392 : vector<8x8xf32> to vector<8x8xbf16>
    %cst_335 = arith.constant dense<0.000000e+00> : vector<8x8xf32>
    %410 = tpu.matmul %408, %409, %cst_335 {dimension_numbers = #tpu.dot_dimension_numbers<[1], [0], [0], [1], [0, 0, 1, 1], [], []>} : vector<8x8xbf16>, vector<8x8xbf16>, vector<8x8xf32> -> vector<8x8xf32>
    %c1_336 = arith.constant 1 : index
    %c1_337 = arith.constant 1 : index
    %c0_338 = arith.constant 0 : index
    %c0_339 = arith.constant 0 : index
    %411 = vector.load %arg10[%c1_336, %c1_337, %c0_338, %c0_339] : memref<2x4x8x32xbf16, #tpu.memory_space<vmem>>, vector<1x1x8x32xbf16>
    %412 = vector.shape_cast %411 : vector<1x1x8x32xbf16> to vector<8x32xbf16>
    %413 = arith.truncf %410 : vector<8x8xf32> to vector<8x8xbf16>
    %cst_340 = arith.constant dense<0.000000e+00> : vector<8x32xf32>
    %414 = tpu.matmul %413, %412, %cst_340 {dimension_numbers = #tpu.dot_dimension_numbers<[1], [0], [0], [1], [0, 0, 1, 1], [], []>} : vector<8x8xbf16>, vector<8x32xbf16>, vector<8x32xf32> -> vector<8x32xf32>
    %415 = arith.addf %368, %414 : vector<8x32xf32>
    %c1_341 = arith.constant 1 : index
    %c0_342 = arith.constant 0 : index
    %c2_343 = arith.constant 2 : index
    %c0_344 = arith.constant 0 : index
    %c0_345 = arith.constant 0 : index
    %416 = vector.load %arg8[%c1_341, %c0_342, %c2_343, %c0_344, %c0_345] : memref<2x3x4x32x8xbf16, #tpu.memory_space<vmem>>, vector<1x1x1x32x8xbf16>
    %417 = vector.shape_cast %416 : vector<1x1x1x32x8xbf16> to vector<32x8xbf16>
    %418 = arith.truncf %322 : vector<8x32xf32> to vector<8x32xbf16>
    %cst_346 = arith.constant dense<0.000000e+00> : vector<8x8xf32>
    %419 = tpu.matmul %418, %417, %cst_346 {dimension_numbers = #tpu.dot_dimension_numbers<[1], [0], [0], [1], [0, 0, 1, 1], [], []>} : vector<8x32xbf16>, vector<32x8xbf16>, vector<8x8xf32> -> vector<8x8xf32>
    %c1_347 = arith.constant 1 : index
    %c0_348 = arith.constant 0 : index
    %c2_349 = arith.constant 2 : index
    %c0_350 = arith.constant 0 : index
    %c0_351 = arith.constant 0 : index
    %420 = vector.load %arg9[%c1_347, %c0_348, %c2_349, %c0_350, %c0_351] : memref<2x3x4x1x8xf32, #tpu.memory_space<vmem>>, vector<1x1x1x1x8xf32>
    %421 = vector.shape_cast %420 : vector<1x1x1x1x8xf32> to vector<1x8xf32>
    %422 = vector.broadcast %421 : vector<1x8xf32> to vector<8x8xf32>
    %423 = arith.addf %419, %422 : vector<8x8xf32>
    %c1_352 = arith.constant 1 : index
    %c1_353 = arith.constant 1 : index
    %c2_354 = arith.constant 2 : index
    %c0_355 = arith.constant 0 : index
    %c0_356 = arith.constant 0 : index
    %424 = vector.load %arg8[%c1_352, %c1_353, %c2_354, %c0_355, %c0_356] : memref<2x3x4x32x8xbf16, #tpu.memory_space<vmem>>, vector<1x1x1x32x8xbf16>
    %425 = vector.shape_cast %424 : vector<1x1x1x32x8xbf16> to vector<32x8xbf16>
    %426 = arith.truncf %322 : vector<8x32xf32> to vector<8x32xbf16>
    %cst_357 = arith.constant dense<0.000000e+00> : vector<8x8xf32>
    %427 = tpu.matmul %426, %425, %cst_357 {dimension_numbers = #tpu.dot_dimension_numbers<[1], [0], [0], [1], [0, 0, 1, 1], [], []>} : vector<8x32xbf16>, vector<32x8xbf16>, vector<8x8xf32> -> vector<8x8xf32>
    %c1_358 = arith.constant 1 : index
    %c1_359 = arith.constant 1 : index
    %c2_360 = arith.constant 2 : index
    %c0_361 = arith.constant 0 : index
    %c0_362 = arith.constant 0 : index
    %428 = vector.load %arg9[%c1_358, %c1_359, %c2_360, %c0_361, %c0_362] : memref<2x3x4x1x8xf32, #tpu.memory_space<vmem>>, vector<1x1x1x1x8xf32>
    %429 = vector.shape_cast %428 : vector<1x1x1x1x8xf32> to vector<1x8xf32>
    %430 = vector.broadcast %429 : vector<1x8xf32> to vector<8x8xf32>
    %431 = arith.addf %427, %430 : vector<8x8xf32>
    %c1_363 = arith.constant 1 : index
    %c2_364 = arith.constant 2 : index
    %c2_365 = arith.constant 2 : index
    %c0_366 = arith.constant 0 : index
    %c0_367 = arith.constant 0 : index
    %432 = vector.load %arg8[%c1_363, %c2_364, %c2_365, %c0_366, %c0_367] : memref<2x3x4x32x8xbf16, #tpu.memory_space<vmem>>, vector<1x1x1x32x8xbf16>
    %433 = vector.shape_cast %432 : vector<1x1x1x32x8xbf16> to vector<32x8xbf16>
    %434 = arith.truncf %322 : vector<8x32xf32> to vector<8x32xbf16>
    %cst_368 = arith.constant dense<0.000000e+00> : vector<8x8xf32>
    %435 = tpu.matmul %434, %433, %cst_368 {dimension_numbers = #tpu.dot_dimension_numbers<[1], [0], [0], [1], [0, 0, 1, 1], [], []>} : vector<8x32xbf16>, vector<32x8xbf16>, vector<8x8xf32> -> vector<8x8xf32>
    %c1_369 = arith.constant 1 : index
    %c2_370 = arith.constant 2 : index
    %c2_371 = arith.constant 2 : index
    %c0_372 = arith.constant 0 : index
    %c0_373 = arith.constant 0 : index
    %436 = vector.load %arg9[%c1_369, %c2_370, %c2_371, %c0_372, %c0_373] : memref<2x3x4x1x8xf32, #tpu.memory_space<vmem>>, vector<1x1x1x1x8xf32>
    %437 = vector.shape_cast %436 : vector<1x1x1x1x8xf32> to vector<1x8xf32>
    %438 = vector.broadcast %437 : vector<1x8xf32> to vector<8x8xf32>
    %439 = arith.addf %435, %438 : vector<8x8xf32>
    %440 = arith.truncf %423 : vector<8x8xf32> to vector<8x8xbf16>
    %441 = arith.truncf %431 : vector<8x8xf32> to vector<8x8xbf16>
    %cst_374 = arith.constant dense<0.000000e+00> : vector<8x8xf32>
    %442 = tpu.matmul %440, %441, %cst_374 {dimension_numbers = #tpu.dot_dimension_numbers<[1], [1], [0], [0], [0, 0, 1, 0], [], []>} : vector<8x8xbf16>, vector<8x8xbf16>, vector<8x8xf32> -> vector<8x8xf32>
    %cst_375 = arith.constant 0.353553385 : f32
    %443 = vector.broadcast %cst_375 : f32 to vector<8x8xf32>
    %444 = arith.mulf %442, %443 : vector<8x8xf32>
    %cst_376 = arith.constant dense<0xFF800000> : vector<8xf32>
    %445 = vector.multi_reduction <maximumf>, %444, %cst_376 [1] : vector<8x8xf32> to vector<8xf32>
    %446 = vector.shape_cast %445 : vector<8xf32> to vector<8x1xf32>
    %447 = vector.broadcast %446 : vector<8x1xf32> to vector<8x8xf32>
    %448 = arith.subf %444, %447 : vector<8x8xf32>
    %449 = math.exp %448 : vector<8x8xf32>
    %cst_377 = arith.constant dense<0.000000e+00> : vector<8xf32>
    %450 = vector.multi_reduction <add>, %449, %cst_377 [1] : vector<8x8xf32> to vector<8xf32>
    %451 = vector.shape_cast %450 : vector<8xf32> to vector<8x1xf32>
    %452 = tpu.reciprocal %451 {approx = true} : vector<8x1xf32> -> vector<8x1xf32>
    %453 = vector.broadcast %452 : vector<8x1xf32> to vector<8x8xf32>
    %454 = arith.mulf %449, %453 : vector<8x8xf32>
    %455 = arith.truncf %454 : vector<8x8xf32> to vector<8x8xbf16>
    %456 = arith.truncf %439 : vector<8x8xf32> to vector<8x8xbf16>
    %cst_378 = arith.constant dense<0.000000e+00> : vector<8x8xf32>
    %457 = tpu.matmul %455, %456, %cst_378 {dimension_numbers = #tpu.dot_dimension_numbers<[1], [0], [0], [1], [0, 0, 1, 1], [], []>} : vector<8x8xbf16>, vector<8x8xbf16>, vector<8x8xf32> -> vector<8x8xf32>
    %c1_379 = arith.constant 1 : index
    %c2_380 = arith.constant 2 : index
    %c0_381 = arith.constant 0 : index
    %c0_382 = arith.constant 0 : index
    %458 = vector.load %arg10[%c1_379, %c2_380, %c0_381, %c0_382] : memref<2x4x8x32xbf16, #tpu.memory_space<vmem>>, vector<1x1x8x32xbf16>
    %459 = vector.shape_cast %458 : vector<1x1x8x32xbf16> to vector<8x32xbf16>
    %460 = arith.truncf %457 : vector<8x8xf32> to vector<8x8xbf16>
    %cst_383 = arith.constant dense<0.000000e+00> : vector<8x32xf32>
    %461 = tpu.matmul %460, %459, %cst_383 {dimension_numbers = #tpu.dot_dimension_numbers<[1], [0], [0], [1], [0, 0, 1, 1], [], []>} : vector<8x8xbf16>, vector<8x32xbf16>, vector<8x32xf32> -> vector<8x32xf32>
    %462 = arith.addf %415, %461 : vector<8x32xf32>
    %c1_384 = arith.constant 1 : index
    %c0_385 = arith.constant 0 : index
    %c3_386 = arith.constant 3 : index
    %c0_387 = arith.constant 0 : index
    %c0_388 = arith.constant 0 : index
    %463 = vector.load %arg8[%c1_384, %c0_385, %c3_386, %c0_387, %c0_388] : memref<2x3x4x32x8xbf16, #tpu.memory_space<vmem>>, vector<1x1x1x32x8xbf16>
    %464 = vector.shape_cast %463 : vector<1x1x1x32x8xbf16> to vector<32x8xbf16>
    %465 = arith.truncf %322 : vector<8x32xf32> to vector<8x32xbf16>
    %cst_389 = arith.constant dense<0.000000e+00> : vector<8x8xf32>
    %466 = tpu.matmul %465, %464, %cst_389 {dimension_numbers = #tpu.dot_dimension_numbers<[1], [0], [0], [1], [0, 0, 1, 1], [], []>} : vector<8x32xbf16>, vector<32x8xbf16>, vector<8x8xf32> -> vector<8x8xf32>
    %c1_390 = arith.constant 1 : index
    %c0_391 = arith.constant 0 : index
    %c3_392 = arith.constant 3 : index
    %c0_393 = arith.constant 0 : index
    %c0_394 = arith.constant 0 : index
    %467 = vector.load %arg9[%c1_390, %c0_391, %c3_392, %c0_393, %c0_394] : memref<2x3x4x1x8xf32, #tpu.memory_space<vmem>>, vector<1x1x1x1x8xf32>
    %468 = vector.shape_cast %467 : vector<1x1x1x1x8xf32> to vector<1x8xf32>
    %469 = vector.broadcast %468 : vector<1x8xf32> to vector<8x8xf32>
    %470 = arith.addf %466, %469 : vector<8x8xf32>
    %c1_395 = arith.constant 1 : index
    %c1_396 = arith.constant 1 : index
    %c3_397 = arith.constant 3 : index
    %c0_398 = arith.constant 0 : index
    %c0_399 = arith.constant 0 : index
    %471 = vector.load %arg8[%c1_395, %c1_396, %c3_397, %c0_398, %c0_399] : memref<2x3x4x32x8xbf16, #tpu.memory_space<vmem>>, vector<1x1x1x32x8xbf16>
    %472 = vector.shape_cast %471 : vector<1x1x1x32x8xbf16> to vector<32x8xbf16>
    %473 = arith.truncf %322 : vector<8x32xf32> to vector<8x32xbf16>
    %cst_400 = arith.constant dense<0.000000e+00> : vector<8x8xf32>
    %474 = tpu.matmul %473, %472, %cst_400 {dimension_numbers = #tpu.dot_dimension_numbers<[1], [0], [0], [1], [0, 0, 1, 1], [], []>} : vector<8x32xbf16>, vector<32x8xbf16>, vector<8x8xf32> -> vector<8x8xf32>
    %c1_401 = arith.constant 1 : index
    %c1_402 = arith.constant 1 : index
    %c3_403 = arith.constant 3 : index
    %c0_404 = arith.constant 0 : index
    %c0_405 = arith.constant 0 : index
    %475 = vector.load %arg9[%c1_401, %c1_402, %c3_403, %c0_404, %c0_405] : memref<2x3x4x1x8xf32, #tpu.memory_space<vmem>>, vector<1x1x1x1x8xf32>
    %476 = vector.shape_cast %475 : vector<1x1x1x1x8xf32> to vector<1x8xf32>
    %477 = vector.broadcast %476 : vector<1x8xf32> to vector<8x8xf32>
    %478 = arith.addf %474, %477 : vector<8x8xf32>
    %c1_406 = arith.constant 1 : index
    %c2_407 = arith.constant 2 : index
    %c3_408 = arith.constant 3 : index
    %c0_409 = arith.constant 0 : index
    %c0_410 = arith.constant 0 : index
    %479 = vector.load %arg8[%c1_406, %c2_407, %c3_408, %c0_409, %c0_410] : memref<2x3x4x32x8xbf16, #tpu.memory_space<vmem>>, vector<1x1x1x32x8xbf16>
    %480 = vector.shape_cast %479 : vector<1x1x1x32x8xbf16> to vector<32x8xbf16>
    %481 = arith.truncf %322 : vector<8x32xf32> to vector<8x32xbf16>
    %cst_411 = arith.constant dense<0.000000e+00> : vector<8x8xf32>
    %482 = tpu.matmul %481, %480, %cst_411 {dimension_numbers = #tpu.dot_dimension_numbers<[1], [0], [0], [1], [0, 0, 1, 1], [], []>} : vector<8x32xbf16>, vector<32x8xbf16>, vector<8x8xf32> -> vector<8x8xf32>
    %c1_412 = arith.constant 1 : index
    %c2_413 = arith.constant 2 : index
    %c3_414 = arith.constant 3 : index
    %c0_415 = arith.constant 0 : index
    %c0_416 = arith.constant 0 : index
    %483 = vector.load %arg9[%c1_412, %c2_413, %c3_414, %c0_415, %c0_416] : memref<2x3x4x1x8xf32, #tpu.memory_space<vmem>>, vector<1x1x1x1x8xf32>
    %484 = vector.shape_cast %483 : vector<1x1x1x1x8xf32> to vector<1x8xf32>
    %485 = vector.broadcast %484 : vector<1x8xf32> to vector<8x8xf32>
    %486 = arith.addf %482, %485 : vector<8x8xf32>
    %487 = arith.truncf %470 : vector<8x8xf32> to vector<8x8xbf16>
    %488 = arith.truncf %478 : vector<8x8xf32> to vector<8x8xbf16>
    %cst_417 = arith.constant dense<0.000000e+00> : vector<8x8xf32>
    %489 = tpu.matmul %487, %488, %cst_417 {dimension_numbers = #tpu.dot_dimension_numbers<[1], [1], [0], [0], [0, 0, 1, 0], [], []>} : vector<8x8xbf16>, vector<8x8xbf16>, vector<8x8xf32> -> vector<8x8xf32>
    %cst_418 = arith.constant 0.353553385 : f32
    %490 = vector.broadcast %cst_418 : f32 to vector<8x8xf32>
    %491 = arith.mulf %489, %490 : vector<8x8xf32>
    %cst_419 = arith.constant dense<0xFF800000> : vector<8xf32>
    %492 = vector.multi_reduction <maximumf>, %491, %cst_419 [1] : vector<8x8xf32> to vector<8xf32>
    %493 = vector.shape_cast %492 : vector<8xf32> to vector<8x1xf32>
    %494 = vector.broadcast %493 : vector<8x1xf32> to vector<8x8xf32>
    %495 = arith.subf %491, %494 : vector<8x8xf32>
    %496 = math.exp %495 : vector<8x8xf32>
    %cst_420 = arith.constant dense<0.000000e+00> : vector<8xf32>
    %497 = vector.multi_reduction <add>, %496, %cst_420 [1] : vector<8x8xf32> to vector<8xf32>
    %498 = vector.shape_cast %497 : vector<8xf32> to vector<8x1xf32>
    %499 = tpu.reciprocal %498 {approx = true} : vector<8x1xf32> -> vector<8x1xf32>
    %500 = vector.broadcast %499 : vector<8x1xf32> to vector<8x8xf32>
    %501 = arith.mulf %496, %500 : vector<8x8xf32>
    %502 = arith.truncf %501 : vector<8x8xf32> to vector<8x8xbf16>
    %503 = arith.truncf %486 : vector<8x8xf32> to vector<8x8xbf16>
    %cst_421 = arith.constant dense<0.000000e+00> : vector<8x8xf32>
    %504 = tpu.matmul %502, %503, %cst_421 {dimension_numbers = #tpu.dot_dimension_numbers<[1], [0], [0], [1], [0, 0, 1, 1], [], []>} : vector<8x8xbf16>, vector<8x8xbf16>, vector<8x8xf32> -> vector<8x8xf32>
    %c1_422 = arith.constant 1 : index
    %c3_423 = arith.constant 3 : index
    %c0_424 = arith.constant 0 : index
    %c0_425 = arith.constant 0 : index
    %505 = vector.load %arg10[%c1_422, %c3_423, %c0_424, %c0_425] : memref<2x4x8x32xbf16, #tpu.memory_space<vmem>>, vector<1x1x8x32xbf16>
    %506 = vector.shape_cast %505 : vector<1x1x8x32xbf16> to vector<8x32xbf16>
    %507 = arith.truncf %504 : vector<8x8xf32> to vector<8x8xbf16>
    %cst_426 = arith.constant dense<0.000000e+00> : vector<8x32xf32>
    %508 = tpu.matmul %507, %506, %cst_426 {dimension_numbers = #tpu.dot_dimension_numbers<[1], [0], [0], [1], [0, 0, 1, 1], [], []>} : vector<8x8xbf16>, vector<8x32xbf16>, vector<8x32xf32> -> vector<8x32xf32>
    %509 = arith.addf %462, %508 : vector<8x32xf32>
    %510 = arith.addf %322, %509 : vector<8x32xf32>
    %c1_427 = arith.constant 1 : index
    %c0_428 = arith.constant 0 : index
    %c0_429 = arith.constant 0 : index
    %511 = vector.load %arg11[%c1_427, %c0_428, %c0_429] : memref<2x1x32xf32, #tpu.memory_space<vmem>>, vector<1x1x32xf32>
    %512 = vector.shape_cast %511 : vector<1x1x32xf32> to vector<1x32xf32>
    %513 = vector.broadcast %512 : vector<1x32xf32> to vector<8x32xf32>
    %514 = arith.addf %510, %513 : vector<8x32xf32>
    %c1_430 = arith.constant 1 : index
    %c0_431 = arith.constant 0 : index
    %c0_432 = arith.constant 0 : index
    %515 = vector.load %arg12[%c1_430, %c0_431, %c0_432] : memref<2x1x32xf32, #tpu.memory_space<vmem>>, vector<1x1x32xf32>
    %516 = vector.shape_cast %515 : vector<1x1x32xf32> to vector<1x32xf32>
    %c1_433 = arith.constant 1 : index
    %c0_434 = arith.constant 0 : index
    %c0_435 = arith.constant 0 : index
    %517 = vector.load %arg13[%c1_433, %c0_434, %c0_435] : memref<2x1x32xf32, #tpu.memory_space<vmem>>, vector<1x1x32xf32>
    %518 = vector.shape_cast %517 : vector<1x1x32xf32> to vector<1x32xf32>
    %cst_436 = arith.constant dense<0.000000e+00> : vector<8xf32>
    %519 = vector.multi_reduction <add>, %514, %cst_436 [1] : vector<8x32xf32> to vector<8xf32>
    %520 = vector.shape_cast %519 : vector<8xf32> to vector<8x1xf32>
    %cst_437 = arith.constant 3.200000e+01 : f32
    %521 = vector.broadcast %cst_437 : f32 to vector<8x1xf32>
    %522 = arith.divf %520, %521 : vector<8x1xf32>
    %523 = vector.broadcast %522 : vector<8x1xf32> to vector<8x32xf32>
    %524 = arith.subf %514, %523 : vector<8x32xf32>
    %525 = arith.mulf %524, %524 : vector<8x32xf32>
    %cst_438 = arith.constant dense<0.000000e+00> : vector<8xf32>
    %526 = vector.multi_reduction <add>, %525, %cst_438 [1] : vector<8x32xf32> to vector<8xf32>
    %527 = vector.shape_cast %526 : vector<8xf32> to vector<8x1xf32>
    %cst_439 = arith.constant 3.200000e+01 : f32
    %528 = vector.broadcast %cst_439 : f32 to vector<8x1xf32>
    %529 = arith.divf %527, %528 : vector<8x1xf32>
    %530 = vector.broadcast %522 : vector<8x1xf32> to vector<8x32xf32>
    %531 = arith.subf %514, %530 : vector<8x32xf32>
    %cst_440 = arith.constant 9.99999974E-6 : f32
    %532 = vector.broadcast %cst_440 : f32 to vector<8x1xf32>
    %533 = arith.addf %529, %532 : vector<8x1xf32>
    %534 = math.rsqrt %533 : vector<8x1xf32>
    %535 = vector.broadcast %534 : vector<8x1xf32> to vector<8x32xf32>
    %536 = arith.mulf %531, %535 : vector<8x32xf32>
    %537 = vector.broadcast %516 : vector<1x32xf32> to vector<8x32xf32>
    %538 = arith.mulf %536, %537 : vector<8x32xf32>
    %539 = vector.broadcast %518 : vector<1x32xf32> to vector<8x32xf32>
    %540 = arith.addf %538, %539 : vector<8x32xf32>
    %c1_441 = arith.constant 1 : index
    %c0_442 = arith.constant 0 : index
    %c0_443 = arith.constant 0 : index
    %541 = vector.load %arg14[%c1_441, %c0_442, %c0_443] : memref<2x32x64xbf16, #tpu.memory_space<vmem>>, vector<1x32x64xbf16>
    %542 = vector.shape_cast %541 : vector<1x32x64xbf16> to vector<32x64xbf16>
    %543 = arith.truncf %540 : vector<8x32xf32> to vector<8x32xbf16>
    %cst_444 = arith.constant dense<0.000000e+00> : vector<8x64xf32>
    %544 = tpu.matmul %543, %542, %cst_444 {dimension_numbers = #tpu.dot_dimension_numbers<[1], [0], [0], [1], [0, 0, 1, 1], [], []>} : vector<8x32xbf16>, vector<32x64xbf16>, vector<8x64xf32> -> vector<8x64xf32>
    %c1_445 = arith.constant 1 : index
    %c0_446 = arith.constant 0 : index
    %c0_447 = arith.constant 0 : index
    %545 = vector.load %arg15[%c1_445, %c0_446, %c0_447] : memref<2x1x64xf32, #tpu.memory_space<vmem>>, vector<1x1x64xf32>
    %546 = vector.shape_cast %545 : vector<1x1x64xf32> to vector<1x64xf32>
    %547 = vector.broadcast %546 : vector<1x64xf32> to vector<8x64xf32>
    %548 = arith.addf %544, %547 : vector<8x64xf32>
    %cst_448 = arith.constant 0.000000e+00 : f32
    %549 = vector.broadcast %cst_448 : f32 to vector<8x64xf32>
    %550 = arith.maximumf %548, %549 : vector<8x64xf32>
    %c1_449 = arith.constant 1 : index
    %c0_450 = arith.constant 0 : index
    %c0_451 = arith.constant 0 : index
    %551 = vector.load %arg16[%c1_449, %c0_450, %c0_451] : memref<2x64x32xbf16, #tpu.memory_space<vmem>>, vector<1x64x32xbf16>
    %552 = vector.shape_cast %551 : vector<1x64x32xbf16> to vector<64x32xbf16>
    %553 = arith.truncf %550 : vector<8x64xf32> to vector<8x64xbf16>
    %cst_452 = arith.constant dense<0.000000e+00> : vector<8x32xf32>
    %554 = tpu.matmul %553, %552, %cst_452 {dimension_numbers = #tpu.dot_dimension_numbers<[1], [0], [0], [1], [0, 0, 1, 1], [], []>} : vector<8x64xbf16>, vector<64x32xbf16>, vector<8x32xf32> -> vector<8x32xf32>
    %c1_453 = arith.constant 1 : index
    %c0_454 = arith.constant 0 : index
    %c0_455 = arith.constant 0 : index
    %555 = vector.load %arg17[%c1_453, %c0_454, %c0_455] : memref<2x1x32xf32, #tpu.memory_space<vmem>>, vector<1x1x32xf32>
    %556 = vector.shape_cast %555 : vector<1x1x32xf32> to vector<1x32xf32>
    %557 = vector.broadcast %556 : vector<1x32xf32> to vector<8x32xf32>
    %558 = arith.addf %554, %557 : vector<8x32xf32>
    %559 = arith.addf %540, %558 : vector<8x32xf32>
    %c1_456 = arith.constant 1 : index
    %c0_457 = arith.constant 0 : index
    %c0_458 = arith.constant 0 : index
    %560 = vector.load %arg18[%c1_456, %c0_457, %c0_458] : memref<2x1x32xf32, #tpu.memory_space<vmem>>, vector<1x1x32xf32>
    %561 = vector.shape_cast %560 : vector<1x1x32xf32> to vector<1x32xf32>
    %c1_459 = arith.constant 1 : index
    %c0_460 = arith.constant 0 : index
    %c0_461 = arith.constant 0 : index
    %562 = vector.load %arg19[%c1_459, %c0_460, %c0_461] : memref<2x1x32xf32, #tpu.memory_space<vmem>>, vector<1x1x32xf32>
    %563 = vector.shape_cast %562 : vector<1x1x32xf32> to vector<1x32xf32>
    %cst_462 = arith.constant dense<0.000000e+00> : vector<8xf32>
    %564 = vector.multi_reduction <add>, %559, %cst_462 [1] : vector<8x32xf32> to vector<8xf32>
    %565 = vector.shape_cast %564 : vector<8xf32> to vector<8x1xf32>
    %cst_463 = arith.constant 3.200000e+01 : f32
    %566 = vector.broadcast %cst_463 : f32 to vector<8x1xf32>
    %567 = arith.divf %565, %566 : vector<8x1xf32>
    %568 = vector.broadcast %567 : vector<8x1xf32> to vector<8x32xf32>
    %569 = arith.subf %559, %568 : vector<8x32xf32>
    %570 = arith.mulf %569, %569 : vector<8x32xf32>
    %cst_464 = arith.constant dense<0.000000e+00> : vector<8xf32>
    %571 = vector.multi_reduction <add>, %570, %cst_464 [1] : vector<8x32xf32> to vector<8xf32>
    %572 = vector.shape_cast %571 : vector<8xf32> to vector<8x1xf32>
    %cst_465 = arith.constant 3.200000e+01 : f32
    %573 = vector.broadcast %cst_465 : f32 to vector<8x1xf32>
    %574 = arith.divf %572, %573 : vector<8x1xf32>
    %575 = vector.broadcast %567 : vector<8x1xf32> to vector<8x32xf32>
    %576 = arith.subf %559, %575 : vector<8x32xf32>
    %cst_466 = arith.constant 9.99999974E-6 : f32
    %577 = vector.broadcast %cst_466 : f32 to vector<8x1xf32>
    %578 = arith.addf %574, %577 : vector<8x1xf32>
    %579 = math.rsqrt %578 : vector<8x1xf32>
    %580 = vector.broadcast %579 : vector<8x1xf32> to vector<8x32xf32>
    %581 = arith.mulf %576, %580 : vector<8x32xf32>
    %582 = vector.broadcast %561 : vector<1x32xf32> to vector<8x32xf32>
    %583 = arith.mulf %581, %582 : vector<8x32xf32>
    %584 = vector.broadcast %563 : vector<1x32xf32> to vector<8x32xf32>
    %585 = arith.addf %583, %584 : vector<8x32xf32>
    %c0_467 = arith.constant 0 : index
    %c0_468 = arith.constant 0 : index
    %586 = vector.load %arg20[%c0_467, %c0_468] : memref<32x16xbf16, #tpu.memory_space<vmem>>, vector<32x16xbf16>
    %587 = arith.truncf %585 : vector<8x32xf32> to vector<8x32xbf16>
    %cst_469 = arith.constant dense<0.000000e+00> : vector<8x16xf32>
    %588 = tpu.matmul %587, %586, %cst_469 {dimension_numbers = #tpu.dot_dimension_numbers<[1], [0], [0], [1], [0, 0, 1, 1], [], []>} : vector<8x32xbf16>, vector<32x16xbf16>, vector<8x16xf32> -> vector<8x16xf32>
    %c0_470 = arith.constant 0 : index
    %c0_471 = arith.constant 0 : index
    %589 = vector.load %arg21[%c0_470, %c0_471] : memref<1x16xf32, #tpu.memory_space<vmem>>, vector<1x16xf32>
    %590 = vector.broadcast %589 : vector<1x16xf32> to vector<8x16xf32>
    %591 = arith.addf %588, %590 : vector<8x16xf32>
    %cst_472 = arith.constant dense<0xFF800000> : vector<8xf32>
    %592 = vector.multi_reduction <maximumf>, %591, %cst_472 [1] : vector<8x16xf32> to vector<8xf32>
    %593 = vector.shape_cast %592 : vector<8xf32> to vector<8x1xf32>
    %594 = vector.broadcast %593 : vector<8x1xf32> to vector<8x16xf32>
    %595 = arith.subf %591, %594 : vector<8x16xf32>
    %596 = math.exp %595 : vector<8x16xf32>
    %cst_473 = arith.constant dense<0.000000e+00> : vector<8xf32>
    %597 = vector.multi_reduction <add>, %596, %cst_473 [1] : vector<8x16xf32> to vector<8xf32>
    %598 = vector.shape_cast %597 : vector<8xf32> to vector<8x1xf32>
    %599 = math.log %598 : vector<8x1xf32>
    %600 = arith.addf %599, %593 : vector<8x1xf32>
    %601 = vector.broadcast %600 : vector<8x1xf32> to vector<8x16xf32>
    %602 = arith.subf %591, %601 : vector<8x16xf32>
    %c0_474 = arith.constant 0 : index
    %c0_475 = arith.constant 0 : index
    %c0_476 = arith.constant 0 : index
    %603 = vector.load %arg22[%c0_474, %c0_475, %c0_476] : memref<1x8x16xf32, #tpu.memory_space<vmem>>, vector<1x8x16xf32>
    %604 = vector.shape_cast %603 : vector<1x8x16xf32> to vector<8x16xf32>
    %605 = vector.shape_cast %602 : vector<8x16xf32> to vector<1x8x16xf32>
    tpu.vector_store %arg22[%c0_474, %c0_475, %c0_476], %605 {strides = array<i32>} : memref<1x8x16xf32, #tpu.memory_space<vmem>>, vector<1x8x16xf32>,
    return
  }
  func.func @transform_0(%arg0: i32) -> (i32, i32, i32, i32) {
    %c0_i32 = arith.constant 0 : i32
    %c0_i32_0 = arith.constant 0 : i32
    %c0_i32_1 = arith.constant 0 : i32
    %c0_i32_2 = arith.constant 0 : i32
    return %arg0, %c0_i32, %c0_i32_0, %c0_i32_1 : i32, i32, i32, i32
  }
  func.func @transform_1(%arg0: i32) -> (i32, i32) {
    %c0_i32 = arith.constant 0 : i32
    %c0_i32_0 = arith.constant 0 : i32
    %c0_i32_1 = arith.constant 0 : i32
    return %c0_i32, %c0_i32_0 : i32, i32
  }
  func.func @transform_2(%arg0: i32) -> (i32, i32, i32) {
    %c0_i32 = arith.constant 0 : i32
    %c0_i32_0 = arith.constant 0 : i32
    %c0_i32_1 = arith.constant 0 : i32
    %c0_i32_2 = arith.constant 0 : i32
    return %c0_i32, %c0_i32_0, %c0_i32_1 : i32, i32, i32
  }
  func.func @transform_3(%arg0: i32) -> (i32, i32) {
    %c0_i32 = arith.constant 0 : i32
    %c0_i32_0 = arith.constant 0 : i32
    %c0_i32_1 = arith.constant 0 : i32
    return %c0_i32, %c0_i32_0 : i32, i32
  }
  func.func @transform_4(%arg0: i32) -> (i32, i32) {
    %c0_i32 = arith.constant 0 : i32
    %c0_i32_0 = arith.constant 0 : i32
    %c0_i32_1 = arith.constant 0 : i32
    return %c0_i32, %c0_i32_0 : i32, i32
  }
  func.func @transform_5(%arg0: i32) -> (i32, i32) {
    %c0_i32 = arith.constant 0 : i32
    %c0_i32_0 = arith.constant 0 : i32
    %c0_i32_1 = arith.constant 0 : i32
    return %c0_i32, %c0_i32_0 : i32, i32
  }
  func.func @transform_6(%arg0: i32) -> (i32, i32) {
    %c0_i32 = arith.constant 0 : i32
    %c0_i32_0 = arith.constant 0 : i32
    %c0_i32_1 = arith.constant 0 : i32
    return %c0_i32, %c0_i32_0 : i32, i32
  }
  func.func @transform_7(%arg0: i32) -> (i32, i32, i32, i32, i32) {
    %c0_i32 = arith.constant 0 : i32
    %c0_i32_0 = arith.constant 0 : i32
    %c0_i32_1 = arith.constant 0 : i32
    %c0_i32_2 = arith.constant 0 : i32
    %c0_i32_3 = arith.constant 0 : i32
    %c0_i32_4 = arith.constant 0 : i32
    return %c0_i32, %c0_i32_0, %c0_i32_1, %c0_i32_2, %c0_i32_3 : i32, i32, i32, i32, i32
  }
  func.func @transform_8(%arg0: i32) -> (i32, i32, i32, i32, i32) {
    %c0_i32 = arith.constant 0 : i32
    %c0_i32_0 = arith.constant 0 : i32
    %c0_i32_1 = arith.constant 0 : i32
    %c0_i32_2 = arith.constant 0 : i32
    %c0_i32_3 = arith.constant 0 : i32
    %c0_i32_4 = arith.constant 0 : i32
    return %c0_i32, %c0_i32_0, %c0_i32_1, %c0_i32_2, %c0_i32_3 : i32, i32, i32, i32, i32
  }
  func.func @transform_9(%arg0: i32) -> (i32, i32, i32, i32) {
    %c0_i32 = arith.constant 0 : i32
    %c0_i32_0 = arith.constant 0 : i32
    %c0_i32_1 = arith.constant 0 : i32
    %c0_i32_2 = arith.constant 0 : i32
    %c0_i32_3 = arith.constant 0 : i32
    return %c0_i32, %c0_i32_0, %c0_i32_1, %c0_i32_2 : i32, i32, i32, i32
  }
  func.func @transform_10(%arg0: i32) -> (i32, i32, i32) {
    %c0_i32 = arith.constant 0 : i32
    %c0_i32_0 = arith.constant 0 : i32
    %c0_i32_1 = arith.constant 0 : i32
    %c0_i32_2 = arith.constant 0 : i32
    return %c0_i32, %c0_i32_0, %c0_i32_1 : i32, i32, i32
  }
  func.func @transform_11(%arg0: i32) -> (i32, i32, i32) {
    %c0_i32 = arith.constant 0 : i32
    %c0_i32_0 = arith.constant 0 : i32
    %c0_i32_1 = arith.constant 0 : i32
    %c0_i32_2 = arith.constant 0 : i32
    return %c0_i32, %c0_i32_0, %c0_i32_1 : i32, i32, i32
  }
  func.func @transform_12(%arg0: i32) -> (i32, i32, i32) {
    %c0_i32 = arith.constant 0 : i32
    %c0_i32_0 = arith.constant 0 : i32
    %c0_i32_1 = arith.constant 0 : i32
    %c0_i32_2 = arith.constant 0 : i32
    return %c0_i32, %c0_i32_0, %c0_i32_1 : i32, i32, i32
  }
  func.func @transform_13(%arg0: i32) -> (i32, i32, i32) {
    %c0_i32 = arith.constant 0 : i32
    %c0_i32_0 = arith.constant 0 : i32
    %c0_i32_1 = arith.constant 0 : i32
    %c0_i32_2 = arith.constant 0 : i32
    return %c0_i32, %c0_i32_0, %c0_i32_1 : i32, i32, i32
  }
  func.func @transform_14(%arg0: i32) -> (i32, i32, i32) {
    %c0_i32 = arith.constant 0 : i32
    %c0_i32_0 = arith.constant 0 : i32
    %c0_i32_1 = arith.constant 0 : i32
    %c0_i32_2 = arith.constant 0 : i32
    return %c0_i32, %c0_i32_0, %c0_i32_1 : i32, i32, i32
  }
  func.func @transform_15(%arg0: i32) -> (i32, i32, i32) {
    %c0_i32 = arith.constant 0 : i32
    %c0_i32_0 = arith.constant 0 : i32
    %c0_i32_1 = arith.constant 0 : i32
    %c0_i32_2 = arith.constant 0 : i32
    return %c0_i32, %c0_i32_0, %c0_i32_1 : i32, i32, i32
  }
  func.func @transform_16(%arg0: i32) -> (i32, i32, i32) {
    %c0_i32 = arith.constant 0 : i32
    %c0_i32_0 = arith.constant 0 : i32
    %c0_i32_1 = arith.constant 0 : i32
    %c0_i32_2 = arith.constant 0 : i32
    return %c0_i32, %c0_i32_0, %c0_i32_1 : i32, i32, i32
  }
  func.func @transform_17(%arg0: i32) -> (i32, i32, i32) {
    %c0_i32 = arith.constant 0 : i32
    %c0_i32_0 = arith.constant 0 : i32
    %c0_i32_1 = arith.constant 0 : i32
    %c0_i32_2 = arith.constant 0 : i32
    return %c0_i32, %c0_i32_0, %c0_i32_1 : i32, i32, i32
  }
  func.func @transform_18(%arg0: i32) -> (i32, i32, i32) {
    %c0_i32 = arith.constant 0 : i32
    %c0_i32_0 = arith.constant 0 : i32
    %c0_i32_1 = arith.constant 0 : i32
    %c0_i32_2 = arith.constant 0 : i32
    return %c0_i32, %c0_i32_0, %c0_i32_1 : i32, i32, i32
  }
  func.func @transform_19(%arg0: i32) -> (i32, i32) {
    %c0_i32 = arith.constant 0 : i32
    %c0_i32_0 = arith.constant 0 : i32
    %c0_i32_1 = arith.constant 0 : i32
    return %c0_i32, %c0_i32_0 : i32, i32
  }
  func.func @transform_20(%arg0: i32) -> (i32, i32) {
    %c0_i32 = arith.constant 0 : i32
    %c0_i32_0 = arith.constant 0 : i32
    %c0_i32_1 = arith.constant 0 : i32
    return %c0_i32, %c0_i32_0 : i32, i32
  }
  func.func @transform_21(%arg0: i32) -> (i32, i32, i32) {
    %c0_i32 = arith.constant 0 : i32
    %c0_i32_0 = arith.constant 0 : i32
    %c0_i32_1 = arith.constant 0 : i32
    return %arg0, %c0_i32, %c0_i32_0 : i32, i32, i32
  }
}

</mosaic_0001>

<bundles_post_ra>
// kernel: cslr_forward.2
= control target key start
LH: loop header
LB: loop body
LE: loop exit
PB: predicated region body
PF: predicated region fallthrough
CT: control target
= control target key end

     0   :  { %s4509_s25 = smov 0   ;;  %s6469_s0 = inlined_call_operand.vmem [shape: f32[32,63], index: 0, kind: input, shape index: {}]   ;;  %s6470_s1 = inlined_call_operand.vmem [shape: f32[2048,27], index: 1, kind: input, shape index: {}]   ;;  %s6471_s2 = inlined_call_operand.vmem [shape: f32[2048,18], index: 2, kind: input, shape index: {}]   ;;  %s6472_s3 = inlined_call_operand.vmem [shape: bf16[63,16], index: 3, kind: input, shape index: {}]   ;;  %s6473_s4 = inlined_call_operand.vmem [shape: f32[1,16], index: 4, kind: input, shape index: {}]   ;;  %s6474_s5 = inlined_call_operand.vmem [shape: bf16[27,8], index: 5, kind: input, shape index: {}]   ;;  %s6475_s6 = inlined_call_operand.vmem [shape: f32[1,8], index: 6, kind: input, shape index: {}]   ;;  %s6476_s7 = inlined_call_operand.vmem [shape: bf16[8,32], index: 7, kind: input, shape index: {}]   ;;  %s6477_s8 = inlined_call_operand.vmem [shape: f32[1,32], index: 8, kind: input, shape index: {}]   ;;  %s6478_s9 = inlined_call_operand.vmem [shape: bf16[18,8], index: 9, kind: input, shape index: {}]   ;;  %s6479_s10 = inlined_call_operand.vmem [shape: f32[1,8], index: 10, kind: input, shape index: {}]   ;;  %s6480_s11 = inlined_call_operand.vmem [shape: bf16[8,32], index: 11, kind: input, shape index: {}]   ;;  %s6481_s12 = inlined_call_operand.vmem [shape: f32[1,32], index: 12, kind: input, shape index: {}]   ;;  %s6482_s13 = inlined_call_operand.vmem [shape: f32[32,80], index: 13, kind: output, shape index: {}]  }
   0x1 LB: > { %s3810_s26 = sadd.s32 4294967295, %s4432_s25   ;;  %p3814_p0 = scmp.ge.s32.totalorder %s4432_s25, 1  ;;  %s4432_s25 = sphi %s4509_s25, %s23_s25  }
   0x2   : > { %p410_p1 = scmp.lt.s32.totalorder %s4432_s25, 3 }
   0x4   : > { %p411_p2 = pnand %p3814_p0, %p410_p1 }
   0x6   : > { %414 = sbr.rel (%p411_p2) target bundleno = 895 (0x37f), region = 72 }
   0xb   : > { %v4412_v0 = vld [vmem:[%s6472_s3 + $0x18] sm:$0xff]   ;;  %v6483_v1 = vmov 0.0   ;;  %vm534_vm0 = vcmask 1046528   ;;  %vm535_vm1 = vcmask 1047552   ;;  %vm991_vm2 = vcmask 1044480   ;;  %v4415_v10 = vld [vmem:[%s6474_s5] sm:$0xff]  }
   0xc   : > { %4110 = vmatprep.subr.bf16.mxu0 %v6483_v1  ;;  %v4435_v2 = vmov 65535   ;;  %v4413_v4 = vld [vmem:[%s6474_s5 + $0x8] sm:$0x3f]   ;;  %vm992_vm3 = vcmask 1045504   ;;  %s3817_s16 = sshll.u32 %s3810_s26, 7  ;;  %v4414_v11 = vld [vmem:[%s6472_s3 + $0x10] sm:$0xff]  }
   0xd   : > { %v536_v3 = vsel %vm534_vm0, 4294967295, %v4435_v2  ;;  %v993_v6 = vsel %vm991_vm2, 4294967295, %v4435_v2  ;;  %p471_p3 = scmp.lt.s32.totalorder %s3817_s16, 255  ;;  %s3815_s19 = sshll.u32 %s3810_s26, 1  ;;  %vm4436_vm4 = vmmov 0   ;;  %v4416_v12 = vld [vmem:[%s6472_s3 + $0x8] sm:$0xff]  }
   0xe   : > { %v537_v5 = vsel %vm535_vm1, %v536_v3, 0  ;;  %v994_v8 = vsel %vm992_vm3, %v993_v6, 0  ;;  %4118 = vmatprep.mubr.msk.bf16.mxu0 %vm4436_vm4, %v6483_v1  ;;  %p465_p4 = scmp.lt.s32.totalorder %s3815_s19, 3  ;;  %vm798_vm5 = vcmask 220160   ;;  %v4417_v21 = vld [vmem:[%s6472_s3] sm:$0xff]   ;;  %vm2556_vm6 = vcmask 1040384  }
   0xf   : > { %v539_v7 = vand.u32 %v4412_v0, %v537_v5  ;;  %v996_v9 = vand.u32 %v4413_v4, %v994_v8  ;;  %s6535_s16 = smov (!%p471_p3, %s3817_s16), 255  ;;  %v4418_v23 = vld [vmem:[%s6478_s9 + $0x8] ss:$0 sps:$4 sm:$0x11]   ;;  %vm530_vm7 = vcmask 515072   ;;  %v4419_v35 = vld [vmem:[%s6478_s9] sm:$0xff]  }
  0x10   : > { %s3818_s20 = sshll.u32 %s6535_s16, 3  ;;  %s6537_s19 = smov (!%p465_p4, %s3815_s19), 3  ;;  %v2558_v34 = vsel %vm2556_vm6, %v4418_v23, 0  ;;  %vm2363_vm8 = vcmask 146432   ;;  %vm2105_vm9 = vcmask 1043456   ;;  %vm1671_vm10 = vcmask 64512  }
  0x11   : > { %4111 = vmatpush3.bf16.msra.mxu0 %v539_v7  ;;  %4122 = vmatprep.subr.bf16.mxu1 %v996_v9  ;;  %s4540_s26 = scalar_lea.vmem %s6470_s1, %s3818_s20  ;;  %s4545_s29 = scalar_lea.vmem %s6471_s2, %s3818_s20  ;;  %vm3705_vm11 = vcmask 130048   ;;  %vm2080_vm12 = vcmask 1041409   ;;  %vm2082_vm13 = vcmask 1042434   ;;  %vm2084_vm14 = vcmask 1043459  }
  0x12   : > { %4112 = vmatprep.subr.bf16.mxu0 %v6483_v1  ;;  %4123 = vmatpush3.bf16.msra.mxu1 %v996_v9  ;;  %v584_v13 = vld [vmem:[%s4540_s26] sm:$0xff]  ;;  %v585_v14 = vld [vmem:[%s4540_s26 + $0x8] sm:$0xff]  ;;  %v586_v15 = vld [vmem:[%s4540_s26 + $0x10] sm:$0xff]  ;;  %s3816_s15 = sshll.u32 %s6537_s19, 3  ;;  %vm2086_vm15 = vcmask 1044484   ;;  %vm2088_vm0 = vcmask 1045509  }
  0x13   : > { %4124 = vmatprep.subr.bf16.mxu1 %v4415_v10  ;;  %v712_v16 = vpack.c.bf16 %v585_v14, %v584_v13  ;;  %v587_v17 = vld [vmem:[%s4540_s26 + $0x18] sm:$0xff]  ;;  %v588_v18 = vld [vmem:[%s4540_s26 + $0x20] sm:$0xff]  ;;  %v589_v19 = vld [vmem:[%s4540_s26 + $0x28] sm:$0xff]  ;;  %s468_s18 = scalar_lea.vmem %s6469_s0, %s3816_s15  ;;  %s4994_s20 = scalar_lea.vmem %s6482_s13, %s3816_s15  ;;  %vm2090_vm1 = vcmask 1046534   ;;  %vm2092_vm2 = vcmask 1047559   ;;  %vm3716_vm3 = vcmask 392320  }
  0x14   : > { %v713_v20 = vpack.c.bf16 %v587_v17, %v586_v15  ;;  %v714_v22 = vpack.c.bf16 %v589_v19, %v588_v18  ;;  %v2152_v24 = vld [vmem:[%s4545_s29] sm:$0xff]  ;;  %v2153_v25 = vld [vmem:[%s4545_s29 + $0x8] sm:$0xff]  ;;  %v590_v29 = vld [vmem:[%s4540_s26 + $0x30] sm:$0xff]  ;;  %s4438_s23 = smov 48  }
  0x15   : > { %4113 = vmatpush3.bf16.msra.mxu0 %v4414_v11  ;;  %4126 = vmatprep.mubr.msk.bf16.mxu1 %vm798_vm5, %v712_v16  ;;  %v489_v26 = vld [vmem:[%s468_s18] sm:$0xff]  ;;  %v490_v27 = vld [vmem:[%s468_s18 + $0x8] sm:$0xff]  ;;  %v591_v30 = vld [vmem:[%s4540_s26 + $0x38] sm:$0xff]  ;;  %v2280_v31 = vpack.c.bf16 %v2153_v25, %v2152_v24 }
  0x16   : > { %4114 = vmatprep.subr.bf16.mxu0 %v6483_v1  ;;  %4125 = vmatpush3.bf16.msra.mxu1 %v4415_v10  ;;  %v491_v28 = vpack.c.bf16 %v490_v27, %v489_v26  ;;  %v592_v32 = vld [vmem:[%s4540_s26 + $0x40] sm:$0xff]  ;;  %v593_v33 = vld [vmem:[%s4540_s26 + $0x48] sm:$0xff]  ;;  %v715_v36 = vpack.c.bf16 %v591_v30, %v590_v29  ;;  %v2154_v38 = vld [vmem:[%s4545_s29 + $0x10] sm:$0xff] }
  0x17   : > { %4254 = vmatprep.subr.bf16.mxu1 %v6483_v1  ;;  %v716_v37 = vpack.c.bf16 %v593_v33, %v592_v32  ;;  %v2155_v39 = vld [vmem:[%s4545_s29 + $0x18] sm:$0xff]  ;;  %v2156_v40 = vld [vmem:[%s4545_s29 + $0x20] sm:$0xff]  ;;  %v2157_v41 = vld [vmem:[%s4545_s29 + $0x28] sm:$0xff] }
  0x18   : > { %v2281_v42 = vpack.c.bf16 %v2155_v39, %v2154_v38  ;;  %v594_v43 = vld [vmem:[%s4540_s26 + $0x50] sm:$0xff]  ;;  %v595_v44 = vld [vmem:[%s4540_s26 + $0x58] sm:$0xff]  ;;  %v2282_v45 = vpack.c.bf16 %v2157_v41, %v2156_v40  ;;  %v596_v46 = vld [vmem:[%s4540_s26 + $0x60] sm:$0xff] }
  0x19   : > { %4115 = vmatpush3.bf16.msra.mxu0 %v4416_v12  ;;  %4127 = vmatmul.mubr.msk.bf16.vlgmr.msra.gmra.mxu1 %vm798_vm5, %v713_v20  ;;  %v597_v47 = vld [vmem:[%s4540_s26 + $0x68] sm:$0xff]  ;;  %v717_v48 = vpack.c.bf16 %v595_v44, %v594_v43  ;;  %v2158_v50 = vld [vmem:[%s4545_s29 + $0x30] sm:$0xff]  ;;  %v2159_v51 = vld [vmem:[%s4545_s29 + $0x38] sm:$0xff] }
  0x1a   : > { %4116 = vmatprep.subr.bf16.mxu0 %v6483_v1  ;;  %4130 = vmatprep.mubr.msk.bf16.mxu1 %vm798_vm5, %v714_v22  ;;  %v718_v49 = vpack.c.bf16 %v597_v47, %v596_v46  ;;  %v2160_v52 = vld [vmem:[%s4545_s29 + $0x40] sm:$0xff]  ;;  %v2161_v53 = vld [vmem:[%s4545_s29 + $0x48] sm:$0xff]  ;;  %v2283_v54 = vpack.c.bf16 %v2159_v51, %v2158_v50  ;;  %v598_v55 = vld [vmem:[%s4540_s26 + $0x70] sm:$0xff] }
  0x1b   : > { %v599_v56 = vld [vmem:[%s4540_s26 + $0x78] sm:$0xff]  ;;  %v2284_v57 = vpack.c.bf16 %v2161_v53, %v2160_v52  ;;  %v600_v58 = vld [vmem:[%s4540_s26 + $0x80] sm:$0xff]  ;;  %v601_v59 = vld [vmem:[%s4540_s26 + $0x88] sm:$0xff] }
  0x1c   : > { %v719_v60 = vpack.c.bf16 %v599_v56, %v598_v55  ;;  %v720_v61 = vpack.c.bf16 %v601_v59, %v600_v58  ;;  %v2162_v62 = vld [vmem:[%s4545_s29 + $0x50] sm:$0xff]  ;;  %v2163_v63 = vld [vmem:[%s4545_s29 + $0x58] sm:$0xff]  ;;  %v2164_v0 = vld [vmem:[%s4545_s29 + $0x60] sm:$0xff] }
  0x1d   : > { %4117 = vmatpush3.bf16.msra.mxu0 %v4417_v21  ;;  %v2165_v2 = vld [vmem:[%s4545_s29 + $0x68] sm:$0xff]  ;;  %v2285_v3 = vpack.c.bf16 %v2163_v63, %v2162_v62  ;;  %v602_v4 = vld [vmem:[%s4540_s26 + $0x90] sm:$0xff]  ;;  %v603_v5 = vld [vmem:[%s4540_s26 + $0x98] sm:$0xff] }
  0x1e   : > { %4398 = vmatprep.subr.msk.bf16.mxu0 %vm2556_vm6, %v4418_v23  ;;  %v2286_v6 = vpack.c.bf16 %v2165_v2, %v2164_v0  ;;  %v604_v7 = vld [vmem:[%s4540_s26 + $0xa0] sm:$0xff]  ;;  %v605_v8 = vld [vmem:[%s4540_s26 + $0xa8] sm:$0xff]  ;;  %v721_v9 = vpack.c.bf16 %v603_v5, %v602_v4  ;;  %v2166_v11 = vld [vmem:[%s4545_s29 + $0x70] sm:$0xff] }
  0x1f   : > { %v722_v10 = vpack.c.bf16 %v605_v8, %v604_v7  ;;  %v2167_v12 = vld [vmem:[%s4545_s29 + $0x78] sm:$0xff]  ;;  %v2168_v13 = vld [vmem:[%s4545_s29 + $0x80] sm:$0xff]  ;;  %v2169_v14 = vld [vmem:[%s4545_s29 + $0x88] sm:$0xff] }
  0x20   : > { %4119 = vmatmul.mubr.msk.bf16.vlgmr.msra.gmra.mxu0 %vm530_vm7, %v491_v28  ;;  %v2287_v15 = vpack.c.bf16 %v2167_v12, %v2166_v11  ;;  %v606_v16 = vld [vmem:[%s4540_s26 + $0xb0] sm:$0xff]  ;;  %v607_v17 = vld [vmem:[%s4540_s26 + $0xb8] sm:$0xff]  ;;  %v2288_v18 = vpack.c.bf16 %v2169_v14, %v2168_v13  ;;  %v608_v19 = vld [vmem:[%s4540_s26 + $0xc0] sm:$0xff] }
  0x21   : > { %4261 = vmatpush3.bf16.msra.mxu0 %v2558_v34  ;;  %4264 = vmatprep.mubr.msk.bf16.mxu0 %vm2363_vm8, %v2280_v31  ;;  %v609_v20 = vld [vmem:[%s4540_s26 + $0xc8] sm:$0xff]  ;;  %v723_v21 = vpack.c.bf16 %v607_v17, %v606_v16  ;;  %v2170_v23 = vld [vmem:[%s4545_s29 + $0x90] sm:$0xff]  ;;  %v2171_v24 = vld [vmem:[%s4545_s29 + $0x98] sm:$0xff] }
  0x22   : > { %4262 = vmatprep.subr.bf16.mxu0 %v4419_v35  ;;  %4131 = vmatmul.mubr.msk.bf16.gmra.mxu1 %vm798_vm5, %v715_v36  ;;  %v724_v22 = vpack.c.bf16 %v609_v20, %v608_v19  ;;  %v2172_v25 = vld [vmem:[%s4545_s29 + $0xa0] sm:$0xff]  ;;  %v2173_v26 = vld [vmem:[%s4545_s29 + $0xa8] sm:$0xff]  ;;  %v2289_v27 = vpack.c.bf16 %v2171_v24, %v2170_v23  ;;  %v610_v28 = vld [vmem:[%s4540_s26 + $0xd0] sm:$0xff] }
  0x23   : > { %4134 = vmatprep.mubr.msk.bf16.mxu1 %vm798_vm5, %v716_v37  ;;  %v611_v29 = vld [vmem:[%s4540_s26 + $0xd8] sm:$0xff]  ;;  %v2290_v30 = vpack.c.bf16 %v2173_v26, %v2172_v25  ;;  %v612_v31 = vld [vmem:[%s4540_s26 + $0xe0] sm:$0xff]  ;;  %v613_v32 = vld [vmem:[%s4540_s26 + $0xe8] sm:$0xff] }
  0x24   : > { %v725_v33 = vpack.c.bf16 %v611_v29, %v610_v28  ;;  %v726_v34 = vpack.c.bf16 %v613_v32, %v612_v31  ;;  %v2175_v36 = vld [vmem:[%s4545_s29 + $0xb8] sm:$0xff]  ;;  %v2176_v37 = vld [vmem:[%s4545_s29 + $0xc0] sm:$0xff]  ;;  %v2177_v38 = vld [vmem:[%s4545_s29 + $0xc8] sm:$0xff] }
  0x25   : > { %4263 = vmatpush3.bf16.msra.mxu0 %v4419_v35  ;;  %v2174_v35 = vld [vmem:[%s4545_s29 + $0xb0] sm:$0xff]  ;;  %v615_v41 = vld [vmem:[%s4540_s26 + $0xf8] sm:$0xff]  ;;  %v616_v43 = vld [vmem:[%s4540_s26 + $0x100] sm:$0xff] }
  0x26   : > { %v2291_v39 = vpack.c.bf16 %v2175_v36, %v2174_v35  ;;  %v614_v40 = vld [vmem:[%s4540_s26 + $0xf0] sm:$0xff]  ;;  %v617_v44 = vld [vmem:[%s4540_s26 + $0x108] sm:$0xff]  ;;  %v619_v53 = vld [vmem:[%s4540_s26 + $0x118] sm:$0xff] }
  0x27   : > { %v728_v46 = vpack.c.bf16 %v617_v44, %v616_v43  ;;  %v2178_v47 = vld [vmem:[%s4545_s29 + $0xd0] sm:$0xff]  ;;  %v2181_v50 = vld [vmem:[%s4545_s29 + $0xe8] sm:$0xff]  ;;  %v620_v55 = vld [vmem:[%s4540_s26 + $0x120] sm:$0xff] }
  0x28   : > { %4265 = vmatmul.mubr.msk.bf16.vlgmr.msra.gmra.mxu0 %vm2363_vm8, %v2281_v42  ;;  %v2292_v42 = vpack.c.bf16 %v2177_v38, %v2176_v37  ;;  %v618_v52 = vld [vmem:[%s4540_s26 + $0x110] sm:$0xff]  ;;  %v621_v56 = vld [vmem:[%s4540_s26 + $0x128] sm:$0xff]  ;;  %v623_v2 = vld [vmem:[%s4540_s26 + $0x138] sm:$0xff] }
  0x29   : > { %4268 = vmatprep.mubr.msk.bf16.mxu0 %vm2363_vm8, %v2282_v45  ;;  %v727_v45 = vpack.c.bf16 %v615_v41, %v614_v40  ;;  %v730_v58 = vpack.c.bf16 %v621_v56, %v620_v55  ;;  %v2182_v59 = vld [vmem:[%s4545_s29 + $0xf0] sm:$0xff]  ;;  %v2185_v62 = vld [vmem:[%s4545_s29 + $0x108] sm:$0xff]  ;;  %v624_v4 = vld [vmem:[%s4540_s26 + $0x140] sm:$0xff] }
  0x2a   : > { %4135 = vmatmul.mubr.msk.bf16.gmra.mxu1 %vm798_vm5, %v717_v48  ;;  %v2179_v48 = vld [vmem:[%s4545_s29 + $0xd8] sm:$0xff]  ;;  %v622_v0 = vld [vmem:[%s4540_s26 + $0x130] sm:$0xff]  ;;  %v625_v5 = vld [vmem:[%s4540_s26 + $0x148] sm:$0xff] }
  0x2b   : > { %4138 = vmatprep.mubr.msk.bf16.mxu1 %vm798_vm5, %v718_v49  ;;  %v2180_v49 = vld [vmem:[%s4545_s29 + $0xe0] sm:$0xff]  ;;  %v2293_v51 = vpack.c.bf16 %v2179_v48, %v2178_v47  ;;  %v732_v7 = vpack.c.bf16 %v625_v5, %v624_v4  ;;  %v2186_v8 = vld [vmem:[%s4545_s29 + $0x110] sm:$0xff]  ;;  %v2189_v11 = vld [vmem:[%s4545_s29 + $0x128] sm:$0xff] }
  0x2c   : > { %v626_v13 = vld [vmem:[%s4540_s26 + $0x150] sm:$0xff]  ;;  %v627_v14 = vld [vmem:[%s4540_s26 + $0x158] sm:$0xff]  ;;  %v628_v16 = vld [vmem:[%s4540_s26 + $0x160] sm:$0xff] }
  0x2d   : > { %v629_v17 = vld [vmem:[%s4540_s26 + $0x168] sm:$0xff]  ;;  %v2190_v20 = vld [vmem:[%s4545_s29 + $0x130] sm:$0xff]  ;;  %v631_v26 = vld [vmem:[%s4540_s26 + $0x178] sm:$0xff] }
  0x2e   : > { %v734_v19 = vpack.c.bf16 %v629_v17, %v628_v16  ;;  %v2193_v23 = vld [vmem:[%s4545_s29 + $0x148] sm:$0xff]  ;;  %v630_v25 = vld [vmem:[%s4540_s26 + $0x170] sm:$0xff]  ;;  %v632_v28 = vld [vmem:[%s4540_s26 + $0x180] sm:$0xff] }
  0x2f   : > { %v633_v29 = vld [vmem:[%s4540_s26 + $0x188] sm:$0xff]  ;;  %v2194_v32 = vld [vmem:[%s4545_s29 + $0x150] sm:$0xff]  ;;  %v635_v38 = vld [vmem:[%s4540_s26 + $0x198] sm:$0xff] }
  0x30   : > { %4269 = vmatmul.mubr.msk.bf16.gmra.mxu0 %vm2363_vm8, %v2283_v54  ;;  %v2294_v54 = vpack.c.bf16 %v2181_v50, %v2180_v49  ;;  %v736_v31 = vpack.c.bf16 %v633_v29, %v632_v28  ;;  %v2197_v35 = vld [vmem:[%s4545_s29 + $0x168] sm:$0xff]  ;;  %v634_v37 = vld [vmem:[%s4540_s26 + $0x190] sm:$0xff]  ;;  %v636_v40 = vld [vmem:[%s4540_s26 + $0x1a0] sm:$0xff] }
  0x31   : > { %4272 = vmatprep.mubr.msk.bf16.mxu0 %vm2363_vm8, %v2284_v57  ;;  %v729_v57 = vpack.c.bf16 %v619_v53, %v618_v52  ;;  %v637_v41 = vld [vmem:[%s4540_s26 + $0x1a8] sm:$0xff]  ;;  %v2198_v44 = vld [vmem:[%s4545_s29 + $0x170] sm:$0xff]  ;;  %v639_v50 = vld [vmem:[%s4540_s26 + $0x1b8] sm:$0xff] }
  0x32   : > { %4139 = vmatmul.mubr.msk.bf16.gmra.mxu1 %vm798_vm5, %v719_v60  ;;  %v2183_v60 = vld [vmem:[%s4545_s29 + $0xf8] sm:$0xff]  ;;  %v738_v43 = vpack.c.bf16 %v637_v41, %v636_v40  ;;  %v2201_v47 = vld [vmem:[%s4545_s29 + $0x188] sm:$0xff]  ;;  %v638_v49 = vld [vmem:[%s4540_s26 + $0x1b0] sm:$0xff] }
  0x33   : > { %4142 = vmatprep.mubr.msk.bf16.mxu1 %vm798_vm5, %v720_v61  ;;  %v2184_v61 = vld [vmem:[%s4545_s29 + $0x100] sm:$0xff]  ;;  %v2295_v63 = vpack.c.bf16 %v2183_v60, %v2182_v59  ;;  %v641_v53 = vld [vmem:[%s4540_s26 + $0x1c8] sm:$0xff]  ;;  %v2202_v56 = vld [vmem:[%s4545_s29 + $0x190] sm:$0xff] }
  0x34   : > { %v640_v52 = vld [vmem:[%s4540_s26 + $0x1c0] sm:$0xff]  ;;  %v2205_v59 = vld [vmem:[%s4545_s29 + $0x1a8] sm:$0xff]  ;;  %v2206_v5 = vld [vmem:[%s4545_s29 + $0x1b0] sm:$0xff] }
  0x35   : > { %v740_v55 = vpack.c.bf16 %v641_v53, %v640_v52  ;;  %v2210_v17 = vld [vmem:[%s4545_s29 + $0x1d0] sm:$0xff]  ;;  %v2040_v28 = vld [vmem:[%s6476_s7] sm:$0xf]  ;;  %v657_v40 = vld [vmem:[%s4540_s26 + $0x248] sm:$0xff] }
  0x36   : > { %v661_v52 = vld [vmem:[%s4540_s26 + $0x268] sm:$0xff] }
  0x38   : > { %4273 = vmatmul.mubr.msk.bf16.gmra.mxu0 %vm2363_vm8, %v2285_v3  ;;  %v2296_v3 = vpack.c.bf16 %v2185_v62, %v2184_v61  ;;  %v642_v61 = vld [vmem:[%s4540_s26 + $0x1d0] sm:$0xff]  ;;  %v643_v62 = vld [vmem:[%s4540_s26 + $0x1d8] sm:$0xff] }
  0x39   : > { %4276 = vmatprep.mubr.msk.bf16.mxu0 %vm2363_vm8, %v2286_v6  ;;  %v731_v6 = vpack.c.bf16 %v623_v2, %v622_v0  ;;  %v644_v0 = vld [vmem:[%s4540_s26 + $0x1e0] sm:$0xff]  ;;  %v645_v2 = vld [vmem:[%s4540_s26 + $0x1e8] sm:$0xff] }
  0x3a   : > { %4143 = vmatmul.mubr.msk.bf16.gmra.mxu1 %vm798_vm5, %v721_v9  ;;  %v2187_v9 = vld [vmem:[%s4545_s29 + $0x118] sm:$0xff]  ;;  %v742_v4 = vpack.c.bf16 %v645_v2, %v644_v0  ;;  %v665_v0 = vld [vmem:[%s4540_s26 + $0x288] sm:$0xff] }
  0x3b   : > { %4146 = vmatprep.mubr.msk.bf16.mxu1 %vm798_vm5, %v722_v10  ;;  %v2188_v10 = vld [vmem:[%s4545_s29 + $0x120] sm:$0xff]  ;;  %v2297_v12 = vpack.c.bf16 %v2187_v9, %v2186_v8  ;;  %v2209_v8 = vld [vmem:[%s4545_s29 + $0x1c8] sm:$0xff] }
  0x40   : > { %4277 = vmatmul.mubr.msk.bf16.gmra.mxu0 %vm2363_vm8, %v2287_v15  ;;  %v2298_v15 = vpack.c.bf16 %v2189_v11, %v2188_v10  ;;  %v646_v10 = vld [vmem:[%s4540_s26 + $0x1f0] sm:$0xff]  ;;  %v647_v11 = vld [vmem:[%s4540_s26 + $0x1f8] sm:$0xff] }
  0x41   : > { %4280 = vmatprep.mubr.msk.bf16.mxu0 %vm2363_vm8, %v2288_v18  ;;  %v733_v18 = vpack.c.bf16 %v627_v14, %v626_v13  ;;  %v648_v13 = vld [vmem:[%s4540_s26 + $0x200] sm:$0xff]  ;;  %v649_v14 = vld [vmem:[%s4540_s26 + $0x208] sm:$0xff] }
  0x42   : > { %4147 = vmatmul.mubr.msk.bf16.gmra.mxu1 %vm798_vm5, %v723_v21  ;;  %v2191_v21 = vld [vmem:[%s4545_s29 + $0x138] sm:$0xff]  ;;  %v744_v16 = vpack.c.bf16 %v649_v14, %v648_v13  ;;  %v669_v13 = vld [vmem:[%s4540_s26 + $0x2a8] sm:$0xff] }
  0x43   : > { %4150 = vmatprep.mubr.msk.bf16.mxu1 %vm798_vm5, %v724_v22  ;;  %v2192_v22 = vld [vmem:[%s4545_s29 + $0x140] sm:$0xff]  ;;  %v2299_v24 = vpack.c.bf16 %v2191_v21, %v2190_v20  ;;  %v2213_v20 = vld [vmem:[%s4545_s29 + $0x1e8] sm:$0xff] }
  0x48   : > { %4281 = vmatmul.mubr.msk.bf16.gmra.mxu0 %vm2363_vm8, %v2289_v27  ;;  %v2300_v27 = vpack.c.bf16 %v2193_v23, %v2192_v22  ;;  %v650_v22 = vld [vmem:[%s4540_s26 + $0x210] sm:$0xff]  ;;  %v651_v23 = vld [vmem:[%s4540_s26 + $0x218] sm:$0xff] }
  0x49   : > { %4284 = vmatprep.mubr.msk.bf16.mxu0 %vm2363_vm8, %v2290_v30  ;;  %v735_v30 = vpack.c.bf16 %v631_v26, %v630_v25  ;;  %v652_v25 = vld [vmem:[%s4540_s26 + $0x220] sm:$0xff]  ;;  %v653_v26 = vld [vmem:[%s4540_s26 + $0x228] sm:$0xff] }
  0x4a   : > { %4151 = vmatmul.mubr.msk.bf16.gmra.mxu1 %vm798_vm5, %v725_v33  ;;  %v2195_v33 = vld [vmem:[%s4545_s29 + $0x158] sm:$0xff]  ;;  %v746_v29 = vpack.c.bf16 %v653_v26, %v652_v25  ;;  %v673_v25 = vld [vmem:[%s4540_s26 + $0x2c8] sm:$0xff] }
  0x4b   : > { %4154 = vmatprep.mubr.msk.bf16.mxu1 %vm798_vm5, %v726_v34  ;;  %v2196_v34 = vld [vmem:[%s4545_s29 + $0x160] sm:$0xff]  ;;  %v2301_v36 = vpack.c.bf16 %v2195_v33, %v2194_v32  ;;  %v2215_v32 = vld [vmem:[%s4545_s29 + $0x1f8] sm:$0xff] }
  0x4c   : > { %v2216_v33 = vld [vmem:[%s4545_s29 + $0x200] sm:$0xff] }
  0x50   : > { %4285 = vmatmul.mubr.msk.bf16.gmra.mxu0 %vm2363_vm8, %v2291_v39  ;;  %v2302_v39 = vpack.c.bf16 %v2197_v35, %v2196_v34  ;;  %v2217_v34 = vld [vmem:[%s4545_s29 + $0x208] sm:$0xff] }
  0x51   : > { %4288 = vmatprep.mubr.msk.bf16.mxu0 %vm2363_vm8, %v2292_v42  ;;  %v737_v42 = vpack.c.bf16 %v635_v38, %v634_v37  ;;  %v655_v37 = vld [vmem:[%s4540_s26 + $0x238] sm:$0xff]  ;;  %v2312_v38 = vpack.c.bf16 %v2217_v34, %v2216_v33  ;;  %v674_v33 = vld [vmem:[%s4540_s26 + $0x2d0] sm:$0xff] }
  0x52   : > { %4155 = vmatmul.mubr.msk.bf16.gmra.mxu1 %vm798_vm5, %v727_v45  ;;  %v2199_v45 = vld [vmem:[%s4545_s29 + $0x178] sm:$0xff] }
  0x53   : > { %4158 = vmatprep.mubr.msk.bf16.mxu1 %vm798_vm5, %v728_v46  ;;  %v2200_v46 = vld [vmem:[%s4545_s29 + $0x180] sm:$0xff]  ;;  %v2303_v48 = vpack.c.bf16 %v2199_v45, %v2198_v44  ;;  %v2219_v44 = vld [vmem:[%s4545_s29 + $0x218] sm:$0xff] }
  0x54   : > { %v2220_v45 = vld [vmem:[%s4545_s29 + $0x220] sm:$0xff]  ;;  %v675_v34 = vld [vmem:[%s4540_s26 + $0x2d8] sm:$0xff] }
  0x58   : > { %4289 = vmatmul.mubr.msk.bf16.gmra.mxu0 %vm2363_vm8, %v2293_v51  ;;  %v2304_v51 = vpack.c.bf16 %v2201_v47, %v2200_v46  ;;  %v2221_v46 = vld [vmem:[%s4545_s29 + $0x228] sm:$0xff] }
  0x59   : > { %4292 = vmatprep.mubr.msk.bf16.mxu0 %vm2363_vm8, %v2294_v54  ;;  %v739_v54 = vpack.c.bf16 %v639_v50, %v638_v49  ;;  %v659_v49 = vld [vmem:[%s4540_s26 + $0x258] sm:$0xff]  ;;  %v2314_v50 = vpack.c.bf16 %v2221_v46, %v2220_v45  ;;  %v678_v45 = vld [vmem:[%s4540_s26 + $0x2f0] sm:$0xff] }
  0x5a   : > { %4159 = vmatmul.mubr.msk.bf16.gmra.mxu1 %vm798_vm5, %v729_v57  ;;  %v2203_v57 = vld [vmem:[%s4545_s29 + $0x198] sm:$0xff] }
  0x5b   : > { %4162 = vmatprep.mubr.msk.bf16.mxu1 %vm798_vm5, %v730_v58  ;;  %v2204_v58 = vld [vmem:[%s4545_s29 + $0x1a0] sm:$0xff]  ;;  %v2305_v60 = vpack.c.bf16 %v2203_v57, %v2202_v56  ;;  %v2223_v56 = vld [vmem:[%s4545_s29 + $0x238] sm:$0xff] }
  0x5c   : > { %v2224_v57 = vld [vmem:[%s4545_s29 + $0x240] sm:$0xff]  ;;  %v679_v46 = vld [vmem:[%s4540_s26 + $0x2f8] sm:$0xff] }
  0x60   : > { %4293 = vmatmul.mubr.msk.bf16.gmra.mxu0 %vm2363_vm8, %v2295_v63  ;;  %v2306_v63 = vpack.c.bf16 %v2205_v59, %v2204_v58  ;;  %v2225_v58 = vld [vmem:[%s4545_s29 + $0x248] sm:$0xff] }
  0x61   : > { %4296 = vmatprep.mubr.msk.bf16.mxu0 %vm2363_vm8, %v2296_v3  ;;  %v741_v3 = vpack.c.bf16 %v643_v62, %v642_v61  ;;  %v663_v61 = vld [vmem:[%s4540_s26 + $0x278] sm:$0xff]  ;;  %v2316_v62 = vpack.c.bf16 %v2225_v58, %v2224_v57  ;;  %v682_v57 = vld [vmem:[%s4540_s26 + $0x310] sm:$0xff] }
  0x62   : > { %4163 = vmatmul.mubr.msk.bf16.gmra.mxu1 %vm798_vm5, %v731_v6  ;;  %v2207_v6 = vld [vmem:[%s4545_s29 + $0x1b8] sm:$0xff] }
  0x63   : > { %4166 = vmatprep.mubr.msk.bf16.mxu1 %vm798_vm5, %v732_v7  ;;  %v2208_v7 = vld [vmem:[%s4545_s29 + $0x1c0] sm:$0xff]  ;;  %v2307_v9 = vpack.c.bf16 %v2207_v6, %v2206_v5  ;;  %v2227_v5 = vld [vmem:[%s4545_s29 + $0x258] sm:$0xff] }
  0x64   : > { %v2228_v6 = vld [vmem:[%s4545_s29 + $0x260] sm:$0xff]  ;;  %v683_v58 = vld [vmem:[%s4540_s26 + $0x318] sm:$0xff] }
  0x68   : > { %4297 = vmatmul.mubr.msk.bf16.gmra.mxu0 %vm2363_vm8, %v2297_v12  ;;  %v2308_v12 = vpack.c.bf16 %v2209_v8, %v2208_v7  ;;  %v2229_v7 = vld [vmem:[%s4545_s29 + $0x268] sm:$0xff] }
  0x69   : > { %4300 = vmatprep.mubr.msk.bf16.mxu0 %vm2363_vm8, %v2298_v15  ;;  %v743_v15 = vpack.c.bf16 %v647_v11, %v646_v10  ;;  %v667_v10 = vld [vmem:[%s4540_s26 + $0x298] sm:$0xff]  ;;  %v2318_v11 = vpack.c.bf16 %v2229_v7, %v2228_v6  ;;  %v2249_v7 = vld [vmem:[%s4545_s29 + $0x308] sm:$0xff] }
  0x6a   : > { %4167 = vmatmul.mubr.msk.bf16.gmra.mxu1 %vm798_vm5, %v733_v18  ;;  %v2211_v18 = vld [vmem:[%s4545_s29 + $0x1d8] sm:$0xff] }
  0x6b   : > { %4170 = vmatprep.mubr.msk.bf16.mxu1 %vm798_vm5, %v734_v19  ;;  %v2212_v19 = vld [vmem:[%s4545_s29 + $0x1e0] sm:$0xff]  ;;  %v2309_v21 = vpack.c.bf16 %v2211_v18, %v2210_v17  ;;  %v2231_v17 = vld [vmem:[%s4545_s29 + $0x278] sm:$0xff] }
  0x6c   : > { %v2232_v18 = vld [vmem:[%s4545_s29 + $0x280] sm:$0xff]  ;;  %v4875_v6 = vld [vmem:[%s4540_s26 + $0x338] sm:$0xff] }
  0x70   : > { %4301 = vmatmul.mubr.msk.bf16.gmra.mxu0 %vm2363_vm8, %v2299_v24  ;;  %v2310_v24 = vpack.c.bf16 %v2213_v20, %v2212_v19  ;;  %v2233_v19 = vld [vmem:[%s4545_s29 + $0x288] sm:$0xff] }
  0x71   : > { %4304 = vmatprep.mubr.msk.bf16.mxu0 %vm2363_vm8, %v2300_v27  ;;  %v745_v27 = vpack.c.bf16 %v651_v23, %v650_v22  ;;  %v671_v22 = vld [vmem:[%s4540_s26 + $0x2b8] sm:$0xff]  ;;  %v2320_v23 = vpack.c.bf16 %v2233_v19, %v2232_v18  ;;  %v4910_v19 = vld [vmem:[%s4540_s26 + $0x360] sm:$0xff] }
  0x72   : > { %4171 = vmatmul.mubr.msk.bf16.gmra.mxu1 %vm798_vm5, %v735_v30  ;;  %v2107_v30 = vsel %vm2105_vm9, %v2040_v28, 0  ;;  %v2234_v28 = vld [vmem:[%s4545_s29 + $0x290] sm:$0xff] }
  0x73   : > { %4174 = vmatprep.mubr.msk.bf16.mxu1 %vm798_vm5, %v736_v31  ;;  %v2214_v31 = vld [vmem:[%s4545_s29 + $0x1f0] sm:$0xff]  ;;  %4255 = vmatpush3.bf16.msra.mxu1 %v2107_v30  ;;  %v2236_v30 = vld [vmem:[%s4545_s29 + $0x2a0] sm:$0xff] }
  0x74   : > { %4392 = vmatprep.subr.bf16.mxu1 %v6483_v1  ;;  %v2311_v35 = vpack.c.bf16 %v2215_v32, %v2214_v31  ;;  %v2237_v31 = vld [vmem:[%s4545_s29 + $0x2a8] sm:$0xff] }
  0x78   : > { %4305 = vmatmul.mubr.msk.bf16.gmra.mxu0 %vm2363_vm8, %v2301_v36  ;;  %v654_v36 = vld [vmem:[%s4540_s26 + $0x230] sm:$0xff] }
  0x79   : > { %4308 = vmatprep.mubr.msk.bf16.mxu0 %vm2363_vm8, %v2302_v39  ;;  %v656_v39 = vld [vmem:[%s4540_s26 + $0x240] sm:$0xff]  ;;  %v747_v41 = vpack.c.bf16 %v655_v37, %v654_v36  ;;  %v677_v37 = vld [vmem:[%s4540_s26 + $0x2e8] sm:$0xff] }
  0x7a   : > { %4175 = vmatmul.mubr.msk.bf16.gmra.mxu1 %vm798_vm5, %v737_v42  ;;  %v748_v42 = vpack.c.bf16 %v657_v40, %v656_v39  ;;  %v676_v36 = vld [vmem:[%s4540_s26 + $0x2e0] sm:$0xff]  ;;  %v2238_v40 = vld [vmem:[%s4545_s29 + $0x2b0] sm:$0xff] }
  0x7b   : > { %4178 = vmatprep.mubr.msk.bf16.mxu1 %vm798_vm5, %v738_v43  ;;  %v2218_v43 = vld [vmem:[%s4545_s29 + $0x210] sm:$0xff]  ;;  %v758_v39 = vpack.c.bf16 %v677_v37, %v676_v36  ;;  %v4951_v37 = vld [vmem:[%s4545_s29 + $0x358] sm:$0xff] }
  0x7c   : > { %v2313_v47 = vpack.c.bf16 %v2219_v44, %v2218_v43  ;;  %v2241_v43 = vld [vmem:[%s4545_s29 + $0x2c8] sm:$0xff]  ;;  %v4948_v36 = vld [vmem:[%s4545_s29 + $0x350] sm:$0xff] }
  0x80   : > { %4309 = vmatmul.mubr.msk.bf16.gmra.mxu0 %vm2363_vm8, %v2303_v48  ;;  %v658_v48 = vld [vmem:[%s4540_s26 + $0x250] sm:$0xff] }
  0x81   : > { %4312 = vmatprep.mubr.msk.bf16.mxu0 %vm2363_vm8, %v2304_v51  ;;  %v660_v51 = vld [vmem:[%s4540_s26 + $0x260] sm:$0xff]  ;;  %v749_v53 = vpack.c.bf16 %v659_v49, %v658_v48  ;;  %v681_v49 = vld [vmem:[%s4540_s26 + $0x308] sm:$0xff] }
  0x82   : > { %4179 = vmatmul.mubr.msk.bf16.gmra.mxu1 %vm798_vm5, %v739_v54  ;;  %v750_v54 = vpack.c.bf16 %v661_v52, %v660_v51  ;;  %v680_v48 = vld [vmem:[%s4540_s26 + $0x300] sm:$0xff]  ;;  %v2242_v52 = vld [vmem:[%s4545_s29 + $0x2d0] sm:$0xff] }
  0x83   : > { %4182 = vmatprep.mubr.msk.bf16.mxu1 %vm798_vm5, %v740_v55  ;;  %v2222_v55 = vld [vmem:[%s4545_s29 + $0x230] sm:$0xff]  ;;  %v760_v51 = vpack.c.bf16 %v681_v49, %v680_v48 }
  0x84   : > { %v2315_v59 = vpack.c.bf16 %v2223_v56, %v2222_v55  ;;  %v2245_v55 = vld [vmem:[%s4545_s29 + $0x2e8] sm:$0xff] }
  0x88   : > { %4313 = vmatmul.mubr.msk.bf16.gmra.mxu0 %vm2363_vm8, %v2305_v60  ;;  %v662_v60 = vld [vmem:[%s4540_s26 + $0x270] sm:$0xff] }
  0x89   : > { %4316 = vmatprep.mubr.msk.bf16.mxu0 %vm2363_vm8, %v2306_v63  ;;  %v664_v63 = vld [vmem:[%s4540_s26 + $0x280] sm:$0xff]  ;;  %v751_v2 = vpack.c.bf16 %v663_v61, %v662_v60  ;;  %v685_v61 = vld [vmem:[%s4540_s26 + $0x328] sm:$0xff] }
  0x8a   : > { %4183 = vmatmul.mubr.msk.bf16.gmra.mxu1 %vm798_vm5, %v741_v3  ;;  %v752_v3 = vpack.c.bf16 %v665_v0, %v664_v63  ;;  %v684_v60 = vld [vmem:[%s4540_s26 + $0x320] sm:$0xff] }
  0x8b   : > { %4186 = vmatprep.mubr.msk.bf16.mxu1 %vm798_vm5, %v742_v4  ;;  %v2226_v4 = vld [vmem:[%s4545_s29 + $0x250] sm:$0xff]  ;;  %v762_v63 = vpack.c.bf16 %v685_v61, %v684_v60  ;;  %v4865_v0 = vld [vmem:[%s6475_s6] ss:$0 sm:$0xff]  ;;  %v5004_v60 = vld [vmem:[%s4545_s29 + $0x378] sm:$0xff] }
  0x8c   : > { %v2317_v8 = vpack.c.bf16 %v2227_v5, %v2226_v4  ;;  %v2248_v4 = vld [vmem:[%s4545_s29 + $0x300] sm:$0xff]  ;;  %v4872_v5 = vld [vmem:[%s4540_s26 + $0x330] sm:$0xff] }
  0x8d   : > { %v5007_v61 = vld [vmem:[%s4540_s26 + $0x3b0] sm:$0xff] }
  0x90   : > { %4317 = vmatmul.mubr.msk.bf16.gmra.mxu0 %vm2363_vm8, %v2307_v9  ;;  %v666_v9 = vld [vmem:[%s4540_s26 + $0x290] sm:$0xff] }
  0x91   : > { %4320 = vmatprep.mubr.msk.bf16.mxu0 %vm2363_vm8, %v2308_v12  ;;  %v668_v12 = vld [vmem:[%s4540_s26 + $0x2a0] sm:$0xff]  ;;  %v753_v14 = vpack.c.bf16 %v667_v10, %v666_v9  ;;  %v4882_v9 = vld [vmem:[%s4540_s26 + $0x348] sm:$0xff] }
  0x92   : > { %4187 = vmatmul.mubr.msk.bf16.gmra.mxu1 %vm798_vm5, %v743_v15  ;;  %v754_v15 = vpack.c.bf16 %v669_v13, %v668_v12  ;;  %v4889_v12 = vld [vmem:[%s4545_s29 + $0x318] sm:$0xff]  ;;  %v4892_v13 = vld [vmem:[%s4540_s26 + $0x350] sm:$0xff] }
  0x93   : > { %4190 = vmatprep.mubr.msk.bf16.mxu1 %vm798_vm5, %v744_v16  ;;  %v2230_v16 = vld [vmem:[%s4545_s29 + $0x270] sm:$0xff] }
  0x94   : > { %v2319_v20 = vpack.c.bf16 %v2231_v17, %v2230_v16  ;;  %v4901_v16 = vld [vmem:[%s4545_s29 + $0x328] sm:$0xff]  ;;  %v4906_v17 = vld [vmem:[%s6473_s4] ss:$0 sm:$0xff] }
  0x98   : > { %4321 = vmatmul.mubr.msk.bf16.gmra.mxu0 %vm2363_vm8, %v2309_v21  ;;  %v670_v21 = vld [vmem:[%s4540_s26 + $0x2b0] sm:$0xff] }
  0x99   : > { %4324 = vmatprep.mubr.msk.bf16.mxu0 %vm2363_vm8, %v2310_v24  ;;  %v672_v24 = vld [vmem:[%s4540_s26 + $0x2c0] sm:$0xff]  ;;  %v755_v26 = vpack.c.bf16 %v671_v22, %v670_v21  ;;  %v4916_v21 = vld [vmem:[%s4545_s29 + $0x330] sm:$0xff]  ;;  %v4919_v22 = vld [vmem:[%s4545_s29 + $0x338] sm:$0xff] }
  0x9a   : > { %4191 = vmatmul.mubr.msk.bf16.gmra.mxu1 %vm798_vm5, %v745_v27  ;;  %v756_v27 = vpack.c.bf16 %v673_v25, %v672_v24  ;;  %v2328_v24 = vpack.c.bf16 %v2249_v7, %v2248_v4  ;;  %v4922_v25 = vld [vmem:[%s4540_s26 + $0x370] sm:$0xff]  ;;  %v5023_v7 = vld [vmem:[%s4545_s29 + $0x388] sm:$0xff] }
  0x9b   : > { %4194 = vmatprep.mubr.msk.bf16.mxu1 %vm798_vm5, %v746_v29  ;;  %v2235_v29 = vld [vmem:[%s4545_s29 + $0x298] sm:$0xff] }
  0x9c   : > { %v2321_v32 = vpack.c.bf16 %v2235_v29, %v2234_v28 }
  0xa0   : > { %4325 = vmatmul.mubr.msk.bf16.gmra.mxu0 %vm2363_vm8, %v2311_v35  ;;  %v2322_v35 = vpack.c.bf16 %v2237_v31, %v2236_v30  ;;  %v4935_v30 = vld [vmem:[%s4545_s29 + $0x348] sm:$0xff]  ;;  %v4938_v31 = vld [vmem:[%s4540_s26 + $0x380] sm:$0xff] }
  0xa1   : > { %4328 = vmatprep.mubr.msk.bf16.mxu0 %vm2363_vm8, %v2312_v38  ;;  %v757_v38 = vpack.c.bf16 %v675_v34, %v674_v33  ;;  %v763_v34 = vpack.c.bf16 %v4875_v6, %v4872_v5  ;;  %v5020_v6 = vld [vmem:[%s4545_s29 + $0x380] sm:$0xff] }
  0xa2   : > { %4195 = vmatmul.mubr.msk.bf16.gmra.mxu1 %vm798_vm5, %v747_v41  ;;  %v2239_v41 = vld [vmem:[%s4545_s29 + $0x2b8] sm:$0xff] }
  0xa3   : > { %4198 = vmatprep.mubr.msk.bf16.mxu1 %vm798_vm5, %v748_v42  ;;  %v2240_v42 = vld [vmem:[%s4545_s29 + $0x2c0] sm:$0xff]  ;;  %v2323_v44 = vpack.c.bf16 %v2239_v41, %v2238_v40 }
  0xa8   : > { %4329 = vmatmul.mubr.msk.bf16.gmra.mxu0 %vm2363_vm8, %v2313_v47  ;;  %v2324_v47 = vpack.c.bf16 %v2241_v43, %v2240_v42 }
  0xa9   : > { %4332 = vmatprep.mubr.msk.bf16.mxu0 %vm2363_vm8, %v2314_v50  ;;  %v759_v50 = vpack.c.bf16 %v679_v46, %v678_v45  ;;  %v4967_v45 = vld [vmem:[%s4545_s29 + $0x360] sm:$0xff]  ;;  %v4970_v46 = vld [vmem:[%s4545_s29 + $0x368] sm:$0xff] }
  0xaa   : > { %4199 = vmatmul.mubr.msk.bf16.gmra.mxu1 %vm798_vm5, %v749_v53  ;;  %v2243_v53 = vld [vmem:[%s4545_s29 + $0x2d8] sm:$0xff] }
  0xab   : > { %4202 = vmatprep.mubr.msk.bf16.mxu1 %vm798_vm5, %v750_v54  ;;  %v2244_v54 = vld [vmem:[%s4545_s29 + $0x2e0] sm:$0xff]  ;;  %v2325_v56 = vpack.c.bf16 %v2243_v53, %v2242_v52  ;;  %v4984_v53 = vld [vmem:[%s4540_s26 + $0x3a8] sm:$0xff] }
  0xac   : > { %v4981_v52 = vld [vmem:[%s4540_s26 + $0x3a0] sm:$0xff] }
  0xb0   : > { %4333 = vmatmul.mubr.msk.bf16.gmra.mxu0 %vm2363_vm8, %v2315_v59  ;;  %v2326_v59 = vpack.c.bf16 %v2245_v55, %v2244_v54  ;;  %v4987_v54 = vld [vmem:[%s4545_s29 + $0x370] sm:$0xff] }
  0xb1   : > { %4336 = vmatprep.mubr.msk.bf16.mxu0 %vm2363_vm8, %v2316_v62  ;;  %v761_v62 = vpack.c.bf16 %v683_v58, %v682_v57 }
  0xb2   : > { %4203 = vmatmul.mubr.msk.bf16.gmra.mxu1 %vm798_vm5, %v751_v2  ;;  %v2246_v2 = vld [vmem:[%s4545_s29 + $0x2f0] sm:$0xff] }
  0xb3   : > { %4206 = vmatprep.mubr.msk.bf16.mxu1 %vm798_vm5, %v752_v3  ;;  %v2247_v3 = vld [vmem:[%s4545_s29 + $0x2f8] sm:$0xff] }
  0xb4   : > { %v2327_v18 = vpack.c.bf16 %v2247_v3, %v2246_v2  ;;  %v5100_v3 = vld [vmem:[%s4540_s26 + $0x3f0] sm:$0xff] }
  0xb5   : > { %6489 = vst [vmem:[#allocation2_spill] sm:$0xff] %v5100_v3 }
  0xb8   : > { %4337 = vmatmul.mubr.msk.bf16.gmra.mxu0 %vm2363_vm8, %v2317_v8  ;;  %v4879_v8 = vld [vmem:[%s4540_s26 + $0x340] sm:$0xff] }
  0xb9   : > { %4340 = vmatprep.mubr.msk.bf16.mxu0 %vm2363_vm8, %v2318_v11  ;;  %v4886_v11 = vld [vmem:[%s4545_s29 + $0x310] sm:$0xff] }
  0xba   : > { %4207 = vmatmul.mubr.msk.bf16.gmra.mxu1 %vm798_vm5, %v753_v14  ;;  %v4895_v14 = vld [vmem:[%s4540_s26 + $0x358] sm:$0xff]  ;;  %v2329_v41 = vpack.c.bf16 %v4889_v12, %v4886_v11 }
  0xbb   : > { %4210 = vmatprep.mubr.msk.bf16.mxu1 %vm798_vm5, %v754_v15  ;;  %v4898_v15 = vld [vmem:[%s4545_s29 + $0x320] sm:$0xff]  ;;  %v765_v42 = vpack.c.bf16 %v4895_v14, %v4892_v13  ;;  %v5146_v14 = vld [vmem:[%s4545_s29 + $0x3d8] sm:$0xff] }
  0xbc   : > { %v2330_v43 = vpack.c.bf16 %v4901_v16, %v4898_v15 }
  0xc0   : > { %4341 = vmatmul.mubr.msk.bf16.gmra.mxu0 %vm2363_vm8, %v2319_v20  ;;  %v4913_v20 = vld [vmem:[%s4540_s26 + $0x368] sm:$0xff] }
  0xc1   : > { %4344 = vmatprep.mubr.msk.bf16.mxu0 %vm2363_vm8, %v2320_v23  ;;  %v766_v49 = vpack.c.bf16 %v4913_v20, %v4910_v19  ;;  %v5160_v19 = vld [vmem:[%s4545_s29 + $0x3f8] sm:$0xff] }
  0xc2   : > { %4211 = vmatmul.mubr.msk.bf16.gmra.mxu1 %vm798_vm5, %v755_v26  ;;  %v4925_v26 = vld [vmem:[%s4540_s26 + $0x378] sm:$0xff] }
  0xc3   : > { %4214 = vmatprep.mubr.msk.bf16.mxu1 %vm798_vm5, %v756_v27  ;;  %v4928_v27 = vld [vmem:[%s4545_s29 + $0x340] sm:$0xff] }
  0xc8   : > { %4345 = vmatmul.mubr.msk.bf16.gmra.mxu0 %vm2363_vm8, %v2321_v32  ;;  %v4941_v32 = vld [vmem:[%s4540_s26 + $0x388] sm:$0xff] }
  0xc9   : > { %4348 = vmatprep.mubr.msk.bf16.mxu0 %vm2363_vm8, %v2322_v35  ;;  %v764_v35 = vpack.c.bf16 %v4882_v9, %v4879_v8 }
  0xca   : > { %4215 = vmatmul.mubr.msk.bf16.gmra.mxu1 %vm798_vm5, %v757_v38  ;;  %v4954_v38 = vld [vmem:[%s4540_s26 + $0x390] sm:$0xff] }
  0xcb   : > { %4218 = vmatprep.mubr.msk.bf16.mxu1 %vm798_vm5, %v758_v39 }
  0xd0   : > { %4349 = vmatmul.mubr.msk.bf16.gmra.mxu0 %vm2363_vm8, %v2323_v44  ;;  %v4964_v44 = vld [vmem:[%s4540_s26 + $0x398] sm:$0xff] }
  0xd1   : > { %4352 = vmatprep.mubr.msk.bf16.mxu0 %vm2363_vm8, %v2324_v47 }
  0xd2   : > { %4219 = vmatmul.mubr.msk.bf16.gmra.mxu1 %vm798_vm5, %v759_v50 }
  0xd3   : > { %4222 = vmatprep.mubr.msk.bf16.mxu1 %vm798_vm5, %v760_v51 }
  0xd8   : > { %4353 = vmatmul.mubr.msk.bf16.gmra.mxu0 %vm2363_vm8, %v2325_v56 }
  0xd9   : > { %4356 = vmatprep.mubr.msk.bf16.mxu0 %vm2363_vm8, %v2326_v59  ;;  %v4128_v10 = vpop.f32.mrf.mxu1  ;;  %v5157_v59 = vld [vmem:[%s4545_s29 + $0x3f0] sm:$0xff] }
  0xda   : > { %4223 = vmatmul.mubr.msk.bf16.gmra.mxu1 %vm798_vm5, %v761_v62  ;;  %v4931_v28 = vadd.f32 %v4128_v10, %v4865_v0  ;;  %v5010_v62 = vld [vmem:[%s4540_s26 + $0x3b8] sm:$0xff] }
  0xdb   : > { %4226 = vmatprep.mubr.msk.bf16.mxu1 %vm798_vm5, %v762_v63  ;;  %v1032_v23 = vpop.f32.mrf.mxu1 }
  0xdc   : > { %v1033_v29 = vadd.f32 %v4865_v0, %v1032_v23  ;;  %v1545_v55 = vmax.f32 %v4931_v28, 0.0  ;;  %v5037_v28 = vld [vmem:[%s4540_s26 + $0x3c0] sm:$0xff] }
  0xdd   : > { %v4129_v33 = vpop.f32.mrf.mxu1 }
  0xde   : > { %v1543_v39 = vmax.f32 %v1033_v29, 0.0  ;;  %v4998_v56 = vadd.f32 %v4129_v33, %v4865_v0  ;;  %v5040_v29 = vld [vmem:[%s4540_s26 + $0x3c8] sm:$0xff]  ;;  %v5043_v33 = vld [vmem:[%s4545_s29 + $0x390] sm:$0xff] }
  0xdf   : > { %v1035_v47 = vpop.f32.mrf.mxu1 }
  0xe0   : > { %v575_v40 = vpop.f32.mrf.mxu0  ;;  %4357 = vmatmul.mubr.msk.bf16.gmra.mxu0 %vm2363_vm8, %v2327_v18  ;;  %v1036_v57 = vadd.f32 %v4865_v0, %v1035_v47  ;;  %v1672_v8 = vsel %vm1671_vm10, %v1543_v39, 0.0  ;;  %v5030_v18 = vld [vmem:[%s6479_s10] ss:$0 sm:$0xff]  ;;  %v5072_v47 = vld [vmem:[%s4545_s29 + $0x3a8] sm:$0xff] }
  0xe1   : > { %v576_v48 = vadd.f32 %v4906_v17, %v575_v40  ;;  %4360 = vmatprep.mubr.msk.bf16.mxu0 %vm2363_vm8, %v2328_v24  ;;  %v5069_v40 = vld [vmem:[%s4545_s29 + $0x3a0] sm:$0xff] }
  0xe2   : > { %v4120_v58 = vpop.f32.mrf.mxu0  ;;  %v4132_v2 = vpop.f32.mrf.mxu1  ;;  %4227 = vmatmul.mubr.msk.bf16.gmra.mxu1 %vm798_vm5, %v763_v34  ;;  %v1544_v9 = vmax.f32 %v1036_v57, 0.0  ;;  %v5059_v57 = vld [vmem:[%s4540_s26 + $0x3d0] sm:$0xff] }
  0xe3   : > { %v582_v63 = vmax.f32 %v576_v48, 0.0  ;;  %4230 = vmatprep.mubr.msk.bf16.mxu1 %vm798_vm5, %v764_v35  ;;  %v5048_v34 = vadd.f32 %v4132_v2, %v4865_v0  ;;  %v5056_v48 = vld [vmem:[%s4545_s29 + $0x398] sm:$0xff]  ;;  %v1546_v2 = vmax.f32 %v4998_v56, 0.0  ;;  %v5116_v56 = vld [vmem:[%s4545_s29 + $0x3c0] sm:$0xff] }
  0xe4   : > { %v578_v10 = vpop.f32.mrf.mxu0  ;;  %v1048_v35 = vpop.f32.mrf.mxu1  ;;  %v5062_v58 = vld [vmem:[%s4540_s26 + $0x3d8] sm:$0xff]  ;;  %6491 = vst [vmem:[#allocation4_spill] sm:$0xff] %v5116_v56 }
  0xe5   : > { %3706 = vst.msk [vmem:[%s4994_s20] sm:$0xff] %vm3705_vm11, %v582_v63  ;;  %v579_v39 = vadd.f32 %v4906_v17, %v578_v10  ;;  %v1675_v63 = vsel %vm1671_vm10, %v1545_v55, 0.0  ;;  %v1673_v17 = vsel %vm1671_vm10, %v1544_v9, 0.0  ;;  %v1049_v10 = vadd.f32 %v4865_v0, %v1048_v35  ;;  %v5079_v9 = vld [vmem:[%s4540_s26 + $0x3e0] sm:$0xff]  ;;  %v5085_v35 = vld [vmem:[%s4545_s29 + $0x3b0] sm:$0xff]  ;;  %v5097_v55 = vld [vmem:[%s4545_s29 + $0x3b8] sm:$0xff] }
  0xe6   : > { %v4121_v1 = vpop.f32.mrf.mxu0  ;;  %v1674_v24 = vadd.f32 %v1673_v17, %v1672_v8  ;;  %v4133_v23 = vpop.f32.mrf.mxu1  ;;  %v1549_v51 = vmax.f32 %v5048_v34, 0.0  ;;  %v5119_v17 = vld [vmem:[%s4545_s29 + $0x3c8] sm:$0xff] }
  0xe7   : > { %v583_v5 = vmax.f32 %v579_v39, 0.0  ;;  %v5082_v1 = vld [vmem:[%s4540_s26 + $0x3e8] sm:$0xff]  ;;  %v1547_v4 = vmax.f32 %v1049_v10, 0.0  ;;  %v1060_v8 = vadd.f32 %v4133_v23, %v4865_v0  ;;  %v5103_v10 = vld [vmem:[%s4540_s26 + $0x3f8] sm:$0xff] }
  0xe8   : > { %v4266_v39 = vpop.f32.mrf.mxu0  ;;  %4361 = vmatmul.mubr.msk.bf16.gmra.mxu0 %vm2363_vm8, %v2329_v41  ;;  %6490 = vst [vmem:[#allocation3_spill] sm:$0xff] %v5103_v10  ;;  %v1676_v23 = vadd.f32 %v1675_v63, %v1674_v24  ;;  %v1051_v11 = vpop.f32.mrf.mxu1  ;;  %v1677_v24 = vsel %vm1671_vm10, %v1546_v2, 0.0 }
  0xe9   : > { %3707 = vst.msk [vmem:[%s4994_s20 + $0x8] sm:$0xff] %vm3705_vm11, %v583_v5  ;;  %v2603_v12 = vadd.f32 %v4266_v39, %v5030_v18  ;;  %4364 = vmatprep.mubr.msk.bf16.mxu0 %vm2363_vm8, %v2330_v43  ;;  %v1679_v5 = vsel %vm1671_vm10, %v1547_v4, 0.0  ;;  %v1052_v34 = vadd.f32 %v4865_v0, %v1051_v11  ;;  %v5136_v11 = vld [vmem:[%s4545_s29 + $0x3d0] sm:$0xff]  ;;  %v1550_v15 = vmax.f32 %v1060_v8, 0.0 }
  0xea   : > { %v2594_v63 = vpop.f32.mrf.mxu0  ;;  %v1678_v16 = vadd.f32 %v1677_v24, %v1676_v23  ;;  %v4136_v43 = vpop.f32.mrf.mxu1  ;;  %4231 = vmatmul.mubr.msk.bf16.gmra.mxu1 %vm798_vm5, %v765_v42  ;;  %v5149_v42 = vld [vmem:[%s4545_s29 + $0x3e0] sm:$0xff]  ;;  %v1683_v8 = vsel %vm1671_vm10, %v1549_v51, 0.0 }
  0xeb   : > { %v2595_v2 = vadd.f32 %v5030_v18, %v2594_v63  ;;  %v1548_v23 = vmax.f32 %v1052_v34, 0.0  ;;  %v1073_v24 = vadd.f32 %v4136_v43, %v4865_v0  ;;  %4234 = vmatprep.mubr.msk.bf16.mxu1 %vm798_vm5, %v766_v49  ;;  %v5152_v63 = vld [vmem:[%s4545_s29 + $0x3e8] sm:$0xff]  ;;  %v3107_v39 = vmax.f32 %v2603_v12, 0.0  ;;  %s4437_s29 = smov 16  }
  0xec   : > { %v4267_v41 = vpop.f32.mrf.mxu0  ;;  %v1680_v34 = vadd.f32 %v1679_v5, %v1678_v16  ;;  %v1064_v43 = vpop.f32.mrf.mxu1  ;;  %v1685_v5 = vsel %vm1671_vm10, %v1550_v15, 0.0 }
  0xed   : > { %v2606_v4 = vadd.f32 %v4267_v41, %v5030_v18  ;;  %v1681_v20 = vsel %vm1671_vm10, %v1548_v23, 0.0  ;;  %v1553_v49 = vmax.f32 %v1073_v24, 0.0  ;;  %v3105_v13 = vmax.f32 %v2595_v2, 0.0 }
  0xee   : > { %v1065_v50 = vadd.f32 %v4865_v0, %v1064_v43  ;;  %v2597_v3 = vpop.f32.mrf.mxu0  ;;  %v1682_v10 = vadd.f32 %v1681_v20, %v1680_v34  ;;  %v4137_v56 = vpop.f32.mrf.mxu1  ;;  %v6492_v2 = vpack.c.bf16 %v4919_v22, %v4916_v21  ;;  %v3236_v43 = vsel %vm1671_vm10, %v3107_v39, 0.0 }
  0xef   : > { %v2598_v51 = vadd.f32 %v5030_v18, %v2597_v3  ;;  %v1076_v23 = vadd.f32 %v4137_v56, %v4865_v0  ;;  %v3108_v20 = vmax.f32 %v2606_v4, 0.0  ;;  %v1696_v56 = vsel %vm1671_vm10, %v1553_v49, 0.0 }
  0xf0   : > { %v1551_v16 = vmax.f32 %v1065_v50, 0.0  ;;  %v4270_v24 = vpop.f32.mrf.mxu0  ;;  %4365 = vmatmul.mubr.msk.bf16.gmra.mxu0 %vm2363_vm8, %v6492_v2  ;;  %v1684_v34 = vadd.f32 %v1683_v8, %v1682_v10  ;;  %v1067_v41 = vpop.f32.mrf.mxu1  ;;  %v6493_v50 = vpack.c.bf16 %v4935_v30, %v4928_v27  ;;  %v3233_v21 = vsel %vm1671_vm10, %v3105_v13, 0.0 }
  0xf1   : > { %v3106_v12 = vmax.f32 %v2598_v51, 0.0  ;;  %v1068_v22 = vadd.f32 %v4865_v0, %v1067_v41  ;;  %v2619_v15 = vadd.f32 %v4270_v24, %v5030_v18  ;;  %v1554_v8 = vmax.f32 %v1076_v23, 0.0 }
  0xf2   : > { %4368 = vmatprep.mubr.msk.bf16.mxu0 %vm2363_vm8, %v6493_v50  ;;  %v2610_v2 = vpop.f32.mrf.mxu0  ;;  %v1686_v10 = vadd.f32 %v1685_v5, %v1684_v34  ;;  %v4140_v39 = vpop.f32.mrf.mxu1  ;;  %v6494_v51 = vpack.c.bf16 %v4925_v26, %v4922_v25  ;;  %v1693_v30 = vsel %vm1671_vm10, %v1551_v16, 0.0  ;;  %v6495_v5 = vpack.c.bf16 %v4941_v32, %v4938_v31 }
  0xf3   : > { %v3234_v4 = vsel %vm1671_vm10, %v3106_v12, 0.0  ;;  %v2611_v27 = vadd.f32 %v5030_v18, %v2610_v2  ;;  %v1552_v49 = vmax.f32 %v1068_v22, 0.0  ;;  %v1089_v41 = vadd.f32 %v4140_v39, %v4865_v0 }
  0xf4   : > { %4235 = vmatmul.mubr.msk.bf16.gmra.mxu1 %vm798_vm5, %v6494_v51  ;;  %v3235_v13 = vadd.f32 %v3234_v4, %v3233_v21  ;;  %v4271_v24 = vpop.f32.mrf.mxu0  ;;  %v1687_v12 = vrot.slane %v1686_v10, 4  ;;  %v3238_v23 = vsel %vm1671_vm10, %v3108_v20, 0.0  ;;  %v1080_v26 = vpop.f32.mrf.mxu1  ;;  %v3111_v21 = vmax.f32 %v2619_v15, 0.0 }
  0xf5   : > { %4238 = vmatprep.mubr.msk.bf16.mxu1 %vm798_vm5, %v6495_v5  ;;  %v3109_v25 = vmax.f32 %v2611_v27, 0.0  ;;  %v2622_v34 = vadd.f32 %v4271_v24, %v5030_v18  ;;  %v1694_v16 = vsel %vm1671_vm10, %v1552_v49, 0.0  ;;  %v1081_v22 = vadd.f32 %v4865_v0, %v1080_v26 }
  0xf6   : > { %v3237_v50 = vadd.f32 %v3236_v43, %v3235_v13  ;;  %v2613_v2 = vpop.f32.mrf.mxu0  ;;  %v1688_v4 = vadd.f32 %v1687_v12, %v1686_v10  ;;  %v1698_v39 = vsel %vm1671_vm10, %v1554_v8, 0.0  ;;  %v1695_v31 = vadd.f32 %v1694_v16, %v1693_v30  ;;  %v4141_v51 = vpop.f32.mrf.mxu1 }
  0xf7   : > { %v1557_v32 = vmax.f32 %v1089_v41, 0.0  ;;  %v3240_v20 = vsel %vm1671_vm10, %v3109_v25, 0.0  ;;  %v1555_v27 = vmax.f32 %v1081_v22, 0.0  ;;  %v1092_v3 = vadd.f32 %v4141_v51, %v4865_v0 }
  0xf8   : > { %v3239_v5 = vadd.f32 %v3238_v23, %v3237_v50  ;;  %v4274_v24 = vpop.f32.mrf.mxu0  ;;  %v6496_v43 = vpack.c.bf16 %v4951_v37, %v4948_v36  ;;  %v1689_v15 = vrot.slane %v1688_v4, 2  ;;  %v1697_v13 = vadd.f32 %v1696_v56, %v1695_v31  ;;  %v1083_v30 = vpop.f32.mrf.mxu1 }
  0xf9   : > { %v3112_v10 = vmax.f32 %v2622_v34, 0.0  ;;  %v2614_v8 = vadd.f32 %v5030_v18, %v2613_v2  ;;  %v6497_v49 = vpack.c.bf16 %v4970_v46, %v4967_v45  ;;  %v1700_v12 = vsel %vm1671_vm10, %v1555_v27, 0.0 }
  0xfa   : > { %4369 = vmatmul.mubr.msk.bf16.gmra.mxu0 %vm2363_vm8, %v6496_v43  ;;  %v3241_v41 = vadd.f32 %v3240_v20, %v3239_v5  ;;  %v1558_v23 = vmax.f32 %v1092_v3, 0.0  ;;  %v1084_v25 = vadd.f32 %v4865_v0, %v1083_v30  ;;  %v2626_v36 = vpop.f32.mrf.mxu0  ;;  %v1690_v37 = vadd.f32 %v1689_v15, %v1688_v4  ;;  %v4144_v34 = vpop.f32.mrf.mxu1 }
  0xfb   : > { %4372 = vmatprep.mubr.msk.bf16.mxu0 %vm2363_vm8, %v6497_v49  ;;  %v1699_v26 = vadd.f32 %v1698_v39, %v1697_v13  ;;  %v3110_v50 = vmax.f32 %v2614_v8, 0.0  ;;  %v2635_v56 = vadd.f32 %v4274_v24, %v5030_v18  ;;  %v6498_v16 = vpack.c.bf16 %v4964_v44, %v4954_v38 }
  0xfc   : > { %v3244_v45 = vsel %vm1671_vm10, %v3111_v21, 0.0  ;;  %v1556_v46 = vmax.f32 %v1084_v25, 0.0  ;;  %v1105_v22 = vadd.f32 %v4144_v34, %v4865_v0  ;;  %v2627_v3 = vadd.f32 %v5030_v18, %v2626_v36  ;;  %v4275_v2 = vpop.f32.mrf.mxu0  ;;  %v1096_v44 = vpop.f32.mrf.mxu1 }
  0xfd   : > { %4239 = vmatmul.mubr.msk.bf16.gmra.mxu1 %vm798_vm5, %v6498_v16  ;;  %v6499_v4 = vpack.c.bf16 %v4984_v53, %v4981_v52  ;;  %v1691_v39 = vrot.slane %v1690_v37, 1  ;;  %v1704_v31 = vsel %vm1671_vm10, %v1557_v32, 0.0  ;;  %v1701_v51 = vadd.f32 %v1700_v12, %v1699_v26 }
  0xfe   : > { %v3242_v38 = vsel %vm1671_vm10, %v3110_v50, 0.0  ;;  %v3246_v21 = vsel %vm1671_vm10, %v3112_v10, 0.0  ;;  %v1706_v5 = vsel %vm1671_vm10, %v1558_v23, 0.0  ;;  %v1702_v27 = vsel %vm1671_vm10, %v1556_v46, 0.0  ;;  %v2629_v24 = vpop.f32.mrf.mxu0  ;;  %v4145_v13 = vpop.f32.mrf.mxu1 }
  0xff   : > { %4242 = vmatprep.mubr.msk.bf16.mxu1 %vm798_vm5, %v6499_v4  ;;  %v3243_v20 = vadd.f32 %v3242_v38, %v3241_v41  ;;  %v1692_v43 = vadd.f32 %v1691_v39, %v1690_v37  ;;  %v1703_v15 = vadd.f32 %v1702_v27, %v1701_v51  ;;  %v3115_v52 = vmax.f32 %v2635_v56, 0.0 }
 0x100   : > { %v1097_v53 = vadd.f32 %v4865_v0, %v1096_v44  ;;  %v1561_v32 = vmax.f32 %v1105_v22, 0.0  ;;  %v3113_v30 = vmax.f32 %v2627_v3, 0.0  ;;  %v2638_v49 = vadd.f32 %v4275_v2, %v5030_v18  ;;  %v4278_v12 = vpop.f32.mrf.mxu0  ;;  %v1099_v37 = vpop.f32.mrf.mxu1 }
 0x101   : > { %v3245_v8 = vadd.f32 %v3244_v45, %v3243_v20  ;;  %v6500_v10 = vpack.c.bf16 %v5004_v60, %v4987_v54  ;;  %v2008_v41 = vmul.f32 0.015625, %v1692_v43  ;;  %v1705_v23 = vadd.f32 %v1704_v31, %v1703_v15 }
 0x102   : > { %v1559_v25 = vmax.f32 %v1097_v53, 0.0  ;;  %v1108_v36 = vadd.f32 %v4145_v13, %v4865_v0  ;;  %v6501_v26 = vpack.c.bf16 %v5023_v7, %v5020_v6  ;;  %v3116_v56 = vmax.f32 %v2638_v49, 0.0  ;;  %v2642_v54 = vpop.f32.mrf.mxu0  ;;  %v4148_v3 = vpop.f32.mrf.mxu1 }
 0x103   : > { %4373 = vmatmul.mubr.msk.bf16.gmra.mxu0 %vm2363_vm8, %v6500_v10  ;;  %v3247_v50 = vadd.f32 %v3246_v21, %v3245_v8  ;;  %v2630_v34 = vadd.f32 %v5030_v18, %v2629_v24  ;;  %v1100_v16 = vadd.f32 %v4865_v0, %v1099_v37  ;;  %v2024_v60 = vpack.c.bf16 %v2008_v41, %v2008_v41 }
 0x104   : > { %4376 = vmatprep.mubr.msk.bf16.mxu0 %vm2363_vm8, %v6501_v26  ;;  %v1707_v45 = vadd.f32 %v1706_v5, %v1705_v23  ;;  %v3257_v46 = vsel %vm1671_vm10, %v3115_v52, 0.0  ;;  %v1714_v22 = vsel %vm1671_vm10, %v1559_v25, 0.0  ;;  %v6502_v2 = vpack.c.bf16 %v5010_v62, %v5007_v61  ;;  %v4279_v31 = vpop.f32.mrf.mxu0  ;;  %v1112_v61 = vpop.f32.mrf.mxu1 }
 0x105   : > { %v3248_v6 = vrot.slane %v3247_v50, 4  ;;  %v1562_v7 = vmax.f32 %v1108_v36, 0.0  ;;  %v3114_v4 = vmax.f32 %v2630_v34, 0.0  ;;  %v1560_v39 = vmax.f32 %v1100_v16, 0.0 }
 0x106   : > { %4243 = vmatmul.mubr.msk.bf16.gmra.mxu1 %vm798_vm5, %v6502_v2  ;;  %v6503_v51 = vpack.c.bf16 %v5040_v29, %v5037_v28  ;;  %v1708_v38 = vrot.slane %v1707_v45, 4  ;;  %v1717_v44 = vsel %vm1671_vm10, %v1561_v32, 0.0  ;;  %v3254_v21 = vsel %vm1671_vm10, %v3113_v30, 0.0  ;;  %v2645_v43 = vpop.f32.mrf.mxu0  ;;  %v4149_v53 = vpop.f32.mrf.mxu1 }
 0x107   : > { %v3259_v5 = vsel %vm1671_vm10, %v3116_v56, 0.0  ;;  %v3249_v62 = vadd.f32 %v3248_v6, %v3247_v50  ;;  %v3255_v20 = vsel %vm1671_vm10, %v3114_v4, 0.0  ;;  %v1715_v27 = vsel %vm1671_vm10, %v1560_v39, 0.0 }
 0x108   : > { %4246 = vmatprep.mubr.msk.bf16.mxu1 %vm798_vm5, %v6503_v51  ;;  %v2651_v24 = vadd.f32 %v4278_v12, %v5030_v18  ;;  %v5262_v15 = vunpack.c.l.b16 %v2024_v60  ;;  %v1709_v28 = vadd.f32 %v1708_v38, %v1707_v45  ;;  %v3256_v29 = vadd.f32 %v3255_v20, %v3254_v21  ;;  %v4282_v49 = vpop.f32.mrf.mxu0  ;;  %v1115_v36 = vpop.f32.mrf.mxu1 }
 0x109   : > { %v1716_v52 = vadd.f32 %v1715_v27, %v1714_v22  ;;  %v3250_v13 = vrot.slane %v3249_v62, 2  ;;  %v1719_v8 = vsel %vm1671_vm10, %v1562_v7, 0.0  ;;  %v2643_v32 = vadd.f32 %v5030_v18, %v2642_v54 }
 0x10a   : > { %v1113_v30 = vadd.f32 %v4865_v0, %v1112_v61  ;;  %v6504_v10 = vpack.c.bf16 %v5056_v48, %v5043_v33  ;;  %v1710_v12 = vrot.slane %v1709_v28, 2  ;;  %v3258_v41 = vadd.f32 %v3257_v46, %v3256_v29  ;;  %v2658_v16 = vpop.f32.mrf.mxu0  ;;  %v4152_v45 = vpop.f32.mrf.mxu1 }
 0x10b   : > { %v1718_v23 = vadd.f32 %v1717_v44, %v1716_v52  ;;  %v1121_v25 = vadd.f32 %v4148_v3, %v4865_v0  ;;  %v6505_v37 = vpack.c.bf16 %v5072_v47, %v5069_v40  ;;  %v3251_v26 = vadd.f32 %v3250_v13, %v3249_v62 }
 0x10c   : > { %4377 = vmatmul.mubr.msk.bf16.gmra.mxu0 %vm2363_vm8, %v6504_v10  ;;  %v3119_v50 = vmax.f32 %v2651_v24, 0.0  ;;  %v3117_v56 = vmax.f32 %v2643_v32, 0.0  ;;  %v1563_v34 = vmax.f32 %v1113_v30, 0.0  ;;  %v1711_v54 = vadd.f32 %v1710_v12, %v1709_v28  ;;  %v4283_v2 = vpop.f32.mrf.mxu0  ;;  %v6509_v30 = vld [vmem:[#allocation4_spill] sm:$0xff] }
 0x10d   : > { %4380 = vmatprep.mubr.msk.bf16.mxu0 %vm2363_vm8, %v6505_v37  ;;  %v3260_v33 = vadd.f32 %v3259_v5, %v3258_v41  ;;  %v1720_v48 = vadd.f32 %v1719_v8, %v1718_v23  ;;  %v2654_v60 = vadd.f32 %v4279_v31, %v5030_v18  ;;  %v6506_v46 = vpack.c.bf16 %v5062_v58, %v5059_v57  ;;  %v1128_v58 = vpop.f32.mrf.mxu1 }
 0x10e   : > { %v3252_v22 = vrot.slane %v3251_v26, 1  ;;  %v3261_v40 = vsel %vm1671_vm10, %v3117_v56, 0.0  ;;  %v1721_v47 = vsel %vm1671_vm10, %v1563_v34, 0.0  ;;  %v1124_v3 = vadd.f32 %v4149_v53, %v4865_v0  ;;  %v2661_v21 = vpop.f32.mrf.mxu0  ;;  %v6512_v56 = vld [vmem:[#allocation2_spill] sm:$0xff] }
 0x10f   : > { %4247 = vmatmul.mubr.msk.bf16.gmra.mxu1 %vm798_vm5, %v6506_v46  ;;  %v6507_v6 = vpack.c.bf16 %v5082_v1, %v5079_v9  ;;  %v1712_v7 = vrot.slane %v1711_v54, 1  ;;  %v1565_v4 = vmax.f32 %v1121_v25, 0.0  ;;  %v3262_v39 = vadd.f32 %v3261_v40, %v3260_v33  ;;  %v4153_v1 = vpop.f32.mrf.mxu1 }
 0x110   : > { %v1722_v57 = vadd.f32 %v1721_v47, %v1720_v48  ;;  %v3253_v31 = vadd.f32 %v3252_v22, %v3251_v26  ;;  %v3265_v51 = vsel %vm1671_vm10, %v3119_v50, 0.0  ;;  %v2646_v38 = vadd.f32 %v5030_v18, %v2645_v43  ;;  %v4286_v29 = vpop.f32.mrf.mxu0  ;;  %v6511_v50 = vld [vmem:[#allocation3_spill] sm:$0xff] }
 0x111   : > { %4250 = vmatprep.mubr.msk.bf16.mxu1 %vm798_vm5, %v6507_v6  ;;  %v1116_v44 = vadd.f32 %v4865_v0, %v1115_v36  ;;  %v1713_v5 = vadd.f32 %v1712_v7, %v1711_v54  ;;  %v3120_v61 = vmax.f32 %v2654_v60, 0.0  ;;  %v1566_v62 = vmax.f32 %v1124_v3, 0.0  ;;  %v1131_v32 = vpop.f32.mrf.mxu1 }
 0x112   : > { %v2667_v9 = vadd.f32 %v4282_v49, %v5030_v18  ;;  %v3569_v20 = vmul.f32 0.015625, %v3253_v31  ;;  %v3118_v27 = vmax.f32 %v2646_v38, 0.0  ;;  %v1137_v28 = vadd.f32 %v4152_v45, %v4865_v0 }
 0x113   : > { %v1564_v24 = vmax.f32 %v1116_v44, 0.0  ;;  %v6508_v52 = vpack.c.bf16 %v5097_v55, %v5085_v35  ;;  %v2009_v43 = vmul.f32 0.015625, %v1713_v5  ;;  %v1725_v53 = vsel %vm1671_vm10, %v1565_v4, 0.0  ;;  %v2674_v35 = vpop.f32.mrf.mxu0  ;;  %v4156_v26 = vpop.f32.mrf.mxu1 }
 0x114   : > { %v3123_v13 = vmax.f32 %v2667_v9, 0.0  ;;  %v2659_v8 = vadd.f32 %v5030_v18, %v2658_v16  ;;  %v6510_v49 = vpack.c.bf16 %v5119_v17, %v6509_v30  ;;  %v3585_v10 = vpack.c.bf16 %v3569_v20, %v3569_v20 }
 0x115   : > { %4381 = vmatmul.mubr.msk.bf16.gmra.mxu0 %vm2363_vm8, %v6508_v52  ;;  %v3263_v12 = vsel %vm1671_vm10, %v3118_v27, 0.0  ;;  %v1723_v41 = vsel %vm1671_vm10, %v1564_v24, 0.0  ;;  %v1129_v55 = vadd.f32 %v4865_v0, %v1128_v58  ;;  %v2025_v23 = vpack.c.bf16 %v2009_v43, %v2009_v43  ;;  %v4287_v48 = vpop.f32.mrf.mxu0  ;;  %v1144_v47 = vpop.f32.mrf.mxu1 }
 0x116   : > { %4384 = vmatprep.mubr.msk.bf16.mxu0 %vm2363_vm8, %v6510_v49  ;;  %v3267_v25 = vsel %vm1671_vm10, %v3120_v61, 0.0  ;;  %v3264_v36 = vadd.f32 %v3263_v12, %v3262_v39  ;;  %v1724_v37 = vadd.f32 %v1723_v41, %v1722_v57  ;;  %v6513_v34 = vpack.c.bf16 %v6511_v50, %v6512_v56 }
 0x117   : > { %v1727_v17 = vsel %vm1671_vm10, %v1566_v62, 0.0  ;;  %v1569_v16 = vmax.f32 %v1137_v28, 0.0  ;;  %v3121_v54 = vmax.f32 %v2659_v8, 0.0  ;;  %v1567_v33 = vmax.f32 %v1129_v55, 0.0  ;;  %v2677_v39 = vpop.f32.mrf.mxu0  ;;  %v4157_v38 = vpop.f32.mrf.mxu1 }
 0x118   : > { %4251 = vmatmul.mubr.msk.bf16.gmra.mxu1 %vm798_vm5, %v6513_v34  ;;  %v6514_v60 = vmov 0.0   ;;  %v2065_v45 = vunpack.c.l.b16 %v2025_v23  ;;  %v3266_v46 = vadd.f32 %v3265_v51, %v3264_v36  ;;  %v1726_v22 = vadd.f32 %v1725_v53, %v1724_v37 }
 0x119   : > { %4256 = vmatprep.mubr.msk.bf16.mxu1 %vm4436_vm4, %v6514_v60  ;;  %v2670_v40 = vadd.f32 %v4283_v2, %v5030_v18  ;;  %v5315_v3 = vunpack.c.l.b16 %v3585_v10  ;;  %v3278_v6 = vsel %vm1671_vm10, %v3123_v13, 0.0  ;;  %v1140_v7 = vadd.f32 %v4153_v1, %v4865_v0  ;;  %v4290_v62 = vpop.f32.mrf.mxu0  ;;  %v1147_v27 = vpop.f32.mrf.mxu1 }
 0x11a   : > { %v2662_v4 = vadd.f32 %v5030_v18, %v2661_v21  ;;  %v5322_v57 = vsel %vm2080_vm12, %v2065_v45, %v5262_v15  ;;  %v3268_v58 = vadd.f32 %v3267_v25, %v3266_v46  ;;  %v1728_v31 = vadd.f32 %v1727_v17, %v1726_v22 }
 0x11b   : > { %v3124_v51 = vmax.f32 %v2670_v40, 0.0  ;;  %v1738_v2 = vsel %vm1671_vm10, %v1569_v16, 0.0  ;;  %v1570_v44 = vmax.f32 %v1140_v7, 0.0  ;;  %v1132_v61 = vadd.f32 %v4865_v0, %v1131_v32  ;;  %v4160_v30 = vpop.f32.mrf.mxu1 }
 0x11c   : > { %v3122_v5 = vmax.f32 %v2662_v4, 0.0  ;;  %v6515_v9 = vpack.c.bf16 %v5146_v14, %v5136_v11  ;;  %v3269_v21 = vrot.slane %v3268_v58, 4  ;;  %v1729_v1 = vrot.slane %v1728_v31, 4  ;;  %v2690_v14 = vpop.f32.mrf.mxu0 }
 0x11d   : > { %v3275_v15 = vsel %vm1671_vm10, %v3121_v54, 0.0  ;;  %v1735_v20 = vsel %vm1671_vm10, %v1567_v33, 0.0  ;;  %v6516_v24 = vpack.c.bf16 %v5152_v63, %v5149_v42  ;;  %v1568_v52 = vmax.f32 %v1132_v61, 0.0  ;;  %v1160_v25 = vpop.f32.mrf.mxu1 }
 0x11e   : > { %4385 = vmatmul.mubr.msk.bf16.gmra.mxu0 %vm2363_vm8, %v6515_v9  ;;  %v3276_v28 = vsel %vm1671_vm10, %v3122_v5, 0.0  ;;  %v2683_v43 = vadd.f32 %v4286_v29, %v5030_v18  ;;  %v1153_v11 = vadd.f32 %v4156_v26, %v4865_v0  ;;  %v3270_v53 = vadd.f32 %v3269_v21, %v3268_v58  ;;  %v5344_v12 = vpop.f32.mrf.mxu0 }
 0x11f   : > { %4388 = vmatprep.mubr.msk.bf16.mxu0 %vm2363_vm8, %v6516_v24  ;;  %v1730_v13 = vadd.f32 %v1729_v1, %v1728_v31  ;;  %v3280_v8 = vsel %vm1671_vm10, %v3124_v51, 0.0  ;;  %v3277_v32 = vadd.f32 %v3276_v28, %v3275_v15  ;;  %v1740_v49 = vsel %vm1671_vm10, %v1570_v44, 0.0 }
 0x120   : > { %v1736_v42 = vsel %vm1671_vm10, %v1568_v52, 0.0  ;;  %v2675_v63 = vadd.f32 %v5030_v18, %v2674_v35  ;;  %v1145_v10 = vadd.f32 %v4865_v0, %v1144_v47  ;;  %v3271_v29 = vrot.slane %v3270_v53, 2  ;;  %v5346_v56 = vpop.f32.mrf.mxu0  ;;  %v4161_v35 = vpop.f32.mrf.mxu1 }
 0x121   : > { %v1731_v41 = vrot.slane %v1730_v13, 2  ;;  %v3279_v55 = vadd.f32 %v3278_v6, %v3277_v32  ;;  %v1737_v23 = vadd.f32 %v1736_v42, %v1735_v20  ;;  %v3127_v36 = vmax.f32 %v2683_v43, 0.0 }
 0x122   : > { %v1573_v37 = vmax.f32 %v1153_v11, 0.0  ;;  %v3125_v26 = vmax.f32 %v2675_v63, 0.0  ;;  %v1571_v50 = vmax.f32 %v1145_v10, 0.0  ;;  %v3272_v34 = vadd.f32 %v3271_v29, %v3270_v53  ;;  %v5352_v40 = vpop.f32.mrf.mxu0  ;;  %v1163_v31 = vpop.f32.mrf.mxu1 }
 0x123   : > { %v1732_v17 = vadd.f32 %v1731_v41, %v1730_v13  ;;  %v1739_v16 = vadd.f32 %v1738_v2, %v1737_v23  ;;  %v3281_v54 = vadd.f32 %v3280_v8, %v3279_v55  ;;  %v2686_v46 = vadd.f32 %v4287_v48, %v5030_v18 }
 0x124   : > { %v3282_v33 = vsel %vm1671_vm10, %v3125_v26, 0.0  ;;  %v1742_v45 = vsel %vm1671_vm10, %v1571_v50, 0.0  ;;  %v1156_v22 = vadd.f32 %v4157_v38, %v4865_v0  ;;  %v6517_v47 = vpack.c.bf16 %v5160_v19, %v5157_v59  ;;  %v5362_v44 = vpop.f32.mrf.mxu0  ;;  %v4164_v9 = vpop.f32.mrf.mxu1 }
 0x125   : > { %v3273_v6 = vrot.slane %v3272_v34, 1  ;;  %v1733_v7 = vrot.slane %v1732_v17, 1  ;;  %v3283_v4 = vadd.f32 %v3282_v33, %v3281_v54  ;;  %v1741_v58 = vadd.f32 %v1740_v49, %v1739_v16 }
 0x126   : > { %4389 = vmatmul.mubr.msk.bf16.gmra.mxu0 %vm2363_vm8, %v6517_v47  ;;  %v3286_v51 = vsel %vm1671_vm10, %v3127_v36, 0.0  ;;  %v1746_v2 = vsel %vm1671_vm10, %v1573_v37, 0.0  ;;  %v2678_v48 = vadd.f32 %v5030_v18, %v2677_v39  ;;  %v1148_v38 = vadd.f32 %v4865_v0, %v1147_v27  ;;  %v5366_v24 = vpop.f32.mrf.mxu0  ;;  %v1176_v43 = vpop.f32.mrf.mxu1 }
 0x127   : > { %v3274_v5 = vadd.f32 %v3273_v6, %v3272_v34  ;;  %v1734_v61 = vadd.f32 %v1733_v7, %v1732_v17  ;;  %v1743_v59 = vadd.f32 %v1742_v45, %v1741_v58  ;;  %v2699_v19 = vadd.f32 %v4290_v62, %v5030_v18 }
 0x128   : > { %v3128_v21 = vmax.f32 %v2686_v46, 0.0  ;;  %v3126_v1 = vmax.f32 %v2678_v48, 0.0  ;;  %v1572_v15 = vmax.f32 %v1148_v38, 0.0  ;;  %v1169_v20 = vadd.f32 %v4160_v30, %v4865_v0  ;;  %v5372_v8 = vpop.f32.mrf.mxu0  ;;  %v5374_v63 = vpop.f32.mrf.mxu1 }
 0x129   : > { %v3570_v28 = vmul.f32 0.015625, %v3274_v5  ;;  %v2010_v52 = vmul.f32 0.015625, %v1734_v61  ;;  %v1574_v39 = vmax.f32 %v1156_v22, 0.0  ;;  %v2691_v27 = vadd.f32 %v5030_v18, %v2690_v14 }
 0x12a   : > { %v3284_v11 = vsel %vm1671_vm10, %v3126_v1, 0.0  ;;  %v1744_v53 = vsel %vm1671_vm10, %v1572_v15, 0.0  ;;  %v3131_v13 = vmax.f32 %v2699_v19, 0.0  ;;  %v1161_v62 = vadd.f32 %v4865_v0, %v1160_v25  ;;  %v5377_v55 = vpop.f32.mrf.mxu0  ;;  %v5379_v25 = vpop.f32.mrf.mxu1 }
 0x12b   : > { %v3586_v32 = vpack.c.bf16 %v3570_v28, %v3570_v28  ;;  %v2026_v49 = vpack.c.bf16 %v2010_v52, %v2010_v52  ;;  %v3285_v30 = vadd.f32 %v3284_v11, %v3283_v4  ;;  %v1745_v42 = vadd.f32 %v1744_v53, %v1743_v59 }
 0x12c   : > { %v3288_v10 = vsel %vm1671_vm10, %v3128_v21, 0.0  ;;  %v1577_v29 = vmax.f32 %v1169_v20, 0.0  ;;  %v3129_v14 = vmax.f32 %v2691_v27, 0.0  ;;  %v1575_v41 = vmax.f32 %v1161_v62, 0.0  ;;  %v5386_v54 = vpop.f32.mrf.mxu0  ;;  %v5396_v47 = vpop.f32.mrf.mxu1 }
 0x12d   : > { %v3626_v23 = vunpack.c.l.b16 %v3586_v32  ;;  %v2066_v36 = vunpack.c.l.b16 %v2026_v49  ;;  %v3287_v37 = vadd.f32 %v3286_v51, %v3285_v30  ;;  %v1747_v26 = vadd.f32 %v1746_v2, %v1745_v42 }
 0x12e   : > { %v1748_v50 = vsel %vm1671_vm10, %v1574_v39, 0.0  ;;  %v3299_v34 = vsel %vm1671_vm10, %v3131_v13, 0.0  ;;  %v2702_v17 = vadd.f32 %v5344_v12, %v5030_v18  ;;  %v1172_v16 = vadd.f32 %v4161_v35, %v4865_v0  ;;  %v5402_v4 = vpop.f32.mrf.mxu0  ;;  %v5406_v2 = vpop.f32.mrf.mxu1 }
 0x12f   : > { %v5390_v33 = vsel %vm2080_vm12, %v3626_v23, %v5315_v3  ;;  %v5394_v45 = vsel %vm2082_vm13, %v2066_v36, %v5322_v57  ;;  %v3289_v46 = vadd.f32 %v3288_v10, %v3287_v37  ;;  %v1749_v22 = vadd.f32 %v1748_v50, %v1747_v26 }
 0x130   : > { %v1759_v6 = vsel %vm1671_vm10, %v1577_v29, 0.0  ;;  %v3132_v7 = vmax.f32 %v2702_v17, 0.0  ;;  %v2694_v12 = vadd.f32 %v5030_v18, %v5346_v56  ;;  %v1164_v35 = vadd.f32 %v4865_v0, %v1163_v31  ;;  %v5409_v59 = vpop.f32.mrf.mxu0  ;;  %v5416_v1 = vpop.f32.mrf.mxu1 }
 0x131   : > { %v3290_v3 = vrot.slane %v3289_v46, 4  ;;  %v1750_v58 = vrot.slane %v1749_v22, 4  ;;  %v3296_v51 = vsel %vm1671_vm10, %v3129_v14, 0.0  ;;  %v1756_v57 = vsel %vm1671_vm10, %v1575_v41, 0.0 }
 0x132   : > { %v1578_v48 = vmax.f32 %v1172_v16, 0.0  ;;  %v3130_v38 = vmax.f32 %v2694_v12, 0.0  ;;  %v1576_v5 = vmax.f32 %v1164_v35, 0.0  ;;  %v1185_v61 = vadd.f32 %v4164_v9, %v4865_v0  ;;  %v5425_v0 = vld [vmem:[%s6475_s6] ss:$0 sm:$0xff]  ;;  %v5428_v52 = vpop.f32.mrf.mxu0  ;;  %v5430_v53 = vpop.f32.mrf.mxu1 }
 0x133   : > { %v3291_v56 = vadd.f32 %v3290_v3, %v3289_v46  ;;  %v1751_v19 = vadd.f32 %v1750_v58, %v1749_v22  ;;  %v3301_v31 = vsel %vm1671_vm10, %v3132_v7, 0.0  ;;  %v5414_v21 = vadd.f32 %v5352_v40, %v5030_v18 }
 0x134   : > { %v3297_v15 = vsel %vm1671_vm10, %v3130_v38, 0.0  ;;  %v1757_v20 = vsel %vm1671_vm10, %v1576_v5, 0.0  ;;  %v2707_v28 = vadd.f32 %v5030_v18, %v5362_v44  ;;  %v1177_v9 = vadd.f32 %v5425_v0, %v1176_v43  ;;  %v5433_v49 = vpop.f32.mrf.mxu0  ;;  %v5435_v43 = vpop.f32.mrf.mxu1 }
 0x135   : > { %v3292_v40 = vrot.slane %v3291_v56, 2  ;;  %v1752_v39 = vrot.slane %v1751_v19, 2  ;;  %v3298_v27 = vadd.f32 %v3297_v15, %v3296_v51  ;;  %v1758_v11 = vadd.f32 %v1757_v20, %v1756_v57 }
 0x136   : > { %v1761_v13 = vsel %vm1671_vm10, %v1578_v48, 0.0  ;;  %v1581_v62 = vmax.f32 %v1185_v61, 0.0  ;;  %v3133_v32 = vmax.f32 %v2707_v28, 0.0  ;;  %v1579_v44 = vmax.f32 %v1177_v9, 0.0  ;;  %v5443_v37 = vpop.f32.mrf.mxu0  ;;  %v5445_v16 = vpop.f32.mrf.mxu1 }
 0x137   : > { %v3293_v30 = vadd.f32 %v3292_v40, %v3291_v56  ;;  %v1753_v42 = vadd.f32 %v1752_v39, %v1751_v19  ;;  %v3300_v10 = vadd.f32 %v3299_v34, %v3298_v27  ;;  %v1760_v29 = vadd.f32 %v1759_v6, %v1758_v11 }
 0x138   : > { %v3135_v14 = vmax.f32 %v5414_v21, 0.0  ;;  %v1763_v41 = vsel %vm1671_vm10, %v1579_v44, 0.0  ;;  %v2718_v23 = vadd.f32 %v5366_v24, %v5030_v18  ;;  %v1188_v36 = vadd.f32 %v5425_v0, %v5374_v63  ;;  %v5453_v7 = vpop.f32.mrf.mxu0  ;;  %v5455_v58 = vpop.f32.mrf.mxu1 }
 0x139   : > { %v3294_v26 = vrot.slane %v3293_v30, 1  ;;  %v1754_v50 = vrot.slane %v1753_v42, 1  ;;  %v3302_v17 = vadd.f32 %v3301_v31, %v3300_v10  ;;  %v1762_v34 = vadd.f32 %v1761_v13, %v1760_v29 }
 0x13a   : > { %v1767_v46 = vsel %vm1671_vm10, %v1581_v62, 0.0  ;;  %v3303_v22 = vsel %vm1671_vm10, %v3133_v32, 0.0  ;;  %v2710_v6 = vadd.f32 %v5030_v18, %v5372_v8  ;;  %v1180_v24 = vadd.f32 %v5425_v0, %v5379_v25  ;;  %v5457_v5 = vpop.f32.mrf.mxu0  ;;  %v5463_v19 = vpop.f32.mrf.mxu1 }
 0x13b   : > { %v3295_v63 = vadd.f32 %v3294_v26, %v3293_v30  ;;  %v1755_v12 = vadd.f32 %v1754_v50, %v1753_v42  ;;  %v3304_v35 = vadd.f32 %v3303_v22, %v3302_v17  ;;  %v1764_v3 = vadd.f32 %v1763_v41, %v1762_v34  ;;  %v5498_v34 = vld [vmem:[%s6479_s10] ss:$0 sm:$0xff] }
 0x13c   : > { %v3136_v51 = vmax.f32 %v2718_v23, 0.0  ;;  %v1582_v57 = vmax.f32 %v1188_v36, 0.0  ;;  %v3134_v48 = vmax.f32 %v2710_v6, 0.0  ;;  %v1580_v38 = vmax.f32 %v1180_v24, 0.0  ;;  %v5471_v28 = vpop.f32.mrf.mxu0  ;;  %v5473_v27 = vpop.f32.mrf.mxu1 }
 0x13d   : > { %v3571_v61 = vmul.f32 0.015625, %v3295_v63  ;;  %v2011_v56 = vmul.f32 0.015625, %v1755_v12  ;;  %v2731_v8 = vadd.f32 %v5377_v55, %v5030_v18  ;;  %v1201_v25 = vadd.f32 %v5425_v0, %v5396_v47 }
 0x13e   : > { %v3305_v31 = vsel %vm1671_vm10, %v3134_v48, 0.0  ;;  %v1765_v21 = vsel %vm1671_vm10, %v1580_v38, 0.0  ;;  %v2723_v15 = vadd.f32 %v5030_v18, %v5386_v54  ;;  %v1193_v20 = vadd.f32 %v5425_v0, %v5406_v2  ;;  %v5477_v32 = vpop.f32.mrf.mxu0  ;;  %v5479_v30 = vpop.f32.mrf.mxu1 }
 0x13f   : > { %v3587_v9 = vpack.c.bf16 %v3571_v61, %v3571_v61  ;;  %v2027_v40 = vpack.c.bf16 %v2011_v56, %v2011_v56  ;;  %v3306_v55 = vadd.f32 %v3305_v31, %v3304_v35  ;;  %v1766_v39 = vadd.f32 %v1765_v21, %v1764_v3 }
 0x140   : > { %v3307_v47 = vsel %vm1671_vm10, %v3135_v14, 0.0  ;;  %v3309_v11 = vsel %vm1671_vm10, %v3136_v51, 0.0  ;;  %v3139_v13 = vmax.f32 %v2731_v8, 0.0  ;;  %v1583_v62 = vmax.f32 %v1193_v20, 0.0  ;;  %v5483_v23 = vpop.f32.mrf.mxu0  ;;  %v5493_v17 = vpop.f32.mrf.mxu1 }
 0x141   : > { %v3627_v18 = vunpack.c.l.b16 %v3587_v9  ;;  %v2067_v54 = vunpack.c.l.b16 %v2027_v40  ;;  %v3308_v44 = vadd.f32 %v3307_v47, %v3306_v55  ;;  %v1768_v2 = vadd.f32 %v1767_v46, %v1766_v39 }
 0x142   : > { %v1769_v42 = vsel %vm1671_vm10, %v1582_v57, 0.0  ;;  %v3320_v10 = vsel %vm1671_vm10, %v3139_v13, 0.0  ;;  %v1585_v29 = vmax.f32 %v1201_v25, 0.0  ;;  %v3137_v41 = vmax.f32 %v2723_v15, 0.0  ;;  %v5508_v6 = vpop.f32.mrf.mxu0  ;;  %v5513_v3 = vpop.f32.mrf.mxu1 }
 0x143   : > { %v5487_v14 = vsel %vm2082_vm13, %v3627_v18, %v5390_v33  ;;  %v5491_v36 = vsel %vm2084_vm14, %v2067_v54, %v5394_v45  ;;  %v3310_v26 = vadd.f32 %v3309_v11, %v3308_v44  ;;  %v1770_v50 = vadd.f32 %v1769_v42, %v1768_v2 }
 0x144   : > { %v2734_v46 = vadd.f32 %v5498_v34, %v5402_v4  ;;  %v1204_v33 = vadd.f32 %v5425_v0, %v5416_v1  ;;  %v2726_v22 = vadd.f32 %v5498_v34, %v5409_v59  ;;  %v1196_v45 = vadd.f32 %v5425_v0, %v5430_v53  ;;  %v5515_v48 = vpop.f32.mrf.mxu0  ;;  %v5519_v56 = vpop.f32.mrf.mxu1 }
 0x145   : > { %v3311_v24 = vrot.slane %v3310_v26, 4  ;;  %v1771_v63 = vrot.slane %v1770_v50, 4  ;;  %v1777_v12 = vsel %vm1671_vm10, %v1583_v62, 0.0  ;;  %v2747_v35 = vadd.f32 %v5498_v34, %v5428_v52 }
 0x146   : > { %v3140_v4 = vmax.f32 %v2734_v46, 0.0  ;;  %v1586_v51 = vmax.f32 %v1204_v33, 0.0  ;;  %v3138_v1 = vmax.f32 %v2726_v22, 0.0  ;;  %v1584_v57 = vmax.f32 %v1196_v45, 0.0  ;;  %v5525_v21 = vpop.f32.mrf.mxu0  ;;  %v5527_v55 = vpop.f32.mrf.mxu1 }
 0x147   : > { %v3312_v59 = vadd.f32 %v3311_v24, %v3310_v26  ;;  %v1772_v38 = vadd.f32 %v1771_v63, %v1770_v50  ;;  %v1780_v53 = vsel %vm1671_vm10, %v1585_v29, 0.0  ;;  %v3317_v61 = vsel %vm1671_vm10, %v3137_v41, 0.0 }
 0x148   : > { %v3318_v8 = vsel %vm1671_vm10, %v3138_v1, 0.0  ;;  %v1778_v52 = vsel %vm1671_vm10, %v1584_v57, 0.0  ;;  %v3143_v25 = vmax.f32 %v2747_v35, 0.0  ;;  %v1217_v31 = vadd.f32 %v5425_v0, %v5435_v43  ;;  %v5535_v62 = vpop.f32.mrf.mxu0  ;;  %v5537_v2 = vpop.f32.mrf.mxu1 }
 0x149   : > { %v3313_v15 = vrot.slane %v3312_v59, 2  ;;  %v1773_v20 = vrot.slane %v1772_v38, 2  ;;  %v3319_v9 = vadd.f32 %v3318_v8, %v3317_v61  ;;  %v1779_v40 = vadd.f32 %v1778_v52, %v1777_v12 }
 0x14a   : > { %v3322_v39 = vsel %vm1671_vm10, %v3140_v4, 0.0  ;;  %v1782_v47 = vsel %vm1671_vm10, %v1586_v51, 0.0  ;;  %v2739_v11 = vadd.f32 %v5498_v34, %v5433_v49  ;;  %v1209_v13 = vadd.f32 %v5425_v0, %v5445_v16  ;;  %v5543_v26 = vpop.f32.mrf.mxu0  ;;  %v5545_v22 = vpop.f32.mrf.mxu1 }
 0x14b   : > { %v3314_v43 = vadd.f32 %v3313_v15, %v3312_v59  ;;  %v1774_v18 = vadd.f32 %v1773_v20, %v1772_v38  ;;  %v3321_v54 = vadd.f32 %v3320_v10, %v3319_v9  ;;  %v1781_v44 = vadd.f32 %v1780_v53, %v1779_v40 }
 0x14c   : > { %v3141_v42 = vmax.f32 %v2739_v11, 0.0  ;;  %v1587_v29 = vmax.f32 %v1209_v13, 0.0  ;;  %v2750_v41 = vadd.f32 %v5498_v34, %v5443_v37  ;;  %v1220_v49 = vadd.f32 %v5425_v0, %v5455_v58  ;;  %v5550_v12 = vpop.f32.mrf.mxu0  ;;  %v5552_v51 = vpop.f32.mrf.mxu1 }
 0x14d   : > { %v3315_v16 = vrot.slane %v3314_v43, 1  ;;  %v1775_v50 = vrot.slane %v1774_v18, 1  ;;  %v3323_v46 = vadd.f32 %v3322_v39, %v3321_v54  ;;  %v1783_v33 = vadd.f32 %v1782_v47, %v1781_v44 }
 0x14e   : > { %v3328_v10 = vsel %vm1671_vm10, %v3143_v25, 0.0  ;;  %v1589_v45 = vmax.f32 %v1217_v31, 0.0  ;;  %v3324_v24 = vsel %vm1671_vm10, %v3141_v42, 0.0  ;;  %v1784_v63 = vsel %vm1671_vm10, %v1587_v29, 0.0  ;;  %v5558_v53 = vpop.f32.mrf.mxu0  ;;  %v5564_v31 = vpop.f32.mrf.mxu1 }
 0x14f   : > { %v3316_v37 = vadd.f32 %v3315_v16, %v3314_v43  ;;  %v1776_v35 = vadd.f32 %v1775_v50, %v1774_v18  ;;  %v3325_v58 = vadd.f32 %v3324_v24, %v3323_v46  ;;  %v1785_v4 = vadd.f32 %v1784_v63, %v1783_v33 }
 0x150   : > { %v3144_v1 = vmax.f32 %v2750_v41, 0.0  ;;  %v1590_v57 = vmax.f32 %v1220_v49, 0.0  ;;  %v2742_v59 = vadd.f32 %v5498_v34, %v5453_v7  ;;  %v1212_v38 = vadd.f32 %v5425_v0, %v5463_v19  ;;  %v5570_v9 = vpop.f32.mrf.mxu0  ;;  %v5573_v11 = vpop.f32.mrf.mxu1 }
 0x151   : > { %v3572_v61 = vmul.f32 0.015625, %v3316_v37  ;;  %v2012_v8 = vmul.f32 0.015625, %v1776_v35  ;;  %v2763_v52 = vadd.f32 %v5498_v34, %v5457_v5  ;;  %v1233_v25 = vadd.f32 %v5425_v0, %v5473_v27 }
 0x152   : > { %v3142_v15 = vmax.f32 %v2742_v59, 0.0  ;;  %v1588_v20 = vmax.f32 %v1212_v38, 0.0  ;;  %v2755_v7 = vadd.f32 %v5498_v34, %v5471_v28  ;;  %v1225_v19 = vadd.f32 %v5425_v0, %v5479_v30  ;;  %v5578_v28 = vpop.f32.mrf.mxu0  ;;  %v5580_v29 = vpop.f32.mrf.mxu1 }
 0x153   : > { %v3588_v40 = vpack.c.bf16 %v3572_v61, %v3572_v61  ;;  %v2028_v39 = vpack.c.bf16 %v2012_v8, %v2012_v8  ;;  %v1788_v47 = vsel %vm1671_vm10, %v1589_v45, 0.0  ;;  %v3147_v5 = vmax.f32 %v2763_v52, 0.0 }
 0x154   : > { %v3330_v27 = vsel %vm1671_vm10, %v3144_v1, 0.0  ;;  %v3326_v13 = vsel %vm1671_vm10, %v3142_v15, 0.0  ;;  %v1786_v43 = vsel %vm1671_vm10, %v1588_v20, 0.0  ;;  %v1591_v18 = vmax.f32 %v1225_v19, 0.0  ;;  %v5584_v46 = vpop.f32.mrf.mxu0  ;;  %v5594_v37 = vpop.f32.mrf.mxu1 }
 0x155   : > { %v3628_v54 = vunpack.c.l.b16 %v3588_v40  ;;  %v2068_v30 = vunpack.c.l.b16 %v2028_v39  ;;  %v3327_v44 = vadd.f32 %v3326_v13, %v3325_v58  ;;  %v1787_v42 = vadd.f32 %v1786_v43, %v1785_v4 }
 0x156   : > { %v1790_v41 = vsel %vm1671_vm10, %v1590_v57, 0.0  ;;  %v3341_v49 = vsel %vm1671_vm10, %v3147_v5, 0.0  ;;  %v1593_v16 = vmax.f32 %v1233_v25, 0.0  ;;  %v3145_v50 = vmax.f32 %v2755_v7, 0.0  ;;  %v5604_v1 = vpop.f32.mrf.mxu0  ;;  %v5609_v38 = vpop.f32.mrf.mxu1 }
 0x157   : > { %v5588_v33 = vsel %vm2084_vm14, %v3628_v54, %v5487_v14  ;;  %v5592_v45 = vsel %vm2086_vm15, %v2068_v30, %v5491_v36  ;;  %v3329_v24 = vadd.f32 %v3328_v10, %v3327_v44  ;;  %v1789_v63 = vadd.f32 %v1788_v47, %v1787_v42 }
 0x158   : > { %v2766_v35 = vadd.f32 %v5498_v34, %v5477_v32  ;;  %v1236_v58 = vadd.f32 %v5425_v0, %v5493_v17  ;;  %v2758_v4 = vadd.f32 %v5498_v34, %v5483_v23  ;;  %v1228_v14 = vadd.f32 %v5425_v0, %v5513_v3  ;;  %v5611_v52 = vpop.f32.mrf.mxu0  ;;  %v5615_v20 = vpop.f32.mrf.mxu1 }
 0x159   : > { %v3331_v36 = vadd.f32 %v3330_v27, %v3329_v24  ;;  %v1791_v57 = vadd.f32 %v1790_v41, %v1789_v63  ;;  %v1798_v10 = vsel %vm1671_vm10, %v1591_v18, 0.0  ;;  %v2779_v59 = vadd.f32 %v5498_v34, %v5508_v6 }
 0x15a   : > { %v3148_v32 = vmax.f32 %v2766_v35, 0.0  ;;  %v1594_v61 = vmax.f32 %v1236_v58, 0.0  ;;  %v3146_v17 = vmax.f32 %v2758_v4, 0.0  ;;  %v1592_v8 = vmax.f32 %v1228_v14, 0.0  ;;  %v5621_v39 = vpop.f32.mrf.mxu0  ;;  %v5623_v43 = vpop.f32.mrf.mxu1 }
 0x15b   : > { %v3332_v23 = vrot.slane %v3331_v36, 4  ;;  %v1792_v25 = vrot.slane %v1791_v57, 4  ;;  %v1801_v3 = vsel %vm1671_vm10, %v1593_v16, 0.0  ;;  %v3338_v15 = vsel %vm1671_vm10, %v3145_v50, 0.0 }
 0x15c   : > { %v3339_v7 = vsel %vm1671_vm10, %v3146_v17, 0.0  ;;  %v1799_v6 = vsel %vm1671_vm10, %v1592_v8, 0.0  ;;  %v3151_v19 = vmax.f32 %v2779_v59, 0.0  ;;  %v1249_v40 = vadd.f32 %v5425_v0, %v5519_v56  ;;  %v5631_v42 = vpop.f32.mrf.mxu0  ;;  %v5633_v24 = vpop.f32.mrf.mxu1 }
 0x15d   : > { %v3333_v47 = vadd.f32 %v3332_v23, %v3331_v36  ;;  %v1793_v5 = vadd.f32 %v1792_v25, %v1791_v57  ;;  %v3340_v27 = vadd.f32 %v3339_v7, %v3338_v15  ;;  %v1800_v13 = vadd.f32 %v1799_v6, %v1798_v10 }
 0x15e   : > { %v3343_v18 = vsel %vm1671_vm10, %v3148_v32, 0.0  ;;  %v1803_v54 = vsel %vm1671_vm10, %v1594_v61, 0.0  ;;  %v2771_v30 = vadd.f32 %v5498_v34, %v5515_v48  ;;  %v1241_v44 = vadd.f32 %v5425_v0, %v5527_v55  ;;  %v5639_v48 = vpop.f32.mrf.mxu0  ;;  %v5641_v10 = vpop.f32.mrf.mxu1 }
 0x15f   : > { %v3334_v56 = vrot.slane %v3333_v47, 2  ;;  %v1794_v41 = vrot.slane %v1793_v5, 2  ;;  %v3342_v16 = vadd.f32 %v3341_v49, %v3340_v27  ;;  %v1802_v50 = vadd.f32 %v1801_v3, %v1800_v13 }
 0x160   : > { %v3149_v63 = vmax.f32 %v2771_v30, 0.0  ;;  %v1595_v35 = vmax.f32 %v1241_v44, 0.0  ;;  %v2782_v58 = vadd.f32 %v5498_v34, %v5525_v21  ;;  %v1252_v4 = vadd.f32 %v5425_v0, %v5537_v2  ;;  %v5645_v61 = vpop.f32.mrf.mxu0  ;;  %v5647_v23 = vpop.f32.mrf.mxu1 }
 0x161   : > { %v3335_v14 = vadd.f32 %v3334_v56, %v3333_v47  ;;  %v1795_v55 = vadd.f32 %v1794_v41, %v1793_v5  ;;  %v3344_v36 = vadd.f32 %v3343_v18, %v3342_v16  ;;  %v1804_v57 = vadd.f32 %v1803_v54, %v1802_v50 }
 0x162   : > { %v1597_v49 = vmax.f32 %v1249_v40, 0.0  ;;  %v3345_v59 = vsel %vm1671_vm10, %v3149_v63, 0.0  ;;  %v1805_v32 = vsel %vm1671_vm10, %v1595_v35, 0.0  ;;  %v3349_v25 = vsel %vm1671_vm10, %v3151_v19, 0.0  ;;  %v5654_v6 = vpop.f32.mrf.mxu0  ;;  %v5658_v13 = vpop.f32.mrf.mxu1 }
 0x163   : > { %v3336_v21 = vrot.slane %v3335_v14, 1  ;;  %v1796_v17 = vrot.slane %v1795_v55, 1  ;;  %v3346_v8 = vadd.f32 %v3345_v59, %v3344_v36  ;;  %v1806_v2 = vadd.f32 %v1805_v32, %v1804_v57 }
 0x164   : > { %v3152_v3 = vmax.f32 %v2782_v58, 0.0  ;;  %v2774_v15 = vadd.f32 %v5498_v34, %v5535_v62  ;;  %v1244_v7 = vadd.f32 %v5425_v0, %v5545_v22  ;;  %v1598_v5 = vmax.f32 %v1252_v4, 0.0  ;;  %v5664_v30 = vpop.f32.mrf.mxu0 }
 0x165   : > { %v3337_v40 = vadd.f32 %v3336_v21, %v3335_v14  ;;  %v1797_v47 = vadd.f32 %v1796_v17, %v1795_v55  ;;  %v2795_v27 = vadd.f32 %v5498_v34, %v5543_v26  ;;  %v1265_v19 = vadd.f32 %v5425_v0, %v5552_v51  ;;  %v5669_v26 = vpop.f32.mrf.mxu1 }
 0x166   : > { %v3150_v18 = vmax.f32 %v2774_v15, 0.0  ;;  %v1596_v54 = vmax.f32 %v1244_v7, 0.0  ;;  %v2787_v62 = vadd.f32 %v5498_v34, %v5550_v12  ;;  %v1809_v56 = vsel %vm1671_vm10, %v1597_v49, 0.0  ;;  %v5674_v35 = vpop.f32.mrf.mxu0 }
 0x167   : > { %v3573_v22 = vmul.f32 0.015625, %v3337_v40  ;;  %v2013_v44 = vmul.f32 0.015625, %v1797_v47  ;;  %v1257_v41 = vadd.f32 %v5425_v0, %v5564_v31  ;;  %v3351_v16 = vsel %vm1671_vm10, %v3152_v3, 0.0  ;;  %v5676_v55 = vpop.f32.mrf.mxu1 }
 0x168   : > { %v3347_v50 = vsel %vm1671_vm10, %v3150_v18, 0.0  ;;  %v1807_v51 = vsel %vm1671_vm10, %v1596_v54, 0.0  ;;  %v3155_v63 = vmax.f32 %v2795_v27, 0.0  ;;  %v1811_v36 = vsel %vm1671_vm10, %v1598_v5, 0.0  ;;  %v5679_v59 = vpop.f32.mrf.mxu0 }
 0x169   : > { %v3589_v12 = vpack.c.bf16 %v3573_v22, %v3573_v22  ;;  %v2029_v58 = vpack.c.bf16 %v2013_v44, %v2013_v44  ;;  %v3348_v4 = vadd.f32 %v3347_v50, %v3346_v8  ;;  %v1808_v14 = vadd.f32 %v1807_v51, %v1806_v2  ;;  %v5681_v15 = vpop.f32.mrf.mxu1 }
 0x16a   : > { %v1601_v31 = vmax.f32 %v1265_v19, 0.0  ;;  %v3153_v57 = vmax.f32 %v2787_v62, 0.0  ;;  %v1599_v49 = vmax.f32 %v1257_v41, 0.0  ;;  %v3362_v7 = vsel %vm1671_vm10, %v3155_v63, 0.0  ;;  %v5690_v47 = vpop.f32.mrf.mxu0 }
 0x16b   : > { %v3629_v32 = vunpack.c.l.b16 %v3589_v12  ;;  %v2069_v21 = vunpack.c.l.b16 %v2029_v58  ;;  %v3350_v17 = vadd.f32 %v3349_v25, %v3348_v4  ;;  %v1810_v3 = vadd.f32 %v1809_v56, %v1808_v14  ;;  %v5700_v54 = vpop.f32.mrf.mxu1 }
 0x16c   : > { %v2798_v8 = vadd.f32 %v5498_v34, %v5558_v53  ;;  %v1268_v2 = vadd.f32 %v5425_v0, %v5573_v11  ;;  %v2790_v40 = vadd.f32 %v5498_v34, %v5570_v9  ;;  %v1822_v53 = vsel %vm1671_vm10, %v1601_v31, 0.0  ;;  %v5705_v62 = vpop.f32.mrf.mxu0 }
 0x16d   : > { %v5694_v5 = vsel %vm2086_vm15, %v3629_v32, %v5588_v33  ;;  %v5698_v25 = vsel %vm2088_vm0, %v2069_v21, %v5592_v45  ;;  %v3352_v27 = vadd.f32 %v3351_v16, %v3350_v17  ;;  %v1812_v18 = vadd.f32 %v1811_v36, %v1810_v3  ;;  %v5709_v56 = vpop.f32.mrf.mxu1 }
 0x16e   : > { %v3156_v11 = vmax.f32 %v2798_v8, 0.0  ;;  %v3154_v19 = vmax.f32 %v2790_v40, 0.0  ;;  %v1260_v9 = vadd.f32 %v5425_v0, %v5580_v29  ;;  %v3359_v44 = vsel %vm1671_vm10, %v3153_v57, 0.0  ;;  %v5714_v63 = vpop.f32.mrf.mxu0 }
 0x16f   : > { %v3353_v22 = vrot.slane %v3352_v27, 4  ;;  %v1813_v33 = vrot.slane %v1812_v18, 4  ;;  %v1819_v45 = vsel %vm1671_vm10, %v1599_v49, 0.0  ;;  %v1602_v41 = vmax.f32 %v1268_v2, 0.0  ;;  %v5720_v14 = vpop.f32.mrf.mxu1 }
 0x170   : > { %v3360_v16 = vsel %vm1671_vm10, %v3154_v19, 0.0  ;;  %v1600_v50 = vmax.f32 %v1260_v9, 0.0  ;;  %v1281_v51 = vadd.f32 %v5425_v0, %v5594_v37  ;;  %v5718_v4 = vadd.f32 %v5498_v34, %v5578_v28  ;;  %v5728_v49 = vpop.f32.mrf.mxu0 }
 0x171   : > { %v3354_v29 = vadd.f32 %v3353_v22, %v3352_v27  ;;  %v1814_v12 = vadd.f32 %v1813_v33, %v1812_v18  ;;  %v3361_v58 = vadd.f32 %v3360_v16, %v3359_v44  ;;  %v3364_v36 = vsel %vm1671_vm10, %v3156_v11, 0.0  ;;  %v5730_v28 = vpop.f32.mrf.mxu1 }
 0x172   : > { %v1820_v31 = vsel %vm1671_vm10, %v1600_v50, 0.0  ;;  %v2803_v57 = vadd.f32 %v5498_v34, %v5584_v46  ;;  %v1273_v37 = vadd.f32 %v5425_v0, %v5609_v38  ;;  %v1824_v8 = vsel %vm1671_vm10, %v1602_v41, 0.0  ;;  %v5733_v18 = vpop.f32.mrf.mxu0 }
 0x173   : > { %v3355_v32 = vrot.slane %v3354_v29, 2  ;;  %v1815_v21 = vrot.slane %v1814_v12, 2  ;;  %v3363_v17 = vadd.f32 %v3362_v7, %v3361_v58  ;;  %v1821_v3 = vadd.f32 %v1820_v31, %v1819_v45  ;;  %v5735_v38 = vpop.f32.mrf.mxu1 }
 0x174   : > { %v1605_v2 = vmax.f32 %v1281_v51, 0.0  ;;  %v3157_v40 = vmax.f32 %v2803_v57, 0.0  ;;  %v1603_v27 = vmax.f32 %v1273_v37, 0.0  ;;  %v2814_v33 = vadd.f32 %v5498_v34, %v5604_v1  ;;  %v5743_v45 = vpop.f32.mrf.mxu0 }
 0x175   : > { %v3356_v11 = vadd.f32 %v3355_v32, %v3354_v29  ;;  %v1816_v46 = vadd.f32 %v1815_v21, %v1814_v12  ;;  %v1823_v19 = vadd.f32 %v1822_v53, %v1821_v3  ;;  %v3365_v9 = vadd.f32 %v3364_v36, %v3363_v17  ;;  %v5745_v53 = vpop.f32.mrf.mxu1 }
 0x176   : > { %v3366_v22 = vsel %vm1671_vm10, %v3157_v40, 0.0  ;;  %v1826_v7 = vsel %vm1671_vm10, %v1603_v27, 0.0  ;;  %v1284_v44 = vadd.f32 %v5425_v0, %v5615_v20  ;;  %v3159_v29 = vmax.f32 %v5718_v4, 0.0  ;;  %v5752_v1 = vpop.f32.mrf.mxu0 }
 0x177   : > { %v3357_v41 = vrot.slane %v3356_v11, 1  ;;  %v1817_v16 = vrot.slane %v1816_v46, 1  ;;  %v3367_v50 = vadd.f32 %v3366_v22, %v3365_v9  ;;  %v1825_v51 = vadd.f32 %v1824_v8, %v1823_v19  ;;  %v5755_v37 = vpop.f32.mrf.mxu1 }
 0x178   : > { %v2806_v12 = vadd.f32 %v5498_v34, %v5611_v52  ;;  %v1276_v58 = vadd.f32 %v5425_v0, %v5623_v43  ;;  %v1830_v31 = vsel %vm1671_vm10, %v1605_v2, 0.0  ;;  %v3160_v32 = vmax.f32 %v2814_v33, 0.0  ;;  %v5757_v4 = vpop.f32.mrf.mxu0 }
 0x179   : > { %v3358_v36 = vadd.f32 %v3357_v41, %v3356_v11  ;;  %v1818_v20 = vadd.f32 %v1817_v16, %v1816_v46  ;;  %v1827_v57 = vadd.f32 %v1826_v7, %v1825_v51  ;;  %v1606_v21 = vmax.f32 %v1284_v44, 0.0  ;;  %v5763_v27 = vpop.f32.mrf.mxu1 }
 0x17a   : > { %v3158_v17 = vmax.f32 %v2806_v12, 0.0  ;;  %v1604_v3 = vmax.f32 %v1276_v58, 0.0  ;;  %v2827_v43 = vadd.f32 %v5498_v34, %v5621_v39  ;;  %v1297_v40 = vadd.f32 %v5425_v0, %v5633_v24  ;;  %v5771_v9 = vpop.f32.mrf.mxu0 }
 0x17b   : > { %v3574_v8 = vmul.f32 0.015625, %v3358_v36  ;;  %v2014_v52 = vmul.f32 0.015625, %v1818_v20  ;;  %v2819_v46 = vadd.f32 %v5498_v34, %v5631_v42  ;;  %v1289_v19 = vadd.f32 %v5425_v0, %v5641_v10  ;;  %v5773_v44 = vpop.f32.mrf.mxu1 }
 0x17c   : > { %v3368_v2 = vsel %vm1671_vm10, %v3158_v17, 0.0  ;;  %v1828_v11 = vsel %vm1671_vm10, %v1604_v3, 0.0  ;;  %v3370_v24 = vsel %vm1671_vm10, %v3159_v29, 0.0  ;;  %v3163_v41 = vmax.f32 %v2827_v43, 0.0  ;;  %v5776_v51 = vpop.f32.mrf.mxu0 }
 0x17d   : > { %v3590_v22 = vpack.c.bf16 %v3574_v8, %v3574_v8  ;;  %v2030_v7 = vpack.c.bf16 %v2014_v52, %v2014_v52  ;;  %v3369_v39 = vadd.f32 %v3368_v2, %v3367_v50  ;;  %v1829_v33 = vadd.f32 %v1828_v11, %v1827_v57  ;;  %v5778_v10 = vpop.f32.mrf.mxu1 }
 0x17e   : > { %v1607_v16 = vmax.f32 %v1289_v19, 0.0  ;;  %v3372_v20 = vsel %vm1671_vm10, %v3160_v32, 0.0  ;;  %v1832_v50 = vsel %vm1671_vm10, %v1606_v21, 0.0  ;;  %v1609_v57 = vmax.f32 %v1297_v40, 0.0  ;;  %v5782_v3 = vpop.f32.mrf.mxu0 }
 0x17f   : > { %v3630_v12 = vunpack.c.l.b16 %v3590_v22  ;;  %v2070_v42 = vunpack.c.l.b16 %v2030_v7  ;;  %v3371_v58 = vadd.f32 %v3370_v24, %v3369_v39  ;;  %v1831_v36 = vadd.f32 %v1830_v31, %v1829_v33  ;;  %v5792_v43 = vpop.f32.mrf.mxu1 }
 0x180   : > { %v3161_v17 = vmax.f32 %v2819_v46, 0.0  ;;  %v2830_v32 = vadd.f32 %v5498_v34, %v5639_v48  ;;  %v1300_v21 = vadd.f32 %v5425_v0, %v5647_v23  ;;  %v2822_v40 = vadd.f32 %v5498_v34, %v5645_v61  ;;  %v5802_v2 = vpop.f32.mrf.mxu0 }
 0x181   : > { %v5786_v29 = vsel %vm2088_vm0, %v3630_v12, %v5694_v5  ;;  %v5790_v8 = vsel %vm2090_vm1, %v2070_v42, %v5698_v25  ;;  %v3373_v52 = vadd.f32 %v3372_v20, %v3371_v58  ;;  %v1833_v31 = vadd.f32 %v1832_v50, %v1831_v36  ;;  %v5806_v22 = vpop.f32.mrf.mxu1 }
 0x182   : > { %v1292_v5 = vadd.f32 %v5425_v0, %v5658_v13  ;;  %v3383_v46 = vsel %vm1671_vm10, %v3163_v41, 0.0  ;;  %v1840_v19 = vsel %vm1671_vm10, %v1607_v16, 0.0  ;;  %v3164_v48 = vmax.f32 %v2830_v32, 0.0  ;;  %v5808_v33 = vpop.f32.mrf.mxu0 }
 0x183   : > { %v3374_v25 = vrot.slane %v3373_v52, 4  ;;  %v1834_v11 = vrot.slane %v1833_v31, 4  ;;  %v1610_v7 = vmax.f32 %v1300_v21, 0.0  ;;  %v3162_v39 = vmax.f32 %v2822_v40, 0.0  ;;  %v5812_v42 = vpop.f32.mrf.mxu1 }
 0x184   : > { %v1608_v23 = vmax.f32 %v1292_v5, 0.0  ;;  %v1843_v13 = vsel %vm1671_vm10, %v1609_v57, 0.0  ;;  %v3380_v12 = vsel %vm1671_vm10, %v3161_v17, 0.0  ;;  %v2843_v58 = vadd.f32 %v5498_v34, %v5654_v6  ;;  %v5820_v20 = vpop.f32.mrf.mxu0 }
 0x185   : > { %v3375_v61 = vadd.f32 %v3374_v25, %v3373_v52  ;;  %v1835_v24 = vadd.f32 %v1834_v11, %v1833_v31  ;;  %v3381_v41 = vsel %vm1671_vm10, %v3162_v39, 0.0  ;;  %v1313_v36 = vadd.f32 %v5425_v0, %v5669_v26  ;;  %v5822_v32 = vpop.f32.mrf.mxu1 }
 0x186   : > { %v1841_v16 = vsel %vm1671_vm10, %v1608_v23, 0.0  ;;  %v3382_v31 = vadd.f32 %v3381_v41, %v3380_v12  ;;  %v3385_v17 = vsel %vm1671_vm10, %v3164_v48, 0.0  ;;  %v1845_v21 = vsel %vm1671_vm10, %v1610_v7, 0.0  ;;  %v5830_v5 = vpop.f32.mrf.mxu0 }
 0x187   : > { %v3376_v50 = vrot.slane %v3375_v61, 2  ;;  %v1836_v52 = vrot.slane %v1835_v24, 2  ;;  %v1842_v57 = vadd.f32 %v1841_v16, %v1840_v19  ;;  %v2835_v40 = vadd.f32 %v5498_v34, %v5664_v30  ;;  %v5832_v23 = vpop.f32.mrf.mxu1 }
 0x188   : > { %v1305_v6 = vadd.f32 %v5425_v0, %v5676_v55  ;;  %v3384_v11 = vadd.f32 %v3383_v46, %v3382_v31  ;;  %v2846_v48 = vadd.f32 %v5498_v34, %v5674_v35  ;;  %v1316_v7 = vadd.f32 %v5425_v0, %v5681_v15  ;;  %v5838_v30 = vpop.f32.mrf.mxu0 }
 0x189   : > { %v3377_v26 = vadd.f32 %v3376_v50, %v3375_v61  ;;  %v1837_v25 = vadd.f32 %v1836_v52, %v1835_v24  ;;  %v1844_v39 = vadd.f32 %v1843_v13, %v1842_v57  ;;  %v3165_v19 = vmax.f32 %v2835_v40, 0.0  ;;  %v5840_v61 = vpop.f32.mrf.mxu1 }
 0x18a   : > { %v1611_v12 = vmax.f32 %v1305_v6, 0.0  ;;  %v3386_v16 = vadd.f32 %v3385_v17, %v3384_v11  ;;  %v3167_v46 = vmax.f32 %v2843_v58, 0.0  ;;  %v1613_v24 = vmax.f32 %v1313_v36, 0.0  ;;  %v5844_v52 = vpop.f32.mrf.mxu0 }
 0x18b   : > { %v3378_v41 = vrot.slane %v3377_v26, 1  ;;  %v1838_v55 = vrot.slane %v1837_v25, 1  ;;  %v1846_v60 = vadd.f32 %v1845_v21, %v1844_v39  ;;  %v3387_v13 = vsel %vm1671_vm10, %v3165_v19, 0.0  ;;  %v5846_v40 = vpop.f32.mrf.mxu1 }
 0x18c   : > { %v1847_v50 = vsel %vm1671_vm10, %v1611_v12, 0.0  ;;  %v3388_v57 = vadd.f32 %v3387_v13, %v3386_v16  ;;  %v3168_v6 = vmax.f32 %v2846_v48, 0.0  ;;  %v2838_v17 = vadd.f32 %v5498_v34, %v5679_v59  ;;  %v5852_v36 = vpop.f32.mrf.mxu0 }
 0x18d   : > { %v3379_v35 = vadd.f32 %v3378_v41, %v3377_v26  ;;  %v1839_v31 = vadd.f32 %v1838_v55, %v1837_v25  ;;  %v1848_v15 = vadd.f32 %v1847_v50, %v1846_v60  ;;  %v1308_v58 = vadd.f32 %v5425_v0, %v5700_v54  ;;  %v5856_v25 = vpop.f32.mrf.mxu1 }
 0x18e   : > { %v1614_v39 = vmax.f32 %v1316_v7, 0.0  ;;  %v1329_v26 = vadd.f32 %v5425_v0, %v5709_v56  ;;  %v3166_v60 = vmax.f32 %v2838_v17, 0.0  ;;  %v2851_v12 = vadd.f32 %v5498_v34, %v5705_v62  ;;  %v5862_v48 = vpop.f32.mrf.mxu0 }
 0x18f   : > { %v3575_v21 = vmul.f32 0.015625, %v3379_v35  ;;  %v2015_v11 = vmul.f32 0.015625, %v1839_v31  ;;  %v1612_v19 = vmax.f32 %v1308_v58, 0.0  ;;  %v1321_v59 = vadd.f32 %v5425_v0, %v5720_v14  ;;  %6518 = vst [vmem:[#allocation4_spill] sm:$0xff] %v5862_v48  ;;  %v5866_v16 = vpop.f32.mrf.mxu1 }
 0x190   : > { %v3391_v55 = vsel %vm1671_vm10, %v3167_v46, 0.0  ;;  %v1851_v7 = vsel %vm1671_vm10, %v1613_v24, 0.0  ;;  %v3393_v56 = vsel %vm1671_vm10, %v3168_v6, 0.0  ;;  %v3389_v13 = vsel %vm1671_vm10, %v3166_v60, 0.0  ;;  %v5873_v14 = vpop.f32.mrf.mxu0 }
 0x191   : > { %v3591_v54 = vpack.c.bf16 %v3575_v21, %v3575_v21  ;;  %v2031_v41 = vpack.c.bf16 %v2015_v11, %v2015_v11  ;;  %v1849_v50 = vsel %vm1671_vm10, %v1612_v19, 0.0  ;;  %v2859_v62 = vadd.f32 %v5498_v34, %v5690_v47  ;;  %v5875_v46 = vpop.f32.mrf.mxu1 }
 0x192   : > { %v3390_v17 = vadd.f32 %v3389_v13, %v3388_v57  ;;  %v1850_v58 = vadd.f32 %v1849_v50, %v1848_v15  ;;  %v1853_v24 = vsel %vm1671_vm10, %v1614_v39, 0.0  ;;  %v1617_v21 = vmax.f32 %v1329_v26, 0.0  ;;  %v5878_v48 = vpop.f32.mrf.mxu0 }
 0x193   : > { %v3631_v35 = vunpack.c.l.b16 %v3591_v54  ;;  %v2071_v31 = vunpack.c.l.b16 %v2031_v41  ;;  %v3169_v11 = vmax.f32 %v2851_v12, 0.0  ;;  %v1615_v6 = vmax.f32 %v1321_v59, 0.0  ;;  %v5888_v15 = vpop.f32.mrf.mxu1 }
 0x194   : > { %v3392_v19 = vadd.f32 %v3391_v55, %v3390_v17  ;;  %v1852_v57 = vadd.f32 %v1851_v7, %v1850_v58  ;;  %v2862_v39 = vadd.f32 %v5498_v34, %v5714_v63  ;;  %v1332_v26 = vadd.f32 %v5425_v0, %v5730_v28  ;;  %v5898_v59 = vpop.f32.mrf.mxu0 }
 0x195   : > { %v5882_v60 = vsel %vm2090_vm1, %v3631_v35, %v5786_v29  ;;  %v5886_v47 = vsel %vm2092_vm2, %v2071_v31, %v5790_v8  ;;  %v2854_v12 = vadd.f32 %v5498_v34, %v5728_v49  ;;  %v1324_v29 = vadd.f32 %v5425_v0, %v5735_v38  ;;  %v5902_v55 = vpop.f32.mrf.mxu1 }
 0x196   : > { %6519 = vst [vmem:[#allocation3_spill] sm:$0xff] %v5882_v60  ;;  %6520 = vst [vmem:[#allocation2_spill] sm:$0xff] %v5886_v47  ;;  %v5900_v8 = vadd.f32 %v3393_v56, %v3392_v19  ;;  %v1854_v54 = vadd.f32 %v1853_v24, %v1852_v57  ;;  %v3171_v41 = vmax.f32 %v2859_v62, 0.0  ;;  %v1861_v7 = vsel %vm1671_vm10, %v1615_v6, 0.0  ;;  %v5905_v50 = vpop.f32.mrf.mxu0 }
 0x197   : > { %v3170_v63 = vmax.f32 %v2854_v12, 0.0  ;;  %v1616_v13 = vmax.f32 %v1324_v29, 0.0  ;;  %v1864_v49 = vsel %vm1671_vm10, %v1617_v21, 0.0  ;;  %v3172_v35 = vmax.f32 %v2862_v39, 0.0  ;;  %v5908_v31 = vpop.f32.mrf.mxu1 }
 0x198   : > { %6521 = vst [vmem:[#allocation5_spill] sm:$0xff] %v5900_v8  ;;  %v1855_v28 = vrot.slane %v1854_v54, 4  ;;  %v3401_v0 = vsel %vm1671_vm10, %v3169_v11, 0.0  ;;  %v1618_v38 = vmax.f32 %v1332_v26, 0.0  ;;  %v5913_v17 = vpop.f32.mrf.mxu0  ;;  %v3404_v24 = vsel %vm1671_vm10, %v3171_v41, 0.0 }
 0x199   : > { %v3402_v56 = vsel %vm1671_vm10, %v3170_v63, 0.0  ;;  %v1862_v62 = vsel %vm1671_vm10, %v1616_v13, 0.0  ;;  %v5916_v57 = vpop.f32.mrf.mxu1  ;;  %v2875_v21 = vadd.f32 %v5498_v34, %v5733_v18  ;;  %v5923_v11 = vld [vmem:[%s6475_s6] ss:$0 sm:$0xff]  ;;  %v2867_v26 = vadd.f32 %v5498_v34, %v5743_v45 }
 0x19a   : > { %v1856_v58 = vadd.f32 %v1855_v28, %v1854_v54  ;;  %v3403_v6 = vadd.f32 %v3402_v56, %v3401_v0  ;;  %v1863_v19 = vadd.f32 %v1862_v62, %v1861_v7  ;;  %v1345_v39 = vadd.f32 %v5923_v11, %v5745_v53  ;;  %v5931_v29 = vpop.f32.mrf.mxu0 }
 0x19b   : > { %v1337_v12 = vadd.f32 %v5923_v11, %v5755_v37  ;;  %v3406_v41 = vsel %vm1671_vm10, %v3172_v35, 0.0  ;;  %v5934_v63 = vpop.f32.mrf.mxu1  ;;  %v1866_v13 = vsel %vm1671_vm10, %v1618_v38, 0.0  ;;  %v3173_v28 = vmax.f32 %v2867_v26, 0.0 }
 0x19c   : > { %v1857_v54 = vrot.slane %v1856_v58, 2  ;;  %v3405_v18 = vadd.f32 %v3404_v24, %v3403_v6  ;;  %v1865_v7 = vadd.f32 %v1864_v49, %v1863_v19  ;;  %v2878_v53 = vadd.f32 %v5498_v34, %v5752_v1  ;;  %v5939_v45 = vpop.f32.mrf.mxu0 }
 0x19d   : > { %v1619_v0 = vmax.f32 %v1337_v12, 0.0  ;;  %v1348_v47 = vadd.f32 %v5923_v11, %v5763_v27  ;;  %v5943_v35 = vpop.f32.mrf.mxu1  ;;  %v3408_v49 = vsel %vm1671_vm10, %v3173_v28, 0.0  ;;  %v3175_v12 = vmax.f32 %v2875_v21, 0.0 }
 0x19e   : > { %v1858_v56 = vadd.f32 %v1857_v54, %v1856_v58  ;;  %v3407_v37 = vadd.f32 %v3406_v41, %v3405_v18  ;;  %v1867_v62 = vadd.f32 %v1866_v13, %v1865_v7  ;;  %v5947_v38 = vpop.f32.mrf.mxu0  ;;  %v1621_v58 = vmax.f32 %v1345_v39, 0.0 }
 0x19f   : > { %v1868_v24 = vsel %vm1671_vm10, %v1619_v0, 0.0  ;;  %v5949_v1 = vpop.f32.mrf.mxu1  ;;  %v2870_v54 = vadd.f32 %v5498_v34, %v5757_v4  ;;  %v1340_v27 = vadd.f32 %v5923_v11, %v5773_v44  ;;  %v3176_v7 = vmax.f32 %v2878_v53, 0.0 }
 0x1a0   : > { %v1859_v6 = vrot.slane %v1858_v56, 1  ;;  %v3409_v19 = vadd.f32 %v3408_v49, %v3407_v37  ;;  %v1869_v26 = vadd.f32 %v1868_v24, %v1867_v62  ;;  %v5955_v41 = vpop.f32.mrf.mxu0  ;;  %v1622_v13 = vmax.f32 %v1348_v47, 0.0 }
 0x1a1   : > { %v2891_v28 = vadd.f32 %v5498_v34, %v5771_v9  ;;  %v3174_v0 = vmax.f32 %v2870_v54, 0.0  ;;  %v1620_v37 = vmax.f32 %v1340_v27, 0.0  ;;  %v1361_v21 = vadd.f32 %v5923_v11, %v5778_v10  ;;  %v5969_v53 = vpop.f32.mrf.mxu1 }
 0x1a2   : > { %v1860_v18 = vadd.f32 %v1859_v6, %v1858_v56  ;;  %v1353_v39 = vadd.f32 %v5923_v11, %v5792_v43  ;;  %v5963_v4 = vpop.f32.mrf.mxu0  ;;  %v2883_v44 = vadd.f32 %v5498_v34, %v5776_v51  ;;  %v1872_v47 = vsel %vm1671_vm10, %v1621_v58, 0.0 }
 0x1a3   : > { %6522 = vst [vmem:[#allocation6_spill] sm:$0xff] %v5963_v4  ;;  %v3410_v9 = vsel %vm1671_vm10, %v3174_v0, 0.0  ;;  %v1870_v56 = vsel %vm1671_vm10, %v1620_v37, 0.0  ;;  %v3179_v43 = vmax.f32 %v2891_v28, 0.0  ;;  %v3412_v54 = vsel %vm1671_vm10, %v3175_v12, 0.0  ;;  %v5983_v8 = vpop.f32.mrf.mxu1 }
 0x1a4   : > { %v5965_v62 = vmul.f32 0.015625, %v1860_v18  ;;  %v5974_v49 = vpop.f32.mrf.mxu0  ;;  %v3411_v10 = vadd.f32 %v3410_v9, %v3409_v19  ;;  %v1871_v24 = vadd.f32 %v1870_v56, %v1869_v26  ;;  %v1623_v6 = vmax.f32 %v1353_v39, 0.0 }
 0x1a5   : > { %v3414_v27 = vsel %vm1671_vm10, %v3176_v7, 0.0  ;;  %v1874_v51 = vsel %vm1671_vm10, %v1622_v13, 0.0  ;;  %v1625_v18 = vmax.f32 %v1361_v21, 0.0  ;;  %v3177_v4 = vmax.f32 %v2883_v44, 0.0 }
 0x1a6   : > { %v5979_v60 = vpop.f32.mrf.mxu0  ;;  %v3413_v0 = vadd.f32 %v3412_v54, %v3411_v10  ;;  %v1873_v37 = vadd.f32 %v1872_v47, %v1871_v24  ;;  %v2894_v19 = vadd.f32 %v5498_v34, %v5782_v3  ;;  %v1364_v26 = vadd.f32 %v5923_v11, %v5806_v22 }
 0x1a7   : > { %v2886_v12 = vadd.f32 %v5498_v34, %v5802_v2  ;;  %v1356_v7 = vadd.f32 %v5923_v11, %v5812_v42  ;;  %v3425_v39 = vsel %vm1671_vm10, %v3179_v43, 0.0  ;;  %v1882_v44 = vsel %vm1671_vm10, %v1623_v6, 0.0  ;;  %v6001_v42 = vpop.f32.mrf.mxu1  ;;  %v6008_v6 = vld [vmem:[%s6479_s10] ss:$0 sm:$0xff] }
 0x1a8   : > { %v5993_v13 = vpop.f32.mrf.mxu0  ;;  %v3415_v28 = vadd.f32 %v3414_v27, %v3413_v0  ;;  %v1875_v21 = vadd.f32 %v1874_v51, %v1873_v37  ;;  %v3180_v47 = vmax.f32 %v2894_v19, 0.0  ;;  %v1626_v9 = vmax.f32 %v1364_v26, 0.0 }
 0x1a9   : > { %v3178_v3 = vmax.f32 %v2886_v12, 0.0  ;;  %v1624_v56 = vmax.f32 %v1356_v7, 0.0  ;;  %v1885_v34 = vsel %vm1671_vm10, %v1625_v18, 0.0  ;;  %v3422_v2 = vsel %vm1671_vm10, %v3177_v4, 0.0 }
 0x1aa   : > { %v5997_v10 = vpop.f32.mrf.mxu0  ;;  %v3416_v22 = vrot.slane %v3415_v28, 4  ;;  %v1876_v24 = vrot.slane %v1875_v21, 4  ;;  %v2907_v27 = vadd.f32 %v6008_v6, %v5808_v33  ;;  %v1377_v51 = vadd.f32 %v5923_v11, %v5822_v32 }
 0x1ab   : > { %v3423_v54 = vsel %vm1671_vm10, %v3178_v3, 0.0  ;;  %v1883_v43 = vsel %vm1671_vm10, %v1624_v56, 0.0  ;;  %v3427_v26 = vsel %vm1671_vm10, %v3180_v47, 0.0  ;;  %v1887_v12 = vsel %vm1671_vm10, %v1626_v9, 0.0 }
 0x1ac   : > { %v6014_v18 = vpop.f32.mrf.mxu0  ;;  %v3417_v4 = vadd.f32 %v3416_v22, %v3415_v28  ;;  %v1877_v0 = vadd.f32 %v1876_v24, %v1875_v21  ;;  %v3424_v37 = vadd.f32 %v3423_v54, %v3422_v2  ;;  %v1884_v19 = vadd.f32 %v1883_v43, %v1882_v44  ;;  %v6024_v28 = vpop.f32.mrf.mxu1 }
 0x1ad   : > { %6523 = vst [vmem:[#allocation7_spill] sm:$0xff] %v6014_v18  ;;  %v2899_v7 = vadd.f32 %v6008_v6, %v5820_v20  ;;  %v1369_v3 = vadd.f32 %v5923_v11, %v5832_v23  ;;  %v2910_v47 = vadd.f32 %v6008_v6, %v5830_v5  ;;  %v1380_v9 = vadd.f32 %v5923_v11, %v5840_v61 }
 0x1ae   : > { %v6022_v33 = vpop.f32.mrf.mxu0  ;;  %v3418_v56 = vrot.slane %v3417_v4, 2  ;;  %v1878_v32 = vrot.slane %v1877_v0, 2  ;;  %v3426_v58 = vadd.f32 %v3425_v39, %v3424_v37  ;;  %v1886_v18 = vadd.f32 %v1885_v34, %v1884_v19  ;;  %v6034_v5 = vpop.f32.mrf.mxu1 }
 0x1af   : > { %6524 = vst [vmem:[#allocation8_spill] sm:$0xff] %v6022_v33  ;;  %v3181_v21 = vmax.f32 %v2899_v7, 0.0  ;;  %v1627_v44 = vmax.f32 %v1369_v3, 0.0  ;;  %v3183_v2 = vmax.f32 %v2907_v27, 0.0  ;;  %v1629_v54 = vmax.f32 %v1377_v51, 0.0 }
 0x1b0   : > { %v3419_v20 = vadd.f32 %v3418_v56, %v3417_v4  ;;  %v1879_v22 = vadd.f32 %v1878_v32, %v1877_v0  ;;  %v3428_v24 = vadd.f32 %v3427_v26, %v3426_v58  ;;  %v1888_v23 = vadd.f32 %v1887_v12, %v1886_v18  ;;  %v6032_v34 = vpop.f32.mrf.mxu0 }
 0x1b1   : > { %v3429_v43 = vsel %vm1671_vm10, %v3181_v21, 0.0  ;;  %v1889_v39 = vsel %vm1671_vm10, %v1627_v44, 0.0  ;;  %v3184_v33 = vmax.f32 %v2910_v47, 0.0  ;;  %v1630_v61 = vmax.f32 %v1380_v9, 0.0 }
 0x1b2   : > { %v3420_v37 = vrot.slane %v3419_v20, 1  ;;  %v1880_v19 = vrot.slane %v1879_v22, 1  ;;  %v3430_v7 = vadd.f32 %v3429_v43, %v3428_v24  ;;  %v1890_v3 = vadd.f32 %v1889_v39, %v1888_v23 }
 0x1b3   : > { %v2902_v58 = vadd.f32 %v6008_v6, %v5838_v30  ;;  %v1372_v27 = vadd.f32 %v5923_v11, %v5846_v40  ;;  %v2923_v4 = vadd.f32 %v6008_v6, %v5844_v52  ;;  %v1393_v0 = vadd.f32 %v5923_v11, %v5856_v25  ;;  %v6048_v30 = vpop.f32.mrf.mxu0  ;;  %v6056_v25 = vpop.f32.mrf.mxu1 }
 0x1b4   : > { %v3421_v51 = vadd.f32 %v3420_v37, %v3419_v20  ;;  %v1881_v18 = vadd.f32 %v1880_v19, %v1879_v22  ;;  %v2915_v56 = vadd.f32 %v6008_v6, %v5852_v36  ;;  %v1385_v32 = vadd.f32 %v5923_v11, %v5866_v16 }
 0x1b5   : > { %v3182_v26 = vmax.f32 %v2902_v58, 0.0  ;;  %v1628_v12 = vmax.f32 %v1372_v27, 0.0  ;;  %v6525_v40 = vpack.c.bf16 %v5965_v62, %v5965_v62  ;;  %v3433_v47 = vsel %vm1671_vm10, %v3183_v2, 0.0  ;;  %v6063_v2 = vpop.f32.mrf.mxu0 }
 0x1b6   : > { %v6053_v44 = vmul.f32 0.015625, %v3421_v51  ;;  %v2017_v52 = vmul.f32 0.015625, %v1881_v18  ;;  %v1893_v9 = vsel %vm1671_vm10, %v1629_v54, 0.0  ;;  %v3435_v36 = vsel %vm1671_vm10, %v3184_v33, 0.0  ;;  %v6067_v51 = vpop.f32.mrf.mxu1  ;;  %v6526_v18 = vld [vmem:[#allocation4_spill] sm:$0xff] }
 0x1b7   : > { %v2072_v21 = vunpack.c.l.b16 %v6525_v40  ;;  %v3431_v20 = vsel %vm1671_vm10, %v3182_v26, 0.0  ;;  %v1891_v16 = vsel %vm1671_vm10, %v1628_v12, 0.0  ;;  %v3187_v62 = vmax.f32 %v2923_v4, 0.0 }
 0x1b8   : > { %v2033_v22 = vpack.c.bf16 %v2017_v52, %v2017_v52  ;;  %v3432_v24 = vadd.f32 %v3431_v20, %v3430_v7  ;;  %v1892_v23 = vadd.f32 %v1891_v16, %v1890_v3  ;;  %v1895_v43 = vsel %vm1671_vm10, %v1630_v61, 0.0  ;;  %v6086_v20 = vpop.f32.mrf.mxu1 }
 0x1b9   : > { %v1633_v39 = vmax.f32 %v1393_v0, 0.0  ;;  %v3185_v37 = vmax.f32 %v2915_v56, 0.0  ;;  %v1631_v19 = vmax.f32 %v1385_v32, 0.0  ;;  %v3593_v54 = vpack.c.bf16 %v6053_v44, %v6053_v44 }
 0x1ba   : > { %v2073_v58 = vunpack.c.l.b16 %v2033_v22  ;;  %v3434_v33 = vadd.f32 %v3433_v47, %v3432_v24  ;;  %v1894_v27 = vadd.f32 %v1893_v9, %v1892_v23  ;;  %v2926_v7 = vadd.f32 %v6008_v6, %v6526_v18  ;;  %v6082_v47 = vpop.f32.mrf.mxu0 }
 0x1bb   : > { %v1396_v3 = vadd.f32 %v5923_v11, %v5875_v46  ;;  %v2918_v61 = vadd.f32 %v6008_v6, %v5873_v14  ;;  %v1388_v4 = vadd.f32 %v5923_v11, %v5888_v15  ;;  %v3446_v56 = vsel %vm1671_vm10, %v3187_v62, 0.0 }
 0x1bc   : > { %v6078_v0 = vsel %vm2080_vm12, %v2073_v58, %v2072_v21  ;;  %v3436_v26 = vadd.f32 %v3435_v36, %v3434_v33  ;;  %v1896_v12 = vadd.f32 %v1895_v43, %v1894_v27  ;;  %v1903_v32 = vsel %vm1671_vm10, %v1631_v19, 0.0  ;;  %v6099_v33 = vpop.f32.mrf.mxu0 }
 0x1bd   : > { %v3188_v40 = vmax.f32 %v2926_v7, 0.0  ;;  %v3186_v44 = vmax.f32 %v2918_v61, 0.0  ;;  %v1632_v52 = vmax.f32 %v1388_v4, 0.0  ;;  %v1906_v14 = vsel %vm1671_vm10, %v1633_v39, 0.0 }
 0x1be   : > { %v3437_v46 = vrot.slane %v3436_v26, 4  ;;  %v1897_v9 = vrot.slane %v1896_v12, 4  ;;  %v3443_v15 = vsel %vm1671_vm10, %v3185_v37, 0.0  ;;  %v1634_v21 = vmax.f32 %v1396_v3, 0.0  ;;  %v6101_v3 = vpop.f32.mrf.mxu1 }
 0x1bf   : > { %v3444_v36 = vsel %vm1671_vm10, %v3186_v44, 0.0  ;;  %v1904_v16 = vsel %vm1671_vm10, %v1632_v52, 0.0  ;;  %v2939_v22 = vadd.f32 %v6008_v6, %v5878_v48  ;;  %v3448_v19 = vsel %vm1671_vm10, %v3188_v40, 0.0 }
 0x1c0   : > { %v3438_v24 = vadd.f32 %v3437_v46, %v3436_v26  ;;  %v1898_v23 = vadd.f32 %v1897_v9, %v1896_v12  ;;  %v3445_v62 = vadd.f32 %v3444_v36, %v3443_v15  ;;  %v1905_v43 = vadd.f32 %v1904_v16, %v1903_v32 }
 0x1c1   : > { %v1409_v39 = vadd.f32 %v5923_v11, %v5902_v55  ;;  %v2931_v37 = vadd.f32 %v6008_v6, %v5898_v59  ;;  %v1401_v58 = vadd.f32 %v5923_v11, %v5908_v31  ;;  %v1908_v61 = vsel %vm1671_vm10, %v1634_v21, 0.0  ;;  %v6110_v21 = vpop.f32.mrf.mxu1 }
 0x1c2   : > { %v3439_v27 = vrot.slane %v3438_v24, 2  ;;  %v1899_v18 = vrot.slane %v1898_v23, 2  ;;  %v3447_v48 = vadd.f32 %v3446_v56, %v3445_v62  ;;  %v1907_v7 = vadd.f32 %v1906_v14, %v1905_v43  ;;  %v6108_v56 = vpop.f32.mrf.mxu0 }
 0x1c3   : > { %v3189_v4 = vmax.f32 %v2931_v37, 0.0  ;;  %v1635_v26 = vmax.f32 %v1401_v58, 0.0  ;;  %v2942_v55 = vadd.f32 %v6008_v6, %v5905_v50  ;;  %v3191_v31 = vmax.f32 %v2939_v22, 0.0 }
 0x1c4   : > { %v3440_v12 = vadd.f32 %v3439_v27, %v3438_v24  ;;  %v1900_v59 = vadd.f32 %v1899_v18, %v1898_v23  ;;  %v3449_v32 = vadd.f32 %v3448_v19, %v3447_v48  ;;  %v1909_v40 = vadd.f32 %v1908_v61, %v1907_v7  ;;  %v6122_v58 = vpop.f32.mrf.mxu0  ;;  %v6126_v18 = vpop.f32.mrf.mxu1 }
 0x1c5   : > { %v3450_v44 = vsel %vm1671_vm10, %v3189_v4, 0.0  ;;  %v1910_v52 = vsel %vm1671_vm10, %v1635_v26, 0.0  ;;  %v1637_v14 = vmax.f32 %v1409_v39, 0.0  ;;  %v3633_v36 = vunpack.c.l.b16 %v3593_v54 }
 0x1c6   : > { %v3441_v46 = vrot.slane %v3440_v12, 1  ;;  %v1901_v9 = vrot.slane %v1900_v59, 1  ;;  %v3451_v15 = vadd.f32 %v3450_v44, %v3449_v32  ;;  %v1412_v50 = vadd.f32 %v5923_v11, %v5916_v57 }
 0x1c7   : > { %v2934_v16 = vadd.f32 %v6008_v6, %v5913_v17  ;;  %v1404_v22 = vadd.f32 %v5923_v11, %v5934_v63  ;;  %v1911_v62 = vadd.f32 %v1910_v52, %v1909_v40  ;;  %v3192_v43 = vmax.f32 %v2942_v55, 0.0 }
 0x1c8   : > { %v3442_v24 = vadd.f32 %v3441_v46, %v3440_v12  ;;  %v1902_v23 = vadd.f32 %v1901_v9, %v1900_v59  ;;  %v2955_v39 = vadd.f32 %v6008_v6, %v5931_v29  ;;  %v2947_v54 = vadd.f32 %v6008_v6, %v5939_v45 }
 0x1c9   : > { %v3190_v19 = vmax.f32 %v2934_v16, 0.0  ;;  %v1636_v37 = vmax.f32 %v1404_v22, 0.0  ;;  %v3454_v17 = vsel %vm1671_vm10, %v3191_v31, 0.0  ;;  %v1914_v63 = vsel %vm1671_vm10, %v1637_v14, 0.0  ;;  %v6135_v31 = vpop.f32.mrf.mxu0  ;;  %v6137_v14 = vpop.f32.mrf.mxu1 }
 0x1ca   : > { %v3578_v57 = vmul.f32 0.015625, %v3442_v24  ;;  %v2018_v27 = vmul.f32 0.015625, %v1902_v23  ;;  %v1638_v48 = vmax.f32 %v1412_v50, 0.0  ;;  %v1417_v29 = vadd.f32 %v5923_v11, %v5949_v1 }
 0x1cb   : > { %v3452_v7 = vsel %vm1671_vm10, %v3190_v19, 0.0  ;;  %v1912_v61 = vsel %vm1671_vm10, %v1636_v37, 0.0  ;;  %v3456_v12 = vsel %vm1671_vm10, %v3192_v43, 0.0  ;;  %v3195_v59 = vmax.f32 %v2955_v39, 0.0  ;;  %v6153_v37 = vpop.f32.mrf.mxu0 }
 0x1cc   : > { %v3594_v4 = vpack.c.bf16 %v3578_v57, %v3578_v57  ;;  %v2034_v45 = vpack.c.bf16 %v2018_v27, %v2018_v27  ;;  %v3453_v26 = vadd.f32 %v3452_v7, %v3451_v15  ;;  %v1913_v55 = vadd.f32 %v1912_v61, %v1911_v62 }
 0x1cd   : > { %v1425_v32 = vadd.f32 %v5923_v11, %v5943_v35  ;;  %v3193_v40 = vmax.f32 %v2947_v54, 0.0  ;;  %v1916_v1 = vsel %vm1671_vm10, %v1638_v48, 0.0  ;;  %v1639_v50 = vmax.f32 %v1417_v29, 0.0  ;;  %v6157_v54 = vpop.f32.mrf.mxu1 }
 0x1ce   : > { %v3634_v44 = vunpack.c.l.b16 %v3594_v4  ;;  %v2074_v52 = vunpack.c.l.b16 %v2034_v45  ;;  %v3455_v46 = vadd.f32 %v3454_v17, %v3453_v26  ;;  %v1915_v9 = vadd.f32 %v1914_v63, %v1913_v55  ;;  %v6169_v26 = vpop.f32.mrf.mxu0 }
 0x1cf   : > { %v2958_v15 = vadd.f32 %v6008_v6, %v5947_v38  ;;  %v2950_v16 = vadd.f32 %v6008_v6, %v5955_v41  ;;  %v1641_v62 = vmax.f32 %v1425_v32, 0.0  ;;  %v1420_v19 = vadd.f32 %v5923_v11, %v5983_v8 }
 0x1d0   : > { %v6145_v35 = vsel %vm2080_vm12, %v3634_v44, %v3633_v36  ;;  %v6149_v22 = vsel %vm2082_vm13, %v2074_v52, %v6078_v0  ;;  %v3457_v24 = vadd.f32 %v3456_v12, %v3455_v46  ;;  %v1917_v23 = vadd.f32 %v1916_v1, %v1915_v9 }
 0x1d1   : > { %v3194_v43 = vmax.f32 %v2950_v16, 0.0  ;;  %v3467_v41 = vsel %vm1671_vm10, %v3195_v59, 0.0  ;;  %v3464_v36 = vsel %vm1671_vm10, %v3193_v40, 0.0  ;;  %v1924_v0 = vsel %vm1671_vm10, %v1639_v50, 0.0  ;;  %v6171_v40 = vpop.f32.mrf.mxu1  ;;  %v6527_v50 = vld [vmem:[#allocation5_spill] sm:$0xff]  ;;  %v6528_v16 = vld [vmem:[#allocation6_spill] sm:$0xff] }
 0x1d2   : > { %v3458_v38 = vrot.slane %v3457_v24, 4  ;;  %v1918_v39 = vrot.slane %v1917_v23, 4  ;;  %v3196_v57 = vmax.f32 %v2958_v15, 0.0  ;;  %v1640_v17 = vmax.f32 %v1420_v19, 0.0 }
 0x1d3   : > { %v3465_v27 = vsel %vm1671_vm10, %v3194_v43, 0.0  ;;  %v1428_v8 = vadd.f32 %v5923_v11, %v5969_v53  ;;  %v1927_v61 = vsel %vm1671_vm10, %v1641_v62, 0.0  ;;  %v2963_v4 = vadd.f32 %v6008_v6, %v5974_v49 }
 0x1d4   : > { %v3459_v63 = vadd.f32 %v3458_v38, %v3457_v24  ;;  %v1919_v48 = vadd.f32 %v1918_v39, %v1917_v23  ;;  %v3466_v7 = vadd.f32 %v3465_v27, %v3464_v36  ;;  %v1925_v29 = vsel %vm1671_vm10, %v1640_v17, 0.0  ;;  %v6177_v24 = vpop.f32.mrf.mxu0  ;;  %v6181_v38 = vpop.f32.mrf.mxu1 }
 0x1d5   : > { %v1433_v45 = vadd.f32 %v5923_v11, %v6024_v28  ;;  %v1926_v32 = vadd.f32 %v1925_v29, %v1924_v0  ;;  %v3469_v53 = vsel %vm1671_vm10, %v3196_v57, 0.0  ;;  %v3197_v44 = vmax.f32 %v2963_v4, 0.0 }
 0x1d6   : > { %v3460_v55 = vrot.slane %v3459_v63, 2  ;;  %v1920_v12 = vrot.slane %v1919_v48, 2  ;;  %v3468_v59 = vadd.f32 %v3467_v41, %v3466_v7  ;;  %v1642_v9 = vmax.f32 %v1428_v8, 0.0  ;;  %v6191_v7 = vpop.f32.mrf.mxu0 }
 0x1d7   : > { %v3395_v49 = vrot.slane %v6527_v50, 4  ;;  %v1928_v15 = vadd.f32 %v1927_v61, %v1926_v32  ;;  %v2971_v28 = vadd.f32 %v6008_v6, %v6528_v16  ;;  %v1441_v43 = vadd.f32 %v5923_v11, %v6001_v42 }
 0x1d8   : > { %v3461_v52 = vadd.f32 %v3460_v55, %v3459_v63  ;;  %v1921_v46 = vadd.f32 %v1920_v12, %v1919_v48  ;;  %v3470_v1 = vadd.f32 %v3469_v53, %v3468_v59  ;;  %v1643_v19 = vmax.f32 %v1433_v45, 0.0  ;;  %v6194_v45 = vpop.f32.mrf.mxu1 }
 0x1d9   : > { %v3471_v39 = vsel %vm1671_vm10, %v3197_v44, 0.0  ;;  %v2974_v41 = vadd.f32 %v6008_v6, %v5979_v60  ;;  %v2966_v36 = vadd.f32 %v6008_v6, %v5993_v13  ;;  %v1436_v0 = vadd.f32 %v5923_v11, %v6056_v25 }
 0x1da   : > { %v3462_v23 = vrot.slane %v3461_v52, 1  ;;  %v1922_v62 = vrot.slane %v1921_v46, 1  ;;  %v1929_v17 = vsel %vm1671_vm10, %v1642_v9, 0.0  ;;  %v3472_v63 = vadd.f32 %v3471_v39, %v3470_v1  ;;  %v6529_v9 = vld [vmem:[#allocation7_spill] sm:$0xff] }
 0x1db   : > { %v3199_v42 = vmax.f32 %v2971_v28, 0.0  ;;  %v1930_v48 = vadd.f32 %v1929_v17, %v1928_v15  ;;  %v3198_v8 = vmax.f32 %v2966_v36, 0.0  ;;  %v1931_v60 = vsel %vm1671_vm10, %v1643_v19, 0.0  ;;  %v6203_v15 = vpop.f32.mrf.mxu0 }
 0x1dc   : > { %v3463_v57 = vadd.f32 %v3462_v23, %v3461_v52  ;;  %v1923_v27 = vadd.f32 %v1922_v62, %v1921_v46  ;;  %v1644_v4 = vmax.f32 %v1436_v0, 0.0  ;;  %v3396_v13 = vadd.f32 %v3395_v49, %v6527_v50  ;;  %v6206_v23 = vpop.f32.mrf.mxu1 }
 0x1dd   : > { %v3200_v25 = vmax.f32 %v2974_v41, 0.0  ;;  %v3473_v55 = vsel %vm1671_vm10, %v3198_v8, 0.0  ;;  %v1645_v32 = vmax.f32 %v1441_v43, 0.0  ;;  %v3475_v44 = vsel %vm1671_vm10, %v3199_v42, 0.0  ;;  %v6225_v17 = vpop.f32.mrf.mxu0  ;;  %v6530_v8 = vld [vmem:[#allocation8_spill] sm:$0xff] }
 0x1de   : > { %v3579_v61 = vmul.f32 0.015625, %v3463_v57  ;;  %v2019_v29 = vmul.f32 0.015625, %v1923_v27  ;;  %v3474_v53 = vadd.f32 %v3473_v55, %v3472_v63  ;;  %v1932_v52 = vadd.f32 %v1931_v60, %v1930_v48  ;;  %v6230_v48 = vpop.f32.mrf.mxu1 }
 0x1df   : > { %v2987_v46 = vadd.f32 %v6008_v6, %v5997_v10  ;;  %v2979_v1 = vadd.f32 %v6008_v6, %v6529_v9  ;;  %v1933_v28 = vsel %vm1671_vm10, %v1644_v4, 0.0  ;;  %v3397_v62 = vrot.slane %v3396_v13, 2 }
 0x1e0   : > { %v3595_v12 = vpack.c.bf16 %v3579_v61, %v3579_v61  ;;  %v2035_v59 = vpack.c.bf16 %v2019_v29, %v2019_v29  ;;  %v3476_v49 = vadd.f32 %v3475_v44, %v3474_v53  ;;  %v3477_v43 = vsel %vm1671_vm10, %v3200_v25, 0.0 }
 0x1e1   : > { %v1449_v19 = vadd.f32 %v5923_v11, %v6086_v20  ;;  %v1444_v41 = vadd.f32 %v5923_v11, %v6034_v5  ;;  %v1934_v0 = vadd.f32 %v1933_v28, %v1932_v52  ;;  %v3201_v57 = vmax.f32 %v2979_v1, 0.0  ;;  %v6239_v52 = vpop.f32.mrf.mxu1 }
 0x1e2   : > { %v3635_v16 = vunpack.c.l.b16 %v3595_v12  ;;  %v2075_v50 = vunpack.c.l.b16 %v2035_v59  ;;  %v3478_v36 = vadd.f32 %v3477_v43, %v3476_v49  ;;  %v2982_v27 = vadd.f32 %v6008_v6, %v6032_v34  ;;  %v6236_v59 = vpop.f32.mrf.mxu0 }
 0x1e3   : > { %v1452_v20 = vadd.f32 %v5923_v11, %v6110_v21  ;;  %v3203_v42 = vmax.f32 %v2987_v46, 0.0  ;;  %v1647_v5 = vmax.f32 %v1449_v19, 0.0  ;;  %v2990_v61 = vadd.f32 %v6008_v6, %v6530_v8 }
 0x1e4   : > { %v6213_v10 = vsel %vm2082_vm13, %v3635_v16, %v6145_v35  ;;  %v6217_v39 = vsel %vm2084_vm14, %v2075_v50, %v6149_v22  ;;  %v1935_v35 = vsel %vm1671_vm10, %v1645_v32, 0.0  ;;  %v3479_v63 = vrot.slane %v3478_v36, 4  ;;  %v6248_v43 = vpop.f32.mrf.mxu0 }
 0x1e5   : > { %v1457_v22 = vadd.f32 %v5923_v11, %v6067_v51  ;;  %v3202_v29 = vmax.f32 %v2982_v27, 0.0  ;;  %v1648_v34 = vmax.f32 %v1452_v20, 0.0  ;;  %v1646_v60 = vmax.f32 %v1444_v41, 0.0 }
 0x1e6   : > { %v3480_v4 = vadd.f32 %v3479_v63, %v3478_v36  ;;  %v3398_v21 = vadd.f32 %v3397_v62, %v3396_v13  ;;  %v1936_v25 = vadd.f32 %v1935_v35, %v1934_v0  ;;  %v3485_v55 = vsel %vm1671_vm10, %v3201_v57, 0.0  ;;  %v6251_v57 = vpop.f32.mrf.mxu1 }
 0x1e7   : > { %v3486_v12 = vsel %vm1671_vm10, %v3202_v29, 0.0  ;;  %v3488_v51 = vsel %vm1671_vm10, %v3203_v42, 0.0  ;;  %v1649_v53 = vmax.f32 %v1457_v22, 0.0  ;;  %v1945_v46 = vsel %vm1671_vm10, %v1647_v5, 0.0 }
 0x1e8   : > { %v3481_v32 = vrot.slane %v3480_v4, 2  ;;  %v3487_v44 = vadd.f32 %v3486_v12, %v3485_v55  ;;  %v3204_v9 = vmax.f32 %v2990_v61, 0.0  ;;  %v1946_v1 = vsel %vm1671_vm10, %v1648_v34, 0.0  ;;  %v6260_v61 = vpop.f32.mrf.mxu0 }
 0x1e9   : > { %v2995_v13 = vadd.f32 %v6008_v6, %v6063_v2  ;;  %v1937_v16 = vsel %vm1671_vm10, %v1646_v60, 0.0  ;;  %v1460_v62 = vadd.f32 %v5923_v11, %v6101_v3  ;;  %v3399_v19 = vrot.slane %v3398_v21, 1 }
 0x1ea   : > { %v3482_v50 = vadd.f32 %v3481_v32, %v3480_v4  ;;  %v3489_v49 = vadd.f32 %v3488_v51, %v3487_v44  ;;  %v1938_v28 = vadd.f32 %v1937_v16, %v1936_v25  ;;  %v1948_v36 = vsel %vm1671_vm10, %v1649_v53, 0.0  ;;  %v6266_v4 = vpop.f32.mrf.mxu1 }
 0x1eb   : > { %v1947_v0 = vadd.f32 %v1946_v1, %v1945_v46  ;;  %v3490_v27 = vsel %vm1671_vm10, %v3204_v9, 0.0  ;;  %v3205_v2 = vmax.f32 %v2995_v13, 0.0  ;;  %v1465_v20 = vadd.f32 %v5923_v11, %v6137_v14  ;;  %v6279_v9 = vpop.f32.mrf.mxu0 }
 0x1ec   : > { %v3483_v41 = vrot.slane %v3482_v50, 1  ;;  %v2998_v35 = vadd.f32 %v6008_v6, %v6099_v33  ;;  %v3491_v3 = vadd.f32 %v3490_v27, %v3489_v49  ;;  %v1939_v42 = vrot.slane %v1938_v28, 4  ;;  %v6283_v16 = vpop.f32.mrf.mxu1 }
 0x1ed   : > { %v1650_v22 = vmax.f32 %v1460_v62, 0.0  ;;  %v3003_v5 = vadd.f32 %v6008_v6, %v6048_v30  ;;  %v6262_v29 = vadd.f32 %v3399_v19, %v3398_v21  ;;  %v1949_v60 = vadd.f32 %v1948_v36, %v1947_v0 }
 0x1ee   : > { %v3484_v63 = vadd.f32 %v3483_v41, %v3482_v50  ;;  %v3206_v8 = vmax.f32 %v2998_v35, 0.0  ;;  %v1473_v14 = vadd.f32 %v5923_v11, %v6126_v18  ;;  %v3492_v33 = vsel %vm1671_vm10, %v3205_v2, 0.0  ;;  %v6298_v2 = vpop.f32.mrf.mxu0 }
 0x1ef   : > { %v1651_v25 = vmax.f32 %v1465_v20, 0.0  ;;  %v1468_v55 = vadd.f32 %v5923_v11, %v6171_v40  ;;  %v1481_v30 = vadd.f32 %v5923_v11, %v6194_v45  ;;  %v3493_v32 = vadd.f32 %v3492_v33, %v3491_v3 }
 0x1f0   : > { %v3580_v34 = vmul.f32 0.015625, %v3484_v63  ;;  %v1489_v21 = vadd.f32 %v5923_v11, %v6181_v38  ;;  %v3011_v51 = vadd.f32 %v6008_v6, %v6122_v58  ;;  %v1940_v18 = vadd.f32 %v1939_v42, %v1938_v28  ;;  %v4248_v63 = vpop.f32.mrf.mxu1  ;;  %v6311_v33 = vpop.f32.mrf.mxu0 }
 0x1f1   : > { %v1950_v53 = vsel %vm1671_vm10, %v1650_v22, 0.0  ;;  %v3207_v44 = vmax.f32 %v3003_v5, 0.0  ;;  %v3494_v46 = vsel %vm1671_vm10, %v3206_v8, 0.0  ;;  %v1653_v1 = vmax.f32 %v1473_v14, 0.0 }
 0x1f2   : > { %v3596_v12 = vpack.c.bf16 %v3580_v34, %v3580_v34  ;;  %v1951_v13 = vadd.f32 %v1950_v53, %v1949_v60  ;;  %v3006_v45 = vadd.f32 %v6008_v6, %v6082_v47  ;;  %v1952_v38 = vsel %vm1671_vm10, %v1651_v25, 0.0 }
 0x1f3   : > { %v1652_v50 = vmax.f32 %v1468_v55, 0.0  ;;  %v3019_v58 = vadd.f32 %v6008_v6, %v6108_v56  ;;  %v1655_v49 = vmax.f32 %v1481_v30, 0.0  ;;  %v3495_v62 = vadd.f32 %v3494_v46, %v3493_v32  ;;  %v1512_v32 = vpop.f32.mrf.mxu1 }
 0x1f4   : > { %v3636_v40 = vunpack.c.l.b16 %v3596_v12  ;;  %v1657_v19 = vmax.f32 %v1489_v21, 0.0  ;;  %v3209_v41 = vmax.f32 %v3011_v51, 0.0  ;;  %v1941_v36 = vrot.slane %v1940_v18, 2 }
 0x1f5   : > { %v1492_v47 = vadd.f32 %v5923_v11, %v6206_v23  ;;  %v3014_v0 = vadd.f32 %v6008_v6, %v6153_v37  ;;  %v1484_v27 = vadd.f32 %v5923_v11, %v6230_v48  ;;  %v3496_v56 = vsel %vm1671_vm10, %v3207_v44, 0.0 }
 0x1f6   : > { %v6290_v28 = vsel %vm2084_vm14, %v3636_v40, %v6213_v10  ;;  %v1953_v20 = vadd.f32 %v1952_v38, %v1951_v13  ;;  %v3208_v10 = vmax.f32 %v3006_v45, 0.0  ;;  %v1476_v35 = vadd.f32 %v5923_v11, %v6157_v54 }
 0x1f7   : > { %v1954_v3 = vsel %vm1671_vm10, %v1652_v50, 0.0  ;;  %v1966_v23 = vsel %vm1671_vm10, %v1655_v49, 0.0  ;;  %v3210_v42 = vmax.f32 %v3014_v0, 0.0  ;;  %v1656_v22 = vmax.f32 %v1484_v27, 0.0  ;;  %v6323_v50 = vpop.f32.mrf.mxu0 }
 0x1f8   : > { %v3497_v37 = vadd.f32 %v3496_v56, %v3495_v62  ;;  %v3211_v5 = vmax.f32 %v3019_v58, 0.0  ;;  %v1969_v48 = vsel %vm1671_vm10, %v1657_v19, 0.0  ;;  %v3506_v8 = vsel %vm1671_vm10, %v3209_v41, 0.0  ;;  %v4249_v19 = vpop.f32.mrf.mxu1 }
 0x1f9   : > { %v3022_v34 = vadd.f32 %v6008_v6, %v6135_v31  ;;  %v1658_v60 = vmax.f32 %v1492_v47, 0.0  ;;  %v3507_v14 = vsel %vm1671_vm10, %v3210_v42, 0.0  ;;  %v1967_v54 = vsel %vm1671_vm10, %v1656_v22, 0.0 }
 0x1fa   : > { %v1956_v25 = vsel %vm1671_vm10, %v1653_v1, 0.0  ;;  %v1955_v55 = vadd.f32 %v1954_v3, %v1953_v20  ;;  %v3508_v30 = vadd.f32 %v3507_v14, %v3506_v8  ;;  %v1968_v12 = vadd.f32 %v1967_v54, %v1966_v23  ;;  %v1515_v22 = vpop.f32.mrf.mxu1 }
 0x1fb   : > { %v1942_v21 = vadd.f32 %v1941_v36, %v1940_v18  ;;  %v3498_v51 = vsel %vm1671_vm10, %v3208_v10, 0.0  ;;  %v1654_v53 = vmax.f32 %v1476_v35, 0.0  ;;  %v1497_v31 = vadd.f32 %v5923_v11, %v6251_v57  ;;  %v6337_v10 = vpop.f32.mrf.mxu0 }
 0x1fc   : > { %v3499_v44 = vadd.f32 %v3498_v51, %v3497_v37  ;;  %v3509_v46 = vsel %vm1671_vm10, %v3211_v5, 0.0  ;;  %v1970_v40 = vadd.f32 %v1969_v48, %v1968_v12  ;;  %v1505_v13 = vadd.f32 %v5923_v11, %v6239_v52 }
 0x1fd   : > { %v3212_v45 = vmax.f32 %v3022_v34, 0.0  ;;  %v1971_v1 = vsel %vm1671_vm10, %v1658_v60, 0.0  ;;  %v3027_v38 = vadd.f32 %v6008_v6, %v6177_v24  ;;  %v1659_v18 = vmax.f32 %v1497_v31, 0.0 }
 0x1fe   : > { %v6326_v58 = vmul.f32 0.015625, %v6262_v29  ;;  %v1957_v57 = vadd.f32 %v1956_v25, %v1955_v55  ;;  %v3510_v49 = vadd.f32 %v3509_v46, %v3508_v30  ;;  %v1972_v62 = vadd.f32 %v1971_v1, %v1970_v40  ;;  %v6354_v25 = vpop.f32.mrf.mxu0 }
 0x1ff   : > { %v1943_v41 = vrot.slane %v1942_v21, 1  ;;  %v1973_v36 = vsel %vm1671_vm10, %v1659_v18, 0.0  ;;  %v1958_v52 = vsel %vm1671_vm10, %v1654_v53, 0.0  ;;  %v3500_v47 = vrot.slane %v3499_v44, 4 }
 0x200   : > { %v1661_v0 = vmax.f32 %v1505_v13, 0.0  ;;  %v1508_v24 = vadd.f32 %v5923_v11, %v6266_v4  ;;  %v3511_v27 = vsel %vm1671_vm10, %v3212_v45, 0.0  ;;  %v3213_v56 = vmax.f32 %v3027_v38, 0.0  ;;  %v6368_v38 = vpop.f32.mrf.mxu0 }
 0x201   : > { %v3030_v29 = vadd.f32 %v6008_v6, %v6203_v15  ;;  %v1500_v20 = vadd.f32 %v5923_v11, %v6283_v16  ;;  %v3592_v35 = vpack.c.bf16 %v6326_v58, %v6326_v58  ;;  %v1959_v3 = vadd.f32 %v1958_v52, %v1957_v57 }
 0x202   : > { %v3512_v23 = vadd.f32 %v3511_v27, %v3510_v49  ;;  %v1974_v42 = vadd.f32 %v1973_v36, %v1972_v62  ;;  %v3035_v4 = vadd.f32 %v6008_v6, %v6169_v26  ;;  %v1513_v48 = vadd.f32 %v5923_v11, %v1512_v32 }
 0x203   : > { %v3214_v37 = vmax.f32 %v3030_v29, 0.0  ;;  %v1660_v5 = vmax.f32 %v1500_v20, 0.0  ;;  %v6344_v15 = vadd.f32 %v1943_v41, %v1942_v21  ;;  %v1662_v8 = vmax.f32 %v1508_v24, 0.0  ;;  %v3077_v29 = vpop.f32.mrf.mxu0 }
 0x204   : > { %v1521_v16 = vadd.f32 %v5923_v11, %v4248_v63  ;;  %v3043_v34 = vadd.f32 %v6008_v6, %v6236_v59  ;;  %v6349_v60 = vadd.f32 %v3500_v47, %v3499_v44  ;;  %v1977_v14 = vsel %vm1671_vm10, %v1661_v0, 0.0  ;;  %v4252_v63 = vpop.f32.mrf.mxu1 }
 0x205   : > { %v3513_v54 = vsel %vm1671_vm10, %v3213_v56, 0.0  ;;  %v1975_v26 = vsel %vm1671_vm10, %v1660_v5, 0.0  ;;  %v1960_v55 = vrot.slane %v1959_v3, 4  ;;  %v3038_v12 = vadd.f32 %v6008_v6, %v6191_v7 }
 0x206   : > { %v3514_v30 = vadd.f32 %v3513_v54, %v3512_v23  ;;  %v1976_v32 = vadd.f32 %v1975_v26, %v1974_v42  ;;  %v3215_v21 = vmax.f32 %v3035_v4, 0.0  ;;  %v3515_v59 = vsel %vm1671_vm10, %v3214_v37, 0.0  ;;  %v1528_v62 = vpop.f32.mrf.mxu1 }
 0x207   : > { %v3051_v51 = vadd.f32 %v6008_v6, %v6225_v17  ;;  %v1663_v53 = vmax.f32 %v1513_v48, 0.0  ;;  %v1979_v31 = vsel %vm1671_vm10, %v1662_v8, 0.0  ;;  %v1665_v46 = vmax.f32 %v1521_v16, 0.0  ;;  %v4424_v48 = vld [vmem:[%s6475_s6] ss:$0 sm:$0xff] }
 0x208   : > { %v1978_v44 = vadd.f32 %v1977_v14, %v1976_v32  ;;  %v3217_v40 = vmax.f32 %v3043_v34, 0.0  ;;  %v3054_v13 = vadd.f32 %v6008_v6, %v6248_v43  ;;  %v1524_v45 = vadd.f32 %v5923_v11, %v4249_v19  ;;  %v4390_v32 = vpop.f32.mrf.mxu0 }
 0x209   : > { %v3046_v7 = vadd.f32 %v6008_v6, %v6260_v61  ;;  %v1516_v1 = vadd.f32 %v5923_v11, %v1515_v22  ;;  %v1961_v18 = vadd.f32 %v1960_v55, %v1959_v3  ;;  %v3216_v17 = vmax.f32 %v3038_v12, 0.0  ;;  %v4253_v22 = vpop.f32.mrf.mxu1 }
 0x20a   : > { %v3516_v57 = vadd.f32 %v3515_v59, %v3514_v30  ;;  %v1980_v49 = vadd.f32 %v1979_v31, %v1978_v44  ;;  %v3219_v41 = vmax.f32 %v3051_v51, 0.0  ;;  %v1987_v36 = vsel %vm1671_vm10, %v1663_v53, 0.0 }
 0x20b   : > { %v3218_v52 = vmax.f32 %v3046_v7, 0.0  ;;  %v1664_v47 = vmax.f32 %v1516_v1, 0.0  ;;  %v3517_v43 = vsel %vm1671_vm10, %v3215_v21, 0.0  ;;  %v1990_v0 = vsel %vm1671_vm10, %v1665_v46, 0.0  ;;  %v1531_v53 = vpop.f32.mrf.mxu1 }
 0x20c   : > { %v1981_v19 = vrot.slane %v1980_v49, 4  ;;  %v3527_v61 = vsel %vm1671_vm10, %v3217_v40, 0.0  ;;  %v3220_v11 = vmax.f32 %v3054_v13, 0.0  ;;  %v1666_v24 = vmax.f32 %v1524_v45, 0.0 }
 0x20d   : > { %v3528_v27 = vsel %vm1671_vm10, %v3218_v52, 0.0  ;;  %v1988_v56 = vsel %vm1671_vm10, %v1664_v47, 0.0  ;;  %v1962_v20 = vrot.slane %v1961_v18, 2  ;;  %v3518_v3 = vadd.f32 %v3517_v43, %v3516_v57 }
 0x20e   : > { %v3529_v23 = vadd.f32 %v3528_v27, %v3527_v61  ;;  %v1989_v42 = vadd.f32 %v1988_v56, %v1987_v36  ;;  %v3519_v4 = vsel %vm1671_vm10, %v3216_v17, 0.0  ;;  %v3530_v37 = vsel %vm1671_vm10, %v3219_v41, 0.0  ;;  %v3090_v17 = vpop.f32.mrf.mxu0 }
 0x20f   : > { %v3059_v5 = vadd.f32 %v6008_v6, %v6298_v2  ;;  %v1529_v8 = vadd.f32 %v4424_v48, %v1528_v62  ;;  %v1982_v16 = vadd.f32 %v1981_v19, %v1980_v49  ;;  %v1537_v54 = vadd.f32 %v4424_v48, %v4252_v63 }
 0x210   : > { %v3531_v34 = vadd.f32 %v3530_v37, %v3529_v23  ;;  %v1991_v14 = vadd.f32 %v1990_v0, %v1989_v42  ;;  %v3532_v26 = vsel %vm1671_vm10, %v3220_v11, 0.0  ;;  %v1992_v55 = vsel %vm1671_vm10, %v1666_v24, 0.0  ;;  %v4391_v11 = vpop.f32.mrf.mxu0 }
 0x211   : > { %v3221_v30 = vmax.f32 %v3059_v5, 0.0  ;;  %v1667_v12 = vmax.f32 %v1529_v8, 0.0  ;;  %v6388_v2 = vunpack.c.l.b16 %v3592_v35  ;;  %v3520_v21 = vadd.f32 %v3519_v4, %v3518_v3 }
 0x212   : > { %v3533_v59 = vadd.f32 %v3532_v26, %v3531_v34  ;;  %v1993_v51 = vadd.f32 %v1992_v55, %v1991_v14  ;;  %v6391_v31 = vmul.f32 0.015625, %v6344_v15  ;;  %v3502_v63 = vrot.slane %v6349_v60, 2 }
 0x213   : > { %v3067_v44 = vadd.f32 %v6008_v6, %v6279_v9  ;;  %v1994_v46 = vsel %vm1671_vm10, %v1667_v12, 0.0  ;;  %v1983_v40 = vrot.slane %v1982_v16, 2  ;;  %v1669_v13 = vmax.f32 %v1537_v54, 0.0 }
 0x214   : > { %v3070_v58 = vadd.f32 %v6008_v6, %v6311_v33  ;;  %v1540_v35 = vadd.f32 %v4424_v48, %v4253_v22  ;;  %v1963_v45 = vadd.f32 %v1962_v20, %v1961_v18  ;;  %v3534_v7 = vsel %vm1671_vm10, %v3221_v30, 0.0 }
 0x215   : > { %v3062_v15 = vadd.f32 %v6008_v6, %v6323_v50  ;;  %v1532_v1 = vadd.f32 %v4424_v48, %v1531_v53  ;;  %v3521_v57 = vrot.slane %v3520_v21, 4  ;;  %v3535_v49 = vadd.f32 %v3534_v7, %v3533_v59 }
 0x216   : > { %v1995_v62 = vadd.f32 %v1994_v46, %v1993_v51  ;;  %v3075_v9 = vadd.f32 %v6008_v6, %v6354_v25  ;;  %v3223_v41 = vmax.f32 %v3067_v44, 0.0  ;;  %v3083_v33 = vadd.f32 %v6008_v6, %v6337_v10 }
 0x217   : > { %v3222_v36 = vmax.f32 %v3062_v15, 0.0  ;;  %v1668_v52 = vmax.f32 %v1532_v1, 0.0  ;;  %v1984_v18 = vadd.f32 %v1983_v40, %v1982_v16  ;;  %v1998_v47 = vsel %vm1671_vm10, %v1669_v13, 0.0  ;;  %v3093_v16 = vpop.f32.mrf.mxu0  ;;  %v6531_v15 = vld [vmem:[#allocation3_spill] sm:$0xff] }
 0x218   : > { %v3224_v43 = vmax.f32 %v3070_v58, 0.0  ;;  %v1670_v19 = vmax.f32 %v1540_v35, 0.0  ;;  %v3086_v61 = vadd.f32 %v6008_v6, %v6368_v38  ;;  %v3078_v25 = vadd.f32 %v6008_v6, %v3077_v29  ;;  %v4425_v29 = vld [vmem:[%s6479_s10] ss:$0 sm:$0xff] }
 0x219   : > { %v3536_v50 = vsel %vm1671_vm10, %v3222_v36, 0.0  ;;  %v1996_v0 = vsel %vm1671_vm10, %v1668_v52, 0.0  ;;  %v1964_v24 = vrot.slane %v1963_v45, 1  ;;  %v3225_v20 = vmax.f32 %v3075_v9, 0.0 }
 0x21a   : > { %v3537_v27 = vadd.f32 %v3536_v50, %v3535_v49  ;;  %v1997_v56 = vadd.f32 %v1996_v0, %v1995_v62  ;;  %v3522_v10 = vadd.f32 %v3521_v57, %v3520_v21  ;;  %v3538_v3 = vsel %vm1671_vm10, %v3223_v41, 0.0 }
 0x21b   : > { %v3227_v23 = vmax.f32 %v3083_v33, 0.0  ;;  %v3226_v42 = vmax.f32 %v3078_v25, 0.0  ;;  %v1985_v22 = vrot.slane %v1984_v18, 1  ;;  %v3540_v4 = vsel %vm1671_vm10, %v3224_v43, 0.0 }
 0x21c   : > { %v3539_v37 = vadd.f32 %v3538_v3, %v3537_v27  ;;  %v1999_v5 = vadd.f32 %v1998_v47, %v1997_v56  ;;  %v2000_v48 = vsel %vm1671_vm10, %v1670_v19, 0.0  ;;  %v3228_v38 = vmax.f32 %v3086_v61, 0.0 }
 0x21d   : > { %v3549_v6 = vsel %vm1671_vm10, %v3226_v42, 0.0  ;;  %v3091_v8 = vadd.f32 %v4425_v29, %v3090_v17  ;;  %v1965_v34 = vadd.f32 %v1964_v24, %v1963_v45  ;;  %v3548_v26 = vsel %vm1671_vm10, %v3225_v20, 0.0 }
 0x21e   : > { %v3541_v14 = vadd.f32 %v3540_v4, %v3539_v37  ;;  %v2001_v54 = vadd.f32 %v2000_v48, %v1999_v5  ;;  %v3523_v55 = vrot.slane %v3522_v10, 2  ;;  %v3551_v30 = vsel %vm1671_vm10, %v3227_v23, 0.0 }
 0x21f   : > { %v3550_v12 = vadd.f32 %v3549_v6, %v3548_v26  ;;  %v3099_v21 = vadd.f32 %v4425_v29, %v4390_v32  ;;  %v3229_v53 = vmax.f32 %v3091_v8, 0.0  ;;  %v3094_v44 = vadd.f32 %v4425_v29, %v3093_v16 }
 0x220   : > { %v3542_v59 = vrot.slane %v3541_v14, 4  ;;  %v2002_v51 = vrot.slane %v2001_v54, 4  ;;  %v1986_v46 = vadd.f32 %v1985_v22, %v1984_v18  ;;  %v3553_v40 = vsel %vm1671_vm10, %v3228_v38, 0.0 }
 0x221   : > { %v3552_v13 = vadd.f32 %v3551_v30, %v3550_v12  ;;  %v3102_v58 = vadd.f32 %v4425_v29, %v4391_v11  ;;  %v3230_v7 = vmax.f32 %v3094_v44, 0.0  ;;  %v6425_v1 = vsel %vm2092_vm2, %v6388_v2, %v6531_v15  ;;  %v6532_v12 = vld [vmem:[#allocation2_spill] sm:$0xff] }
 0x222   : > { %v3543_v35 = vadd.f32 %v3542_v59, %v3541_v14  ;;  %v2003_v45 = vadd.f32 %v2002_v51, %v2001_v54  ;;  %v3503_v32 = vadd.f32 %v3502_v63, %v6349_v60  ;;  %v2021_v17 = vmul.f32 0.015625, %v1965_v34  ;;  %v3601_v34 = vld [vmem:[%s6480_s11] sm:$0xf] }
 0x223   : > { %v3231_v57 = vmax.f32 %v3099_v21, 0.0  ;;  %v3554_v49 = vadd.f32 %v3553_v40, %v3552_v13  ;;  %v3555_v41 = vsel %vm1671_vm10, %v3229_v53, 0.0  ;;  %v3557_v36 = vsel %vm1671_vm10, %v3230_v7, 0.0 }
 0x224   : > { %v3544_v62 = vrot.slane %v3543_v35, 2  ;;  %v2004_v9 = vrot.slane %v2003_v45, 2  ;;  %v3524_v52 = vadd.f32 %v3523_v55, %v3522_v10  ;;  %v2022_v33 = vmul.f32 0.015625, %v1986_v46 }
 0x225   : > { %v3556_v18 = vadd.f32 %v3555_v41, %v3554_v49  ;;  %v3232_v2 = vmax.f32 %v3102_v58, 0.0  ;;  %v2036_v19 = vpack.c.bf16 %v6391_v31, %v6391_v31  ;;  %v3504_v60 = vrot.slane %v3503_v32, 1  ;;  %v3896_v41 = vld [vmem:[%s6477_s8] ss:$0 sm:$0xff] }
 0x226   : > { %v3545_v47 = vadd.f32 %v3544_v62, %v3543_v35  ;;  %v2005_v43 = vadd.f32 %v2004_v9, %v2003_v45  ;;  %v2037_v63 = vpack.c.bf16 %v2021_v17, %v2021_v17  ;;  %v3559_v61 = vsel %vm1671_vm10, %v3231_v57, 0.0 }
 0x227   : > { %v3558_v50 = vadd.f32 %v3557_v36, %v3556_v18  ;;  %v3525_v25 = vrot.slane %v3524_v52, 1  ;;  %v2038_v11 = vpack.c.bf16 %v2022_v33, %v2022_v33  ;;  %v3561_v20 = vsel %vm1671_vm10, %v3232_v2, 0.0 }
 0x228   : > { %v2006_v0 = vrot.slane %v2005_v43, 1  ;;  %v3546_v27 = vrot.slane %v3545_v47, 1  ;;  %v2076_v10 = vunpack.c.l.b16 %v2036_v19  ;;  %v3505_v23 = vadd.f32 %v3504_v60, %v3503_v32 }
 0x229   : > { %v3560_v24 = vadd.f32 %v3559_v61, %v3558_v50  ;;  %v2077_v42 = vunpack.c.l.b16 %v2037_v63  ;;  %v3526_v4 = vadd.f32 %v3525_v25, %v3524_v52  ;;  %v2078_v31 = vunpack.c.l.b16 %v2038_v11 }
 0x22a   : > { %v2007_v56 = vadd.f32 %v2006_v0, %v2005_v43  ;;  %v3547_v5 = vadd.f32 %v3546_v27, %v3545_v47  ;;  %v2097_v38 = vsel %vm2086_vm15, %v2076_v10, %v6217_v39  ;;  %v3581_v29 = vmul.f32 0.015625, %v3505_v23 }
 0x22b   : > { %v3562_v3 = vadd.f32 %v3561_v20, %v3560_v24  ;;  %v2098_v8 = vsel %vm2088_vm0, %v2077_v42, %v2097_v38  ;;  %v3582_v14 = vmul.f32 0.015625, %v3526_v4  ;;  %v3660_v39 = vsel %vm2105_vm9, %v3601_v34, 0 }
 0x22c   : > { %v2023_v22 = vmul.f32 0.015625, %v2007_v56  ;;  %v2099_v54 = vsel %vm2090_vm1, %v2078_v31, %v2098_v8  ;;  %v3583_v55 = vmul.f32 0.015625, %v3547_v5  ;;  %v3597_v51 = vpack.c.bf16 %v3581_v29, %v3581_v29 }
 0x22d   : > { %v3563_v37 = vrot.slane %v3562_v3, 4  ;;  %v3598_v53 = vpack.c.bf16 %v3582_v14, %v3582_v14  ;;  %v6533_v40 = vmov 0.0  }
 0x22e   : > { %v2039_v48 = vpack.c.bf16 %v2023_v22, %v2023_v22  ;;  %v3599_v46 = vpack.c.bf16 %v3583_v55, %v3583_v55  ;;  %v3637_v58 = vunpack.c.l.b16 %v3597_v51 }
 0x22f   : > { %v3564_v6 = vadd.f32 %v3563_v37, %v3562_v3  ;;  %v3638_v35 = vunpack.c.l.b16 %v3598_v53 }
 0x230   : > { %v2079_v16 = vunpack.c.l.b16 %v2039_v48  ;;  %v3639_v7 = vunpack.c.l.b16 %v3599_v46  ;;  %v3651_v32 = vsel %vm2086_vm15, %v3637_v58, %v6290_v28 }
 0x231   : > { %v3565_v26 = vrot.slane %v3564_v6, 2  ;;  %v3652_v17 = vsel %vm2088_vm0, %v3638_v35, %v3651_v32 }
 0x232   : > { %v2100_v30 = vsel %vm2092_vm2, %v2079_v16, %v2099_v54  ;;  %v3653_v49 = vsel %vm2090_vm1, %v3639_v7, %v3652_v17 }
 0x233   : > { %v2101_v21 = vpack.c.b16 %v2100_v30, %v6532_v12  ;;  %v3566_v59 = vadd.f32 %v3565_v26, %v3564_v6 }
 0x235   : > { %v3567_v44 = vrot.slane %v3566_v59, 1  ;;  %4257 = vmatmul.mubr.msk.bf16.vlgmr.msra.gmra.mxu1 %vm1671_vm10, %v2101_v21 }
 0x236   : > { %4393 = vmatpush3.bf16.msra.mxu1 %v3660_v39  ;;  %4394 = vmatprep.mubr.msk.bf16.mxu1 %vm4436_vm4, %v6533_v40  ;;  %vm3727_vm4 = vcmask 654720  }
 0x237   : > { %v3568_v13 = vadd.f32 %v3567_v44, %v3566_v59 }
 0x239   : > { %v3584_v45 = vmul.f32 0.015625, %v3568_v13 }
 0x23b   : > { %v3600_v15 = vpack.c.bf16 %v3584_v45, %v3584_v45 }
 0x23d   : > { %v3640_v57 = vunpack.c.l.b16 %v3600_v15 }
 0x23f   : > { %v3654_v62 = vsel %vm2092_vm2, %v3640_v57, %v3653_v49 }
 0x240   : > { %v3655_v9 = vpack.c.b16 %v3654_v62, %v6425_v1  ;;  %v3965_v1 = vld [vmem:[%s6481_s12] ss:$0 sm:$0xff] }
 0x242   : > { %4395 = vmatmul.mubr.msk.bf16.vlgmr.msra.gmra.mxu1 %vm1671_vm10, %v3655_v9 }
 0x2f5   : > { %v2143_v36 = vpop.f32.mrf.mxu1 }
 0x2f6   : > { %v2144_v52 = vadd.f32 %v3896_v41, %v2143_v36 }
 0x2f7   : > { %v4258_v33 = vpop.f32.mrf.mxu1 }
 0x2f8   : > { %v2150_v18 = vmax.f32 %v2144_v52, 0.0 }
 0x2f9   : > { %v2146_v28 = vpop.f32.mrf.mxu1 }
 0x2fa   : > { %v2147_v47 = vadd.f32 %v3896_v41, %v2146_v28  ;;  %3710 = vrot.lane.b32.xlu0 %v2150_v18, %s4437_s29 }
 0x2fb   : > { %v4259_v43 = vpop.f32.mrf.mxu1 }
 0x2fc   : > { %v2151_v2 = vmax.f32 %v2147_v47, 0.0 }
 0x2fe   : > { %3712 = vrot.lane.b32.xlu0 %v2151_v2, %s4437_s29 }
 0x302   : > { %v3696_v19 = vpop.f32.mrf.mxu1 }
 0x303   : > { %v3697_v50 = vadd.f32 %v3965_v1, %v3696_v19 }
 0x304   : > { %v4396_v60 = vpop.f32.mrf.mxu1 }
 0x305   : > { %v3703_v63 = vmax.f32 %v3697_v50, 0.0 }
 0x306   : > { %v3699_v0 = vpop.f32.mrf.mxu1 }
 0x307   : > { %v3700_v61 = vadd.f32 %v3965_v1, %v3699_v0  ;;  %3721 = vrot.lane.b32.xlu1 %v3703_v63, %s4438_s23 }
 0x308   : > { %v4397_v25 = vpop.f32.mrf.mxu1 }
 0x309   : > { %v3704_v11 = vmax.f32 %v3700_v61, 0.0 }
 0x30b   : > { %3723 = vrot.lane.b32.xlu1 %v3704_v11, %s4438_s23 }
 0x36c   : > { %v3711_v24 = vpop.permute.xlu0 %3710 }
 0x36d   : > { %3717 = vst.msk [vmem:[%s4994_s20] sm:$0xff] %vm3716_vm3, %v3711_v24 }
 0x370   : > { %v3713_v27 = vpop.permute.xlu0 %3712 }
 0x371   : > { %3718 = vst.msk [vmem:[%s4994_s20 + $0x8] sm:$0xff] %vm3716_vm3, %v3713_v27 }
 0x379   : > { %v3722_v56 = vpop.permute.xlu1 %3721 }
 0x37a   : > { %3728 = vst.msk [vmem:[%s4994_s20] sm:$0xff] %vm3727_vm4, %v3722_v56 }
 0x37d   : > { %v3724_v20 = vpop.permute.xlu1 %3723 }
 0x37e   : > { %3729 = vst.msk [vmem:[%s4994_s20 + $0x8] sm:$0xff] %vm3727_vm4, %v3724_v20 }
 0x37f PF: > { %s23_s25 = sadd.s32 1, %s4432_s25  }
 0x380   : > { %p20_p5 = scmp.ge.s32.totalorder %s23_s25, 4  }
 0x382   :  { %22 = sbr.rel (!%p20_p5) target bundleno = 1 (0x1), region = 108 }

// kernel: cslr_forward.3
= control target key start
LH: loop header
LB: loop body
LE: loop exit
PB: predicated region body
PF: predicated region fallthrough
CT: control target
= control target key end

     0   :  { %s6917_s0 = inlined_call_operand.vmem [shape: f32[2,2,10,80], index: 0, kind: input, shape index: {}]   ;;  %s6918_s1 = inlined_call_operand.vmem [shape: f32[8,32], index: 1, kind: input, shape index: {}]   ;;  %s6919_s2 = inlined_call_operand.vmem [shape: bf16[3,80,32], index: 2, kind: input, shape index: {}]   ;;  %s6920_s3 = inlined_call_operand.vmem [shape: f32[1,32], index: 3, kind: input, shape index: {}]   ;;  %s6921_s4 = inlined_call_operand.vmem [shape: bf16[32,32], index: 4, kind: input, shape index: {}]   ;;  %s6922_s5 = inlined_call_operand.vmem [shape: bf16[32,32], index: 5, kind: input, shape index: {}]   ;;  %s6923_s6 = inlined_call_operand.vmem [shape: f32[1,32], index: 6, kind: input, shape index: {}]   ;;  %s6924_s7 = inlined_call_operand.vmem [shape: bf16[2,3,4,32,8], index: 7, kind: input, shape index: {}]   ;;  %s6925_s8 = inlined_call_operand.vmem [shape: f32[2,3,4,1,8], index: 8, kind: input, shape index: {}]   ;;  %s6926_s9 = inlined_call_operand.vmem [shape: bf16[2,4,8,32], index: 9, kind: input, shape index: {}]   ;;  %s6927_s10 = inlined_call_operand.vmem [shape: f32[2,1,32], index: 10, kind: input, shape index: {}]   ;;  %s6928_s11 = inlined_call_operand.vmem [shape: f32[2,1,32], index: 11, kind: input, shape index: {}]   ;;  %s6929_s12 = inlined_call_operand.vmem [shape: f32[2,1,32], index: 12, kind: input, shape index: {}]   ;;  %s6930_s13 = inlined_call_operand.vmem [shape: bf16[2,32,64], index: 13, kind: input, shape index: {}]   ;;  %s6931_s14 = inlined_call_operand.vmem [shape: f32[2,1,64], index: 14, kind: input, shape index: {}]   ;;  %s6932_s15 = inlined_call_operand.vmem [shape: bf16[2,64,32], index: 15, kind: input, shape index: {}]   ;;  %s6933_s16 = inlined_call_operand.vmem [shape: f32[2,1,32], index: 16, kind: input, shape index: {}]   ;;  %s6934_s17 = inlined_call_operand.vmem [shape: f32[2,1,32], index: 17, kind: input, shape index: {}]   ;;  %s6935_s18 = inlined_call_operand.vmem [shape: f32[2,1,32], index: 18, kind: input, shape index: {}]   ;;  %s6936_s19 = inlined_call_operand.vmem [shape: bf16[32,16], index: 19, kind: input, shape index: {}]   ;;  %s6937_s20 = inlined_call_operand.vmem [shape: f32[1,16], index: 20, kind: input, shape index: {}]   ;;  %s6938_s21 = inlined_call_operand.hbm [shape: f32[2,8,16], index: 21, kind: output, shape index: {}]  }
   0x1   :  { %6950 = sst [smem:[#allocation11_spill]] %s6917_s0 }
   0x2   :  { %6951 = sst [smem:[#allocation12_spill]] %s6918_s1 }
   0x3   :  { %6952 = sst [smem:[#allocation13_spill]] %s6919_s2 }
   0x4   :  { %6953 = sst [smem:[#allocation14_spill]] %s6920_s3 }
   0x5   :  { %6954 = sst [smem:[#allocation15_spill]] %s6921_s4 }
   0x6   :  { %6955 = sst [smem:[#allocation16_spill]] %s6922_s5 }
   0x7   :  { %6956 = sst [smem:[#allocation17_spill]] %s6923_s6 }
   0x8   :  { %6957 = sst [smem:[#allocation18_spill]] %s6924_s7 }
   0x9   :  { %6958 = sst [smem:[#allocation19_spill]] %s6925_s8 }
   0xa   :  { %6959 = sst [smem:[#allocation20_spill]] %s6938_s21 }
   0xb   :  { %26 = vsyncpa [#allocation3], 0 }
   0xc   :  { %28 = vsyncpa [#allocation3 + $0x1], 0  ;;  %s6003_s2 = smov 0   ;;  %s6005_s25 = smov 0  }
   0xd   :  { %s6007_s26 = smov 0   ;;  %s6009_s27 = smov 0  }
   0xe LB: > { %6960 = sst [smem:[#allocation5_spill]] %s5876_s2  ;;  %s6024_s3 = sadd.s32 4294967295, %s5888_s27   ;;  %s5888_s27 = sphi %s6009_s27, %s6982_s27   ;;  %s5884_s26 = sphi %s6007_s26, %s6984_s26   ;;  %s5880_s25 = sphi %s6005_s25, %s6986_s25   ;;  %s5876_s2 = sphi %s6003_s2, %s6985_s2  }
   0xf   : > { %6961 = sst [smem:[#allocation6_spill]] %s5884_s26  ;;  %s4639_s28 = sadd.s32 4294967294, %s5888_s27  }
  0x10   : > { %6962 = sst [smem:[#allocation7_spill]] %s5888_s27  ;;  %s6028_s29 = sadd.s32 1, %s5888_s27  }
  0x11   : > { %6963 = sst [smem:[#allocation8_spill]] %s6028_s29  ;;  %s487_s0 = sadd.s32 1, %s5884_s26 }
  0x12   : > { %s484_s4 = ssub.s32 %s5888_s27, %s6028_s29  ;;  %p497_p0 = scmp.ne.s32.totalorder %s5884_s26, %s5880_s25 }
  0x13   : > { %p485_p1 = scmp.eq.s32.totalorder %s484_s4, 0  ;;  %p498_p2 = scmp.eq.s32.totalorder %s6024_s3, 1 }
  0x14   : > { %p503_p3 = scmp.ne.s32.totalorder %s5880_s25, %s5876_s2  ;;  %p504_p4 = scmp.eq.s32.totalorder %s4639_s28, 1 }
  0x15   : > { %s6039_s30 = scalar_select %p485_p1, %s5884_s26, %s487_s0  }
  0x16   : > { %p6041_p5 = por %p498_p2, %p497_p0  ;;  %p6045_p6 = por %p504_p4, %p503_p3 }
  0x17   : > { %6964 = sst [smem:[#allocation9_spill]] %s6039_s30  ;;  %p4642_p7 = scmp.ge.s32.totalorder %s5888_s27, 1 }
  0x18   : > { %s6966_s22 = scalar_select %p6045_p6, 1, 0 }
  0x19   : > { %p590_p8 = scmp.lt.s32.totalorder %s5888_s27, 3 }
  0x1a   : > { %6967 = sst [smem:[#allocation10_spill]] %s6966_s22 }
  0x1b   : > { %p591_p9 = pnand %p4642_p7, %p590_p8 }
  0x1c   : > { %s6968_s24 = sld [smem:[#allocation13_spill]] (!%p591_p9)  ;;  %p650_p10 = scmp.lt.s32.totalorder (!%p591_p9), %s6024_s3, 1 }
  0x1d   : > { %594 = sbr.rel (%p591_p9) target bundleno = 10375 (0x2887), region = 104  ;;  %s6969_s22 = sld [smem:[#allocation11_spill]] (!%p591_p9) }
  0x1e   : > { %s6970_s28 = sld [smem:[#allocation15_spill]] (!%p591_p9)  ;;  %s647_s23 = sand.u32 (!%p591_p9), 1, %s5880_s25  }
  0x1f   : > { %s6971_s1 = sld [smem:[#allocation16_spill]] (!%p591_p9)  ;;  %s4993_s26 = sshll.u32 (!%p591_p9), %s6024_s3, 7 }
  0x20   : > { %s6972_s21 = sld [smem:[#allocation14_spill]] (!%p591_p9) }
  0x21   : > { %s6973_s7 = sld [smem:[#allocation18_spill]] (!%p591_p9) }
  0x22   : > { %v5703_v0 = vld [vmem:[%s6968_s24 + $0x48] sm:$0xff]   ;;  %v5890_v1 = vmov 0.0   ;;  %v6059_v2 = vld [vmem:[%s6968_s24 + $0x20] sm:$0xff]   ;;  %vm5891_vm0 = vmmov 0   ;;  %v6072_v4 = vld [vmem:[%s6968_s24 + $0x18] sm:$0xff]   ;;  %s651_s30 = scalar_select %p650_p10, %s6024_s3, 1 }
  0x23   : > { %5178 = vmatprep.subr.bf16.mxu0 %v5890_v1  ;;  %5192 = vmatprep.subr.bf16.mxu1 %v5890_v1  ;;  %v5705_v3 = vld [vmem:[%s6968_s24 + $0x40] sm:$0xff]   ;;  %v5707_v5 = vld [vmem:[%s6968_s24 + $0x38] sm:$0xff]   ;;  %v6086_v6 = vld [vmem:[%s6968_s24 + $0x10] sm:$0xff]   ;;  %vm718_vm1 = vcmask 654336   ;;  %vm1099_vm2 = vcmask 261120   ;;  %s6974_s6 = sld [smem:[#allocation17_spill]] }
  0x24   : > { %5179 = vmatpush3.bf16.msra.mxu0 %v5703_v0  ;;  %5188 = vmatprep.mubr.msk.bf16.mxu0 %vm5891_vm0, %v5890_v1  ;;  %s4996_s4 = sshll.u32 %s651_s30, 5  ;;  %v5709_v7 = vld [vmem:[%s6968_s24 + $0x30] sm:$0xff]   ;;  %v6100_v10 = vld [vmem:[%s6968_s24 + $0x8] sm:$0xff]   ;;  %v6111_v15 = vld [vmem:[%s6968_s24] sm:$0xff]   ;;  %s6976_s8 = sld [smem:[#allocation19_spill]]  ;;  %vm1407_vm3 = vcmask 64512  }
  0x25   : > { %5193 = vmatpush3.bf16.msra.mxu1 %v6059_v2  ;;  %5180 = vmatprep.subr.bf16.mxu0 %v5890_v1  ;;  %s654_s2 = scalar_lea.vmem %s6969_s22, %s4996_s4  ;;  %v5711_v12 = vld [vmem:[%s6968_s24 + $0x28] sm:$0xff]   ;;  %v5713_v18 = vld [vmem:[%s6968_s24 + $0x70] sm:$0xff]   ;;  %v5715_v29 = vld [vmem:[%s6968_s24 + $0x60] sm:$0xff]   ;;  %s6975_s4 = sld [smem:[#allocation12_spill]]  ;;  %vm1471_vm4 = vcmask 1043456   ;;  %vm2768_vm5 = vcmask 523264  }
  0x26   : > { %5194 = vmatprep.subr.bf16.mxu1 %v5890_v1  ;;  %5202 = vmatprep.mubr.msk.bf16.mxu1 %vm5891_vm0, %v5890_v1  ;;  %v656_v8 = vld [vmem:[%s654_s2] sm:$0xff]  ;;  %v657_v9 = vld [vmem:[%s654_s2 + $0x8] sm:$0x3]  ;;  %v6113_v17 = vld [vmem:[%s654_s2 + $0x10] sm:$0xff]  ;;  %vm4551_vm6 = vcmask 130048   ;;  %s6977_s27 = sld [smem:[#allocation20_spill]] }
  0x27   : > { %v680_v11 = vpack.c.bf16 %v657_v9, %v656_v8  ;;  %v4686_v19 = vld [vmem:[%s654_s2 + $0x18] sm:$0x3]  ;;  %v668_v22 = vpack.c.bf16 %v656_v8, %v656_v8  ;;  %v5714_v26 = vld [vmem:[%s6968_s24 + $0x68] sm:$0xff]   ;;  %v5717_v31 = vld [vmem:[%s6968_s24 + $0x50] sm:$0xff]   ;;  %v934_v33 = vpack.c.bf16 %v6113_v17, %v6113_v17  ;;  %s4643_s2 = sshll.u32 %s647_s23, 3 }
  0x28   : > { %5181 = vmatpush3.bf16.msra.mxu0 %v5705_v3  ;;  %v6120_v21 = vpack.c.bf16 %v4686_v19, %v6113_v17  ;;  %v5716_v30 = vld [vmem:[%s6968_s24 + $0x58] sm:$0xff]   ;;  %v5718_v34 = vld [vmem:[%s6970_s28 + $0x8] sm:$0xff]   ;;  %v5719_v35 = vld [vmem:[%s6970_s28] sm:$0xff]   ;;  %s649_s30 = scalar_lea.vmem [#allocation2], %s4643_s2 }
  0x29   : > { %5195 = vmatpush3.bf16.msra.mxu1 %v6072_v4  ;;  %5182 = vmatprep.subr.bf16.mxu0 %v5890_v1  ;;  %v682_v13 = vshrl.u32 %v680_v11, 16  ;;  %v684_v14 = vshll.u32 %v680_v11, 16  ;;  %v847_v23 = vrot.slane %v680_v11, 1  ;;  %v5720_v36 = vld [vmem:[%s6971_s1 + $0x8] sm:$0xff]   ;;  %v5721_v37 = vld [vmem:[%s6971_s1] sm:$0xff]   ;;  %s4580_s29 = sshll.u32 %s649_s30, 4  ;;  %s4581_s29 = int_to_ptr.vmem [resolvable:$true] %s4580_s29 }
  0x2a   : > { %5196 = vmatprep.subr.bf16.mxu1 %v5890_v1  ;;  %v937_v24 = vshrl.u32 %v6120_v21, 16  ;;  %v939_v25 = vshll.u32 %v6120_v21, 16  ;;  %v1030_v28 = vrot.slane %v6120_v21, 1  ;;  %v4684_v48 = vld [vmem:[%s6972_s21] ss:$0 sm:$0xff]  ;;  %v5723_v11 = vld [vmem:[%s6973_s7 + $0x48] sm:$0xff]  }
  0x2b   : > { %v686_v16 = vrot.slane %v684_v14, 1  ;;  %v4696_v19 = vld [vmem:[%s6974_s6] ss:$0 sm:$0xff]  ;;  %s4567_s1 = scalar_lea.sflag [#allocation3], %s647_s23  ;;  %s5828_s6 = scalar_lea.vmem %s4581_s29, 128 }
  0x2c   : > { %5183 = vmatpush3.bf16.msra.mxu0 %v5707_v5  ;;  %v941_v27 = vrot.slane %v939_v25, 1  ;;  %v1206_v21 = vld [vmem:[%s6975_s4] sm:$0xff]  ;;  %s6978_s0 = smov %s6977_s27  ;;  %s4578_s4 = scalar_lea.hbm %s6977_s27, %s4993_s26 }
  0x2d   : > { %5197 = vmatpush3.bf16.msra.mxu1 %v6086_v6  ;;  %5184 = vmatprep.subr.bf16.mxu0 %v5890_v1  ;;  %v687_v20 = vor.u32 %v686_v16, %v682_v13  ;;  %v5725_v13 = vld [vmem:[%s6973_s7 + $0x40] sm:$0xff]   ;;  %p5829_p11 = scmp.ne.s32.totalorder %s4581_s29, %s5828_s6 }
  0x2e   : > { %5198 = vmatprep.subr.bf16.mxu1 %v5890_v1  ;;  %v942_v32 = vor.u32 %v941_v27, %v937_v24  ;;  %v5726_v27 = vld [vmem:[%s6973_s7 + $0x88] sm:$0xff]  }
  0x2f   : > { %p5830_p12 = pnand %p5829_p11, %p6041_p5 }
  0x30   : > { %5185 = vmatpush3.bf16.msra.mxu0 %v5709_v7 }
  0x31   : > { %5199 = vmatpush3.bf16.msra.mxu1 %v6100_v10  ;;  %5186 = vmatprep.subr.bf16.mxu0 %v5890_v1  ;;  %p5831_p13 = pneg %p5830_p12 }
  0x32   : > { %5200 = vmatprep.subr.bf16.mxu1 %v5890_v1 }
  0x34   : > { %5187 = vmatpush3.bf16.msra.mxu0 %v5711_v12 }
  0x35   : > { %5201 = vmatpush3.bf16.msra.mxu1 %v6111_v15  ;;  %5206 = vmatprep.subr.bf16.mxu0 %v5890_v1 }
  0x36   : > { %5220 = vmatprep.subr.bf16.mxu1 %v5890_v1 }
  0x37   : > { %5189 = vmatmul.mubr.msk.bf16.vlgmr.msra.gmra.mxu0 %vm718_vm1, %v687_v20 }
  0x38   : > { %5203 = vmatmul.mubr.msk.bf16.vlgmr.msra.gmra.mxu1 %vm718_vm1, %v668_v22  ;;  %5207 = vmatpush3.bf16.msra.mxu0 %v5713_v18 }
  0x39   : > { %5221 = vmatpush3.bf16.msra.mxu1 %v5703_v0  ;;  %5208 = vmatprep.subr.bf16.mxu0 %v5890_v1 }
  0x3a   : > { %5222 = vmatprep.subr.bf16.mxu1 %v5890_v1  ;;  %5216 = vmatprep.mubr.msk.bf16.mxu0 %vm5891_vm0, %v5890_v1 }
  0x3b   : > { %5230 = vmatprep.mubr.msk.bf16.mxu1 %vm5891_vm0, %v5890_v1 }
  0x3c   : > { %5209 = vmatpush3.bf16.msra.mxu0 %v5714_v26 }
  0x3d   : > { %5223 = vmatpush3.bf16.msra.mxu1 %v5705_v3  ;;  %5210 = vmatprep.subr.bf16.mxu0 %v5890_v1 }
  0x3e   : > { %5224 = vmatprep.subr.bf16.mxu1 %v5890_v1 }
  0x40   : > { %5211 = vmatpush3.bf16.msra.mxu0 %v5715_v29 }
  0x41   : > { %5225 = vmatpush3.bf16.msra.mxu1 %v5707_v5  ;;  %5212 = vmatprep.subr.bf16.mxu0 %v5890_v1 }
  0x42   : > { %5226 = vmatprep.subr.bf16.mxu1 %v5890_v1 }
  0x44   : > { %5213 = vmatpush3.bf16.msra.mxu0 %v5716_v30 }
  0x45   : > { %5227 = vmatpush3.bf16.msra.mxu1 %v5709_v7  ;;  %5214 = vmatprep.subr.bf16.mxu0 %v5890_v1 }
  0x46   : > { %5228 = vmatprep.subr.bf16.mxu1 %v5890_v1 }
  0x48   : > { %5215 = vmatpush3.bf16.msra.mxu0 %v5717_v31 }
  0x49   : > { %5229 = vmatpush3.bf16.msra.mxu1 %v5711_v12  ;;  %5234 = vmatprep.subr.bf16.mxu0 %v5890_v1  ;;  %v5724_v12 = vld [vmem:[%s6973_s7] sm:$0xff]  }
  0x4a   : > { %5248 = vmatprep.subr.bf16.mxu1 %v5890_v1 }
  0x4b   : > { %5217 = vmatmul.mubr.msk.bf16.vlgmr.msra.gmra.mxu0 %vm718_vm1, %v847_v23 }
  0x4c   : > { %5231 = vmatmul.mubr.msk.bf16.vlgmr.msra.gmra.mxu1 %vm718_vm1, %v942_v32  ;;  %5235 = vmatpush3.bf16.msra.mxu0 %v6059_v2 }
  0x4d   : > { %5249 = vmatpush3.bf16.msra.mxu1 %v5713_v18  ;;  %5236 = vmatprep.subr.bf16.mxu0 %v5890_v1 }
  0x4e   : > { %5250 = vmatprep.subr.bf16.mxu1 %v5890_v1  ;;  %5244 = vmatprep.mubr.msk.bf16.mxu0 %vm5891_vm0, %v5890_v1 }
  0x4f   : > { %5258 = vmatprep.mubr.msk.bf16.mxu1 %vm5891_vm0, %v5890_v1 }
  0x50   : > { %5237 = vmatpush3.bf16.msra.mxu0 %v6072_v4 }
  0x51   : > { %5251 = vmatpush3.bf16.msra.mxu1 %v5714_v26  ;;  %5238 = vmatprep.subr.bf16.mxu0 %v5890_v1 }
  0x52   : > { %5252 = vmatprep.subr.bf16.mxu1 %v5890_v1 }
  0x54   : > { %5239 = vmatpush3.bf16.msra.mxu0 %v6086_v6 }
  0x55   : > { %5253 = vmatpush3.bf16.msra.mxu1 %v5715_v29  ;;  %5240 = vmatprep.subr.bf16.mxu0 %v5890_v1  ;;  %v5727_v29 = vld [vmem:[%s6973_s7 + $0x80] sm:$0xff]  }
  0x56   : > { %5254 = vmatprep.subr.bf16.mxu1 %v5890_v1 }
  0x58   : > { %5241 = vmatpush3.bf16.msra.mxu0 %v6100_v10  ;;  %v5722_v10 = vld [vmem:[%s6973_s7 + $0x8] sm:$0xff]  }
  0x59   : > { %5255 = vmatpush3.bf16.msra.mxu1 %v5716_v30  ;;  %5242 = vmatprep.subr.bf16.mxu0 %v5890_v1  ;;  %v4706_v30 = vld [vmem:[%s6976_s8 + $0x4] ss:$0 sm:$0xff] }
  0x5a   : > { %5256 = vmatprep.subr.bf16.mxu1 %v5890_v1 }
  0x5c   : > { %5243 = vmatpush3.bf16.msra.mxu0 %v6111_v15 }
  0x5d   : > { %5257 = vmatpush3.bf16.msra.mxu1 %v5717_v31  ;;  %5262 = vmatprep.subr.bf16.mxu0 %v5890_v1 }
  0x5e   : > { %5270 = vmatprep.subr.bf16.mxu1 %v5890_v1 }
  0x5f   : > { %5245 = vmatmul.mubr.msk.bf16.vlgmr.msra.gmra.mxu0 %vm718_vm1, %v934_v33 }
  0x60   : > { %5259 = vmatmul.mubr.msk.bf16.vlgmr.msra.gmra.mxu1 %vm718_vm1, %v1030_v28  ;;  %5266 = vmatprep.mubr.msk.bf16.mxu0 %vm5891_vm0, %v5890_v1 }
  0x61   : > { %5274 = vmatprep.mubr.msk.bf16.mxu1 %vm5891_vm0, %v5890_v1  ;;  %5271 = vmatpush3.bf16.msra.mxu1 %v5718_v34 }
  0x62   : > { %5272 = vmatprep.subr.bf16.mxu1 %v5890_v1  ;;  %5263 = vmatpush3.bf16.msra.mxu0 %v5720_v36 }
  0x63   : > { %5264 = vmatprep.subr.bf16.mxu0 %v5890_v1 }
  0x65   : > { %5273 = vmatpush3.bf16.msra.mxu1 %v5719_v35 }
  0x66   : > { %5286 = vmatprep.subr.bf16.mxu1 %v5890_v1  ;;  %5265 = vmatpush3.bf16.msra.mxu0 %v5721_v37  ;;  %v4697_v37 = vld [vmem:[%s6976_s8] ss:$0 sm:$0xff] }
  0x67   : > { %5278 = vmatprep.subr.bf16.mxu0 %v5890_v1 }
  0xf7   : > { %v756_v38 = vpop.f32.mrf.mxu0 }
  0xf8   : > { %v829_v39 = vpop.f32.mrf.mxu1 }
  0xf9   : > { %v5190_v40 = vpop.f32.mrf.mxu0  ;;  %v830_v46 = vadd.f32 %v829_v39, %v756_v38 }
  0xfa   : > { %v5204_v41 = vpop.f32.mrf.mxu1 }
  0xfb   : > { %v759_v42 = vpop.f32.mrf.mxu0 }
  0xfc   : > { %v832_v43 = vpop.f32.mrf.mxu1 }
  0xfd   : > { %v5191_v44 = vpop.f32.mrf.mxu0  ;;  %v4715_v43 = vld [vmem:[%s6976_s8 + $0x8] ss:$0 sm:$0xff] }
  0xfe   : > { %v5205_v45 = vpop.f32.mrf.mxu1 }
 0x10b   : > { %v915_v47 = vpop.f32.mrf.mxu0 }
 0x10c   : > { %v921_v49 = vadd.f32 %v915_v47, %v830_v46  ;;  %v980_v50 = vpop.f32.mrf.mxu1 }
 0x10d   : > { %v5218_v51 = vpop.f32.mrf.mxu0 }
 0x10e   : > { %v929_v52 = vadd.f32 %v4684_v48, %v921_v49  ;;  %v5232_v53 = vpop.f32.mrf.mxu1 }
 0x10f   : > { %v918_v54 = vpop.f32.mrf.mxu0 }
 0x110   : > { %v930_v55 = vmax.f32 %v929_v52, 0.0  ;;  %v983_v56 = vpop.f32.mrf.mxu1  ;;  %v5729_v54 = vld [vmem:[%s6973_s7 + $0x10] sm:$0xff]  }
 0x111   : > { %v5219_v57 = vpop.f32.mrf.mxu0  ;;  %v5731_v56 = vld [vmem:[%s6973_s7 + $0x90] sm:$0xff]  }
 0x112   : > { %v1081_v58 = vpack.c.bf16 %v930_v55, %v930_v55  ;;  %v5233_v59 = vpop.f32.mrf.mxu1  ;;  %v5730_v55 = vld [vmem:[%s6973_s7 + $0x98] sm:$0xff]  }
 0x114   : > { %5275 = vmatmul.mubr.msk.bf16.vlgmr.msra.gmra.mxu1 %vm1099_vm2, %v1081_v58 }
 0x115   : > { %5290 = vmatprep.mubr.msk.bf16.mxu1 %vm5891_vm0, %v5890_v1  ;;  %5287 = vmatpush3.bf16.msra.mxu1 %v5723_v11 }
 0x116   : > { %5288 = vmatprep.subr.bf16.mxu1 %v5890_v1 }
 0x119   : > { %5289 = vmatpush3.bf16.msra.mxu1 %v5725_v13 }
 0x11a   : > { %5302 = vmatprep.subr.bf16.mxu1 %v5890_v1 }
 0x11f   : > { %v1023_v60 = vpop.f32.mrf.mxu0 }
 0x120   : > { %v1024_v61 = vadd.f32 %v1023_v60, %v980_v50  ;;  %v1068_v62 = vpop.f32.mrf.mxu1 }
 0x121   : > { %v5246_v63 = vpop.f32.mrf.mxu0 }
 0x122   : > { %v1074_v0 = vadd.f32 %v1068_v62, %v1024_v61  ;;  %v5260_v2 = vpop.f32.mrf.mxu1 }
 0x123   : > { %v1026_v3 = vpop.f32.mrf.mxu0 }
 0x124   : > { %v1075_v4 = vadd.f32 %v4684_v48, %v1074_v0  ;;  %v1071_v5 = vpop.f32.mrf.mxu1  ;;  %v5728_v48 = vld [vmem:[%s6973_s7 + $0x18] sm:$0xff]  }
 0x125   : > { %v5247_v6 = vpop.f32.mrf.mxu0 }
 0x126   : > { %v1076_v7 = vmax.f32 %v1075_v4, 0.0  ;;  %v5261_v8 = vpop.f32.mrf.mxu1  ;;  %v4744_v4 = vld [vmem:[%s6976_s8 + $0x9] ss:$0 sm:$0xff] }
 0x128   : > { %v1086_v9 = vpack.c.bf16 %v1076_v7, %v1076_v7 }
 0x12a   : > { %5267 = vmatmul.mubr.msk.bf16.vlgmr.msra.gmra.mxu0 %vm1099_vm2, %v1086_v9 }
 0x12b   : > { %5282 = vmatprep.mubr.msk.bf16.mxu0 %vm5891_vm0, %v5890_v1  ;;  %5279 = vmatpush3.bf16.msra.mxu0 %v5722_v10 }
 0x12c   : > { %5280 = vmatprep.subr.bf16.mxu0 %v5890_v1 }
 0x12f   : > { %5281 = vmatpush3.bf16.msra.mxu0 %v5724_v12 }
 0x130   : > { %5294 = vmatprep.subr.bf16.mxu0 %v5890_v1 }
 0x1d4   : > { %v1192_v14 = vpop.f32.mrf.mxu1 }
 0x1d6   : > { %v5276_v15 = vpop.f32.mrf.mxu1 }
 0x1d8   : > { %v1195_v16 = vpop.f32.mrf.mxu1 }
 0x1da   : > { %v5277_v17 = vpop.f32.mrf.mxu1 }
 0x1ea   : > { %v1137_v18 = vpop.f32.mrf.mxu0 }
 0x1eb   : > { %v1193_v20 = vadd.f32 %v1192_v14, %v1137_v18 }
 0x1ec   : > { %v5268_v22 = vpop.f32.mrf.mxu0 }
 0x1ed   : > { %v1205_v23 = vadd.f32 %v4696_v19, %v1193_v20  ;;  %v5732_v20 = vld [vmem:[%s6973_s7 + $0x58] sm:$0xff]   ;;  %v5733_v22 = vld [vmem:[%s6973_s7 + $0x50] sm:$0xff]  }
 0x1ee   : > { %v1140_v24 = vpop.f32.mrf.mxu0 }
 0x1ef   : > { %v6232_v25 = vadd.f32 %v1206_v21, %v1205_v23 }
 0x1f0   : > { %v5269_v26 = vpop.f32.mrf.mxu0 }
 0x1f1   : > { %v6239_v28 = vpack.c.bf16 %v6232_v25, %v6232_v25 }
 0x1f3   : > { %5283 = vmatmul.mubr.msk.bf16.vlgmr.msra.gmra.mxu0 %vm1099_vm2, %v6239_v28  ;;  %5291 = vmatmul.mubr.msk.bf16.vlgmr.msra.gmra.mxu1 %vm1099_vm2, %v6239_v28 }
 0x1f4   : > { %5295 = vmatpush3.bf16.msra.mxu0 %v5726_v27  ;;  %5298 = vmatprep.mubr.msk.bf16.mxu0 %vm5891_vm0, %v5890_v1 }
 0x1f5   : > { %5296 = vmatprep.subr.bf16.mxu0 %v5890_v1  ;;  %5304 = vmatprep.mubr.msk.bf16.mxu1 %vm5891_vm0, %v5890_v1 }
 0x1f8   : > { %5297 = vmatpush3.bf16.msra.mxu0 %v5727_v29  ;;  %v4735_v29 = vld [vmem:[%s6976_s8 + $0x5] ss:$0 sm:$0xff] }
 0x1f9   : > { %5308 = vmatprep.subr.bf16.mxu0 %v5890_v1 }
 0x1fb   : > { %5299 = vmatmul.mubr.msk.bf16.vlgmr.msra.gmra.mxu0 %vm1099_vm2, %v6239_v28 }
 0x1fc   : > { %5310 = vmatprep.mubr.msk.bf16.mxu0 %vm5891_vm0, %v5890_v1 }
 0x2b3   : > { %v1269_v31 = vpop.f32.mrf.mxu0  ;;  %v1334_v32 = vpop.f32.mrf.mxu1 }
 0x2b4   : > { %v1335_v33 = vadd.f32 %v4706_v30, %v1334_v32  ;;  %v1270_v44 = vadd.f32 %v4697_v37, %v1269_v31 }
 0x2b5   : > { %v5284_v34 = vpop.f32.mrf.mxu0  ;;  %v5292_v35 = vpop.f32.mrf.mxu1 }
 0x2b6   : > { %v1406_v36 = vpack.c.bf16 %v1335_v33, %v1335_v33  ;;  %v1405_v49 = vpack.c.bf16 %v1270_v44, %v1270_v44  ;;  %v4726_v34 = vld [vmem:[%s6976_s8 + $0x1] ss:$0 sm:$0xff] }
 0x2b7   : > { %v1272_v38 = vpop.f32.mrf.mxu0  ;;  %v1337_v39 = vpop.f32.mrf.mxu1 }
 0x2b8   : > { %v1412_v40 = vsel %vm1407_vm3, %v1406_v36, 0 }
 0x2b9   : > { %v5285_v41 = vpop.f32.mrf.mxu0  ;;  %v5293_v42 = vpop.f32.mrf.mxu1  ;;  %5303 = vmatpush3.bf16.xpose.msra.mxu1 %v1412_v40 }
 0x2ba   : > { %5314 = vmatprep.subr.bf16.mxu1 %v5890_v1 }
 0x2bb   : > { %v1399_v45 = vpop.f32.mrf.mxu0 }
 0x2bc   : > { %v1400_v46 = vadd.f32 %v4715_v43, %v1399_v45 }
 0x2bd   : > { %v5300_v47 = vpop.f32.mrf.mxu0 }
 0x2be   : > { %v1467_v50 = vpack.c.bf16 %v1400_v46, %v1400_v46 }
 0x2bf   : > { %v1402_v51 = vpop.f32.mrf.mxu0 }
 0x2c0   : > { %v1473_v52 = vsel %vm1471_vm4, %v1467_v50, 0  ;;  %5305 = vmatmul.mubr.msk.bf16.vlgmr.msra.gmra.mxu1 %vm1407_vm3, %v1405_v49  ;;  %v4750_v51 = vld [vmem:[%s6926_s9 + $0x4] sm:$0xf] }
 0x2c1   : > { %v5301_v53 = vpop.f32.mrf.mxu0  ;;  %5309 = vmatpush3.bf16.msra.mxu0 %v1473_v52  ;;  %5315 = vmatpush3.bf16.msra.mxu1 %v5728_v48  ;;  %v1827_v52 = vsel %vm1471_vm4, %v4750_v51, 0 }
 0x2c2   : > { %5316 = vmatprep.subr.bf16.mxu1 %v5890_v1  ;;  %5318 = vmatprep.mubr.msk.bf16.mxu1 %vm5891_vm0, %v5890_v1 }
 0x2c3   : > { %5322 = vmatprep.subr.bf16.mxu0 %v5890_v1 }
 0x2c5   : > { %5317 = vmatpush3.bf16.msra.mxu1 %v5729_v54 }
 0x2c6   : > { %5330 = vmatprep.subr.bf16.mxu1 %v5890_v1 }
 0x2c8   : > { %5319 = vmatmul.mubr.msk.bf16.vlgmr.msra.gmra.mxu1 %vm1099_vm2, %v6239_v28 }
 0x2c9   : > { %5331 = vmatpush3.bf16.msra.mxu1 %v5730_v55  ;;  %5334 = vmatprep.mubr.msk.bf16.mxu1 %vm5891_vm0, %v5890_v1  ;;  %v1515_v55 = vld [vmem:[%s6926_s9] sm:$0xf] }
 0x2ca   : > { %5332 = vmatprep.subr.bf16.mxu1 %v5890_v1 }
 0x2cd   : > { %5333 = vmatpush3.bf16.msra.mxu1 %v5731_v56 }
 0x2ce   : > { %5344 = vmatprep.subr.bf16.mxu1 %v5890_v1 }
 0x2d0   : > { %5335 = vmatmul.mubr.msk.bf16.vlgmr.msra.gmra.mxu1 %vm1099_vm2, %v6239_v28 }
 0x2d1   : > { %5346 = vmatprep.mubr.msk.bf16.mxu1 %vm5891_vm0, %v5890_v1 }
 0x380   : > { %v1448_v57 = vpop.f32.mrf.mxu1 }
 0x381   : > { %v1454_v58 = vmul.f32 0.35355338, %v1448_v57 }
 0x382   : > { %v5306_v59 = vpop.f32.mrf.mxu1 }
 0x383   : > { %v1455_v60 = vsel %vm1407_vm3, %v1454_v58, -inf  ;;  %v5734_v59 = vld [vmem:[%s6973_s7 + $0x68] sm:$0xff]  }
 0x384   : > { %1456 = vmax.xlane.f32.xlu0 %v1455_v60  ;;  %v1451_v61 = vpop.f32.mrf.mxu1 }
 0x385   : > { %v5735_v61 = vld [vmem:[%s6973_s7 + $0x60] sm:$0xff]  }
 0x386   : > { %v5307_v62 = vpop.f32.mrf.mxu1 }
 0x388   : > { %v1576_v63 = vpop.f32.mrf.mxu1 }
 0x389   : > { %v1577_v38 = vadd.f32 %v4726_v34, %v1576_v63  ;;  %v5736_v63 = vld [vmem:[%s6973_s7 + $0x28] sm:$0xff]  }
 0x38a   : > { %v5320_v0 = vpop.f32.mrf.mxu1 }
 0x38b   : > { %v1712_v39 = vpack.c.bf16 %v1577_v38, %v1577_v38 }
 0x38c   : > { %v1579_v2 = vpop.f32.mrf.mxu1 }
 0x38e   : > { %v5321_v3 = vpop.f32.mrf.mxu1 }
 0x390   : > { %v1706_v5 = vpop.f32.mrf.mxu1 }
 0x391   : > { %v1707_v6 = vadd.f32 %v4744_v4, %v1706_v5  ;;  %v5737_v4 = vld [vmem:[%s6973_s7 + $0x20] sm:$0xff]  }
 0x392   : > { %v5336_v7 = vpop.f32.mrf.mxu1 }
 0x393   : > { %v1773_v8 = vpack.c.bf16 %v1707_v6, %v1707_v6  ;;  %v5738_v7 = vld [vmem:[%s6973_s7 + $0xa8] sm:$0xff]  }
 0x394   : > { %v1709_v9 = vpop.f32.mrf.mxu1 }
 0x395   : > { %v1778_v10 = vsel %vm1471_vm4, %v1773_v8, 0 }
 0x396   : > { %v5337_v11 = vpop.f32.mrf.mxu1  ;;  %5345 = vmatpush3.bf16.msra.mxu1 %v1778_v10  ;;  %v5739_v10 = vld [vmem:[%s6973_s7 + $0xa0] sm:$0xff]  }
 0x397   : > { %5356 = vmatprep.subr.bf16.mxu1 %v5890_v1 }
 0x40d   : > { %v1457_v12 = vpop.xlane.xlu0 %1456 }
 0x40e   : > { %v1458_v13 = vsub.f32 %v1454_v58, %v1457_v12  ;;  %v1873_v58 = vsel %vm1471_vm4, %v1515_v55, 0  ;;  %v4767_v12 = vld [vmem:[%s6976_s8 + $0x6] ss:$0 sm:$0xff] }
 0x410   : > { %v1459_v14 = vmul.f32 1.442695, %v1458_v13 }
 0x412   : > { %5784 = vpow2.f32 %v1459_v14 }
 0x41f   : > { %v5785_v15 = vpop.eup %5784 }
 0x420   : > { %v1461_v16 = vsel %vm1407_vm3, %v5785_v15, 0.0 }
 0x421   : > { %1462 = vadd.xlane.f32.xlu0 %v1461_v16 }
 0x4aa   : > { %v1463_v17 = vpop.xlane.xlu0 %1462 }
 0x4ab   : > { %5786 = vrcp.f32 %v1463_v17 }
 0x4b8   : > { %v5787_v18 = vpop.eup %5786 }
 0x4b9   : > { %v1465_v19 = vmul.f32 %v5787_v18, %v5785_v15 }
 0x4bb   : > { %v1466_v21 = vpack.c.bf16 %v1465_v19, %v1465_v19 }
 0x4bd   : > { %5311 = vmatmul.mubr.msk.bf16.vlgmr.msra.gmra.mxu0 %vm1407_vm3, %v1466_v21 }
 0x4be   : > { %5323 = vmatpush3.bf16.msra.mxu0 %v5732_v20  ;;  %5326 = vmatprep.mubr.msk.bf16.mxu0 %vm5891_vm0, %v5890_v1 }
 0x4bf   : > { %5324 = vmatprep.subr.bf16.mxu0 %v5890_v1 }
 0x4c2   : > { %5325 = vmatpush3.bf16.msra.mxu0 %v5733_v22 }
 0x4c3   : > { %5338 = vmatprep.subr.bf16.mxu0 %v5890_v1 }
 0x4c5   : > { %5327 = vmatmul.mubr.msk.bf16.vlgmr.msra.gmra.mxu0 %vm1099_vm2, %v6239_v28 }
 0x4c6   : > { %5340 = vmatprep.mubr.msk.bf16.mxu0 %vm5891_vm0, %v5890_v1 }
 0x57d   : > { %v1509_v23 = vpop.f32.mrf.mxu0 }
 0x57e   : > { %v1516_v60 = vpack.c.bf16 %v1509_v23, %v1509_v23 }
 0x57f   : > { %v5312_v24 = vpop.f32.mrf.mxu0 }
 0x580   : > { %v4758_v24 = vld [vmem:[%s6976_s8 + $0x2] ss:$0 sm:$0xff] }
 0x581   : > { %v1512_v26 = vpop.f32.mrf.mxu0 }
 0x583   : > { %v5313_v27 = vpop.f32.mrf.mxu0 }
 0x585   : > { %v1641_v30 = vpop.f32.mrf.mxu0 }
 0x586   : > { %v1642_v31 = vadd.f32 %v4735_v29, %v1641_v30 }
 0x587   : > { %v5328_v32 = vpop.f32.mrf.mxu0 }
 0x588   : > { %v1713_v33 = vpack.c.bf16 %v1642_v31, %v1642_v31 }
 0x589   : > { %v1644_v35 = vpop.f32.mrf.mxu0 }
 0x58a   : > { %v1718_v36 = vsel %vm1407_vm3, %v1713_v33, 0  ;;  %v4776_v33 = vld [vmem:[%s6976_s8 + $0xa] ss:$0 sm:$0xff] }
 0x58b   : > { %v5329_v37 = vpop.f32.mrf.mxu0  ;;  %5339 = vmatpush3.bf16.xpose.msra.mxu0 %v1718_v36 }
 0x58c   : > { %5350 = vmatprep.subr.bf16.mxu0 %v5890_v1 }
 0x592   : > { %5341 = vmatmul.mubr.msk.bf16.vlgmr.msra.gmra.mxu0 %vm1407_vm3, %v1712_v39 }
 0x593   : > { %5352 = vmatprep.mubr.msk.bf16.mxu0 %vm5891_vm0, %v5890_v1  ;;  %5351 = vmatpush3.bf16.msra.mxu0 %v1827_v52  ;;  %v4782_v52 = vld [vmem:[%s6926_s9 + $0x8] sm:$0xf] }
 0x594   : > { %5362 = vmatprep.subr.bf16.mxu0 %v5890_v1 }
 0x652   : > { %v1754_v40 = vpop.f32.mrf.mxu0 }
 0x653   : > { %v1760_v41 = vmul.f32 0.35355338, %v1754_v40 }
 0x654   : > { %v5342_v42 = vpop.f32.mrf.mxu0 }
 0x655   : > { %v1761_v43 = vsel %vm1407_vm3, %v1760_v41, -inf }
 0x656   : > { %1762 = vmax.xlane.f32.xlu1 %v1761_v43  ;;  %v1757_v44 = vpop.f32.mrf.mxu0 }
 0x658   : > { %v5343_v45 = vpop.f32.mrf.mxu0 }
 0x6df   : > { %v1763_v46 = vpop.xlane.xlu1 %1762 }
 0x6e0   : > { %v1764_v47 = vsub.f32 %v1760_v41, %v1763_v46 }
 0x6e2   : > { %v1765_v48 = vmul.f32 1.442695, %v1764_v47 }
 0x6e4   : > { %5788 = vpow2.f32 %v1765_v48 }
 0x6f1   : > { %v5789_v49 = vpop.eup %5788 }
 0x6f2   : > { %v1767_v50 = vsel %vm1407_vm3, %v5789_v49, 0.0 }
 0x6f3   : > { %1768 = vadd.xlane.f32.xlu1 %v1767_v50 }
 0x77c   : > { %v1769_v53 = vpop.xlane.xlu1 %1768 }
 0x77d   : > { %5790 = vrcp.f32 %v1769_v53  ;;  %v2225_v53 = vsel %vm1471_vm4, %v4782_v52, 0 }
 0x78a   : > { %v5791_v54 = vpop.eup %5790 }
 0x78b   : > { %v1771_v56 = vmul.f32 %v5791_v54, %v5789_v49 }
 0x78d   : > { %v1772_v57 = vpack.c.bf16 %v1771_v56, %v1771_v56 }
 0x78f   : > { %5347 = vmatmul.mubr.msk.bf16.vlgmr.msra.gmra.mxu1 %vm1407_vm3, %v1772_v57  ;;  %v5740_v57 = vld [vmem:[%s6973_s7 + $0x38] sm:$0xff]  }
 0x790   : > { %5357 = vmatpush3.bf16.msra.mxu1 %v1873_v58  ;;  %5358 = vmatprep.mubr.msk.bf16.mxu1 %vm5891_vm0, %v5890_v1 }
 0x791   : > { %5370 = vmatprep.subr.bf16.mxu1 %v5890_v1 }
 0x797   : > { %5359 = vmatmul.mubr.msk.bf16.vlgmr.msra.gmra.mxu1 %vm1407_vm3, %v1516_v60  ;;  %v5742_v60 = vld [vmem:[%s6973_s7 + $0xb8] sm:$0xff]  }
 0x798   : > { %5371 = vmatpush3.bf16.msra.mxu1 %v5734_v59  ;;  %5374 = vmatprep.mubr.msk.bf16.mxu1 %vm5891_vm0, %v5890_v1  ;;  %v5741_v59 = vld [vmem:[%s6973_s7 + $0x30] sm:$0xff]  }
 0x799   : > { %5372 = vmatprep.subr.bf16.mxu1 %v5890_v1 }
 0x79c   : > { %5373 = vmatpush3.bf16.msra.mxu1 %v5735_v61  ;;  %v5743_v61 = vld [vmem:[%s6973_s7 + $0xb0] sm:$0xff]  }
 0x79d   : > { %5386 = vmatprep.subr.bf16.mxu1 %v5890_v1 }
 0x79f   : > { %5375 = vmatmul.mubr.msk.bf16.vlgmr.msra.gmra.mxu1 %vm1099_vm2, %v6239_v28 }
 0x7a0   : > { %5388 = vmatprep.mubr.msk.bf16.mxu1 %vm5891_vm0, %v5890_v1 }
 0x84f   : > { %v1814_v62 = vpop.f32.mrf.mxu1 }
 0x850   : > { %v1822_v0 = vpack.c.bf16 %v1814_v62, %v1814_v62 }
 0x851   : > { %v5348_v2 = vpop.f32.mrf.mxu1 }
 0x852   : > { %5353 = vmatmul.mubr.msk.bf16.vlgmr.msra.gmra.mxu0 %vm1407_vm3, %v1822_v0 }
 0x853   : > { %v1817_v3 = vpop.f32.mrf.mxu1  ;;  %5363 = vmatpush3.bf16.msra.mxu0 %v5736_v63  ;;  %5366 = vmatprep.mubr.msk.bf16.mxu0 %vm5891_vm0, %v5890_v1  ;;  %v5744_v63 = vld [vmem:[%s6973_s7 + $0x78] sm:$0xff]  }
 0x854   : > { %5364 = vmatprep.subr.bf16.mxu0 %v5890_v1 }
 0x855   : > { %v5349_v5 = vpop.f32.mrf.mxu1 }
 0x857   : > { %v6371_v6 = vpop.f32.mrf.mxu1  ;;  %5365 = vmatpush3.bf16.msra.mxu0 %v5737_v4  ;;  %v5745_v4 = vld [vmem:[%s6973_s7 + $0x70] sm:$0xff]  }
 0x858   : > { %5378 = vmatprep.subr.bf16.mxu0 %v5890_v1 }
 0x859   : > { %v5360_v8 = vpop.f32.mrf.mxu1 }
 0x85a   : > { %5367 = vmatmul.mubr.msk.bf16.vlgmr.msra.gmra.mxu0 %vm1099_vm2, %v6239_v28 }
 0x85b   : > { %v1912_v9 = vpop.f32.mrf.mxu1  ;;  %5379 = vmatpush3.bf16.msra.mxu0 %v5738_v7  ;;  %5382 = vmatprep.mubr.msk.bf16.mxu0 %vm5891_vm0, %v5890_v1 }
 0x85c   : > { %5380 = vmatprep.subr.bf16.mxu0 %v5890_v1 }
 0x85d   : > { %v5361_v11 = vpop.f32.mrf.mxu1 }
 0x85e   : > { %v4807_v11 = vld [vmem:[%s6976_s8 + $0xb] ss:$0 sm:$0xff] }
 0x85f   : > { %v2039_v13 = vpop.f32.mrf.mxu1  ;;  %5381 = vmatpush3.bf16.msra.mxu0 %v5739_v10 }
 0x860   : > { %v2040_v14 = vadd.f32 %v4767_v12, %v2039_v13  ;;  %5392 = vmatprep.subr.bf16.mxu0 %v5890_v1 }
 0x861   : > { %v5376_v15 = vpop.f32.mrf.mxu1 }
 0x862   : > { %v2111_v16 = vpack.c.bf16 %v2040_v14, %v2040_v14  ;;  %5383 = vmatmul.mubr.msk.bf16.vlgmr.msra.gmra.mxu0 %vm1099_vm2, %v6239_v28 }
 0x863   : > { %v2042_v17 = vpop.f32.mrf.mxu1  ;;  %5394 = vmatprep.mubr.msk.bf16.mxu0 %vm5891_vm0, %v5890_v1 }
 0x864   : > { %v2116_v18 = vsel %vm1407_vm3, %v2111_v16, 0 }
 0x865   : > { %v5377_v19 = vpop.f32.mrf.mxu1  ;;  %5387 = vmatpush3.bf16.xpose.msra.mxu1 %v2116_v18 }
 0x866   : > { %5398 = vmatprep.subr.bf16.mxu1 %v5890_v1 }
 0x912   : > { %v6395_v20 = vpop.f32.mrf.mxu0 }
 0x914   : > { %v5354_v21 = vpop.f32.mrf.mxu0 }
 0x916   : > { %v1866_v22 = vpop.f32.mrf.mxu0 }
 0x918   : > { %v5355_v23 = vpop.f32.mrf.mxu0 }
 0x91a   : > { %v1974_v26 = vpop.f32.mrf.mxu0 }
 0x91b   : > { %v1975_v27 = vadd.f32 %v4758_v24, %v1974_v26  ;;  %v4798_v26 = vld [vmem:[%s6976_s8 + $0x7] ss:$0 sm:$0xff] }
 0x91c   : > { %v5368_v29 = vpop.f32.mrf.mxu0 }
 0x91d   : > { %v2110_v30 = vpack.c.bf16 %v1975_v27, %v1975_v27 }
 0x91e   : > { %v1977_v31 = vpop.f32.mrf.mxu0 }
 0x91f   : > { %5389 = vmatmul.mubr.msk.bf16.vlgmr.msra.gmra.mxu1 %vm1407_vm3, %v2110_v30 }
 0x920   : > { %v5369_v32 = vpop.f32.mrf.mxu0  ;;  %5400 = vmatprep.mubr.msk.bf16.mxu1 %vm5891_vm0, %v5890_v1  ;;  %5399 = vmatpush3.bf16.msra.mxu1 %v2225_v53 }
 0x921   : > { %5412 = vmatprep.subr.bf16.mxu1 %v5890_v1  ;;  %v4789_v32 = vld [vmem:[%s6976_s8 + $0x3] ss:$0 sm:$0xff] }
 0x922   : > { %v2104_v34 = vpop.f32.mrf.mxu0 }
 0x923   : > { %v2105_v35 = vadd.f32 %v4776_v33, %v2104_v34 }
 0x924   : > { %v5384_v36 = vpop.f32.mrf.mxu0 }
 0x925   : > { %v2171_v37 = vpack.c.bf16 %v2105_v35, %v2105_v35 }
 0x926   : > { %v2107_v38 = vpop.f32.mrf.mxu0 }
 0x927   : > { %v2176_v39 = vsel %vm1471_vm4, %v2171_v37, 0 }
 0x928   : > { %v5385_v40 = vpop.f32.mrf.mxu0  ;;  %5393 = vmatpush3.bf16.msra.mxu0 %v2176_v39 }
 0x929   : > { %5404 = vmatprep.subr.bf16.mxu0 %v5890_v1 }
 0x9df   : > { %v2152_v41 = vpop.f32.mrf.mxu1 }
 0x9e0   : > { %v2158_v42 = vmul.f32 0.35355338, %v2152_v41 }
 0x9e1   : > { %v5390_v43 = vpop.f32.mrf.mxu1 }
 0x9e2   : > { %v2159_v44 = vsel %vm1407_vm3, %v2158_v42, -inf }
 0x9e3   : > { %2160 = vmax.xlane.f32.xlu0 %v2159_v44  ;;  %v2155_v45 = vpop.f32.mrf.mxu1 }
 0x9e5   : > { %v5391_v46 = vpop.f32.mrf.mxu1 }
 0xa6c   : > { %v2161_v47 = vpop.xlane.xlu0 %2160 }
 0xa6d   : > { %v2162_v48 = vsub.f32 %v2158_v42, %v2161_v47  ;;  %v4813_v47 = vld [vmem:[%s6926_s9 + $0xc] sm:$0xf] }
 0xa6f   : > { %v2163_v49 = vmul.f32 1.442695, %v2162_v48  ;;  %v2578_v48 = vsel %vm1471_vm4, %v4813_v47, 0  ;;  %v5753_v47 = vld [vmem:[%s6973_s7 + $0x148] sm:$0xff]  }
 0xa71   : > { %5792 = vpow2.f32 %v2163_v49 }
 0xa7e   : > { %v5793_v50 = vpop.eup %5792 }
 0xa7f   : > { %v2165_v51 = vsel %vm1407_vm3, %v5793_v50, 0.0 }
 0xa80   : > { %2166 = vadd.xlane.f32.xlu1 %v2165_v51 }
 0xb09   : > { %v2167_v54 = vpop.xlane.xlu1 %2166 }
 0xb0a   : > { %5794 = vrcp.f32 %v2167_v54 }
 0xb17   : > { %v5795_v55 = vpop.eup %5794 }
 0xb18   : > { %v2169_v56 = vmul.f32 %v5795_v55, %v5793_v50 }
 0xb1a   : > { %v2170_v58 = vpack.c.bf16 %v2169_v56, %v2169_v56 }
 0xb1c   : > { %5395 = vmatmul.mubr.msk.bf16.vlgmr.msra.gmra.mxu0 %vm1407_vm3, %v2170_v58 }
 0xb1d   : > { %5405 = vmatpush3.bf16.msra.mxu0 %v5740_v57  ;;  %5408 = vmatprep.mubr.msk.bf16.mxu0 %vm5891_vm0, %v5890_v1 }
 0xb1e   : > { %5406 = vmatprep.subr.bf16.mxu0 %v5890_v1 }
 0xb21   : > { %5407 = vmatpush3.bf16.msra.mxu0 %v5741_v59 }
 0xb22   : > { %5420 = vmatprep.subr.bf16.mxu0 %v5890_v1 }
 0xb24   : > { %5409 = vmatmul.mubr.msk.bf16.vlgmr.msra.gmra.mxu0 %vm1099_vm2, %v6239_v28 }
 0xb25   : > { %5421 = vmatpush3.bf16.msra.mxu0 %v5742_v60  ;;  %5424 = vmatprep.mubr.msk.bf16.mxu0 %vm5891_vm0, %v5890_v1 }
 0xb26   : > { %5422 = vmatprep.subr.bf16.mxu0 %v5890_v1 }
 0xb29   : > { %5423 = vmatpush3.bf16.msra.mxu0 %v5743_v61  ;;  %v4815_v61 = vld [vmem:[%s6927_s10] ss:$0 sm:$0xff] }
 0xb2a   : > { %5434 = vmatprep.subr.bf16.mxu0 %v5890_v1 }
 0xb2c   : > { %5425 = vmatmul.mubr.msk.bf16.vlgmr.msra.gmra.mxu0 %vm1099_vm2, %v6239_v28 }
 0xb2d   : > { %5436 = vmatprep.mubr.msk.bf16.mxu0 %vm5891_vm0, %v5890_v1 }
 0xbdc   : > { %v2212_v62 = vpop.f32.mrf.mxu0 }
 0xbdd   : > { %v2220_v0 = vpack.c.bf16 %v2212_v62, %v2212_v62 }
 0xbde   : > { %v5396_v2 = vpop.f32.mrf.mxu0 }
 0xbdf   : > { %5401 = vmatmul.mubr.msk.bf16.vlgmr.msra.gmra.mxu1 %vm1407_vm3, %v2220_v0 }
 0xbe0   : > { %v2215_v3 = vpop.f32.mrf.mxu0  ;;  %5413 = vmatpush3.bf16.msra.mxu1 %v5744_v63  ;;  %5416 = vmatprep.mubr.msk.bf16.mxu1 %vm5891_vm0, %v5890_v1 }
 0xbe1   : > { %5414 = vmatprep.subr.bf16.mxu1 %v5890_v1 }
 0xbe2   : > { %v5397_v5 = vpop.f32.mrf.mxu0 }
 0xbe4   : > { %v2327_v7 = vpop.f32.mrf.mxu0  ;;  %5415 = vmatpush3.bf16.msra.mxu1 %v5745_v4 }
 0xbe5   : > { %5428 = vmatprep.subr.bf16.mxu1 %v5890_v1  ;;  %v2328_v34 = vadd.f32 %v4789_v32, %v2327_v7 }
 0xbe6   : > { %v5410_v8 = vpop.f32.mrf.mxu0 }
 0xbe7   : > { %5417 = vmatmul.mubr.msk.bf16.vlgmr.msra.gmra.mxu1 %vm1099_vm2, %v6239_v28  ;;  %v1910_v28 = vadd.f32 %v6371_v6, %v6395_v20  ;;  %v2463_v35 = vpack.c.bf16 %v2328_v34, %v2328_v34 }
 0xbe8   : > { %v2330_v9 = vpop.f32.mrf.mxu0  ;;  %5430 = vmatprep.mubr.msk.bf16.mxu1 %vm5891_vm0, %v5890_v1 }
 0xbea   : > { %v5411_v10 = vpop.f32.mrf.mxu0 }
 0xbeb   : > { %v5746_v10 = vld [vmem:[%s6930_s13 + $0x8] sm:$0xff]  }
 0xbec   : > { %v2457_v12 = vpop.f32.mrf.mxu0 }
 0xbed   : > { %v2458_v13 = vadd.f32 %v4807_v11, %v2457_v12  ;;  %v5748_v11 = vld [vmem:[%s6932_s15 + $0x18] sm:$0xff]   ;;  %v5749_v12 = vld [vmem:[%s6932_s15 + $0x10] sm:$0xff]  }
 0xbee   : > { %v5426_v14 = vpop.f32.mrf.mxu0 }
 0xbef   : > { %v2524_v15 = vpack.c.bf16 %v2458_v13, %v2458_v13 }
 0xbf0   : > { %v2460_v16 = vpop.f32.mrf.mxu0 }
 0xbf1   : > { %v2529_v17 = vsel %vm1471_vm4, %v2524_v15, 0 }
 0xbf2   : > { %v5427_v18 = vpop.f32.mrf.mxu0  ;;  %5435 = vmatpush3.bf16.msra.mxu0 %v2529_v17  ;;  %v4816_v17 = vld [vmem:[%s6928_s11] ss:$0 sm:$0xff] }
 0xbf3   : > { %5446 = vmatprep.subr.bf16.mxu0 %v5890_v1 }
 0xc9f   : > { %v2261_v19 = vpop.f32.mrf.mxu1 }
 0xca0   : > { %v2267_v21 = vadd.f32 %v2261_v19, %v1910_v28  ;;  %v4817_v28 = vld [vmem:[%s6929_s12] ss:$0 sm:$0xff] }
 0xca1   : > { %v5402_v22 = vpop.f32.mrf.mxu1 }
 0xca3   : > { %v2264_v23 = vpop.f32.mrf.mxu1 }
 0xca4   : > { %v5750_v23 = vld [vmem:[%s6932_s15 + $0x8] sm:$0xff]  }
 0xca5   : > { %v5403_v24 = vpop.f32.mrf.mxu1 }
 0xca6   : > { %v5751_v24 = vld [vmem:[%s6932_s15] sm:$0xff]  }
 0xca7   : > { %v2392_v27 = vpop.f32.mrf.mxu1 }
 0xca8   : > { %v2393_v29 = vadd.f32 %v4798_v26, %v2392_v27  ;;  %v4818_v26 = vld [vmem:[%s6931_s14] ss:$0 sm:$0xff] }
 0xca9   : > { %v5418_v30 = vpop.f32.mrf.mxu1 }
 0xcaa   : > { %v2464_v31 = vpack.c.bf16 %v2393_v29, %v2393_v29 }
 0xcab   : > { %v2395_v33 = vpop.f32.mrf.mxu1 }
 0xcac   : > { %v2469_v6 = vsel %vm1407_vm3, %v2464_v31, 0 }
 0xcad   : > { %v5419_v20 = vpop.f32.mrf.mxu1  ;;  %5429 = vmatpush3.bf16.xpose.msra.mxu1 %v2469_v6 }
 0xcae   : > { %5440 = vmatprep.subr.bf16.mxu1 %v5890_v1  ;;  %v4822_v20 = vld [vmem:[%s6933_s16] ss:$0 sm:$0xff] }
 0xcb4   : > { %5431 = vmatmul.mubr.msk.bf16.vlgmr.msra.gmra.mxu1 %vm1407_vm3, %v2463_v35 }
 0xcb5   : > { %5442 = vmatprep.mubr.msk.bf16.mxu1 %vm5891_vm0, %v5890_v1  ;;  %5441 = vmatpush3.bf16.msra.mxu1 %v2578_v48  ;;  %v5754_v48 = vld [vmem:[%s6973_s7 + $0xc0] sm:$0xff]  }
 0xcb6   : > { %5454 = vmatprep.subr.bf16.mxu1 %v5890_v1 }
 0xd74   : > { %v2505_v36 = vpop.f32.mrf.mxu1 }
 0xd75   : > { %v2511_v37 = vmul.f32 0.35355338, %v2505_v36 }
 0xd76   : > { %v5432_v38 = vpop.f32.mrf.mxu1 }
 0xd77   : > { %v2512_v39 = vsel %vm1407_vm3, %v2511_v37, -inf }
 0xd78   : > { %2513 = vmax.xlane.f32.xlu0 %v2512_v39  ;;  %v2508_v40 = vpop.f32.mrf.mxu1 }
 0xd7a   : > { %v5433_v41 = vpop.f32.mrf.mxu1 }
 0xe01   : > { %v2514_v42 = vpop.xlane.xlu0 %2513 }
 0xe02   : > { %v2515_v43 = vsub.f32 %v2511_v37, %v2514_v42 }
 0xe04   : > { %v2516_v44 = vmul.f32 1.442695, %v2515_v43 }
 0xe06   : > { %5796 = vpow2.f32 %v2516_v44 }
 0xe13   : > { %v5797_v45 = vpop.eup %5796 }
 0xe14   : > { %v2518_v46 = vsel %vm1407_vm3, %v5797_v45, 0.0 }
 0xe15   : > { %2519 = vadd.xlane.f32.xlu1 %v2518_v46  ;;  %v5752_v46 = vld [vmem:[%s6973_s7 + $0xc8] sm:$0xff]  }
 0xe9e   : > { %v2520_v49 = vpop.xlane.xlu1 %2519 }
 0xe9f   : > { %5798 = vrcp.f32 %v2520_v49  ;;  %v5755_v49 = vld [vmem:[%s6973_s7 + $0x140] sm:$0xff]  }
 0xeac   : > { %v5799_v50 = vpop.eup %5798 }
 0xead   : > { %v2522_v51 = vmul.f32 %v5799_v50, %v5797_v45 }
 0xeaf   : > { %v2523_v52 = vpack.c.bf16 %v2522_v51, %v2522_v51 }
 0xeb1   : > { %5437 = vmatmul.mubr.msk.bf16.vlgmr.msra.gmra.mxu0 %vm1407_vm3, %v2523_v52 }
 0xeb2   : > { %5450 = vmatprep.mubr.msk.bf16.mxu0 %vm5891_vm0, %v5890_v1  ;;  %5447 = vmatpush3.bf16.msra.mxu0 %v5746_v10 }
 0xeb3   : > { %5448 = vmatprep.subr.bf16.mxu0 %v5890_v1 }
 0xf71   : > { %v2565_v53 = vpop.f32.mrf.mxu0 }
 0xf72   : > { %v2573_v54 = vpack.c.bf16 %v2565_v53, %v2565_v53 }
 0xf73   : > { %v5438_v55 = vpop.f32.mrf.mxu0 }
 0xf74   : > { %5443 = vmatmul.mubr.msk.bf16.vlgmr.msra.gmra.mxu1 %vm1407_vm3, %v2573_v54  ;;  %v4828_v54 = vld [vmem:[%s6934_s17] ss:$0 sm:$0xff] }
 0xf75   : > { %v2568_v56 = vpop.f32.mrf.mxu0  ;;  %5462 = vmatprep.mubr.msk.bf16.mxu1 %vm5891_vm0, %v5890_v1  ;;  %5455 = vmatpush3.bf16.msra.mxu1 %v5748_v11  ;;  %v4844_v11 = vld [vmem:[%s6976_s8 + $0x10] ss:$0 sm:$0xff] }
 0xf76   : > { %5456 = vmatprep.subr.bf16.mxu1 %v5890_v1  ;;  %v4829_v56 = vld [vmem:[%s6935_s18] ss:$0 sm:$0xff] }
 0xf77   : > { %v5439_v57 = vpop.f32.mrf.mxu0 }
 0xf79   : > { %5457 = vmatpush3.bf16.msra.mxu1 %v5749_v12 }
 0xf7a   : > { %5458 = vmatprep.subr.bf16.mxu1 %v5890_v1 }
 0xf7d   : > { %5459 = vmatpush3.bf16.msra.mxu1 %v5750_v23  ;;  %v5759_v23 = vld [vmem:[%s6973_s7 + $0xd0] sm:$0xff]  }
 0xf7e   : > { %5460 = vmatprep.subr.bf16.mxu1 %v5890_v1 }
 0xf81   : > { %5461 = vmatpush3.bf16.msra.mxu1 %v5751_v24  ;;  %v5760_v24 = vld [vmem:[%s6973_s7 + $0x158] sm:$0xff]  }
 0xf82   : > { %5482 = vmatprep.subr.bf16.mxu1 %v5890_v1 }
0x1034   : > { %v2614_v58 = vpop.f32.mrf.mxu1 }
0x1035   : > { %v2620_v59 = vadd.f32 %v2614_v58, %v2267_v21 }
0x1036   : > { %v5444_v60 = vpop.f32.mrf.mxu1 }
0x1037   : > { %v2621_v62 = vadd.f32 %v2620_v59, %v6232_v25  ;;  %v5747_v25 = vld [vmem:[%s6930_s13] sm:$0xff]   ;;  %v5756_v59 = vld [vmem:[%s6973_s7 + $0x108] sm:$0xff]  }
0x1038   : > { %v2617_v63 = vpop.f32.mrf.mxu1  ;;  %5449 = vmatpush3.bf16.msra.mxu0 %v5747_v25 }
0x1039   : > { %v2629_v0 = vadd.f32 %v4815_v61, %v2621_v62  ;;  %5466 = vmatprep.subr.bf16.mxu0 %v5890_v1  ;;  %v5757_v61 = vld [vmem:[%s6973_s7 + $0x100] sm:$0xff]   ;;  %v4853_v62 = vld [vmem:[%s6976_s8 + $0x14] ss:$0 sm:$0xff] }
0x103a   : > { %v5445_v2 = vpop.f32.mrf.mxu1 }
0x103b   : > { %v2632_v3 = vsel %vm1099_vm2, %v2629_v0, 0.0 }
0x103c   : > { %2633 = vadd.xlane.f32.xlu0 %v2632_v3 }
0x10c5   : > { %v2634_v4 = vpop.xlane.xlu0 %2633 }
0x10c6   : > { %v2636_v5 = vmul.f32 0.03125, %v2634_v4 }
0x10c8   : > { %v2637_v7 = vsub.f32 %v2629_v0, %v2636_v5 }
0x10ca   : > { %v2638_v8 = vmul.f32 %v2637_v7, %v2637_v7 }
0x10cc   : > { %v2639_v9 = vsel %vm1099_vm2, %v2638_v8, 0.0 }
0x10cd   : > { %2640 = vadd.xlane.f32.xlu1 %v2639_v9 }
0x1156   : > { %v2641_v13 = vpop.xlane.xlu1 %2640 }
0x1157   : > { %v2642_v14 = vmul.f32 0.03125, %v2641_v13 }
0x1159   : > { %v2643_v15 = vadd.f32 1e-05, %v2642_v14 }
0x115b   : > { %5800 = vrsqrt.f32 %v2643_v15 }
0x1168   : > { %v5801_v16 = vpop.eup %5800 }
0x1169   : > { %v2645_v18 = vmul.f32 %v5801_v16, %v2637_v7  ;;  %v4835_v16 = vld [vmem:[%s6976_s8 + $0xc] ss:$0 sm:$0xff] }
0x116b   : > { %v2652_v19 = vmul.f32 %v4816_v17, %v2645_v18 }
0x116d   : > { %v2659_v21 = vadd.f32 %v4817_v28, %v2652_v19 }
0x116f   : > { %v2664_v22 = vpack.c.bf16 %v2659_v21, %v2659_v21 }
0x1171   : > { %5451 = vmatmul.mubr.msk.bf16.vlgmr.msra.gmra.mxu0 %vm1099_vm2, %v2664_v22 }
0x1172   : > { %5470 = vmatprep.mubr.msk.bf16.mxu0 %vm5891_vm0, %v5890_v1  ;;  %5467 = vmatpush3.bf16.msra.mxu0 %v5752_v46 }
0x1173   : > { %5468 = vmatprep.subr.bf16.mxu0 %v5890_v1 }
0x1176   : > { %5469 = vmatpush3.bf16.msra.mxu0 %v5754_v48 }
0x1177   : > { %5474 = vmatprep.subr.bf16.mxu0 %v5890_v1 }
0x1231   : > { %v2721_v27 = vpop.f32.mrf.mxu0 }
0x1232   : > { %v2722_v29 = vadd.f32 %v4818_v26, %v2721_v27  ;;  %v5761_v26 = vld [vmem:[%s6973_s7 + $0x150] sm:$0xff]  }
0x1233   : > { %v5452_v30 = vpop.f32.mrf.mxu0 }
0x1234   : > { %v2727_v31 = vmax.f32 %v2722_v29, 0.0 }
0x1235   : > { %v2724_v32 = vpop.f32.mrf.mxu0 }
0x1236   : > { %v2736_v33 = vpack.c.bf16 %v2727_v31, %v2727_v31 }
0x1237   : > { %v5453_v6 = vpop.f32.mrf.mxu0 }
0x1238   : > { %5463 = vmatmul.mubr.msk.bf16.vlgmr.msra.gmra.mxu1 %vm2768_vm5, %v2736_v33 }
0x1239   : > { %5486 = vmatprep.mubr.msk.bf16.mxu1 %vm5891_vm0, %v5890_v1  ;;  %5483 = vmatpush3.bf16.msra.mxu1 %v5753_v47 }
0x123a   : > { %5484 = vmatprep.subr.bf16.mxu1 %v5890_v1 }
0x123d   : > { %5485 = vmatpush3.bf16.msra.mxu1 %v5755_v49 }
0x123e   : > { %5496 = vmatprep.subr.bf16.mxu1 %v5890_v1 }
0x12f8   : > { %v2806_v34 = vpop.f32.mrf.mxu1 }
0x12f9   : > { %v2807_v35 = vadd.f32 %v4822_v20, %v2806_v34 }
0x12fa   : > { %v5464_v36 = vpop.f32.mrf.mxu1 }
0x12fb   : > { %v2812_v37 = vadd.f32 %v2807_v35, %v2659_v21  ;;  %v5758_v21 = vld [vmem:[%s6973_s7 + $0xd8] sm:$0xff]   ;;  %v4883_v36 = vld [vmem:[%s6976_s8 + $0x15] ss:$0 sm:$0xff] }
0x12fc   : > { %v2809_v38 = vpop.f32.mrf.mxu1 }
0x12fd   : > { %v2815_v39 = vsel %vm1099_vm2, %v2812_v37, 0.0 }
0x12fe   : > { %2816 = vadd.xlane.f32.xlu0 %v2815_v39  ;;  %v5465_v40 = vpop.f32.mrf.mxu1 }
0x1387   : > { %v2817_v41 = vpop.xlane.xlu0 %2816 }
0x1388   : > { %v2818_v42 = vmul.f32 0.03125, %v2817_v41 }
0x138a   : > { %v2819_v43 = vsub.f32 %v2812_v37, %v2818_v42 }
0x138c   : > { %v2820_v44 = vmul.f32 %v2819_v43, %v2819_v43 }
0x138e   : > { %v2821_v45 = vsel %vm1099_vm2, %v2820_v44, 0.0 }
0x138f   : > { %2822 = vadd.xlane.f32.xlu1 %v2821_v45 }
0x1418   : > { %v2823_v50 = vpop.xlane.xlu1 %2822 }
0x1419   : > { %v2824_v51 = vmul.f32 0.03125, %v2823_v50 }
0x141b   : > { %v2825_v52 = vadd.f32 1e-05, %v2824_v51 }
0x141d   : > { %5802 = vrsqrt.f32 %v2825_v52  ;;  %v5762_v52 = vld [vmem:[%s6973_s7 + $0x118] sm:$0xff]  }
0x142a   : > { %v5803_v53 = vpop.eup %5802 }
0x142b   : > { %v2827_v55 = vmul.f32 %v5803_v53, %v2819_v43 }
0x142d   : > { %v2834_v57 = vmul.f32 %v4828_v54, %v2827_v55  ;;  %v5763_v54 = vld [vmem:[%s6973_s7 + $0x110] sm:$0xff]  }
0x142f   : > { %v6560_v58 = vadd.f32 %v4829_v56, %v2834_v57 }
0x1431   : > { %v6567_v60 = vpack.c.bf16 %v6560_v58, %v6560_v58 }
0x1433   : > { %5471 = vmatmul.mubr.msk.bf16.vlgmr.msra.gmra.mxu0 %vm1099_vm2, %v6567_v60  ;;  %5487 = vmatmul.mubr.msk.bf16.vlgmr.msra.gmra.mxu1 %vm1099_vm2, %v6567_v60 }
0x1434   : > { %5475 = vmatpush3.bf16.msra.mxu0 %v5756_v59  ;;  %5478 = vmatprep.mubr.msk.bf16.mxu0 %vm5891_vm0, %v5890_v1 }
0x1435   : > { %5476 = vmatprep.subr.bf16.mxu0 %v5890_v1  ;;  %5498 = vmatprep.mubr.msk.bf16.mxu1 %vm5891_vm0, %v5890_v1 }
0x1438   : > { %5477 = vmatpush3.bf16.msra.mxu0 %v5757_v61  ;;  %v4874_v61 = vld [vmem:[%s6976_s8 + $0x11] ss:$0 sm:$0xff] }
0x1439   : > { %5490 = vmatprep.subr.bf16.mxu0 %v5890_v1 }
0x143b   : > { %5479 = vmatmul.mubr.msk.bf16.vlgmr.msra.gmra.mxu0 %vm1099_vm2, %v6567_v60 }
0x143c   : > { %5492 = vmatprep.mubr.msk.bf16.mxu0 %vm5891_vm0, %v5890_v1 }
0x14f3   : > { %v2905_v63 = vpop.f32.mrf.mxu0  ;;  %v3035_v0 = vpop.f32.mrf.mxu1 }
0x14f4   : > { %v3036_v2 = vadd.f32 %v4853_v62, %v3035_v0  ;;  %v2906_v19 = vadd.f32 %v4835_v16, %v2905_v63 }
0x14f5   : > { %v5472_v3 = vpop.f32.mrf.mxu0  ;;  %v5488_v4 = vpop.f32.mrf.mxu1 }
0x14f6   : > { %v3102_v5 = vpack.c.bf16 %v3036_v2, %v3036_v2  ;;  %v3041_v22 = vpack.c.bf16 %v2906_v19, %v2906_v19  ;;  %v4865_v3 = vld [vmem:[%s6976_s8 + $0xd] ss:$0 sm:$0xff]  ;;  %v4889_v19 = vld [vmem:[%s6926_s9 + $0x14] sm:$0xf] }
0x14f7   : > { %v2908_v7 = vpop.f32.mrf.mxu0  ;;  %v3038_v8 = vpop.f32.mrf.mxu1 }
0x14f8   : > { %v3107_v9 = vsel %vm1471_vm4, %v3102_v5, 0 }
0x14f9   : > { %v5473_v10 = vpop.f32.mrf.mxu0  ;;  %v5489_v25 = vpop.f32.mrf.mxu1  ;;  %5497 = vmatpush3.bf16.msra.mxu1 %v3107_v9 }
0x14fa   : > { %5510 = vmatprep.subr.bf16.mxu1 %v5890_v1 }
0x14fb   : > { %v2970_v12 = vpop.f32.mrf.mxu0 }
0x14fc   : > { %v2971_v13 = vadd.f32 %v4844_v11, %v2970_v12 }
0x14fd   : > { %v5480_v14 = vpop.f32.mrf.mxu0 }
0x14fe   : > { %v3042_v15 = vpack.c.bf16 %v2971_v13, %v2971_v13 }
0x14ff   : > { %v2973_v17 = vpop.f32.mrf.mxu0 }
0x1500   : > { %v3047_v18 = vsel %vm1407_vm3, %v3042_v15, 0 }
0x1501   : > { %v5481_v28 = vpop.f32.mrf.mxu0  ;;  %5491 = vmatpush3.bf16.xpose.msra.mxu0 %v3047_v18 }
0x1502   : > { %5502 = vmatprep.subr.bf16.mxu0 %v5890_v1 }
0x1508   : > { %5493 = vmatmul.mubr.msk.bf16.vlgmr.msra.gmra.mxu0 %vm1407_vm3, %v3041_v22 }
0x1509   : > { %5503 = vmatpush3.bf16.msra.mxu0 %v5758_v21  ;;  %5506 = vmatprep.mubr.msk.bf16.mxu0 %vm5891_vm0, %v5890_v1  ;;  %v3462_v21 = vsel %vm1471_vm4, %v4889_v19, 0 }
0x150a   : > { %5504 = vmatprep.subr.bf16.mxu0 %v5890_v1 }
0x150d   : > { %5505 = vmatpush3.bf16.msra.mxu0 %v5759_v23 }
0x150e   : > { %5518 = vmatprep.subr.bf16.mxu0 %v5890_v1 }
0x1510   : > { %5507 = vmatmul.mubr.msk.bf16.vlgmr.msra.gmra.mxu0 %vm1099_vm2, %v6567_v60 }
0x1511   : > { %5519 = vmatpush3.bf16.msra.mxu0 %v5760_v24  ;;  %5522 = vmatprep.mubr.msk.bf16.mxu0 %vm5891_vm0, %v5890_v1  ;;  %v4859_v24 = vld [vmem:[%s6926_s9 + $0x10] sm:$0xf] }
0x1512   : > { %5520 = vmatprep.subr.bf16.mxu0 %v5890_v1 }
0x1515   : > { %5521 = vmatpush3.bf16.msra.mxu0 %v5761_v26 }
0x1516   : > { %5532 = vmatprep.subr.bf16.mxu0 %v5890_v1 }
0x1518   : > { %5523 = vmatmul.mubr.msk.bf16.vlgmr.msra.gmra.mxu0 %vm1099_vm2, %v6567_v60 }
0x1519   : > { %5534 = vmatprep.mubr.msk.bf16.mxu0 %vm5891_vm0, %v5890_v1 }
0x15c8   : > { %v3083_v27 = vpop.f32.mrf.mxu0 }
0x15c9   : > { %v3089_v29 = vmul.f32 0.35355338, %v3083_v27 }
0x15ca   : > { %v5494_v30 = vpop.f32.mrf.mxu0 }
0x15cb   : > { %v3090_v31 = vsel %vm1407_vm3, %v3089_v29, -inf  ;;  %v5764_v30 = vld [vmem:[%s6973_s7 + $0x128] sm:$0xff]  }
0x15cc   : > { %3091 = vmax.xlane.f32.xlu0 %v3090_v31  ;;  %v3086_v32 = vpop.f32.mrf.mxu0 }
0x15cd   : > { %v5765_v32 = vld [vmem:[%s6973_s7 + $0x120] sm:$0xff]  }
0x15ce   : > { %v5495_v33 = vpop.f32.mrf.mxu0 }
0x15d0   : > { %v3211_v6 = vpop.f32.mrf.mxu0 }
0x15d1   : > { %v3212_v8 = vadd.f32 %v4865_v3, %v3211_v6  ;;  %v5766_v6 = vld [vmem:[%s6973_s7 + $0xe8] sm:$0xff]  }
0x15d2   : > { %v5508_v20 = vpop.f32.mrf.mxu0 }
0x15d3   : > { %v3347_v9 = vpack.c.bf16 %v3212_v8, %v3212_v8 }
0x15d4   : > { %v3214_v34 = vpop.f32.mrf.mxu0 }
0x15d6   : > { %v5509_v35 = vpop.f32.mrf.mxu0 }
0x15d8   : > { %v3341_v37 = vpop.f32.mrf.mxu0 }
0x15d9   : > { %v3342_v38 = vadd.f32 %v4883_v36, %v3341_v37  ;;  %v5767_v36 = vld [vmem:[%s6973_s7 + $0xe0] sm:$0xff]  }
0x15da   : > { %v5524_v39 = vpop.f32.mrf.mxu0 }
0x15db   : > { %v3408_v40 = vpack.c.bf16 %v3342_v38, %v3342_v38  ;;  %v5768_v39 = vld [vmem:[%s6973_s7 + $0x168] sm:$0xff]  }
0x15dc   : > { %v3344_v41 = vpop.f32.mrf.mxu0 }
0x15dd   : > { %v3413_v42 = vsel %vm1471_vm4, %v3408_v40, 0 }
0x15de   : > { %v5525_v43 = vpop.f32.mrf.mxu0  ;;  %5533 = vmatpush3.bf16.msra.mxu0 %v3413_v42  ;;  %v5769_v42 = vld [vmem:[%s6973_s7 + $0x160] sm:$0xff]  }
0x15df   : > { %5544 = vmatprep.subr.bf16.mxu0 %v5890_v1 }
0x1655   : > { %v3092_v44 = vpop.xlane.xlu0 %3091 }
0x1656   : > { %v3093_v45 = vsub.f32 %v3089_v29, %v3092_v44  ;;  %v3508_v29 = vsel %vm1471_vm4, %v4859_v24, 0  ;;  %v4906_v44 = vld [vmem:[%s6976_s8 + $0x12] ss:$0 sm:$0xff] }
0x1658   : > { %v3094_v46 = vmul.f32 1.442695, %v3093_v45 }
0x165a   : > { %5804 = vpow2.f32 %v3094_v46 }
0x1667   : > { %v5805_v47 = vpop.eup %5804 }
0x1668   : > { %v3096_v48 = vsel %vm1407_vm3, %v5805_v47, 0.0 }
0x1669   : > { %3097 = vadd.xlane.f32.xlu1 %v3096_v48 }
0x16f2   : > { %v3098_v49 = vpop.xlane.xlu1 %3097 }
0x16f3   : > { %5806 = vrcp.f32 %v3098_v49 }
0x1700   : > { %v5807_v50 = vpop.eup %5806 }
0x1701   : > { %v3100_v51 = vmul.f32 %v5807_v50, %v5805_v47 }
0x1703   : > { %v3101_v53 = vpack.c.bf16 %v3100_v51, %v3100_v51 }
0x1705   : > { %5499 = vmatmul.mubr.msk.bf16.vlgmr.msra.gmra.mxu1 %vm1407_vm3, %v3101_v53 }
0x1706   : > { %5511 = vmatpush3.bf16.msra.mxu1 %v5762_v52  ;;  %5514 = vmatprep.mubr.msk.bf16.mxu1 %vm5891_vm0, %v5890_v1 }
0x1707   : > { %5512 = vmatprep.subr.bf16.mxu1 %v5890_v1 }
0x170a   : > { %5513 = vmatpush3.bf16.msra.mxu1 %v5763_v54 }
0x170b   : > { %5526 = vmatprep.subr.bf16.mxu1 %v5890_v1 }
0x170d   : > { %5515 = vmatmul.mubr.msk.bf16.vlgmr.msra.gmra.mxu1 %vm1099_vm2, %v6567_v60 }
0x170e   : > { %5528 = vmatprep.mubr.msk.bf16.mxu1 %vm5891_vm0, %v5890_v1 }
0x17c5   : > { %v3143_v55 = vpop.f32.mrf.mxu1 }
0x17c6   : > { %v3151_v31 = vpack.c.bf16 %v3143_v55, %v3143_v55 }
0x17c7   : > { %v5500_v56 = vpop.f32.mrf.mxu1 }
0x17c8   : > { %v4897_v56 = vld [vmem:[%s6976_s8 + $0xe] ss:$0 sm:$0xff] }
0x17c9   : > { %v3146_v57 = vpop.f32.mrf.mxu1 }
0x17cb   : > { %v5501_v59 = vpop.f32.mrf.mxu1 }
0x17cd   : > { %v3276_v62 = vpop.f32.mrf.mxu1 }
0x17ce   : > { %v3277_v63 = vadd.f32 %v4874_v61, %v3276_v62 }
0x17cf   : > { %v5516_v0 = vpop.f32.mrf.mxu1 }
0x17d0   : > { %v3348_v2 = vpack.c.bf16 %v3277_v63, %v3277_v63 }
0x17d1   : > { %v3279_v4 = vpop.f32.mrf.mxu1 }
0x17d2   : > { %v3353_v5 = vsel %vm1407_vm3, %v3348_v2, 0  ;;  %v4915_v2 = vld [vmem:[%s6976_s8 + $0x16] ss:$0 sm:$0xff] }
0x17d3   : > { %v5517_v7 = vpop.f32.mrf.mxu1  ;;  %5527 = vmatpush3.bf16.xpose.msra.mxu1 %v3353_v5 }
0x17d4   : > { %5538 = vmatprep.subr.bf16.mxu1 %v5890_v1 }
0x17da   : > { %5529 = vmatmul.mubr.msk.bf16.vlgmr.msra.gmra.mxu1 %vm1407_vm3, %v3347_v9 }
0x17db   : > { %5540 = vmatprep.mubr.msk.bf16.mxu1 %vm5891_vm0, %v5890_v1  ;;  %5539 = vmatpush3.bf16.msra.mxu1 %v3462_v21  ;;  %v4921_v21 = vld [vmem:[%s6926_s9 + $0x18] sm:$0xf] }
0x17dc   : > { %5550 = vmatprep.subr.bf16.mxu1 %v5890_v1 }
0x189a   : > { %v3389_v10 = vpop.f32.mrf.mxu1 }
0x189b   : > { %v3395_v25 = vmul.f32 0.35355338, %v3389_v10 }
0x189c   : > { %v5530_v11 = vpop.f32.mrf.mxu1 }
0x189d   : > { %v3396_v12 = vsel %vm1407_vm3, %v3395_v25, -inf }
0x189e   : > { %3397 = vmax.xlane.f32.xlu0 %v3396_v12  ;;  %v3392_v13 = vpop.f32.mrf.mxu1 }
0x18a0   : > { %v5531_v14 = vpop.f32.mrf.mxu1 }
0x1927   : > { %v3398_v15 = vpop.xlane.xlu0 %3397 }
0x1928   : > { %v3399_v16 = vsub.f32 %v3395_v25, %v3398_v15 }
0x192a   : > { %v3400_v17 = vmul.f32 1.442695, %v3399_v16 }
0x192c   : > { %5808 = vpow2.f32 %v3400_v17 }
0x1939   : > { %v5809_v18 = vpop.eup %5808 }
0x193a   : > { %v3402_v28 = vsel %vm1407_vm3, %v5809_v18, 0.0 }
0x193b   : > { %3403 = vadd.xlane.f32.xlu1 %v3402_v28 }
0x19c4   : > { %v3404_v22 = vpop.xlane.xlu1 %3403 }
0x19c5   : > { %5810 = vrcp.f32 %v3404_v22  ;;  %v3860_v22 = vsel %vm1471_vm4, %v4921_v21, 0 }
0x19d2   : > { %v5811_v23 = vpop.eup %5810 }
0x19d3   : > { %v3406_v26 = vmul.f32 %v5811_v23, %v5809_v18 }
0x19d5   : > { %v3407_v27 = vpack.c.bf16 %v3406_v26, %v3406_v26 }
0x19d7   : > { %5535 = vmatmul.mubr.msk.bf16.vlgmr.msra.gmra.mxu0 %vm1407_vm3, %v3407_v27  ;;  %v5770_v27 = vld [vmem:[%s6973_s7 + $0xf8] sm:$0xff]  }
0x19d8   : > { %5545 = vmatpush3.bf16.msra.mxu0 %v3508_v29  ;;  %5546 = vmatprep.mubr.msk.bf16.mxu0 %vm5891_vm0, %v5890_v1 }
0x19d9   : > { %5558 = vmatprep.subr.bf16.mxu0 %v5890_v1 }
0x19df   : > { %5547 = vmatmul.mubr.msk.bf16.vlgmr.msra.gmra.mxu0 %vm1407_vm3, %v3151_v31  ;;  %v5772_v31 = vld [vmem:[%s6973_s7 + $0x178] sm:$0xff]  }
0x19e0   : > { %5559 = vmatpush3.bf16.msra.mxu0 %v5764_v30  ;;  %5562 = vmatprep.mubr.msk.bf16.mxu0 %vm5891_vm0, %v5890_v1  ;;  %v5771_v30 = vld [vmem:[%s6973_s7 + $0xf0] sm:$0xff]  }
0x19e1   : > { %5560 = vmatprep.subr.bf16.mxu0 %v5890_v1 }
0x19e4   : > { %5561 = vmatpush3.bf16.msra.mxu0 %v5765_v32  ;;  %v5773_v32 = vld [vmem:[%s6973_s7 + $0x170] sm:$0xff]  }
0x19e5   : > { %5574 = vmatprep.subr.bf16.mxu0 %v5890_v1 }
0x19e7   : > { %5563 = vmatmul.mubr.msk.bf16.vlgmr.msra.gmra.mxu0 %vm1099_vm2, %v6567_v60 }
0x19e8   : > { %5576 = vmatprep.mubr.msk.bf16.mxu0 %vm5891_vm0, %v5890_v1 }
0x1a97   : > { %v3449_v33 = vpop.f32.mrf.mxu0 }
0x1a98   : > { %v3457_v20 = vpack.c.bf16 %v3449_v33, %v3449_v33 }
0x1a99   : > { %v5536_v34 = vpop.f32.mrf.mxu0 }
0x1a9a   : > { %5541 = vmatmul.mubr.msk.bf16.vlgmr.msra.gmra.mxu1 %vm1407_vm3, %v3457_v20 }
0x1a9b   : > { %v3452_v35 = vpop.f32.mrf.mxu0  ;;  %5551 = vmatpush3.bf16.msra.mxu1 %v5766_v6  ;;  %5554 = vmatprep.mubr.msk.bf16.mxu1 %vm5891_vm0, %v5890_v1  ;;  %v5774_v6 = vld [vmem:[%s6973_s7 + $0x138] sm:$0xff]  }
0x1a9c   : > { %5552 = vmatprep.subr.bf16.mxu1 %v5890_v1 }
0x1a9d   : > { %v5537_v37 = vpop.f32.mrf.mxu0 }
0x1a9f   : > { %v6699_v38 = vpop.f32.mrf.mxu0  ;;  %5553 = vmatpush3.bf16.msra.mxu1 %v5767_v36  ;;  %v5775_v36 = vld [vmem:[%s6973_s7 + $0x130] sm:$0xff]   ;;  %s5892_s7 = smov [#allocation2]  }
0x1aa0   : > { %5566 = vmatprep.subr.bf16.mxu1 %v5890_v1 }
0x1aa1   : > { %v5548_v40 = vpop.f32.mrf.mxu0 }
0x1aa2   : > { %5555 = vmatmul.mubr.msk.bf16.vlgmr.msra.gmra.mxu1 %vm1099_vm2, %v6567_v60 }
0x1aa3   : > { %v3547_v41 = vpop.f32.mrf.mxu0  ;;  %5567 = vmatpush3.bf16.msra.mxu1 %v5768_v39  ;;  %5570 = vmatprep.mubr.msk.bf16.mxu1 %vm5891_vm0, %v5890_v1 }
0x1aa4   : > { %5568 = vmatprep.subr.bf16.mxu1 %v5890_v1 }
0x1aa5   : > { %v5549_v43 = vpop.f32.mrf.mxu0 }
0x1aa6   : > { %v4946_v43 = vld [vmem:[%s6976_s8 + $0x17] ss:$0 sm:$0xff] }
0x1aa7   : > { %v3674_v45 = vpop.f32.mrf.mxu0  ;;  %5569 = vmatpush3.bf16.msra.mxu1 %v5769_v42 }
0x1aa8   : > { %v3675_v46 = vadd.f32 %v4906_v44, %v3674_v45  ;;  %5580 = vmatprep.subr.bf16.mxu1 %v5890_v1 }
0x1aa9   : > { %v5564_v47 = vpop.f32.mrf.mxu0 }
0x1aaa   : > { %v3746_v48 = vpack.c.bf16 %v3675_v46, %v3675_v46  ;;  %5571 = vmatmul.mubr.msk.bf16.vlgmr.msra.gmra.mxu1 %vm1099_vm2, %v6567_v60 }
0x1aab   : > { %v3677_v49 = vpop.f32.mrf.mxu0  ;;  %5582 = vmatprep.mubr.msk.bf16.mxu1 %vm5891_vm0, %v5890_v1 }
0x1aac   : > { %v3751_v50 = vsel %vm1407_vm3, %v3746_v48, 0 }
0x1aad   : > { %v5565_v51 = vpop.f32.mrf.mxu0  ;;  %5575 = vmatpush3.bf16.xpose.msra.mxu0 %v3751_v50 }
0x1aae   : > { %5586 = vmatprep.subr.bf16.mxu0 %v5890_v1 }
0x1b5a   : > { %v6723_v52 = vpop.f32.mrf.mxu1 }
0x1b5c   : > { %v5542_v53 = vpop.f32.mrf.mxu1 }
0x1b5e   : > { %v3501_v54 = vpop.f32.mrf.mxu1 }
0x1b60   : > { %v5543_v55 = vpop.f32.mrf.mxu1 }
0x1b62   : > { %v3609_v57 = vpop.f32.mrf.mxu1 }
0x1b63   : > { %v3610_v59 = vadd.f32 %v4897_v56, %v3609_v57  ;;  %v4937_v57 = vld [vmem:[%s6976_s8 + $0x13] ss:$0 sm:$0xff] }
0x1b64   : > { %v5556_v61 = vpop.f32.mrf.mxu1 }
0x1b65   : > { %v3745_v62 = vpack.c.bf16 %v3610_v59, %v3610_v59 }
0x1b66   : > { %v3612_v63 = vpop.f32.mrf.mxu1 }
0x1b67   : > { %5577 = vmatmul.mubr.msk.bf16.vlgmr.msra.gmra.mxu0 %vm1407_vm3, %v3745_v62 }
0x1b68   : > { %v5557_v0 = vpop.f32.mrf.mxu1  ;;  %5588 = vmatprep.mubr.msk.bf16.mxu0 %vm5891_vm0, %v5890_v1  ;;  %5587 = vmatpush3.bf16.msra.mxu0 %v3860_v22 }
0x1b69   : > { %5600 = vmatprep.subr.bf16.mxu0 %v5890_v1  ;;  %v4928_v0 = vld [vmem:[%s6976_s8 + $0xf] ss:$0 sm:$0xff]  ;;  %s5832_s8 = sshll.u32 %s5892_s7, 4  ;;  %s5833_s8 = int_to_ptr.vmem [resolvable:$false] %s5832_s8 }
0x1b6a   : > { %v3739_v3 = vpop.f32.mrf.mxu1  ;;  %s5834_s3 = scalar_lea.vmem %s5833_s8, 256  ;;  %p5835_p0 = scmp.lt.s32.totalorder %s4581_s29, %s5833_s8 }
0x1b6b   : > { %v3740_v4 = vadd.f32 %v4915_v2, %v3739_v3  ;;  %p5836_p1 = scmp.lt.s32.totalorder %s5834_s3, %s5828_s6 }
0x1b6c   : > { %v5572_v5 = vpop.f32.mrf.mxu1 }
0x1b6d   : > { %v3806_v7 = vpack.c.bf16 %v3740_v4, %v3740_v4  ;;  %p5837_p2 = por %p5836_p1, %p5835_p0 }
0x1b6e   : > { %v3742_v8 = vpop.f32.mrf.mxu1 }
0x1b6f   : > { %v3811_v9 = vsel %vm1471_vm4, %v3806_v7, 0  ;;  %p5838_p3 = pnand %p5837_p2, %p5831_p13 }
0x1b70   : > { %v5573_v10 = vpop.f32.mrf.mxu1  ;;  %5581 = vmatpush3.bf16.msra.mxu1 %v3811_v9 }
0x1b71   : > { %5592 = vmatprep.subr.bf16.mxu1 %v5890_v1 }
0x1c27   : > { %v3787_v25 = vpop.f32.mrf.mxu0 }
0x1c28   : > { %v3793_v11 = vmul.f32 0.35355338, %v3787_v25 }
0x1c29   : > { %v5578_v12 = vpop.f32.mrf.mxu0 }
0x1c2a   : > { %v3794_v13 = vsel %vm1407_vm3, %v3793_v11, -inf }
0x1c2b   : > { %3795 = vmax.xlane.f32.xlu0 %v3794_v13  ;;  %v3790_v14 = vpop.f32.mrf.mxu0 }
0x1c2d   : > { %v5579_v15 = vpop.f32.mrf.mxu0 }
0x1cb4   : > { %v3796_v16 = vpop.xlane.xlu0 %3795 }
0x1cb5   : > { %v3797_v17 = vsub.f32 %v3793_v11, %v3796_v16  ;;  %v4952_v16 = vld [vmem:[%s6926_s9 + $0x1c] sm:$0xf] }
0x1cb7   : > { %v3798_v18 = vmul.f32 1.442695, %v3797_v17  ;;  %v4213_v17 = vsel %vm1471_vm4, %v4952_v16, 0  ;;  %v5783_v16 = vld [vmem:[%s6936_s19] sm:$0xff]  }
0x1cb9   : > { %5812 = vpow2.f32 %v3798_v18 }
0x1cc6   : > { %v5813_v28 = vpop.eup %5812 }
0x1cc7   : > { %v3800_v19 = vsel %vm1407_vm3, %v5813_v28, 0.0 }
0x1cc8   : > { %3801 = vadd.xlane.f32.xlu1 %v3800_v19 }
0x1d51   : > { %v3802_v23 = vpop.xlane.xlu1 %3801 }
0x1d52   : > { %5814 = vrcp.f32 %v3802_v23 }
0x1d5f   : > { %v5815_v24 = vpop.eup %5814 }
0x1d60   : > { %v3804_v26 = vmul.f32 %v5815_v24, %v5813_v28 }
0x1d62   : > { %v3805_v29 = vpack.c.bf16 %v3804_v26, %v3804_v26 }
0x1d64   : > { %5583 = vmatmul.mubr.msk.bf16.vlgmr.msra.gmra.mxu1 %vm1407_vm3, %v3805_v29 }
0x1d65   : > { %5593 = vmatpush3.bf16.msra.mxu1 %v5770_v27  ;;  %5596 = vmatprep.mubr.msk.bf16.mxu1 %vm5891_vm0, %v5890_v1 }
0x1d66   : > { %5594 = vmatprep.subr.bf16.mxu1 %v5890_v1 }
0x1d69   : > { %5595 = vmatpush3.bf16.msra.mxu1 %v5771_v30 }
0x1d6a   : > { %5608 = vmatprep.subr.bf16.mxu1 %v5890_v1 }
0x1d6c   : > { %5597 = vmatmul.mubr.msk.bf16.vlgmr.msra.gmra.mxu1 %vm1099_vm2, %v6567_v60 }
0x1d6d   : > { %5609 = vmatpush3.bf16.msra.mxu1 %v5772_v31  ;;  %5612 = vmatprep.mubr.msk.bf16.mxu1 %vm5891_vm0, %v5890_v1 }
0x1d6e   : > { %5610 = vmatprep.subr.bf16.mxu1 %v5890_v1 }
0x1d71   : > { %5611 = vmatpush3.bf16.msra.mxu1 %v5773_v32  ;;  %v4955_v32 = vld [vmem:[%s6927_s10 + $0x1] ss:$0 sm:$0xff] }
0x1d72   : > { %5622 = vmatprep.subr.bf16.mxu1 %v5890_v1 }
0x1d74   : > { %5613 = vmatmul.mubr.msk.bf16.vlgmr.msra.gmra.mxu1 %vm1099_vm2, %v6567_v60 }
0x1d75   : > { %5624 = vmatprep.mubr.msk.bf16.mxu1 %vm5891_vm0, %v5890_v1 }
0x1e24   : > { %v3847_v33 = vpop.f32.mrf.mxu1 }
0x1e25   : > { %v3855_v20 = vpack.c.bf16 %v3847_v33, %v3847_v33 }
0x1e26   : > { %v5584_v34 = vpop.f32.mrf.mxu1 }
0x1e27   : > { %5589 = vmatmul.mubr.msk.bf16.vlgmr.msra.gmra.mxu0 %vm1407_vm3, %v3855_v20 }
0x1e28   : > { %v3850_v35 = vpop.f32.mrf.mxu1  ;;  %5601 = vmatpush3.bf16.msra.mxu0 %v5774_v6  ;;  %5604 = vmatprep.mubr.msk.bf16.mxu0 %vm5891_vm0, %v5890_v1 }
0x1e29   : > { %5602 = vmatprep.subr.bf16.mxu0 %v5890_v1 }
0x1e2a   : > { %v5585_v37 = vpop.f32.mrf.mxu1 }
0x1e2c   : > { %v3962_v39 = vpop.f32.mrf.mxu1  ;;  %5603 = vmatpush3.bf16.msra.mxu0 %v5775_v36 }
0x1e2d   : > { %5616 = vmatprep.subr.bf16.mxu0 %v5890_v1  ;;  %v3963_v3 = vadd.f32 %v4928_v0, %v3962_v39 }
0x1e2e   : > { %v5598_v40 = vpop.f32.mrf.mxu1 }
0x1e2f   : > { %5605 = vmatmul.mubr.msk.bf16.vlgmr.msra.gmra.mxu0 %vm1099_vm2, %v6567_v60  ;;  %v3545_v60 = vadd.f32 %v6699_v38, %v6723_v52  ;;  %v4098_v4 = vpack.c.bf16 %v3963_v3, %v3963_v3 }
0x1e30   : > { %v3965_v41 = vpop.f32.mrf.mxu1  ;;  %5618 = vmatprep.mubr.msk.bf16.mxu0 %vm5891_vm0, %v5890_v1 }
0x1e32   : > { %v5599_v42 = vpop.f32.mrf.mxu1 }
0x1e33   : > { %v5776_v42 = vld [vmem:[%s6930_s13 + $0x18] sm:$0xff]  }
0x1e34   : > { %v4092_v44 = vpop.f32.mrf.mxu1 }
0x1e35   : > { %v4093_v45 = vadd.f32 %v4946_v43, %v4092_v44  ;;  %v5778_v43 = vld [vmem:[%s6932_s15 + $0x38] sm:$0xff]   ;;  %v5779_v44 = vld [vmem:[%s6932_s15 + $0x30] sm:$0xff]  }
0x1e36   : > { %v5614_v46 = vpop.f32.mrf.mxu1 }
0x1e37   : > { %v4159_v47 = vpack.c.bf16 %v4093_v45, %v4093_v45 }
0x1e38   : > { %v4095_v48 = vpop.f32.mrf.mxu1 }
0x1e39   : > { %v4164_v49 = vsel %vm1471_vm4, %v4159_v47, 0 }
0x1e3a   : > { %v5615_v50 = vpop.f32.mrf.mxu1  ;;  %5623 = vmatpush3.bf16.msra.mxu1 %v4164_v49  ;;  %v4958_v49 = vld [vmem:[%s6928_s11 + $0x1] ss:$0 sm:$0xff] }
0x1e3b   : > { %5634 = vmatprep.subr.bf16.mxu1 %v5890_v1 }
0x1ee7   : > { %v3896_v51 = vpop.f32.mrf.mxu0 }
0x1ee8   : > { %v3902_v53 = vadd.f32 %v3896_v51, %v3545_v60  ;;  %v4959_v60 = vld [vmem:[%s6929_s12 + $0x1] ss:$0 sm:$0xff] }
0x1ee9   : > { %v5590_v54 = vpop.f32.mrf.mxu0 }
0x1eeb   : > { %v3899_v55 = vpop.f32.mrf.mxu0 }
0x1eec   : > { %v5780_v55 = vld [vmem:[%s6932_s15 + $0x28] sm:$0xff]  }
0x1eed   : > { %v5591_v56 = vpop.f32.mrf.mxu0 }
0x1eee   : > { %v5781_v56 = vld [vmem:[%s6932_s15 + $0x20] sm:$0xff]  }
0x1eef   : > { %v4027_v59 = vpop.f32.mrf.mxu0 }
0x1ef0   : > { %v4028_v61 = vadd.f32 %v4937_v57, %v4027_v59  ;;  %v4965_v57 = vld [vmem:[%s6931_s14 + $0x1] ss:$0 sm:$0xff] }
0x1ef1   : > { %v5606_v62 = vpop.f32.mrf.mxu0 }
0x1ef2   : > { %v4099_v63 = vpack.c.bf16 %v4028_v61, %v4028_v61 }
0x1ef3   : > { %v4030_v2 = vpop.f32.mrf.mxu0 }
0x1ef4   : > { %v4104_v38 = vsel %vm1407_vm3, %v4099_v63, 0 }
0x1ef5   : > { %v5607_v52 = vpop.f32.mrf.mxu0  ;;  %5617 = vmatpush3.bf16.xpose.msra.mxu0 %v4104_v38 }
0x1ef6   : > { %5628 = vmatprep.subr.bf16.mxu0 %v5890_v1  ;;  %v4978_v52 = vld [vmem:[%s6933_s16 + $0x1] ss:$0 sm:$0xff] }
0x1efc   : > { %5619 = vmatmul.mubr.msk.bf16.vlgmr.msra.gmra.mxu0 %vm1407_vm3, %v4098_v4 }
0x1efd   : > { %5630 = vmatprep.mubr.msk.bf16.mxu0 %vm5891_vm0, %v5890_v1  ;;  %5629 = vmatpush3.bf16.msra.mxu0 %v4213_v17 }
0x1efe   : > { %5642 = vmatprep.subr.bf16.mxu0 %v5890_v1 }
0x1fbc   : > { %v4140_v5 = vpop.f32.mrf.mxu0 }
0x1fbd   : > { %v4146_v7 = vmul.f32 0.35355338, %v4140_v5 }
0x1fbe   : > { %v5620_v8 = vpop.f32.mrf.mxu0 }
0x1fbf   : > { %v4147_v9 = vsel %vm1407_vm3, %v4146_v7, -inf }
0x1fc0   : > { %4148 = vmax.xlane.f32.xlu0 %v4147_v9  ;;  %v4143_v10 = vpop.f32.mrf.mxu0 }
0x1fc2   : > { %v5621_v25 = vpop.f32.mrf.mxu0 }
0x2049   : > { %v4149_v11 = vpop.xlane.xlu0 %4148 }
0x204a   : > { %v4150_v12 = vsub.f32 %v4146_v7, %v4149_v11 }
0x204c   : > { %v4151_v13 = vmul.f32 1.442695, %v4150_v12 }
0x204e   : > { %5816 = vpow2.f32 %v4151_v13 }
0x205b   : > { %v5817_v14 = vpop.eup %5816 }
0x205c   : > { %v4153_v15 = vsel %vm1407_vm3, %v5817_v14, 0.0 }
0x205d   : > { %4154 = vadd.xlane.f32.xlu1 %v4153_v15  ;;  %v5782_v15 = vld [vmem:[%s6936_s19 + $0x8] sm:$0xff]  }
0x20e6   : > { %v4155_v18 = vpop.xlane.xlu1 %4154 }
0x20e7   : > { %5818 = vrcp.f32 %v4155_v18 }
0x20f4   : > { %v5819_v28 = vpop.eup %5818 }
0x20f5   : > { %v4157_v19 = vmul.f32 %v5819_v28, %v5817_v14 }
0x20f7   : > { %v4158_v21 = vpack.c.bf16 %v4157_v19, %v4157_v19 }
0x20f9   : > { %5625 = vmatmul.mubr.msk.bf16.vlgmr.msra.gmra.mxu1 %vm1407_vm3, %v4158_v21  ;;  %v4986_v21 = vld [vmem:[%s6934_s17 + $0x1] ss:$0 sm:$0xff] }
0x20fa   : > { %5638 = vmatprep.mubr.msk.bf16.mxu1 %vm5891_vm0, %v5890_v1  ;;  %5635 = vmatpush3.bf16.msra.mxu1 %v5776_v42 }
0x20fb   : > { %5636 = vmatprep.subr.bf16.mxu1 %v5890_v1 }
0x21b9   : > { %v4200_v22 = vpop.f32.mrf.mxu1 }
0x21ba   : > { %v4208_v23 = vpack.c.bf16 %v4200_v22, %v4200_v22 }
0x21bb   : > { %v5626_v24 = vpop.f32.mrf.mxu1 }
0x21bc   : > { %5631 = vmatmul.mubr.msk.bf16.vlgmr.msra.gmra.mxu0 %vm1407_vm3, %v4208_v23  ;;  %v4987_v23 = vld [vmem:[%s6935_s18 + $0x1] ss:$0 sm:$0xff] }
0x21bd   : > { %v4203_v26 = vpop.f32.mrf.mxu1  ;;  %5650 = vmatprep.mubr.msk.bf16.mxu0 %vm5891_vm0, %v5890_v1  ;;  %5643 = vmatpush3.bf16.msra.mxu0 %v5778_v43 }
0x21be   : > { %5644 = vmatprep.subr.bf16.mxu0 %v5890_v1 }
0x21bf   : > { %v5627_v27 = vpop.f32.mrf.mxu1 }
0x21c1   : > { %5645 = vmatpush3.bf16.msra.mxu0 %v5779_v44 }
0x21c2   : > { %5646 = vmatprep.subr.bf16.mxu0 %v5890_v1 }
0x21c5   : > { %5647 = vmatpush3.bf16.msra.mxu0 %v5780_v55 }
0x21c6   : > { %5648 = vmatprep.subr.bf16.mxu0 %v5890_v1 }
0x21c9   : > { %5649 = vmatpush3.bf16.msra.mxu0 %v5781_v56 }
0x227c   : > { %v4249_v29 = vpop.f32.mrf.mxu0 }
0x227d   : > { %v4255_v30 = vadd.f32 %v4249_v29, %v3902_v53 }
0x227e   : > { %v5632_v31 = vpop.f32.mrf.mxu0 }
0x227f   : > { %v4256_v33 = vadd.f32 %v4255_v30, %v6560_v58  ;;  %v5777_v58 = vld [vmem:[%s6930_s13 + $0x10] sm:$0xff]  }
0x2280   : > { %v4252_v6 = vpop.f32.mrf.mxu0  ;;  %5637 = vmatpush3.bf16.msra.mxu1 %v5777_v58 }
0x2281   : > { %v4265_v20 = vadd.f32 %v4955_v32, %v4256_v33  ;;  %5654 = vmatprep.subr.bf16.mxu1 %v5890_v1 }
0x2282   : > { %v5633_v34 = vpop.f32.mrf.mxu0 }
0x2283   : > { %v4270_v35 = vsel %vm1099_vm2, %v4265_v20, 0.0 }
0x2284   : > { %4271 = vadd.xlane.f32.xlu0 %v4270_v35 }
0x230d   : > { %v4272_v36 = vpop.xlane.xlu0 %4271 }
0x230e   : > { %v4273_v37 = vmul.f32 0.03125, %v4272_v36 }
0x2310   : > { %v4274_v39 = vsub.f32 %v4265_v20, %v4273_v37 }
0x2312   : > { %v4275_v40 = vmul.f32 %v4274_v39, %v4274_v39 }
0x2314   : > { %v4276_v41 = vsel %vm1099_vm2, %v4275_v40, 0.0 }
0x2315   : > { %4277 = vadd.xlane.f32.xlu1 %v4276_v41 }
0x239e   : > { %v4278_v45 = vpop.xlane.xlu1 %4277 }
0x239f   : > { %v4279_v46 = vmul.f32 0.03125, %v4278_v45 }
0x23a1   : > { %v4280_v47 = vadd.f32 1e-05, %v4279_v46 }
0x23a3   : > { %5820 = vrsqrt.f32 %v4280_v47 }
0x23b0   : > { %v5821_v48 = vpop.eup %5820 }
0x23b1   : > { %v4282_v50 = vmul.f32 %v5821_v48, %v4274_v39 }
0x23b3   : > { %v4289_v51 = vmul.f32 %v4958_v49, %v4282_v50 }
0x23b5   : > { %v4296_v53 = vadd.f32 %v4959_v60, %v4289_v51 }
0x23b7   : > { %v4302_v54 = vpack.c.bf16 %v4296_v53, %v4296_v53 }
0x23b9   : > { %5639 = vmatmul.mubr.msk.bf16.vlgmr.msra.gmra.mxu1 %vm1099_vm2, %v4302_v54 }
0x23ba   : > { %5658 = vmatprep.mubr.msk.bf16.mxu1 %vm5891_vm0, %v5890_v1  ;;  %5655 = vmatpush3.bf16.msra.mxu1 %v5782_v15 }
0x23bb   : > { %5656 = vmatprep.subr.bf16.mxu1 %v5890_v1  ;;  %v4988_v1 = vld [vmem:[%s6937_s20] ss:$0 sm:$0xff] }
0x23be   : > { %5657 = vmatpush3.bf16.msra.mxu1 %v5783_v16 }
0x2479   : > { %v4360_v59 = vpop.f32.mrf.mxu1 }
0x247a   : > { %v4361_v61 = vadd.f32 %v4965_v57, %v4360_v59 }
0x247b   : > { %v5640_v62 = vpop.f32.mrf.mxu1 }
0x247c   : > { %v4366_v63 = vmax.f32 %v4361_v61, 0.0 }
0x247d   : > { %v4363_v0 = vpop.f32.mrf.mxu1 }
0x247e   : > { %v4376_v2 = vpack.c.bf16 %v4366_v63, %v4366_v63 }
0x247f   : > { %v5641_v38 = vpop.f32.mrf.mxu1 }
0x2480   : > { %5651 = vmatmul.mubr.msk.bf16.vlgmr.msra.gmra.mxu0 %vm2768_vm5, %v4376_v2 }
0x2540   : > { %v4446_v3 = vpop.f32.mrf.mxu0 }
0x2541   : > { %v4447_v4 = vadd.f32 %v4978_v52, %v4446_v3 }
0x2542   : > { %v5652_v5 = vpop.f32.mrf.mxu0 }
0x2543   : > { %v4452_v7 = vadd.f32 %v4447_v4, %v4296_v53 }
0x2544   : > { %v4449_v8 = vpop.f32.mrf.mxu0 }
0x2545   : > { %v4457_v9 = vsel %vm1099_vm2, %v4452_v7, 0.0 }
0x2546   : > { %4458 = vadd.xlane.f32.xlu0 %v4457_v9  ;;  %v5653_v10 = vpop.f32.mrf.mxu0 }
0x25cf   : > { %v4459_v25 = vpop.xlane.xlu0 %4458 }
0x25d0   : > { %v4460_v11 = vmul.f32 0.03125, %v4459_v25 }
0x25d2   : > { %v4461_v12 = vsub.f32 %v4452_v7, %v4460_v11 }
0x25d4   : > { %v4462_v13 = vmul.f32 %v4461_v12, %v4461_v12 }
0x25d6   : > { %v4463_v14 = vsel %vm1099_vm2, %v4462_v13, 0.0 }
0x25d7   : > { %4464 = vadd.xlane.f32.xlu1 %v4463_v14 }
0x2660   : > { %v4465_v17 = vpop.xlane.xlu1 %4464 }
0x2661   : > { %v4466_v18 = vmul.f32 0.03125, %v4465_v17 }
0x2663   : > { %v4467_v28 = vadd.f32 1e-05, %v4466_v18 }
0x2665   : > { %5822 = vrsqrt.f32 %v4467_v28 }
0x2672   : > { %v5823_v19 = vpop.eup %5822 }
0x2673   : > { %v4469_v22 = vmul.f32 %v5823_v19, %v4461_v12 }
0x2675   : > { %v4476_v24 = vmul.f32 %v4986_v21, %v4469_v22 }
0x2677   : > { %v4483_v26 = vadd.f32 %v4987_v23, %v4476_v24 }
0x2679   : > { %v4488_v27 = vpack.c.bf16 %v4483_v26, %v4483_v26 }
0x267b   : > { %5659 = vmatmul.mubr.msk.bf16.vlgmr.msra.gmra.mxu1 %vm1099_vm2, %v4488_v27 }
0x273b   : > { %v4545_v29 = vpop.f32.mrf.mxu1 }
0x273c   : > { %v4546_v30 = vadd.f32 %v4988_v1, %v4545_v29 }
0x273d   : > { %v5660_v31 = vpop.f32.mrf.mxu1 }
0x273e   : > { %v4552_v32 = vsel %vm4551_vm6, %v4546_v30, -inf }
0x273f   : > { %4553 = vmax.xlane.f32.xlu0 %v4552_v32  ;;  %v4548_v33 = vpop.f32.mrf.mxu1 }
0x2741   : > { %v5661_v6 = vpop.f32.mrf.mxu1 }
0x27c8   : > { %v4554_v20 = vpop.xlane.xlu0 %4553 }
0x27c9   : > { %v4555_v34 = vsub.f32 %v4546_v30, %v4554_v20 }
0x27cb   : > { %v4556_v35 = vmul.f32 1.442695, %v4555_v34 }
0x27cd   : > { %5824 = vpow2.f32 %v4556_v35 }
0x27da   : > { %v5825_v36 = vpop.eup %5824 }
0x27db   : > { %v4558_v37 = vsel %vm4551_vm6, %v5825_v36, 0.0 }
0x27dc   : > { %4559 = vadd.xlane.f32.xlu1 %v4558_v37 }
0x2865   : > { %v4560_v39 = vpop.xlane.xlu1 %4559 }
0x2866   : > { %5826 = vlog2.f32 %v4560_v39 }
0x2873   : > { %v5827_v40 = vpop.eup %5826 }
0x2874   : > { %v4562_v41 = vmul.f32 0.6931472, %v5827_v40 }
0x2876   : > { %v4563_v42 = vadd.f32 %v4562_v41, %v4554_v20 }
0x2878   : > { %v4564_v58 = vsub.f32 %v4546_v30, %v4563_v42 }
0x287a   : > { %4565 = vst.msk [vmem:[%s649_s30] sm:$0xff] %vm4551_vm6, %v4564_v58 }
0x287b   : > { %5841 = shalt.err (!%p5838_p3)
}
0x287c   : > { %s5842_s2 = scalar_lea.hbm %s4578_s4, 128  ;;  %s5846_s30 = scalar_lea.hbm %s6978_s0, 256 }
0x287d   : > { %p5843_p4 = scmp.ne.s32.totalorder %s4578_s4, %s5842_s2  ;;  %p5847_p9 = scmp.lt.s32.totalorder %s4578_s4, %s6978_s0 }
0x287e   : > { %p5848_p10 = scmp.lt.s32.totalorder %s5846_s30, %s5842_s2 }
0x287f   : > { %p5844_p7 = pnand %p5843_p4, %p6041_p5 }
0x2880   : > { %p5849_p11 = por %p5848_p10, %p5847_p9 }
0x2881   : > { %p5845_p8 = pneg %p5844_p7 }
0x2883   : > { %p5850_p12 = pnand %p5849_p11, %p5845_p8 }
0x2885   : > { %5853 = shalt.err (!%p5850_p12)
}
0x2886   : > { %5662 = dma.vmem_to_hbm [thread:$0]  (%p6041_p5), %s4581_s29, 128, %s4578_s4, %s4567_s1  }
0x2887 PF: > { %s6979_s6 = sld [smem:[#allocation7_spill]] }
0x2888   : > { %s6980_s7 = sld [smem:[#allocation5_spill]] }
0x288d   : > { %p5668_p13 = scmp.ge.s32.totalorder %s6979_s6, 2 }
0x288e   : > { %s4592_s27 = sand.u32 1, %s6980_s7  }
0x288f   : > { %p5665_p0 = pnand %p5668_p13, %p6045_p6  ;;  %s4593_s3 = scalar_lea.sflag [#allocation3], %s4592_s27 }
0x2891   : > { %p5666_p1 = pneg %p5665_p0 }
0x2893   : > { %5871 = dma.done.wait (%p5666_p1), %s4593_s3, 128  }
0x2894   : > { %5873 = vsyncadd (%p5666_p1), %s4593_s3, 4294967168  ;;  %s6982_s27 = sld [smem:[#allocation8_spill]]  ;;  %s6985_s2 = smov %s5880_s25 }
0x2895   : > { %s6983_s23 = sld [smem:[#allocation6_spill]] }
0x2896   : > { %s6984_s26 = sld [smem:[#allocation9_spill]] }
0x289a   : > { %p31_p2 = scmp.ge.s32.totalorder %s6982_s27, 4  }
0x289b   : > { %s6986_s25 = smov %s6983_s23 }
0x289c   :  { %33 = sbr.rel (!%p31_p2) target bundleno = 14 (0xe), region = 204 }
0x28a1   :  { %4598 = vsyncpa [#allocation3], 1 }
0x28a2   :  { %4600 = vsyncpa [#allocation3 + $0x1], 1 }

</bundles_post_ra>
